<compile_context>
chip_gen: v6e
topology: v6e:2x2x1
jax: 0.10.0
libtpu: 0.0.40
codegen_flags: <defaults>
</compile_context>

<pallas_src>
import functools

import jax
import jax.numpy as jnp
import numpy as np
from jax.experimental import pallas as pl
from jax.experimental.pallas import tpu as pltpu


# ----------------------------------------------------------------------------
# Model geometry (PyTorch module defaults: 1x28x28 input, bottleneck 16)
# ----------------------------------------------------------------------------
IMG = 28
IN_CH = 1
BOT = 16                        # cfg.bottleneck := 16
H1 = (IMG - 3) // 2 + 1         # 13 : conv1 output (stride 2)
H4 = H1 - 6                     # 7  : encoder output spatial size
CONV_OUT = 32 * H4 * H4         # 1568
PH = IMG // 2                   # 14 : output row-pairs of the final ConvT


# ----------------------------------------------------------------------------
# Fused VAE kernel: one batch element per grid step
# ----------------------------------------------------------------------------
def _vae_kernel(img_ref, eps_ref,
                sstack_ref, m1_ref, b1t_ref,
                we2_ref, be2_ref, we3_ref, be3_ref, we4_ref, be4_ref,
                wml_ref, bml_ref, wlin_ref, blin_ref,
                wd1_ref, bd1_ref, wd2_ref, bd2_ref, wd3_ref, bd3_ref,
                wfin_ref, bfin_ref,
                ml_ref, dec_ref):
    f32, bf16 = jnp.float32, jnp.bfloat16

    def mm(a, b):
        return jnp.dot(a, b, preferred_element_type=f32)

    # -------------------- encoder --------------------------------------
    # conv1 (3x3, stride 2): y-selection via a 0/1 matmul, x/channel taps via
    # banded matrices -> activation rows = y, lanes = x*32 + c  (13, 416)
    img = img_ref[0].astype(bf16)                                   # (28, 28)
    sel = mm(sstack_ref[...], img).astype(bf16)                     # (39, 28)
    acc = (mm(sel[0:H1], m1_ref[0])
           + mm(sel[H1:2 * H1], m1_ref[1])
           + mm(sel[2 * H1:3 * H1], m1_ref[2]))                     # (13, 416)
    a = jnp.maximum(acc + b1t_ref[...], 0.0).astype(bf16)

    def conv(x, w_ref, b_ref):                 # 3x3 stride-1 conv, banded taps
        h = x.shape[0] - 2
        acc = (mm(x[0:h], w_ref[0]) + mm(x[1:1 + h], w_ref[1])
               + mm(x[2:2 + h], w_ref[2]))
        return jnp.maximum(acc + b_ref[...], 0.0).astype(bf16)

    a = conv(a, we2_ref, be2_ref)                                   # (11, 352)
    a = conv(a, we3_ref, be3_ref)                                   # (9, 288)
    a = conv(a, we4_ref, be4_ref)                                   # (7, 224)

    # -------------------- bottleneck ------------------------------------
    # [mean | logvar] : NCHW flatten folded into per-y weight slabs
    ml = bml_ref[...]                                               # (1, 32)
    for y in range(H4):
        ml = ml + mm(a[y:y + 1, :], wml_ref[y])
    ml_ref[0] = ml
    mu, logvar = ml[:, :BOT], ml[:, BOT:]
    z = (mu + eps_ref[0] * jnp.exp(0.5 * logvar)).astype(bf16)      # (1, 16)

    # decoder Linear + ReLU, emitted directly in grid layout (7, 224)
    blin = blin_ref[...]                                            # (7, 224)
    rows = [jnp.maximum(mm(z, wlin_ref[y]) + blin[y:y + 1, :], 0.0)
            for y in range(H4)]
    g = jnp.concatenate(rows, axis=0).astype(bf16)                  # (7, 224)

    # -------------------- decoder ---------------------------------------
    def convt(x, w_ref, b_ref):                # 3x3 stride-1 ConvT, banded taps
        h, lanes = x.shape
        zp = jnp.zeros((2, lanes), x.dtype)
        xp = jnp.concatenate([zp, x, zp], axis=0)                   # (h+4, L)
        acc = (mm(xp[0:h + 2], w_ref[0]) + mm(xp[1:h + 3], w_ref[1])
               + mm(xp[2:h + 4], w_ref[2]))
        return jnp.maximum(acc + b_ref[...], 0.0).astype(bf16)

    g = convt(g, wd1_ref, bd1_ref)                                  # (9, 288)
    g = convt(g, wd2_ref, bd2_ref)                                  # (11, 352)
    g = convt(g, wd3_ref, bd3_ref)                                  # (13, 416)

    # final ConvT(32->1, 3, stride 2, output_padding=1): sub-pixel phase
    # decomposition; output row yo holds [row 2*yo (28) | row 2*yo+1 (28)]
    zrow = jnp.zeros((1, H1 * 32), g.dtype)
    gp = jnp.concatenate([zrow, g, zrow], axis=0)                   # (15, 416)
    even = mm(gp[1:1 + PH], wfin_ref[0]) + mm(gp[0:PH], wfin_ref[2])
    odd = mm(gp[1:1 + PH], wfin_ref[1])
    out = jnp.concatenate([even, odd], axis=1) + bfin_ref[...]      # (14, 56)
    dec_ref[0] = jax.nn.sigmoid(out)


# ----------------------------------------------------------------------------
# Raw (PyTorch-layout) parameter init
# ----------------------------------------------------------------------------
def init_raw_params(key, in_channels=1, bottleneck=BOT):
    def uinit(k, shape, fan_in):
        b = 1.0 / np.sqrt(fan_in)
        return jax.random.uniform(k, shape, jnp.float32, -b, b)

    keys = iter(jax.random.split(key, 24))
    raw = {}
    enc_w, enc_b = [], []
    for cin, cout in [(in_channels, 32), (32, 32), (32, 32), (32, 32)]:
        enc_w.append(uinit(next(keys), (cout, cin, 3, 3), cin * 9))
        enc_b.append(uinit(next(keys), (cout,), cin * 9))
    raw["enc_w"], raw["enc_b"] = enc_w, enc_b
    raw["wm"] = uinit(next(keys), (bottleneck, CONV_OUT), CONV_OUT)
    raw["bm"] = uinit(next(keys), (bottleneck,), CONV_OUT)
    raw["wv"] = uinit(next(keys), (bottleneck, CONV_OUT), CONV_OUT)
    raw["bv"] = uinit(next(keys), (bottleneck,), CONV_OUT)
    raw["wl"] = uinit(next(keys), (CONV_OUT, bottleneck), bottleneck)
    raw["bl"] = uinit(next(keys), (CONV_OUT,), bottleneck)
    dec_w, dec_b = [], []
    for cin, cout in [(32, 32), (32, 32), (32, 32), (32, in_channels)]:
        dec_w.append(uinit(next(keys), (cin, cout, 3, 3), cout * 9))
        dec_b.append(uinit(next(keys), (cout,), cout * 9))
    raw["dec_w"], raw["dec_b"] = dec_w, dec_b
    return raw


# ----------------------------------------------------------------------------
# Kernel-native weight layouts (banded tap matrices, per-y slabs, bias tiles)
# ----------------------------------------------------------------------------
def build_kernel_params(raw):
    bf16, f32 = jnp.bfloat16, jnp.float32
    p = {}

    # ---- conv1: y-selection matrix + banded x/channel weights ----
    w1 = np.asarray(raw["enc_w"][0])                       # (32, 1, 3, 3)
    s = np.zeros((3 * H1, IMG), np.float32)
    for ky in range(3):
        for yo in range(H1):
            s[ky * H1 + yo, 2 * yo + ky] = 1.0
    p["sstack"] = jnp.asarray(s, bf16)
    m1 = np.zeros((3, IMG, H1 * 32), np.float32)
    for ky in range(3):
        for xo in range(H1):
            for kx in range(3):
                m1[ky, 2 * xo + kx, xo * 32:(xo + 1) * 32] = w1[:, 0, ky, kx]
    p["m1"] = jnp.asarray(m1, bf16)
    p["b1t"] = jnp.asarray(np.tile(np.asarray(raw["enc_b"][0]), H1)[None, :], f32)

    # ---- encoder stride-1 convs: banded (Xin*32, Xout*32) per tap row ----
    def enc_band(w, x_in):
        x_out = x_in - 2
        out = np.zeros((3, x_in * 32, x_out * 32), np.float32)
        for ky in range(3):
            for xo in range(x_out):
                for kx in range(3):
                    xi = xo + kx
                    out[ky, xi * 32:(xi + 1) * 32, xo * 32:(xo + 1) * 32] = \
                        w[:, :, ky, kx].T          # rows=ci, cols=co
        return out

    for l, x_in in zip((1, 2, 3), (13, 11, 9)):
        w = np.asarray(raw["enc_w"][l])
        p[f"we{l + 1}"] = jnp.asarray(enc_band(w, x_in), bf16)
        p[f"be{l + 1}"] = jnp.asarray(
            np.tile(np.asarray(raw["enc_b"][l]), x_in - 2)[None, :], f32)

    # ---- mean/logvar: NCHW flatten folded into per-y (224, 32) slabs ----
    WM = np.concatenate([np.asarray(raw["wm"]), np.asarray(raw["wv"])], axis=0)
    p["wml"] = jnp.asarray(
        WM.reshape(2 * BOT, 32, H4, H4).transpose(2, 3, 1, 0)
          .reshape(H4, H4 * 32, 2 * BOT), bf16)
    p["bml"] = jnp.asarray(
        np.concatenate([np.asarray(raw["bm"]), np.asarray(raw["bv"])])[None, :], f32)

    # ---- decoder Linear: per-y (16, 224) slabs, bias in grid layout ----
    WL = np.asarray(raw["wl"])                              # (1568, 16)
    p["wlin"] = jnp.asarray(
        WL.reshape(32, H4, H4, BOT).transpose(1, 3, 2, 0)
          .reshape(H4, BOT, H4 * 32), bf16)
    p["blin"] = jnp.asarray(
        np.asarray(raw["bl"]).reshape(32, H4, H4).transpose(1, 2, 0)
          .reshape(H4, H4 * 32), f32)

    # ---- decoder stride-1 ConvT: banded (Xin*32, (Xin+2)*32), flipped taps ----
    def dec_band(w, x_in):                                  # w (Cin, Cout, 3, 3)
        x_out = x_in + 2
        out = np.zeros((3, x_in * 32, x_out * 32), np.float32)
        for t in range(3):
            ky = 2 - t
            for xi in range(x_in):
                for kx in range(3):
                    xo = xi + kx
                    out[t, xi * 32:(xi + 1) * 32, xo * 32:(xo + 1) * 32] = \
                        w[:, :, ky, kx]            # rows=ci, cols=co
        return out

    for l, x_in in zip((0, 1, 2), (7, 9, 11)):
        w = np.asarray(raw["dec_w"][l])
        p[f"wd{l + 1}"] = jnp.asarray(dec_band(w, x_in), bf16)
        p[f"bd{l + 1}"] = jnp.asarray(
            np.tile(np.asarray(raw["dec_b"][l]), x_in + 2)[None, :], f32)

    # ---- final ConvT(32->1, 3, stride 2, output_padding=1): phase-packed ----
    wf = np.asarray(raw["dec_w"][3])                        # (32, 1, 3, 3)
    wfin = np.zeros((3, H1 * 32, IMG), np.float32)
    for kyy in range(3):
        for X in range(IMG):
            xo, px = X // 2, X % 2
            if xo < H1:
                wfin[kyy, xo * 32:(xo + 1) * 32, X] += wf[:, 0, kyy, px]
            if px == 0 and 1 <= xo <= H1:
                wfin[kyy, (xo - 1) * 32:xo * 32, X] += wf[:, 0, kyy, 2]
    p["wfin"] = jnp.asarray(wfin, bf16)
    p["bfin"] = jnp.full((1, 2 * IMG), float(np.asarray(raw["dec_b"][3])[0]), f32)
    return p


_WEIGHT_ORDER = ["sstack", "m1", "b1t", "we2", "be2", "we3", "be3", "we4",
                 "be4", "wml", "bml", "wlin", "blin", "wd1", "bd1", "wd2",
                 "bd2", "wd3", "bd3", "wfin", "bfin"]


# ----------------------------------------------------------------------------
# Forward pass (matches VAE.forward: returns (x_hat, mu, logvar))
# ----------------------------------------------------------------------------
def vae_forward(params, x_nchw, eps):
    B = x_nchw.shape[0]
    ximg = x_nchw.reshape(B, IMG, IMG)            # free reshape (in_channels=1)
    eps3 = eps.reshape(B, 1, BOT)
    ws = [params[n] for n in _WEIGHT_ORDER]

    def const_spec(a):
        nd = a.ndim
        return pl.BlockSpec(a.shape, lambda i, nd=nd: (0,) * nd)

    ml, dec = pl.pallas_call(
        _vae_kernel,
        grid=(B,),
        in_specs=[pl.BlockSpec((1, IMG, IMG), lambda i: (i, 0, 0)),
                  pl.BlockSpec((1, 1, BOT), lambda i: (i, 0, 0))]
                 + [const_spec(w) for w in ws],
        out_specs=(pl.BlockSpec((1, 1, 2 * BOT), lambda i: (i, 0, 0)),
                   pl.BlockSpec((1, PH, 2 * IMG), lambda i: (i, 0, 0))),
        out_shape=(jax.ShapeDtypeStruct((B, 1, 2 * BOT), jnp.float32),
                   jax.ShapeDtypeStruct((B, PH, 2 * IMG), jnp.float32)),
        compiler_params=pltpu.CompilerParams(
            dimension_semantics=("parallel",),
            vmem_limit_bytes=32 * 1024 * 1024),
    )(ximg, eps3, *ws)

    mu = ml[:, 0, :BOT]
    logvar = ml[:, 0, BOT:]
    # (B, 14, 56) rows hold [even row | odd row] -> row-major reshape is the
    # depth-to-space interleave (free).
    x_hat = dec.reshape(B, 1, IMG, IMG)
    return x_hat, mu, logvar


# ----------------------------------------------------------------------------
# Pure-JAX golden reference (same bf16 operand / f32 accumulate convention)
# ----------------------------------------------------------------------------
def vae_reference(raw, x, eps):
    f32 = jnp.float32
    bf = lambda t: t.astype(jnp.bfloat16)
    dn = ("NCHW", "OIHW", "NCHW")

    def conv(x, w, b, stride):
        y = jax.lax.conv_general_dilated(
            bf(x), bf(w), (stride, stride), "VALID",
            dimension_numbers=dn, preferred_element_type=f32)
        return y + b.reshape(1, -1, 1, 1)

    def convt(x, w, b, stride, out_pad):
        wf = jnp.transpose(w, (1, 0, 2, 3))[:, :, ::-1, ::-1]
        pad = ((2, 2 + out_pad), (2, 2 + out_pad))
        y = jax.lax.conv_general_dilated(
            bf(x), bf(wf), (1, 1), pad, lhs_dilation=(stride, stride),
            dimension_numbers=dn, preferred_element_type=f32)
        return y + b.reshape(1, -1, 1, 1)

    a = jax.nn.relu(conv(x, raw["enc_w"][0], raw["enc_b"][0], 2))
    a = jax.nn.relu(conv(a, raw["enc_w"][1], raw["enc_b"][1], 1))
    a = jax.nn.relu(conv(a, raw["enc_w"][2], raw["enc_b"][2], 1))
    a = jax.nn.relu(conv(a, raw["enc_w"][3], raw["enc_b"][3], 1))
    feat = a.reshape(a.shape[0], -1)
    mu = jnp.dot(bf(feat), bf(raw["wm"]).T, preferred_element_type=f32) + raw["bm"]
    logvar = jnp.dot(bf(feat), bf(raw["wv"]).T, preferred_element_type=f32) + raw["bv"]
    z = mu + eps * jnp.exp(0.5 * logvar)
    h = jax.nn.relu(
        jnp.dot(bf(z), bf(raw["wl"]).T, preferred_element_type=f32) + raw["bl"])
    g = h.reshape(-1, 32, H4, H4)
    g = jax.nn.relu(convt(g, raw["dec_w"][0], raw["dec_b"][0], 1, 0))
    g = jax.nn.relu(convt(g, raw["dec_w"][1], raw["dec_b"][1], 1, 0))
    g = jax.nn.relu(convt(g, raw["dec_w"][2], raw["dec_b"][2], 1, 0))
    y = convt(g, raw["dec_w"][3], raw["dec_b"][3], 2, 1)
    return jax.nn.sigmoid(y), mu, logvar


if __name__ == "__main__":
    BATCH = 2

    key = jax.random.PRNGKey(0)
    pkey, xkey, ekey = jax.random.split(key, 3)

    raw = init_raw_params(pkey, in_channels=IN_CH, bottleneck=BOT)
    params = build_kernel_params(raw)
    x = jax.random.uniform(xkey, (BATCH, IN_CH, IMG, IMG), jnp.float32)
    eps = jax.random.normal(ekey, (BATCH, BOT), jnp.float32)

    fwd = jax.jit(functools.partial(vae_forward, params))
    x_hat, mu, logvar = fwd(x, eps)
    jax.block_until_ready((x_hat, mu, logvar))

    assert x_hat.shape == (BATCH, IN_CH, IMG, IMG)
    assert mu.shape == (BATCH, BOT)
    assert logvar.shape == (BATCH, BOT)
    assert bool(jnp.all(jnp.isfinite(x_hat)))
    assert bool(jnp.all((x_hat >= 0.0) & (x_hat <= 1.0)))

    # numerical golden test against lax.conv / dilated-conv ConvTranspose
    xr, mur, lvr = jax.jit(functools.partial(vae_reference, raw))(x, eps)
    jax.block_until_ready((xr, mur, lvr))
    assert np.allclose(np.asarray(mu), np.asarray(mur), atol=2e-2), \
        f"mu mismatch: {np.max(np.abs(np.asarray(mu) - np.asarray(mur)))}"
    assert np.allclose(np.asarray(logvar), np.asarray(lvr), atol=2e-2), \
        f"logvar mismatch: {np.max(np.abs(np.asarray(logvar) - np.asarray(lvr)))}"
    assert np.allclose(np.asarray(x_hat), np.asarray(xr), atol=2e-2), \
        f"x_hat mismatch: {np.max(np.abs(np.asarray(x_hat) - np.asarray(xr)))}"

    print("KERNEL_OK")
</pallas_src>

<mosaic_0001>
module attributes {stable_mosaic.version = 11 : i64} {
  func.func @_vae_kernel(%arg0: i32, %arg1: memref<1x28x28xf32, #tpu.memory_space<vmem>>, %arg2: memref<1x1x16xf32, #tpu.memory_space<vmem>>, %arg3: memref<39x28xbf16, #tpu.memory_space<vmem>>, %arg4: memref<3x28x416xbf16, #tpu.memory_space<vmem>>, %arg5: memref<1x416xf32, #tpu.memory_space<vmem>>, %arg6: memref<3x416x352xbf16, #tpu.memory_space<vmem>>, %arg7: memref<1x352xf32, #tpu.memory_space<vmem>>, %arg8: memref<3x352x288xbf16, #tpu.memory_space<vmem>>, %arg9: memref<1x288xf32, #tpu.memory_space<vmem>>, %arg10: memref<3x288x224xbf16, #tpu.memory_space<vmem>>, %arg11: memref<1x224xf32, #tpu.memory_space<vmem>>, %arg12: memref<7x224x32xbf16, #tpu.memory_space<vmem>>, %arg13: memref<1x32xf32, #tpu.memory_space<vmem>>, %arg14: memref<7x16x224xbf16, #tpu.memory_space<vmem>>, %arg15: memref<7x224xf32, #tpu.memory_space<vmem>>, %arg16: memref<3x224x288xbf16, #tpu.memory_space<vmem>>, %arg17: memref<1x288xf32, #tpu.memory_space<vmem>>, %arg18: memref<3x288x352xbf16, #tpu.memory_space<vmem>>, %arg19: memref<1x352xf32, #tpu.memory_space<vmem>>, %arg20: memref<3x352x416xbf16, #tpu.memory_space<vmem>>, %arg21: memref<1x416xf32, #tpu.memory_space<vmem>>, %arg22: memref<3x416x28xbf16, #tpu.memory_space<vmem>>, %arg23: memref<1x56xf32, #tpu.memory_space<vmem>>, %arg24: memref<1x1x32xf32, #tpu.memory_space<vmem>>, %arg25: memref<1x14x56xf32, #tpu.memory_space<vmem>>) attributes {dimension_semantics = [#tpu.dimension_semantics<parallel>], iteration_bounds = array<i64: 2>, scalar_prefetch = 0 : i64, scratch_operands = 0 : i64, tpu.core_type = #tpu.core_type<tc>, window_params = [{transform_indices = @transform_0, window_bounds = array<i64: 1, 28, 28>}, {transform_indices = @transform_1, window_bounds = array<i64: 1, 1, 16>}, {pipeline_mode = #tpu.pipeline_mode<synchronous>, transform_indices = @transform_2, window_bounds = array<i64: 39, 28>}, {pipeline_mode = #tpu.pipeline_mode<synchronous>, transform_indices = @transform_3, window_bounds = array<i64: 3, 28, 416>}, {pipeline_mode = #tpu.pipeline_mode<synchronous>, transform_indices = @transform_4, window_bounds = array<i64: 1, 416>}, {pipeline_mode = #tpu.pipeline_mode<synchronous>, transform_indices = @transform_5, window_bounds = array<i64: 3, 416, 352>}, {pipeline_mode = #tpu.pipeline_mode<synchronous>, transform_indices = @transform_6, window_bounds = array<i64: 1, 352>}, {pipeline_mode = #tpu.pipeline_mode<synchronous>, transform_indices = @transform_7, window_bounds = array<i64: 3, 352, 288>}, {pipeline_mode = #tpu.pipeline_mode<synchronous>, transform_indices = @transform_8, window_bounds = array<i64: 1, 288>}, {pipeline_mode = #tpu.pipeline_mode<synchronous>, transform_indices = @transform_9, window_bounds = array<i64: 3, 288, 224>}, {pipeline_mode = #tpu.pipeline_mode<synchronous>, transform_indices = @transform_10, window_bounds = array<i64: 1, 224>}, {pipeline_mode = #tpu.pipeline_mode<synchronous>, transform_indices = @transform_11, window_bounds = array<i64: 7, 224, 32>}, {pipeline_mode = #tpu.pipeline_mode<synchronous>, transform_indices = @transform_12, window_bounds = array<i64: 1, 32>}, {pipeline_mode = #tpu.pipeline_mode<synchronous>, transform_indices = @transform_13, window_bounds = array<i64: 7, 16, 224>}, {pipeline_mode = #tpu.pipeline_mode<synchronous>, transform_indices = @transform_14, window_bounds = array<i64: 7, 224>}, {pipeline_mode = #tpu.pipeline_mode<synchronous>, transform_indices = @transform_15, window_bounds = array<i64: 3, 224, 288>}, {pipeline_mode = #tpu.pipeline_mode<synchronous>, transform_indices = @transform_16, window_bounds = array<i64: 1, 288>}, {pipeline_mode = #tpu.pipeline_mode<synchronous>, transform_indices = @transform_17, window_bounds = array<i64: 3, 288, 352>}, {pipeline_mode = #tpu.pipeline_mode<synchronous>, transform_indices = @transform_18, window_bounds = array<i64: 1, 352>}, {pipeline_mode = #tpu.pipeline_mode<synchronous>, transform_indices = @transform_19, window_bounds = array<i64: 3, 352, 416>}, {pipeline_mode = #tpu.pipeline_mode<synchronous>, transform_indices = @transform_20, window_bounds = array<i64: 1, 416>}, {pipeline_mode = #tpu.pipeline_mode<synchronous>, transform_indices = @transform_21, window_bounds = array<i64: 3, 416, 28>}, {pipeline_mode = #tpu.pipeline_mode<synchronous>, transform_indices = @transform_22, window_bounds = array<i64: 1, 56>}, {transform_indices = @transform_23, window_bounds = array<i64: 1, 1, 32>}, {transform_indices = @transform_24, window_bounds = array<i64: 1, 14, 56>}]} {
    %c0 = arith.constant 0 : index
    %c0_0 = arith.constant 0 : index
    %c0_1 = arith.constant 0 : index
    %0 = vector.load %arg1[%c0, %c0_0, %c0_1] : memref<1x28x28xf32, #tpu.memory_space<vmem>>, vector<1x28x28xf32>
    %1 = vector.shape_cast %0 : vector<1x28x28xf32> to vector<28x28xf32>
    %2 = arith.truncf %1 : vector<28x28xf32> to vector<28x28xbf16>
    %c0_2 = arith.constant 0 : index
    %c0_3 = arith.constant 0 : index
    %3 = vector.load %arg3[%c0_2, %c0_3] : memref<39x28xbf16, #tpu.memory_space<vmem>>, vector<39x28xbf16>
    %cst = arith.constant dense<0.000000e+00> : vector<39x28xf32>
    %4 = tpu.matmul %3, %2, %cst {dimension_numbers = #tpu.dot_dimension_numbers<[1], [0], [0], [1], [0, 0, 1, 1], [], []>} : vector<39x28xbf16>, vector<28x28xbf16>, vector<39x28xf32> -> vector<39x28xf32>
    %5 = arith.truncf %4 : vector<39x28xf32> to vector<39x28xbf16>
    %6 = vector.extract_strided_slice %5 {offsets = [0, 0], sizes = [13, 28], strides = [1, 1]} : vector<39x28xbf16> to vector<13x28xbf16>
    %c0_4 = arith.constant 0 : index
    %c0_5 = arith.constant 0 : index
    %c0_6 = arith.constant 0 : index
    %7 = vector.load %arg4[%c0_4, %c0_5, %c0_6] : memref<3x28x416xbf16, #tpu.memory_space<vmem>>, vector<1x28x416xbf16>
    %8 = vector.shape_cast %7 : vector<1x28x416xbf16> to vector<28x416xbf16>
    %cst_7 = arith.constant dense<0.000000e+00> : vector<13x416xf32>
    %9 = tpu.matmul %6, %8, %cst_7 {dimension_numbers = #tpu.dot_dimension_numbers<[1], [0], [0], [1], [0, 0, 1, 1], [], []>} : vector<13x28xbf16>, vector<28x416xbf16>, vector<13x416xf32> -> vector<13x416xf32>
    %10 = vector.extract_strided_slice %5 {offsets = [13, 0], sizes = [13, 28], strides = [1, 1]} : vector<39x28xbf16> to vector<13x28xbf16>
    %c1 = arith.constant 1 : index
    %c0_8 = arith.constant 0 : index
    %c0_9 = arith.constant 0 : index
    %11 = vector.load %arg4[%c1, %c0_8, %c0_9] : memref<3x28x416xbf16, #tpu.memory_space<vmem>>, vector<1x28x416xbf16>
    %12 = vector.shape_cast %11 : vector<1x28x416xbf16> to vector<28x416xbf16>
    %cst_10 = arith.constant dense<0.000000e+00> : vector<13x416xf32>
    %13 = tpu.matmul %10, %12, %cst_10 {dimension_numbers = #tpu.dot_dimension_numbers<[1], [0], [0], [1], [0, 0, 1, 1], [], []>} : vector<13x28xbf16>, vector<28x416xbf16>, vector<13x416xf32> -> vector<13x416xf32>
    %14 = arith.addf %9, %13 : vector<13x416xf32>
    %15 = vector.extract_strided_slice %5 {offsets = [26, 0], sizes = [13, 28], strides = [1, 1]} : vector<39x28xbf16> to vector<13x28xbf16>
    %c2 = arith.constant 2 : index
    %c0_11 = arith.constant 0 : index
    %c0_12 = arith.constant 0 : index
    %16 = vector.load %arg4[%c2, %c0_11, %c0_12] : memref<3x28x416xbf16, #tpu.memory_space<vmem>>, vector<1x28x416xbf16>
    %17 = vector.shape_cast %16 : vector<1x28x416xbf16> to vector<28x416xbf16>
    %cst_13 = arith.constant dense<0.000000e+00> : vector<13x416xf32>
    %18 = tpu.matmul %15, %17, %cst_13 {dimension_numbers = #tpu.dot_dimension_numbers<[1], [0], [0], [1], [0, 0, 1, 1], [], []>} : vector<13x28xbf16>, vector<28x416xbf16>, vector<13x416xf32> -> vector<13x416xf32>
    %19 = arith.addf %14, %18 : vector<13x416xf32>
    %c0_14 = arith.constant 0 : index
    %c0_15 = arith.constant 0 : index
    %20 = vector.load %arg5[%c0_14, %c0_15] : memref<1x416xf32, #tpu.memory_space<vmem>>, vector<1x416xf32>
    %21 = vector.broadcast %20 : vector<1x416xf32> to vector<13x416xf32>
    %22 = arith.addf %19, %21 : vector<13x416xf32>
    %cst_16 = arith.constant 0.000000e+00 : f32
    %23 = vector.broadcast %cst_16 : f32 to vector<13x416xf32>
    %24 = arith.maximumf %22, %23 : vector<13x416xf32>
    %25 = arith.truncf %24 : vector<13x416xf32> to vector<13x416xbf16>
    %26 = vector.extract_strided_slice %25 {offsets = [0, 0], sizes = [11, 416], strides = [1, 1]} : vector<13x416xbf16> to vector<11x416xbf16>
    %c0_17 = arith.constant 0 : index
    %c0_18 = arith.constant 0 : index
    %c0_19 = arith.constant 0 : index
    %27 = vector.load %arg6[%c0_17, %c0_18, %c0_19] : memref<3x416x352xbf16, #tpu.memory_space<vmem>>, vector<1x416x352xbf16>
    %28 = vector.shape_cast %27 : vector<1x416x352xbf16> to vector<416x352xbf16>
    %cst_20 = arith.constant dense<0.000000e+00> : vector<11x352xf32>
    %29 = tpu.matmul %26, %28, %cst_20 {dimension_numbers = #tpu.dot_dimension_numbers<[1], [0], [0], [1], [0, 0, 1, 1], [], []>} : vector<11x416xbf16>, vector<416x352xbf16>, vector<11x352xf32> -> vector<11x352xf32>
    %30 = vector.extract_strided_slice %25 {offsets = [1, 0], sizes = [11, 416], strides = [1, 1]} : vector<13x416xbf16> to vector<11x416xbf16>
    %c1_21 = arith.constant 1 : index
    %c0_22 = arith.constant 0 : index
    %c0_23 = arith.constant 0 : index
    %31 = vector.load %arg6[%c1_21, %c0_22, %c0_23] : memref<3x416x352xbf16, #tpu.memory_space<vmem>>, vector<1x416x352xbf16>
    %32 = vector.shape_cast %31 : vector<1x416x352xbf16> to vector<416x352xbf16>
    %cst_24 = arith.constant dense<0.000000e+00> : vector<11x352xf32>
    %33 = tpu.matmul %30, %32, %cst_24 {dimension_numbers = #tpu.dot_dimension_numbers<[1], [0], [0], [1], [0, 0, 1, 1], [], []>} : vector<11x416xbf16>, vector<416x352xbf16>, vector<11x352xf32> -> vector<11x352xf32>
    %34 = arith.addf %29, %33 : vector<11x352xf32>
    %35 = vector.extract_strided_slice %25 {offsets = [2, 0], sizes = [11, 416], strides = [1, 1]} : vector<13x416xbf16> to vector<11x416xbf16>
    %c2_25 = arith.constant 2 : index
    %c0_26 = arith.constant 0 : index
    %c0_27 = arith.constant 0 : index
    %36 = vector.load %arg6[%c2_25, %c0_26, %c0_27] : memref<3x416x352xbf16, #tpu.memory_space<vmem>>, vector<1x416x352xbf16>
    %37 = vector.shape_cast %36 : vector<1x416x352xbf16> to vector<416x352xbf16>
    %cst_28 = arith.constant dense<0.000000e+00> : vector<11x352xf32>
    %38 = tpu.matmul %35, %37, %cst_28 {dimension_numbers = #tpu.dot_dimension_numbers<[1], [0], [0], [1], [0, 0, 1, 1], [], []>} : vector<11x416xbf16>, vector<416x352xbf16>, vector<11x352xf32> -> vector<11x352xf32>
    %39 = arith.addf %34, %38 : vector<11x352xf32>
    %c0_29 = arith.constant 0 : index
    %c0_30 = arith.constant 0 : index
    %40 = vector.load %arg7[%c0_29, %c0_30] : memref<1x352xf32, #tpu.memory_space<vmem>>, vector<1x352xf32>
    %41 = vector.broadcast %40 : vector<1x352xf32> to vector<11x352xf32>
    %42 = arith.addf %39, %41 : vector<11x352xf32>
    %cst_31 = arith.constant 0.000000e+00 : f32
    %43 = vector.broadcast %cst_31 : f32 to vector<11x352xf32>
    %44 = arith.maximumf %42, %43 : vector<11x352xf32>
    %45 = arith.truncf %44 : vector<11x352xf32> to vector<11x352xbf16>
    %46 = vector.extract_strided_slice %45 {offsets = [0, 0], sizes = [9, 352], strides = [1, 1]} : vector<11x352xbf16> to vector<9x352xbf16>
    %c0_32 = arith.constant 0 : index
    %c0_33 = arith.constant 0 : index
    %c0_34 = arith.constant 0 : index
    %47 = vector.load %arg8[%c0_32, %c0_33, %c0_34] : memref<3x352x288xbf16, #tpu.memory_space<vmem>>, vector<1x352x288xbf16>
    %48 = vector.shape_cast %47 : vector<1x352x288xbf16> to vector<352x288xbf16>
    %cst_35 = arith.constant dense<0.000000e+00> : vector<9x288xf32>
    %49 = tpu.matmul %46, %48, %cst_35 {dimension_numbers = #tpu.dot_dimension_numbers<[1], [0], [0], [1], [0, 0, 1, 1], [], []>} : vector<9x352xbf16>, vector<352x288xbf16>, vector<9x288xf32> -> vector<9x288xf32>
    %50 = vector.extract_strided_slice %45 {offsets = [1, 0], sizes = [9, 352], strides = [1, 1]} : vector<11x352xbf16> to vector<9x352xbf16>
    %c1_36 = arith.constant 1 : index
    %c0_37 = arith.constant 0 : index
    %c0_38 = arith.constant 0 : index
    %51 = vector.load %arg8[%c1_36, %c0_37, %c0_38] : memref<3x352x288xbf16, #tpu.memory_space<vmem>>, vector<1x352x288xbf16>
    %52 = vector.shape_cast %51 : vector<1x352x288xbf16> to vector<352x288xbf16>
    %cst_39 = arith.constant dense<0.000000e+00> : vector<9x288xf32>
    %53 = tpu.matmul %50, %52, %cst_39 {dimension_numbers = #tpu.dot_dimension_numbers<[1], [0], [0], [1], [0, 0, 1, 1], [], []>} : vector<9x352xbf16>, vector<352x288xbf16>, vector<9x288xf32> -> vector<9x288xf32>
    %54 = arith.addf %49, %53 : vector<9x288xf32>
    %55 = vector.extract_strided_slice %45 {offsets = [2, 0], sizes = [9, 352], strides = [1, 1]} : vector<11x352xbf16> to vector<9x352xbf16>
    %c2_40 = arith.constant 2 : index
    %c0_41 = arith.constant 0 : index
    %c0_42 = arith.constant 0 : index
    %56 = vector.load %arg8[%c2_40, %c0_41, %c0_42] : memref<3x352x288xbf16, #tpu.memory_space<vmem>>, vector<1x352x288xbf16>
    %57 = vector.shape_cast %56 : vector<1x352x288xbf16> to vector<352x288xbf16>
    %cst_43 = arith.constant dense<0.000000e+00> : vector<9x288xf32>
    %58 = tpu.matmul %55, %57, %cst_43 {dimension_numbers = #tpu.dot_dimension_numbers<[1], [0], [0], [1], [0, 0, 1, 1], [], []>} : vector<9x352xbf16>, vector<352x288xbf16>, vector<9x288xf32> -> vector<9x288xf32>
    %59 = arith.addf %54, %58 : vector<9x288xf32>
    %c0_44 = arith.constant 0 : index
    %c0_45 = arith.constant 0 : index
    %60 = vector.load %arg9[%c0_44, %c0_45] : memref<1x288xf32, #tpu.memory_space<vmem>>, vector<1x288xf32>
    %61 = vector.broadcast %60 : vector<1x288xf32> to vector<9x288xf32>
    %62 = arith.addf %59, %61 : vector<9x288xf32>
    %cst_46 = arith.constant 0.000000e+00 : f32
    %63 = vector.broadcast %cst_46 : f32 to vector<9x288xf32>
    %64 = arith.maximumf %62, %63 : vector<9x288xf32>
    %65 = arith.truncf %64 : vector<9x288xf32> to vector<9x288xbf16>
    %66 = vector.extract_strided_slice %65 {offsets = [0, 0], sizes = [7, 288], strides = [1, 1]} : vector<9x288xbf16> to vector<7x288xbf16>
    %c0_47 = arith.constant 0 : index
    %c0_48 = arith.constant 0 : index
    %c0_49 = arith.constant 0 : index
    %67 = vector.load %arg10[%c0_47, %c0_48, %c0_49] : memref<3x288x224xbf16, #tpu.memory_space<vmem>>, vector<1x288x224xbf16>
    %68 = vector.shape_cast %67 : vector<1x288x224xbf16> to vector<288x224xbf16>
    %cst_50 = arith.constant dense<0.000000e+00> : vector<7x224xf32>
    %69 = tpu.matmul %66, %68, %cst_50 {dimension_numbers = #tpu.dot_dimension_numbers<[1], [0], [0], [1], [0, 0, 1, 1], [], []>} : vector<7x288xbf16>, vector<288x224xbf16>, vector<7x224xf32> -> vector<7x224xf32>
    %70 = vector.extract_strided_slice %65 {offsets = [1, 0], sizes = [7, 288], strides = [1, 1]} : vector<9x288xbf16> to vector<7x288xbf16>
    %c1_51 = arith.constant 1 : index
    %c0_52 = arith.constant 0 : index
    %c0_53 = arith.constant 0 : index
    %71 = vector.load %arg10[%c1_51, %c0_52, %c0_53] : memref<3x288x224xbf16, #tpu.memory_space<vmem>>, vector<1x288x224xbf16>
    %72 = vector.shape_cast %71 : vector<1x288x224xbf16> to vector<288x224xbf16>
    %cst_54 = arith.constant dense<0.000000e+00> : vector<7x224xf32>
    %73 = tpu.matmul %70, %72, %cst_54 {dimension_numbers = #tpu.dot_dimension_numbers<[1], [0], [0], [1], [0, 0, 1, 1], [], []>} : vector<7x288xbf16>, vector<288x224xbf16>, vector<7x224xf32> -> vector<7x224xf32>
    %74 = arith.addf %69, %73 : vector<7x224xf32>
    %75 = vector.extract_strided_slice %65 {offsets = [2, 0], sizes = [7, 288], strides = [1, 1]} : vector<9x288xbf16> to vector<7x288xbf16>
    %c2_55 = arith.constant 2 : index
    %c0_56 = arith.constant 0 : index
    %c0_57 = arith.constant 0 : index
    %76 = vector.load %arg10[%c2_55, %c0_56, %c0_57] : memref<3x288x224xbf16, #tpu.memory_space<vmem>>, vector<1x288x224xbf16>
    %77 = vector.shape_cast %76 : vector<1x288x224xbf16> to vector<288x224xbf16>
    %cst_58 = arith.constant dense<0.000000e+00> : vector<7x224xf32>
    %78 = tpu.matmul %75, %77, %cst_58 {dimension_numbers = #tpu.dot_dimension_numbers<[1], [0], [0], [1], [0, 0, 1, 1], [], []>} : vector<7x288xbf16>, vector<288x224xbf16>, vector<7x224xf32> -> vector<7x224xf32>
    %79 = arith.addf %74, %78 : vector<7x224xf32>
    %c0_59 = arith.constant 0 : index
    %c0_60 = arith.constant 0 : index
    %80 = vector.load %arg11[%c0_59, %c0_60] : memref<1x224xf32, #tpu.memory_space<vmem>>, vector<1x224xf32>
    %81 = vector.broadcast %80 : vector<1x224xf32> to vector<7x224xf32>
    %82 = arith.addf %79, %81 : vector<7x224xf32>
    %cst_61 = arith.constant 0.000000e+00 : f32
    %83 = vector.broadcast %cst_61 : f32 to vector<7x224xf32>
    %84 = arith.maximumf %82, %83 : vector<7x224xf32>
    %85 = arith.truncf %84 : vector<7x224xf32> to vector<7x224xbf16>
    %c0_62 = arith.constant 0 : index
    %c0_63 = arith.constant 0 : index
    %86 = vector.load %arg13[%c0_62, %c0_63] : memref<1x32xf32, #tpu.memory_space<vmem>>, vector<1x32xf32>
    %87 = vector.extract_strided_slice %85 {offsets = [0, 0], sizes = [1, 224], strides = [1, 1]} : vector<7x224xbf16> to vector<1x224xbf16>
    %c0_64 = arith.constant 0 : index
    %c0_65 = arith.constant 0 : index
    %c0_66 = arith.constant 0 : index
    %88 = vector.load %arg12[%c0_64, %c0_65, %c0_66] : memref<7x224x32xbf16, #tpu.memory_space<vmem>>, vector<1x224x32xbf16>
    %89 = vector.shape_cast %88 : vector<1x224x32xbf16> to vector<224x32xbf16>
    %cst_67 = arith.constant dense<0.000000e+00> : vector<1x32xf32>
    %90 = tpu.matmul %87, %89, %cst_67 {dimension_numbers = #tpu.dot_dimension_numbers<[1], [0], [0], [1], [0, 0, 1, 1], [], []>} : vector<1x224xbf16>, vector<224x32xbf16>, vector<1x32xf32> -> vector<1x32xf32>
    %91 = arith.addf %86, %90 : vector<1x32xf32>
    %92 = vector.extract_strided_slice %85 {offsets = [1, 0], sizes = [1, 224], strides = [1, 1]} : vector<7x224xbf16> to vector<1x224xbf16>
    %c1_68 = arith.constant 1 : index
    %c0_69 = arith.constant 0 : index
    %c0_70 = arith.constant 0 : index
    %93 = vector.load %arg12[%c1_68, %c0_69, %c0_70] : memref<7x224x32xbf16, #tpu.memory_space<vmem>>, vector<1x224x32xbf16>
    %94 = vector.shape_cast %93 : vector<1x224x32xbf16> to vector<224x32xbf16>
    %cst_71 = arith.constant dense<0.000000e+00> : vector<1x32xf32>
    %95 = tpu.matmul %92, %94, %cst_71 {dimension_numbers = #tpu.dot_dimension_numbers<[1], [0], [0], [1], [0, 0, 1, 1], [], []>} : vector<1x224xbf16>, vector<224x32xbf16>, vector<1x32xf32> -> vector<1x32xf32>
    %96 = arith.addf %91, %95 : vector<1x32xf32>
    %97 = vector.extract_strided_slice %85 {offsets = [2, 0], sizes = [1, 224], strides = [1, 1]} : vector<7x224xbf16> to vector<1x224xbf16>
    %c2_72 = arith.constant 2 : index
    %c0_73 = arith.constant 0 : index
    %c0_74 = arith.constant 0 : index
    %98 = vector.load %arg12[%c2_72, %c0_73, %c0_74] : memref<7x224x32xbf16, #tpu.memory_space<vmem>>, vector<1x224x32xbf16>
    %99 = vector.shape_cast %98 : vector<1x224x32xbf16> to vector<224x32xbf16>
    %cst_75 = arith.constant dense<0.000000e+00> : vector<1x32xf32>
    %100 = tpu.matmul %97, %99, %cst_75 {dimension_numbers = #tpu.dot_dimension_numbers<[1], [0], [0], [1], [0, 0, 1, 1], [], []>} : vector<1x224xbf16>, vector<224x32xbf16>, vector<1x32xf32> -> vector<1x32xf32>
    %101 = arith.addf %96, %100 : vector<1x32xf32>
    %102 = vector.extract_strided_slice %85 {offsets = [3, 0], sizes = [1, 224], strides = [1, 1]} : vector<7x224xbf16> to vector<1x224xbf16>
    %c3 = arith.constant 3 : index
    %c0_76 = arith.constant 0 : index
    %c0_77 = arith.constant 0 : index
    %103 = vector.load %arg12[%c3, %c0_76, %c0_77] : memref<7x224x32xbf16, #tpu.memory_space<vmem>>, vector<1x224x32xbf16>
    %104 = vector.shape_cast %103 : vector<1x224x32xbf16> to vector<224x32xbf16>
    %cst_78 = arith.constant dense<0.000000e+00> : vector<1x32xf32>
    %105 = tpu.matmul %102, %104, %cst_78 {dimension_numbers = #tpu.dot_dimension_numbers<[1], [0], [0], [1], [0, 0, 1, 1], [], []>} : vector<1x224xbf16>, vector<224x32xbf16>, vector<1x32xf32> -> vector<1x32xf32>
    %106 = arith.addf %101, %105 : vector<1x32xf32>
    %107 = vector.extract_strided_slice %85 {offsets = [4, 0], sizes = [1, 224], strides = [1, 1]} : vector<7x224xbf16> to vector<1x224xbf16>
    %c4 = arith.constant 4 : index
    %c0_79 = arith.constant 0 : index
    %c0_80 = arith.constant 0 : index
    %108 = vector.load %arg12[%c4, %c0_79, %c0_80] : memref<7x224x32xbf16, #tpu.memory_space<vmem>>, vector<1x224x32xbf16>
    %109 = vector.shape_cast %108 : vector<1x224x32xbf16> to vector<224x32xbf16>
    %cst_81 = arith.constant dense<0.000000e+00> : vector<1x32xf32>
    %110 = tpu.matmul %107, %109, %cst_81 {dimension_numbers = #tpu.dot_dimension_numbers<[1], [0], [0], [1], [0, 0, 1, 1], [], []>} : vector<1x224xbf16>, vector<224x32xbf16>, vector<1x32xf32> -> vector<1x32xf32>
    %111 = arith.addf %106, %110 : vector<1x32xf32>
    %112 = vector.extract_strided_slice %85 {offsets = [5, 0], sizes = [1, 224], strides = [1, 1]} : vector<7x224xbf16> to vector<1x224xbf16>
    %c5 = arith.constant 5 : index
    %c0_82 = arith.constant 0 : index
    %c0_83 = arith.constant 0 : index
    %113 = vector.load %arg12[%c5, %c0_82, %c0_83] : memref<7x224x32xbf16, #tpu.memory_space<vmem>>, vector<1x224x32xbf16>
    %114 = vector.shape_cast %113 : vector<1x224x32xbf16> to vector<224x32xbf16>
    %cst_84 = arith.constant dense<0.000000e+00> : vector<1x32xf32>
    %115 = tpu.matmul %112, %114, %cst_84 {dimension_numbers = #tpu.dot_dimension_numbers<[1], [0], [0], [1], [0, 0, 1, 1], [], []>} : vector<1x224xbf16>, vector<224x32xbf16>, vector<1x32xf32> -> vector<1x32xf32>
    %116 = arith.addf %111, %115 : vector<1x32xf32>
    %117 = vector.extract_strided_slice %85 {offsets = [6, 0], sizes = [1, 224], strides = [1, 1]} : vector<7x224xbf16> to vector<1x224xbf16>
    %c6 = arith.constant 6 : index
    %c0_85 = arith.constant 0 : index
    %c0_86 = arith.constant 0 : index
    %118 = vector.load %arg12[%c6, %c0_85, %c0_86] : memref<7x224x32xbf16, #tpu.memory_space<vmem>>, vector<1x224x32xbf16>
    %119 = vector.shape_cast %118 : vector<1x224x32xbf16> to vector<224x32xbf16>
    %cst_87 = arith.constant dense<0.000000e+00> : vector<1x32xf32>
    %120 = tpu.matmul %117, %119, %cst_87 {dimension_numbers = #tpu.dot_dimension_numbers<[1], [0], [0], [1], [0, 0, 1, 1], [], []>} : vector<1x224xbf16>, vector<224x32xbf16>, vector<1x32xf32> -> vector<1x32xf32>
    %121 = arith.addf %116, %120 : vector<1x32xf32>
    %c0_88 = arith.constant 0 : index
    %c0_89 = arith.constant 0 : index
    %c0_90 = arith.constant 0 : index
    %122 = vector.load %arg24[%c0_88, %c0_89, %c0_90] : memref<1x1x32xf32, #tpu.memory_space<vmem>>, vector<1x1x32xf32>
    %123 = vector.shape_cast %122 : vector<1x1x32xf32> to vector<1x32xf32>
    %124 = vector.shape_cast %121 : vector<1x32xf32> to vector<1x1x32xf32>
    tpu.vector_store %arg24[%c0_88, %c0_89, %c0_90], %124 {strides = array<i32>} : memref<1x1x32xf32, #tpu.memory_space<vmem>>, vector<1x1x32xf32>,
    %125 = vector.extract_strided_slice %121 {offsets = [0, 0], sizes = [1, 16], strides = [1, 1]} : vector<1x32xf32> to vector<1x16xf32>
    %126 = vector.extract_strided_slice %121 {offsets = [0, 16], sizes = [1, 16], strides = [1, 1]} : vector<1x32xf32> to vector<1x16xf32>
    %c0_91 = arith.constant 0 : index
    %c0_92 = arith.constant 0 : index
    %c0_93 = arith.constant 0 : index
    %127 = vector.load %arg2[%c0_91, %c0_92, %c0_93] : memref<1x1x16xf32, #tpu.memory_space<vmem>>, vector<1x1x16xf32>
    %128 = vector.shape_cast %127 : vector<1x1x16xf32> to vector<1x16xf32>
    %cst_94 = arith.constant 5.000000e-01 : f32
    %129 = vector.broadcast %cst_94 : f32 to vector<1x16xf32>
    %130 = arith.mulf %129, %126 : vector<1x16xf32>
    %131 = math.exp %130 : vector<1x16xf32>
    %132 = arith.mulf %128, %131 : vector<1x16xf32>
    %133 = arith.addf %125, %132 : vector<1x16xf32>
    %134 = arith.truncf %133 : vector<1x16xf32> to vector<1x16xbf16>
    %c0_95 = arith.constant 0 : index
    %c0_96 = arith.constant 0 : index
    %135 = vector.load %arg15[%c0_95, %c0_96] : memref<7x224xf32, #tpu.memory_space<vmem>>, vector<7x224xf32>
    %c0_97 = arith.constant 0 : index
    %c0_98 = arith.constant 0 : index
    %c0_99 = arith.constant 0 : index
    %136 = vector.load %arg14[%c0_97, %c0_98, %c0_99] : memref<7x16x224xbf16, #tpu.memory_space<vmem>>, vector<1x16x224xbf16>
    %137 = vector.shape_cast %136 : vector<1x16x224xbf16> to vector<16x224xbf16>
    %cst_100 = arith.constant dense<0.000000e+00> : vector<1x224xf32>
    %138 = tpu.matmul %134, %137, %cst_100 {dimension_numbers = #tpu.dot_dimension_numbers<[1], [0], [0], [1], [0, 0, 1, 1], [], []>} : vector<1x16xbf16>, vector<16x224xbf16>, vector<1x224xf32> -> vector<1x224xf32>
    %139 = vector.extract_strided_slice %135 {offsets = [0, 0], sizes = [1, 224], strides = [1, 1]} : vector<7x224xf32> to vector<1x224xf32>
    %140 = arith.addf %138, %139 : vector<1x224xf32>
    %cst_101 = arith.constant 0.000000e+00 : f32
    %141 = vector.broadcast %cst_101 : f32 to vector<1x224xf32>
    %142 = arith.maximumf %140, %141 : vector<1x224xf32>
    %c1_102 = arith.constant 1 : index
    %c0_103 = arith.constant 0 : index
    %c0_104 = arith.constant 0 : index
    %143 = vector.load %arg14[%c1_102, %c0_103, %c0_104] : memref<7x16x224xbf16, #tpu.memory_space<vmem>>, vector<1x16x224xbf16>
    %144 = vector.shape_cast %143 : vector<1x16x224xbf16> to vector<16x224xbf16>
    %cst_105 = arith.constant dense<0.000000e+00> : vector<1x224xf32>
    %145 = tpu.matmul %134, %144, %cst_105 {dimension_numbers = #tpu.dot_dimension_numbers<[1], [0], [0], [1], [0, 0, 1, 1], [], []>} : vector<1x16xbf16>, vector<16x224xbf16>, vector<1x224xf32> -> vector<1x224xf32>
    %146 = vector.extract_strided_slice %135 {offsets = [1, 0], sizes = [1, 224], strides = [1, 1]} : vector<7x224xf32> to vector<1x224xf32>
    %147 = arith.addf %145, %146 : vector<1x224xf32>
    %cst_106 = arith.constant 0.000000e+00 : f32
    %148 = vector.broadcast %cst_106 : f32 to vector<1x224xf32>
    %149 = arith.maximumf %147, %148 : vector<1x224xf32>
    %c2_107 = arith.constant 2 : index
    %c0_108 = arith.constant 0 : index
    %c0_109 = arith.constant 0 : index
    %150 = vector.load %arg14[%c2_107, %c0_108, %c0_109] : memref<7x16x224xbf16, #tpu.memory_space<vmem>>, vector<1x16x224xbf16>
    %151 = vector.shape_cast %150 : vector<1x16x224xbf16> to vector<16x224xbf16>
    %cst_110 = arith.constant dense<0.000000e+00> : vector<1x224xf32>
    %152 = tpu.matmul %134, %151, %cst_110 {dimension_numbers = #tpu.dot_dimension_numbers<[1], [0], [0], [1], [0, 0, 1, 1], [], []>} : vector<1x16xbf16>, vector<16x224xbf16>, vector<1x224xf32> -> vector<1x224xf32>
    %153 = vector.extract_strided_slice %135 {offsets = [2, 0], sizes = [1, 224], strides = [1, 1]} : vector<7x224xf32> to vector<1x224xf32>
    %154 = arith.addf %152, %153 : vector<1x224xf32>
    %cst_111 = arith.constant 0.000000e+00 : f32
    %155 = vector.broadcast %cst_111 : f32 to vector<1x224xf32>
    %156 = arith.maximumf %154, %155 : vector<1x224xf32>
    %c3_112 = arith.constant 3 : index
    %c0_113 = arith.constant 0 : index
    %c0_114 = arith.constant 0 : index
    %157 = vector.load %arg14[%c3_112, %c0_113, %c0_114] : memref<7x16x224xbf16, #tpu.memory_space<vmem>>, vector<1x16x224xbf16>
    %158 = vector.shape_cast %157 : vector<1x16x224xbf16> to vector<16x224xbf16>
    %cst_115 = arith.constant dense<0.000000e+00> : vector<1x224xf32>
    %159 = tpu.matmul %134, %158, %cst_115 {dimension_numbers = #tpu.dot_dimension_numbers<[1], [0], [0], [1], [0, 0, 1, 1], [], []>} : vector<1x16xbf16>, vector<16x224xbf16>, vector<1x224xf32> -> vector<1x224xf32>
    %160 = vector.extract_strided_slice %135 {offsets = [3, 0], sizes = [1, 224], strides = [1, 1]} : vector<7x224xf32> to vector<1x224xf32>
    %161 = arith.addf %159, %160 : vector<1x224xf32>
    %cst_116 = arith.constant 0.000000e+00 : f32
    %162 = vector.broadcast %cst_116 : f32 to vector<1x224xf32>
    %163 = arith.maximumf %161, %162 : vector<1x224xf32>
    %c4_117 = arith.constant 4 : index
    %c0_118 = arith.constant 0 : index
    %c0_119 = arith.constant 0 : index
    %164 = vector.load %arg14[%c4_117, %c0_118, %c0_119] : memref<7x16x224xbf16, #tpu.memory_space<vmem>>, vector<1x16x224xbf16>
    %165 = vector.shape_cast %164 : vector<1x16x224xbf16> to vector<16x224xbf16>
    %cst_120 = arith.constant dense<0.000000e+00> : vector<1x224xf32>
    %166 = tpu.matmul %134, %165, %cst_120 {dimension_numbers = #tpu.dot_dimension_numbers<[1], [0], [0], [1], [0, 0, 1, 1], [], []>} : vector<1x16xbf16>, vector<16x224xbf16>, vector<1x224xf32> -> vector<1x224xf32>
    %167 = vector.extract_strided_slice %135 {offsets = [4, 0], sizes = [1, 224], strides = [1, 1]} : vector<7x224xf32> to vector<1x224xf32>
    %168 = arith.addf %166, %167 : vector<1x224xf32>
    %cst_121 = arith.constant 0.000000e+00 : f32
    %169 = vector.broadcast %cst_121 : f32 to vector<1x224xf32>
    %170 = arith.maximumf %168, %169 : vector<1x224xf32>
    %c5_122 = arith.constant 5 : index
    %c0_123 = arith.constant 0 : index
    %c0_124 = arith.constant 0 : index
    %171 = vector.load %arg14[%c5_122, %c0_123, %c0_124] : memref<7x16x224xbf16, #tpu.memory_space<vmem>>, vector<1x16x224xbf16>
    %172 = vector.shape_cast %171 : vector<1x16x224xbf16> to vector<16x224xbf16>
    %cst_125 = arith.constant dense<0.000000e+00> : vector<1x224xf32>
    %173 = tpu.matmul %134, %172, %cst_125 {dimension_numbers = #tpu.dot_dimension_numbers<[1], [0], [0], [1], [0, 0, 1, 1], [], []>} : vector<1x16xbf16>, vector<16x224xbf16>, vector<1x224xf32> -> vector<1x224xf32>
    %174 = vector.extract_strided_slice %135 {offsets = [5, 0], sizes = [1, 224], strides = [1, 1]} : vector<7x224xf32> to vector<1x224xf32>
    %175 = arith.addf %173, %174 : vector<1x224xf32>
    %cst_126 = arith.constant 0.000000e+00 : f32
    %176 = vector.broadcast %cst_126 : f32 to vector<1x224xf32>
    %177 = arith.maximumf %175, %176 : vector<1x224xf32>
    %c6_127 = arith.constant 6 : index
    %c0_128 = arith.constant 0 : index
    %c0_129 = arith.constant 0 : index
    %178 = vector.load %arg14[%c6_127, %c0_128, %c0_129] : memref<7x16x224xbf16, #tpu.memory_space<vmem>>, vector<1x16x224xbf16>
    %179 = vector.shape_cast %178 : vector<1x16x224xbf16> to vector<16x224xbf16>
    %cst_130 = arith.constant dense<0.000000e+00> : vector<1x224xf32>
    %180 = tpu.matmul %134, %179, %cst_130 {dimension_numbers = #tpu.dot_dimension_numbers<[1], [0], [0], [1], [0, 0, 1, 1], [], []>} : vector<1x16xbf16>, vector<16x224xbf16>, vector<1x224xf32> -> vector<1x224xf32>
    %181 = vector.extract_strided_slice %135 {offsets = [6, 0], sizes = [1, 224], strides = [1, 1]} : vector<7x224xf32> to vector<1x224xf32>
    %182 = arith.addf %180, %181 : vector<1x224xf32>
    %cst_131 = arith.constant 0.000000e+00 : f32
    %183 = vector.broadcast %cst_131 : f32 to vector<1x224xf32>
    %184 = arith.maximumf %182, %183 : vector<1x224xf32>
    %185 = tpu.concatenate %142, %149, %156, %163, %170, %177, %184 in 0 : vector<1x224xf32>, vector<1x224xf32>, vector<1x224xf32>, vector<1x224xf32>, vector<1x224xf32>, vector<1x224xf32>, vector<1x224xf32> -> vector<7x224xf32>
    %186 = arith.truncf %185 : vector<7x224xf32> to vector<7x224xbf16>
    %cst_132 = arith.constant 0.000000e+00 : bf16
    %187 = vector.broadcast %cst_132 : bf16 to vector<2x224xbf16>
    %188 = tpu.concatenate %187, %186, %187 in 0 : vector<2x224xbf16>, vector<7x224xbf16>, vector<2x224xbf16> -> vector<11x224xbf16>
    %189 = vector.extract_strided_slice %188 {offsets = [0, 0], sizes = [9, 224], strides = [1, 1]} : vector<11x224xbf16> to vector<9x224xbf16>
    %c0_133 = arith.constant 0 : index
    %c0_134 = arith.constant 0 : index
    %c0_135 = arith.constant 0 : index
    %190 = vector.load %arg16[%c0_133, %c0_134, %c0_135] : memref<3x224x288xbf16, #tpu.memory_space<vmem>>, vector<1x224x288xbf16>
    %191 = vector.shape_cast %190 : vector<1x224x288xbf16> to vector<224x288xbf16>
    %cst_136 = arith.constant dense<0.000000e+00> : vector<9x288xf32>
    %192 = tpu.matmul %189, %191, %cst_136 {dimension_numbers = #tpu.dot_dimension_numbers<[1], [0], [0], [1], [0, 0, 1, 1], [], []>} : vector<9x224xbf16>, vector<224x288xbf16>, vector<9x288xf32> -> vector<9x288xf32>
    %193 = vector.extract_strided_slice %188 {offsets = [1, 0], sizes = [9, 224], strides = [1, 1]} : vector<11x224xbf16> to vector<9x224xbf16>
    %c1_137 = arith.constant 1 : index
    %c0_138 = arith.constant 0 : index
    %c0_139 = arith.constant 0 : index
    %194 = vector.load %arg16[%c1_137, %c0_138, %c0_139] : memref<3x224x288xbf16, #tpu.memory_space<vmem>>, vector<1x224x288xbf16>
    %195 = vector.shape_cast %194 : vector<1x224x288xbf16> to vector<224x288xbf16>
    %cst_140 = arith.constant dense<0.000000e+00> : vector<9x288xf32>
    %196 = tpu.matmul %193, %195, %cst_140 {dimension_numbers = #tpu.dot_dimension_numbers<[1], [0], [0], [1], [0, 0, 1, 1], [], []>} : vector<9x224xbf16>, vector<224x288xbf16>, vector<9x288xf32> -> vector<9x288xf32>
    %197 = arith.addf %192, %196 : vector<9x288xf32>
    %198 = vector.extract_strided_slice %188 {offsets = [2, 0], sizes = [9, 224], strides = [1, 1]} : vector<11x224xbf16> to vector<9x224xbf16>
    %c2_141 = arith.constant 2 : index
    %c0_142 = arith.constant 0 : index
    %c0_143 = arith.constant 0 : index
    %199 = vector.load %arg16[%c2_141, %c0_142, %c0_143] : memref<3x224x288xbf16, #tpu.memory_space<vmem>>, vector<1x224x288xbf16>
    %200 = vector.shape_cast %199 : vector<1x224x288xbf16> to vector<224x288xbf16>
    %cst_144 = arith.constant dense<0.000000e+00> : vector<9x288xf32>
    %201 = tpu.matmul %198, %200, %cst_144 {dimension_numbers = #tpu.dot_dimension_numbers<[1], [0], [0], [1], [0, 0, 1, 1], [], []>} : vector<9x224xbf16>, vector<224x288xbf16>, vector<9x288xf32> -> vector<9x288xf32>
    %202 = arith.addf %197, %201 : vector<9x288xf32>
    %c0_145 = arith.constant 0 : index
    %c0_146 = arith.constant 0 : index
    %203 = vector.load %arg17[%c0_145, %c0_146] : memref<1x288xf32, #tpu.memory_space<vmem>>, vector<1x288xf32>
    %204 = vector.broadcast %203 : vector<1x288xf32> to vector<9x288xf32>
    %205 = arith.addf %202, %204 : vector<9x288xf32>
    %cst_147 = arith.constant 0.000000e+00 : f32
    %206 = vector.broadcast %cst_147 : f32 to vector<9x288xf32>
    %207 = arith.maximumf %205, %206 : vector<9x288xf32>
    %208 = arith.truncf %207 : vector<9x288xf32> to vector<9x288xbf16>
    %cst_148 = arith.constant 0.000000e+00 : bf16
    %209 = vector.broadcast %cst_148 : bf16 to vector<2x288xbf16>
    %210 = tpu.concatenate %209, %208, %209 in 0 : vector<2x288xbf16>, vector<9x288xbf16>, vector<2x288xbf16> -> vector<13x288xbf16>
    %211 = vector.extract_strided_slice %210 {offsets = [0, 0], sizes = [11, 288], strides = [1, 1]} : vector<13x288xbf16> to vector<11x288xbf16>
    %c0_149 = arith.constant 0 : index
    %c0_150 = arith.constant 0 : index
    %c0_151 = arith.constant 0 : index
    %212 = vector.load %arg18[%c0_149, %c0_150, %c0_151] : memref<3x288x352xbf16, #tpu.memory_space<vmem>>, vector<1x288x352xbf16>
    %213 = vector.shape_cast %212 : vector<1x288x352xbf16> to vector<288x352xbf16>
    %cst_152 = arith.constant dense<0.000000e+00> : vector<11x352xf32>
    %214 = tpu.matmul %211, %213, %cst_152 {dimension_numbers = #tpu.dot_dimension_numbers<[1], [0], [0], [1], [0, 0, 1, 1], [], []>} : vector<11x288xbf16>, vector<288x352xbf16>, vector<11x352xf32> -> vector<11x352xf32>
    %215 = vector.extract_strided_slice %210 {offsets = [1, 0], sizes = [11, 288], strides = [1, 1]} : vector<13x288xbf16> to vector<11x288xbf16>
    %c1_153 = arith.constant 1 : index
    %c0_154 = arith.constant 0 : index
    %c0_155 = arith.constant 0 : index
    %216 = vector.load %arg18[%c1_153, %c0_154, %c0_155] : memref<3x288x352xbf16, #tpu.memory_space<vmem>>, vector<1x288x352xbf16>
    %217 = vector.shape_cast %216 : vector<1x288x352xbf16> to vector<288x352xbf16>
    %cst_156 = arith.constant dense<0.000000e+00> : vector<11x352xf32>
    %218 = tpu.matmul %215, %217, %cst_156 {dimension_numbers = #tpu.dot_dimension_numbers<[1], [0], [0], [1], [0, 0, 1, 1], [], []>} : vector<11x288xbf16>, vector<288x352xbf16>, vector<11x352xf32> -> vector<11x352xf32>
    %219 = arith.addf %214, %218 : vector<11x352xf32>
    %220 = vector.extract_strided_slice %210 {offsets = [2, 0], sizes = [11, 288], strides = [1, 1]} : vector<13x288xbf16> to vector<11x288xbf16>
    %c2_157 = arith.constant 2 : index
    %c0_158 = arith.constant 0 : index
    %c0_159 = arith.constant 0 : index
    %221 = vector.load %arg18[%c2_157, %c0_158, %c0_159] : memref<3x288x352xbf16, #tpu.memory_space<vmem>>, vector<1x288x352xbf16>
    %222 = vector.shape_cast %221 : vector<1x288x352xbf16> to vector<288x352xbf16>
    %cst_160 = arith.constant dense<0.000000e+00> : vector<11x352xf32>
    %223 = tpu.matmul %220, %222, %cst_160 {dimension_numbers = #tpu.dot_dimension_numbers<[1], [0], [0], [1], [0, 0, 1, 1], [], []>} : vector<11x288xbf16>, vector<288x352xbf16>, vector<11x352xf32> -> vector<11x352xf32>
    %224 = arith.addf %219, %223 : vector<11x352xf32>
    %c0_161 = arith.constant 0 : index
    %c0_162 = arith.constant 0 : index
    %225 = vector.load %arg19[%c0_161, %c0_162] : memref<1x352xf32, #tpu.memory_space<vmem>>, vector<1x352xf32>
    %226 = vector.broadcast %225 : vector<1x352xf32> to vector<11x352xf32>
    %227 = arith.addf %224, %226 : vector<11x352xf32>
    %cst_163 = arith.constant 0.000000e+00 : f32
    %228 = vector.broadcast %cst_163 : f32 to vector<11x352xf32>
    %229 = arith.maximumf %227, %228 : vector<11x352xf32>
    %230 = arith.truncf %229 : vector<11x352xf32> to vector<11x352xbf16>
    %cst_164 = arith.constant 0.000000e+00 : bf16
    %231 = vector.broadcast %cst_164 : bf16 to vector<2x352xbf16>
    %232 = tpu.concatenate %231, %230, %231 in 0 : vector<2x352xbf16>, vector<11x352xbf16>, vector<2x352xbf16> -> vector<15x352xbf16>
    %233 = vector.extract_strided_slice %232 {offsets = [0, 0], sizes = [13, 352], strides = [1, 1]} : vector<15x352xbf16> to vector<13x352xbf16>
    %c0_165 = arith.constant 0 : index
    %c0_166 = arith.constant 0 : index
    %c0_167 = arith.constant 0 : index
    %234 = vector.load %arg20[%c0_165, %c0_166, %c0_167] : memref<3x352x416xbf16, #tpu.memory_space<vmem>>, vector<1x352x416xbf16>
    %235 = vector.shape_cast %234 : vector<1x352x416xbf16> to vector<352x416xbf16>
    %cst_168 = arith.constant dense<0.000000e+00> : vector<13x416xf32>
    %236 = tpu.matmul %233, %235, %cst_168 {dimension_numbers = #tpu.dot_dimension_numbers<[1], [0], [0], [1], [0, 0, 1, 1], [], []>} : vector<13x352xbf16>, vector<352x416xbf16>, vector<13x416xf32> -> vector<13x416xf32>
    %237 = vector.extract_strided_slice %232 {offsets = [1, 0], sizes = [13, 352], strides = [1, 1]} : vector<15x352xbf16> to vector<13x352xbf16>
    %c1_169 = arith.constant 1 : index
    %c0_170 = arith.constant 0 : index
    %c0_171 = arith.constant 0 : index
    %238 = vector.load %arg20[%c1_169, %c0_170, %c0_171] : memref<3x352x416xbf16, #tpu.memory_space<vmem>>, vector<1x352x416xbf16>
    %239 = vector.shape_cast %238 : vector<1x352x416xbf16> to vector<352x416xbf16>
    %cst_172 = arith.constant dense<0.000000e+00> : vector<13x416xf32>
    %240 = tpu.matmul %237, %239, %cst_172 {dimension_numbers = #tpu.dot_dimension_numbers<[1], [0], [0], [1], [0, 0, 1, 1], [], []>} : vector<13x352xbf16>, vector<352x416xbf16>, vector<13x416xf32> -> vector<13x416xf32>
    %241 = arith.addf %236, %240 : vector<13x416xf32>
    %242 = vector.extract_strided_slice %232 {offsets = [2, 0], sizes = [13, 352], strides = [1, 1]} : vector<15x352xbf16> to vector<13x352xbf16>
    %c2_173 = arith.constant 2 : index
    %c0_174 = arith.constant 0 : index
    %c0_175 = arith.constant 0 : index
    %243 = vector.load %arg20[%c2_173, %c0_174, %c0_175] : memref<3x352x416xbf16, #tpu.memory_space<vmem>>, vector<1x352x416xbf16>
    %244 = vector.shape_cast %243 : vector<1x352x416xbf16> to vector<352x416xbf16>
    %cst_176 = arith.constant dense<0.000000e+00> : vector<13x416xf32>
    %245 = tpu.matmul %242, %244, %cst_176 {dimension_numbers = #tpu.dot_dimension_numbers<[1], [0], [0], [1], [0, 0, 1, 1], [], []>} : vector<13x352xbf16>, vector<352x416xbf16>, vector<13x416xf32> -> vector<13x416xf32>
    %246 = arith.addf %241, %245 : vector<13x416xf32>
    %c0_177 = arith.constant 0 : index
    %c0_178 = arith.constant 0 : index
    %247 = vector.load %arg21[%c0_177, %c0_178] : memref<1x416xf32, #tpu.memory_space<vmem>>, vector<1x416xf32>
    %248 = vector.broadcast %247 : vector<1x416xf32> to vector<13x416xf32>
    %249 = arith.addf %246, %248 : vector<13x416xf32>
    %cst_179 = arith.constant 0.000000e+00 : f32
    %250 = vector.broadcast %cst_179 : f32 to vector<13x416xf32>
    %251 = arith.maximumf %249, %250 : vector<13x416xf32>
    %252 = arith.truncf %251 : vector<13x416xf32> to vector<13x416xbf16>
    %cst_180 = arith.constant 0.000000e+00 : bf16
    %253 = vector.broadcast %cst_180 : bf16 to vector<1x416xbf16>
    %254 = tpu.concatenate %253, %252, %253 in 0 : vector<1x416xbf16>, vector<13x416xbf16>, vector<1x416xbf16> -> vector<15x416xbf16>
    %255 = vector.extract_strided_slice %254 {offsets = [1, 0], sizes = [14, 416], strides = [1, 1]} : vector<15x416xbf16> to vector<14x416xbf16>
    %c0_181 = arith.constant 0 : index
    %c0_182 = arith.constant 0 : index
    %c0_183 = arith.constant 0 : index
    %256 = vector.load %arg22[%c0_181, %c0_182, %c0_183] : memref<3x416x28xbf16, #tpu.memory_space<vmem>>, vector<1x416x28xbf16>
    %257 = vector.shape_cast %256 : vector<1x416x28xbf16> to vector<416x28xbf16>
    %cst_184 = arith.constant dense<0.000000e+00> : vector<14x28xf32>
    %258 = tpu.matmul %255, %257, %cst_184 {dimension_numbers = #tpu.dot_dimension_numbers<[1], [0], [0], [1], [0, 0, 1, 1], [], []>} : vector<14x416xbf16>, vector<416x28xbf16>, vector<14x28xf32> -> vector<14x28xf32>
    %259 = vector.extract_strided_slice %254 {offsets = [0, 0], sizes = [14, 416], strides = [1, 1]} : vector<15x416xbf16> to vector<14x416xbf16>
    %c2_185 = arith.constant 2 : index
    %c0_186 = arith.constant 0 : index
    %c0_187 = arith.constant 0 : index
    %260 = vector.load %arg22[%c2_185, %c0_186, %c0_187] : memref<3x416x28xbf16, #tpu.memory_space<vmem>>, vector<1x416x28xbf16>
    %261 = vector.shape_cast %260 : vector<1x416x28xbf16> to vector<416x28xbf16>
    %cst_188 = arith.constant dense<0.000000e+00> : vector<14x28xf32>
    %262 = tpu.matmul %259, %261, %cst_188 {dimension_numbers = #tpu.dot_dimension_numbers<[1], [0], [0], [1], [0, 0, 1, 1], [], []>} : vector<14x416xbf16>, vector<416x28xbf16>, vector<14x28xf32> -> vector<14x28xf32>
    %263 = arith.addf %258, %262 : vector<14x28xf32>
    %264 = vector.extract_strided_slice %254 {offsets = [1, 0], sizes = [14, 416], strides = [1, 1]} : vector<15x416xbf16> to vector<14x416xbf16>
    %c1_189 = arith.constant 1 : index
    %c0_190 = arith.constant 0 : index
    %c0_191 = arith.constant 0 : index
    %265 = vector.load %arg22[%c1_189, %c0_190, %c0_191] : memref<3x416x28xbf16, #tpu.memory_space<vmem>>, vector<1x416x28xbf16>
    %266 = vector.shape_cast %265 : vector<1x416x28xbf16> to vector<416x28xbf16>
    %cst_192 = arith.constant dense<0.000000e+00> : vector<14x28xf32>
    %267 = tpu.matmul %264, %266, %cst_192 {dimension_numbers = #tpu.dot_dimension_numbers<[1], [0], [0], [1], [0, 0, 1, 1], [], []>} : vector<14x416xbf16>, vector<416x28xbf16>, vector<14x28xf32> -> vector<14x28xf32>
    %268 = tpu.concatenate %263, %267 in 1 : vector<14x28xf32>, vector<14x28xf32> -> vector<14x56xf32>
    %c0_193 = arith.constant 0 : index
    %c0_194 = arith.constant 0 : index
    %269 = vector.load %arg23[%c0_193, %c0_194] : memref<1x56xf32, #tpu.memory_space<vmem>>, vector<1x56xf32>
    %270 = vector.broadcast %269 : vector<1x56xf32> to vector<14x56xf32>
    %271 = arith.addf %268, %270 : vector<14x56xf32>
    %272 = arith.negf %271 : vector<14x56xf32>
    %273 = math.exp %272 : vector<14x56xf32>
    %cst_195 = arith.constant 1.000000e+00 : f32
    %274 = vector.broadcast %cst_195 : f32 to vector<14x56xf32>
    %275 = arith.addf %274, %273 : vector<14x56xf32>
    %276 = arith.divf %274, %275 : vector<14x56xf32>
    %c0_196 = arith.constant 0 : index
    %c0_197 = arith.constant 0 : index
    %c0_198 = arith.constant 0 : index
    %277 = vector.load %arg25[%c0_196, %c0_197, %c0_198] : memref<1x14x56xf32, #tpu.memory_space<vmem>>, vector<1x14x56xf32>
    %278 = vector.shape_cast %277 : vector<1x14x56xf32> to vector<14x56xf32>
    %279 = vector.shape_cast %276 : vector<14x56xf32> to vector<1x14x56xf32>
    tpu.vector_store %arg25[%c0_196, %c0_197, %c0_198], %279 {strides = array<i32>} : memref<1x14x56xf32, #tpu.memory_space<vmem>>, vector<1x14x56xf32>,
    return
  }
  func.func @transform_0(%arg0: i32) -> (i32, i32, i32) {
    %c0_i32 = arith.constant 0 : i32
    %c0_i32_0 = arith.constant 0 : i32
    %c0_i32_1 = arith.constant 0 : i32
    return %arg0, %c0_i32, %c0_i32_0 : i32, i32, i32
  }
  func.func @transform_1(%arg0: i32) -> (i32, i32, i32) {
    %c0_i32 = arith.constant 0 : i32
    %c0_i32_0 = arith.constant 0 : i32
    %c0_i32_1 = arith.constant 0 : i32
    return %arg0, %c0_i32, %c0_i32_0 : i32, i32, i32
  }
  func.func @transform_2(%arg0: i32) -> (i32, i32) {
    %c0_i32 = arith.constant 0 : i32
    %c0_i32_0 = arith.constant 0 : i32
    %c0_i32_1 = arith.constant 0 : i32
    return %c0_i32, %c0_i32_0 : i32, i32
  }
  func.func @transform_3(%arg0: i32) -> (i32, i32, i32) {
    %c0_i32 = arith.constant 0 : i32
    %c0_i32_0 = arith.constant 0 : i32
    %c0_i32_1 = arith.constant 0 : i32
    %c0_i32_2 = arith.constant 0 : i32
    return %c0_i32, %c0_i32_0, %c0_i32_1 : i32, i32, i32
  }
  func.func @transform_4(%arg0: i32) -> (i32, i32) {
    %c0_i32 = arith.constant 0 : i32
    %c0_i32_0 = arith.constant 0 : i32
    %c0_i32_1 = arith.constant 0 : i32
    return %c0_i32, %c0_i32_0 : i32, i32
  }
  func.func @transform_5(%arg0: i32) -> (i32, i32, i32) {
    %c0_i32 = arith.constant 0 : i32
    %c0_i32_0 = arith.constant 0 : i32
    %c0_i32_1 = arith.constant 0 : i32
    %c0_i32_2 = arith.constant 0 : i32
    return %c0_i32, %c0_i32_0, %c0_i32_1 : i32, i32, i32
  }
  func.func @transform_6(%arg0: i32) -> (i32, i32) {
    %c0_i32 = arith.constant 0 : i32
    %c0_i32_0 = arith.constant 0 : i32
    %c0_i32_1 = arith.constant 0 : i32
    return %c0_i32, %c0_i32_0 : i32, i32
  }
  func.func @transform_7(%arg0: i32) -> (i32, i32, i32) {
    %c0_i32 = arith.constant 0 : i32
    %c0_i32_0 = arith.constant 0 : i32
    %c0_i32_1 = arith.constant 0 : i32
    %c0_i32_2 = arith.constant 0 : i32
    return %c0_i32, %c0_i32_0, %c0_i32_1 : i32, i32, i32
  }
  func.func @transform_8(%arg0: i32) -> (i32, i32) {
    %c0_i32 = arith.constant 0 : i32
    %c0_i32_0 = arith.constant 0 : i32
    %c0_i32_1 = arith.constant 0 : i32
    return %c0_i32, %c0_i32_0 : i32, i32
  }
  func.func @transform_9(%arg0: i32) -> (i32, i32, i32) {
    %c0_i32 = arith.constant 0 : i32
    %c0_i32_0 = arith.constant 0 : i32
    %c0_i32_1 = arith.constant 0 : i32
    %c0_i32_2 = arith.constant 0 : i32
    return %c0_i32, %c0_i32_0, %c0_i32_1 : i32, i32, i32
  }
  func.func @transform_10(%arg0: i32) -> (i32, i32) {
    %c0_i32 = arith.constant 0 : i32
    %c0_i32_0 = arith.constant 0 : i32
    %c0_i32_1 = arith.constant 0 : i32
    return %c0_i32, %c0_i32_0 : i32, i32
  }
  func.func @transform_11(%arg0: i32) -> (i32, i32, i32) {
    %c0_i32 = arith.constant 0 : i32
    %c0_i32_0 = arith.constant 0 : i32
    %c0_i32_1 = arith.constant 0 : i32
    %c0_i32_2 = arith.constant 0 : i32
    return %c0_i32, %c0_i32_0, %c0_i32_1 : i32, i32, i32
  }
  func.func @transform_12(%arg0: i32) -> (i32, i32) {
    %c0_i32 = arith.constant 0 : i32
    %c0_i32_0 = arith.constant 0 : i32
    %c0_i32_1 = arith.constant 0 : i32
    return %c0_i32, %c0_i32_0 : i32, i32
  }
  func.func @transform_13(%arg0: i32) -> (i32, i32, i32) {
    %c0_i32 = arith.constant 0 : i32
    %c0_i32_0 = arith.constant 0 : i32
    %c0_i32_1 = arith.constant 0 : i32
    %c0_i32_2 = arith.constant 0 : i32
    return %c0_i32, %c0_i32_0, %c0_i32_1 : i32, i32, i32
  }
  func.func @transform_14(%arg0: i32) -> (i32, i32) {
    %c0_i32 = arith.constant 0 : i32
    %c0_i32_0 = arith.constant 0 : i32
    %c0_i32_1 = arith.constant 0 : i32
    return %c0_i32, %c0_i32_0 : i32, i32
  }
  func.func @transform_15(%arg0: i32) -> (i32, i32, i32) {
    %c0_i32 = arith.constant 0 : i32
    %c0_i32_0 = arith.constant 0 : i32
    %c0_i32_1 = arith.constant 0 : i32
    %c0_i32_2 = arith.constant 0 : i32
    return %c0_i32, %c0_i32_0, %c0_i32_1 : i32, i32, i32
  }
  func.func @transform_16(%arg0: i32) -> (i32, i32) {
    %c0_i32 = arith.constant 0 : i32
    %c0_i32_0 = arith.constant 0 : i32
    %c0_i32_1 = arith.constant 0 : i32
    return %c0_i32, %c0_i32_0 : i32, i32
  }
  func.func @transform_17(%arg0: i32) -> (i32, i32, i32) {
    %c0_i32 = arith.constant 0 : i32
    %c0_i32_0 = arith.constant 0 : i32
    %c0_i32_1 = arith.constant 0 : i32
    %c0_i32_2 = arith.constant 0 : i32
    return %c0_i32, %c0_i32_0, %c0_i32_1 : i32, i32, i32
  }
  func.func @transform_18(%arg0: i32) -> (i32, i32) {
    %c0_i32 = arith.constant 0 : i32
    %c0_i32_0 = arith.constant 0 : i32
    %c0_i32_1 = arith.constant 0 : i32
    return %c0_i32, %c0_i32_0 : i32, i32
  }
  func.func @transform_19(%arg0: i32) -> (i32, i32, i32) {
    %c0_i32 = arith.constant 0 : i32
    %c0_i32_0 = arith.constant 0 : i32
    %c0_i32_1 = arith.constant 0 : i32
    %c0_i32_2 = arith.constant 0 : i32
    return %c0_i32, %c0_i32_0, %c0_i32_1 : i32, i32, i32
  }
  func.func @transform_20(%arg0: i32) -> (i32, i32) {
    %c0_i32 = arith.constant 0 : i32
    %c0_i32_0 = arith.constant 0 : i32
    %c0_i32_1 = arith.constant 0 : i32
    return %c0_i32, %c0_i32_0 : i32, i32
  }
  func.func @transform_21(%arg0: i32) -> (i32, i32, i32) {
    %c0_i32 = arith.constant 0 : i32
    %c0_i32_0 = arith.constant 0 : i32
    %c0_i32_1 = arith.constant 0 : i32
    %c0_i32_2 = arith.constant 0 : i32
    return %c0_i32, %c0_i32_0, %c0_i32_1 : i32, i32, i32
  }
  func.func @transform_22(%arg0: i32) -> (i32, i32) {
    %c0_i32 = arith.constant 0 : i32
    %c0_i32_0 = arith.constant 0 : i32
    %c0_i32_1 = arith.constant 0 : i32
    return %c0_i32, %c0_i32_0 : i32, i32
  }
  func.func @transform_23(%arg0: i32) -> (i32, i32, i32) {
    %c0_i32 = arith.constant 0 : i32
    %c0_i32_0 = arith.constant 0 : i32
    %c0_i32_1 = arith.constant 0 : i32
    return %arg0, %c0_i32, %c0_i32_0 : i32, i32, i32
  }
  func.func @transform_24(%arg0: i32) -> (i32, i32, i32) {
    %c0_i32 = arith.constant 0 : i32
    %c0_i32_0 = arith.constant 0 : i32
    %c0_i32_1 = arith.constant 0 : i32
    return %arg0, %c0_i32, %c0_i32_0 : i32, i32, i32
  }
}

</mosaic_0001>

<bundles_post_ra>
// kernel: vae_forward.1
= control target key start
LH: loop header
LB: loop body
LE: loop exit
PB: predicated region body
PF: predicated region fallthrough
CT: control target
= control target key end

     0   :  { %s20423_s0 = inlined_call_operand.vmem [shape: f32[2,28,28], index: 0, kind: input, shape index: {}]   ;;  %s20424_s1 = inlined_call_operand.hbm [shape: f32[2,1,16], index: 1, kind: input, shape index: {}]   ;;  %s20425_s2 = inlined_call_operand.hbm [shape: bf16[39,28], index: 2, kind: input, shape index: {}]   ;;  %s20426_s3 = inlined_call_operand.hbm [shape: bf16[3,28,416], index: 3, kind: input, shape index: {}]   ;;  %s20427_s4 = inlined_call_operand.hbm [shape: f32[1,416], index: 4, kind: input, shape index: {}]   ;;  %s20428_s5 = inlined_call_operand.hbm [shape: bf16[3,416,352], index: 5, kind: input, shape index: {}]   ;;  %s20429_s6 = inlined_call_operand.hbm [shape: f32[1,352], index: 6, kind: input, shape index: {}]   ;;  %s20430_s7 = inlined_call_operand.hbm [shape: bf16[3,352,288], index: 7, kind: input, shape index: {}]   ;;  %s20431_s8 = inlined_call_operand.hbm [shape: f32[1,288], index: 8, kind: input, shape index: {}]   ;;  %s20432_s9 = inlined_call_operand.hbm [shape: bf16[3,288,224], index: 9, kind: input, shape index: {}]   ;;  %s20433_s10 = inlined_call_operand.hbm [shape: f32[1,224], index: 10, kind: input, shape index: {}]   ;;  %s20434_s11 = inlined_call_operand.hbm [shape: bf16[7,224,32], index: 11, kind: input, shape index: {}]   ;;  %s20435_s12 = inlined_call_operand.hbm [shape: f32[1,32], index: 12, kind: input, shape index: {}]   ;;  %s20436_s13 = inlined_call_operand.hbm [shape: bf16[7,16,224], index: 13, kind: input, shape index: {}]   ;;  %s20437_s14 = inlined_call_operand.hbm [shape: f32[7,224], index: 14, kind: input, shape index: {}]   ;;  %s20438_s15 = inlined_call_operand.hbm [shape: bf16[3,224,288], index: 15, kind: input, shape index: {}]   ;;  %s20439_s16 = inlined_call_operand.hbm [shape: f32[1,288], index: 16, kind: input, shape index: {}]   ;;  %s20440_s17 = inlined_call_operand.hbm [shape: bf16[3,288,352], index: 17, kind: input, shape index: {}]   ;;  %s20441_s18 = inlined_call_operand.hbm [shape: f32[1,352], index: 18, kind: input, shape index: {}]   ;;  %s20442_s19 = inlined_call_operand.hbm [shape: bf16[3,352,416], index: 19, kind: input, shape index: {}]   ;;  %s20443_s20 = inlined_call_operand.hbm [shape: f32[1,416], index: 20, kind: input, shape index: {}]   ;;  %s20444_s21 = inlined_call_operand.hbm [shape: bf16[3,416,28], index: 21, kind: input, shape index: {}]   ;;  %s20445_s22 = inlined_call_operand.vmem [shape: f32[1,56], index: 22, kind: input, shape index: {}]   ;;  %s20446_s23 = inlined_call_operand.vmem [shape: f32[2,1,32], index: 23, kind: output, shape index: {0}]   ;;  %s20447_s24 = inlined_call_operand.vmem [shape: f32[2,14,56], index: 24, kind: output, shape index: {1}]  }
   0x1   :  { %20462 = sst [smem:[#allocation47_spill]] %s20423_s0 }
   0x2   :  { %20463 = sst [smem:[#allocation48_spill]] %s20424_s1 }
   0x3   :  { %20464 = sst [smem:[#allocation49_spill]] %s20425_s2 }
   0x4   :  { %20465 = sst [smem:[#allocation50_spill]] %s20426_s3 }
   0x5   :  { %20466 = sst [smem:[#allocation51_spill]] %s20427_s4 }
   0x6   :  { %20467 = sst [smem:[#allocation52_spill]] %s20428_s5 }
   0x7   :  { %20468 = sst [smem:[#allocation53_spill]] %s20429_s6 }
   0x8   :  { %20469 = sst [smem:[#allocation54_spill]] %s20430_s7 }
   0x9   :  { %20470 = sst [smem:[#allocation55_spill]] %s20431_s8 }
   0xa   :  { %20471 = sst [smem:[#allocation56_spill]] %s20432_s9 }
   0xb   :  { %20472 = sst [smem:[#allocation57_spill]] %s20433_s10 }
   0xc   :  { %20473 = sst [smem:[#allocation58_spill]] %s20445_s22 }
   0xd   :  { %20474 = sst [smem:[#allocation59_spill]] %s20446_s23 }
   0xe   :  { %20475 = sst [smem:[#allocation60_spill]] %s20447_s24 }
   0xf   :  { %30 = vsyncpa [#allocation3], 0 }
  0x10   :  { %32 = vsyncpa [#allocation3 + $0x1], 0 }
  0x11   :  { %33 = vsyncpa [#allocation5], 0 }
  0x12   :  { %34 = vsyncpa [#allocation8], 0 }
  0x13   :  { %35 = vsyncpa [#allocation11], 0 }
  0x14   :  { %36 = vsyncpa [#allocation14], 0 }
  0x15   :  { %37 = vsyncpa [#allocation17], 0 }
  0x16   :  { %38 = vsyncpa [#allocation20], 0 }
  0x17   :  { %39 = vsyncpa [#allocation23], 0 }
  0x18   :  { %40 = vsyncpa [#allocation26], 0 }
  0x19   :  { %41 = vsyncpa [#allocation29], 0 }
  0x1a   :  { %42 = vsyncpa [#allocation32], 0  ;;  %s19261_s5 = smov 0   ;;  %s19263_s26 = smov 0  }
  0x1b   :  { %s19265_s27 = smov 0   ;;  %s19267_s28 = smov 0  }
  0x1c LB: > { %s19102_s6 = smov [#allocation4]   ;;  %s19282_s29 = sadd.s32 4294967295, %s19100_s28   ;;  %s19100_s28 = sphi %s19267_s28, %s20535_s28   ;;  %s19096_s27 = sphi %s19265_s27, %s20534_s27   ;;  %s19092_s26 = sphi %s19263_s26, %s20533_s26   ;;  %s19088_s5 = sphi %s19261_s5, %s20532_s5  }
  0x1d   : > { %s610_s2 = sshll.u32 %s19102_s6, 4  ;;  %20476 = sst [smem:[#allocation45_spill]] %s19282_s29  ;;  %s611_s2 = int_to_ptr.vmem [resolvable:$true] %s610_s2 }
  0x1e   : > { %p14642_p0 = scmp.ge.s32.totalorder %s19100_s28, 1  ;;  %p20454_p1 = scmp.eq.s32.totalorder %s19282_s29, 0 }
  0x1f   : > { %p598_p2 = scmp.lt.s32.totalorder %s19100_s28, 3  ;;  %s19103_s7 = smov [#allocation7]  }
  0x20   : > { %s637_s30 = sshll.u32 %s19103_s7, 4  ;;  %s19104_s25 = smov [#allocation10]   ;;  %s638_s30 = int_to_ptr.vmem [resolvable:$true] %s637_s30 }
  0x21   : > { %p19287_p3 = pnand %p14642_p0, %p598_p2  ;;  %s661_s8 = sshll.u32 %s19104_s25, 4  ;;  %s19299_s8 = int_to_ptr.vmem [resolvable:$true] %s661_s8 }
  0x22   : > { %s18489_s1 = scalar_lea.vmem %s611_s2, 320  ;;  %p18497_p10 = scmp.lt.s32.totalorder %s611_s2, %s611_s2 }
  0x23   : > { %s20477_s0 = scalar_select %p19287_p3, 1, 0 }
  0x24   : > { %p16543_p4 = pneg %p19287_p3  ;;  %p18490_p7 = scmp.ne.s32.totalorder %s611_s2, %s18489_s1 }
  0x25   : > { %20478 = sst [smem:[#allocation46_spill]] %s20477_s0  ;;  %p18498_p11 = scmp.lt.s32.totalorder %s18489_s1, %s18489_s1 }
  0x26   : > { %p19295_p5 = pnand %p16543_p4, %p20454_p1 }
  0x27   : > { %p18499_p12 = por %p18498_p11, %p18497_p10 }
  0x28   : > { %p19303_p6 = pneg %p19295_p5 }
  0x2a   : > { %p18492_p8 = pnand %p18490_p7, %p19303_p6 }
  0x2c   : > { %p18493_p9 = pneg %p18492_p8 }
  0x2e   : > { %p18500_p13 = pnand %p18499_p12, %p18493_p9 }
  0x30   : > { %18503 = shalt.err (!%p18500_p13)
}
  0x31   : > { %s20452_s6 = smov 64   ;;  %s20460_s7 = smov 4  }
  0x32   : > { %s20481_s22 = sld [smem:[#allocation49_spill]]  ;;  %s18515_s23 = scalar_lea.vmem %s638_s30, 64 }
  0x33   : > { %p18516_p0 = scmp.ne.s32.totalorder %s638_s30, %s18515_s23  ;;  %p18523_p7 = scmp.lt.s32.totalorder %s638_s30, %s638_s30 }
  0x34   : > { %p18524_p8 = scmp.lt.s32.totalorder %s18515_s23, %s18515_s23 }
  0x35   : > { %p18518_p2 = pnand %p18516_p0, %p19303_p6 }
  0x36   : > { %p18525_p9 = por %p18524_p8, %p18523_p7 }
  0x37   : > { %p18519_p4 = pneg %p18518_p2 }
  0x38   : > { %16546 = dma.hbm_to_vmem [thread:$0]  (!%p19295_p5), %s20481_s22, 320, %s611_s2, [#allocation5], %s20452_s6, %s20452_s6, %s20460_s7  }
  0x39   : > { %p18526_p10 = pnand %p18525_p9, %p18519_p4 }
  0x3b   : > { %18529 = shalt.err (!%p18526_p10)
}
  0x3c   : > { %s20482_s29 = sld [smem:[#allocation51_spill]]  ;;  %s18541_s22 = scalar_lea.vmem %s19299_s8, 48 }
  0x3d   : > { %p18542_p11 = scmp.ne.s32.totalorder %s19299_s8, %s18541_s22  ;;  %s18548_s23 = scalar_lea.vmem %s19299_s8, 64 }
  0x3e   : > { %p18549_p0 = scmp.lt.s32.totalorder %s19299_s8, %s19299_s8  ;;  %p18550_p2 = scmp.lt.s32.totalorder %s18548_s23, %s18541_s22 }
  0x3f   : > { %p18544_p12 = pnand %p18542_p11, %p19303_p6 }
  0x40   : > { %p18551_p4 = por %p18550_p2, %p18549_p0 }
  0x41   : > { %p18545_p13 = pneg %p18544_p12 }
  0x42   : > { %16552 = dma.hbm_to_vmem [thread:$0]  (!%p19295_p5), %s20482_s29, 64, %s638_s30, [#allocation8]  }
  0x43   : > { %p18552_p7 = pnand %p18551_p4, %p18545_p13 }
  0x45   : > { %18555 = shalt.err (!%p18552_p7)
}
  0x46   : > { %s20483_s0 = sld [smem:[#allocation53_spill]]  ;;  %s19107_s29 = smov [#allocation13]  }
  0x47   : > { %s685_s30 = sshll.u32 %s19107_s29, 4  ;;  %s19108_s25 = smov [#allocation16]   ;;  %s686_s30 = int_to_ptr.vmem [resolvable:$true] %s685_s30 }
  0x48   : > { %s709_s1 = sshll.u32 %s19108_s25, 4  ;;  %s18567_s6 = scalar_lea.vmem %s686_s30, 48  ;;  %s710_s1 = int_to_ptr.vmem [resolvable:$true] %s709_s1 }
  0x49   : > { %p18568_p8 = scmp.ne.s32.totalorder %s686_s30, %s18567_s6  ;;  %s18574_s22 = scalar_lea.vmem %s686_s30, 64 }
  0x4a   : > { %p18575_p11 = scmp.lt.s32.totalorder %s686_s30, %s686_s30  ;;  %p18576_p12 = scmp.lt.s32.totalorder %s18574_s22, %s18567_s6 }
  0x4b   : > { %p18570_p9 = pnand %p18568_p8, %p19303_p6 }
  0x4c   : > { %16558 = dma.hbm_to_vmem [thread:$0]  (!%p19295_p5), %s20483_s0, 48, %s19299_s8, [#allocation11]  }
  0x4d   : > { %p18571_p10 = pneg %p18570_p9  ;;  %p18577_p13 = por %p18576_p12, %p18575_p11 }
  0x4f   : > { %p18578_p0 = pnand %p18577_p13, %p18571_p10 }
  0x51   : > { %18581 = shalt.err (!%p18578_p0)
}
  0x52   : > { %s20484_s24 = sld [smem:[#allocation55_spill]]  ;;  %s18593_s2 = scalar_lea.vmem %s710_s1, 32 }
  0x53   : > { %p18594_p2 = scmp.ne.s32.totalorder %s710_s1, %s18593_s2  ;;  %p18601_p8 = scmp.lt.s32.totalorder %s710_s1, %s710_s1 }
  0x54   : > { %p18602_p9 = scmp.lt.s32.totalorder %s18593_s2, %s18593_s2 }
  0x55   : > { %p18596_p4 = pnand %p18594_p2, %p19303_p6 }
  0x56   : > { %p18603_p1 = por %p18602_p9, %p18601_p8 }
  0x57   : > { %p18597_p7 = pneg %p18596_p4 }
  0x58   : > { %16564 = dma.hbm_to_vmem [thread:$0]  (!%p19295_p5), %s20484_s24, 48, %s686_s30, [#allocation14]  }
  0x59   : > { %p18604_p3 = pnand %p18603_p1, %p18597_p7 }
  0x5b   : > { %18607 = shalt.err (!%p18604_p3)
}
  0x5c   : > { %s20485_s10 = sld [smem:[#allocation57_spill]]  ;;  %s19109_s29 = smov [#allocation19]  }
  0x5d   : > { %s733_s30 = sshll.u32 %s19109_s29, 4  ;;  %s19110_s25 = smov [#allocation22]   ;;  %s734_s30 = int_to_ptr.vmem [resolvable:$true] %s733_s30 }
  0x5e   : > { %s757_s22 = sshll.u32 %s19110_s25, 4  ;;  %s18619_s23 = scalar_lea.vmem %s734_s30, 16  ;;  %s758_s22 = int_to_ptr.vmem [resolvable:$true] %s757_s22 }
  0x5f   : > { %p18620_p10 = scmp.ne.s32.totalorder %s734_s30, %s18619_s23  ;;  %s18626_s8 = scalar_lea.vmem %s734_s30, 32 }
  0x60   : > { %p18627_p1 = scmp.lt.s32.totalorder %s734_s30, %s734_s30  ;;  %p18628_p3 = scmp.lt.s32.totalorder %s18626_s8, %s18619_s23 }
  0x61   : > { %p18622_p11 = pnand %p18620_p10, %p19303_p6 }
  0x62   : > { %16570 = dma.hbm_to_vmem [thread:$0]  (!%p19295_p5), %s20485_s10, 32, %s710_s1, [#allocation17]  }
  0x63   : > { %p18623_p12 = pneg %p18622_p11  ;;  %p18629_p13 = por %p18628_p3, %p18627_p1 }
  0x65   : > { %p18630_p0 = pnand %p18629_p13, %p18623_p12 }
  0x67   : > { %18633 = shalt.err (!%p18630_p0)
}
  0x68   : > { %16576 = dma.hbm_to_vmem [thread:$0]  (!%p19295_p5), %s20435_s12, 16, %s734_s30, [#allocation20]  }
  0x69   : > { %s18645_s2 = scalar_lea.vmem %s758_s22, 256  ;;  %p18653_p8 = scmp.lt.s32.totalorder %s758_s22, %s758_s22 }
  0x6a   : > { %p18646_p2 = scmp.ne.s32.totalorder %s758_s22, %s18645_s2  ;;  %p18654_p9 = scmp.lt.s32.totalorder %s18645_s2, %s18645_s2 }
  0x6c   : > { %p18648_p4 = pnand %p18646_p2, %p19303_p6  ;;  %p18655_p10 = por %p18654_p9, %p18653_p8 }
  0x6e   : > { %p18649_p7 = pneg %p18648_p4 }
  0x70   : > { %p18656_p11 = pnand %p18655_p10, %p18649_p7 }
  0x72   : > { %18659 = shalt.err (!%p18656_p11)
}
  0x73   : > { %16582 = dma.hbm_to_vmem [thread:$0]  (!%p19295_p5), %s20437_s14, 256, %s758_s22, [#allocation23]  }
  0x74   : > { %s19111_s29 = smov [#allocation25]   ;;  %s19112_s25 = smov [#allocation28]  }
  0x75   : > { %s781_s30 = sshll.u32 %s19111_s29, 4  ;;  %s805_s23 = sshll.u32 %s19112_s25, 4  ;;  %s782_s30 = int_to_ptr.vmem [resolvable:$true] %s781_s30  ;;  %s806_s23 = int_to_ptr.vmem [resolvable:$true] %s805_s23 }
  0x76   : > { %s18671_s8 = scalar_lea.vmem %s782_s30, 48  ;;  %s18678_s24 = scalar_lea.vmem %s782_s30, 64 }
  0x77   : > { %p18672_p12 = scmp.ne.s32.totalorder %s782_s30, %s18671_s8  ;;  %p18679_p13 = scmp.lt.s32.totalorder %s782_s30, %s782_s30 }
  0x78   : > { %p18680_p0 = scmp.lt.s32.totalorder %s18678_s24, %s18671_s8 }
  0x79   : > { %p18674_p1 = pnand %p18672_p12, %p19303_p6 }
  0x7a   : > { %p18681_p2 = por %p18680_p0, %p18679_p13 }
  0x7b   : > { %p18675_p3 = pneg %p18674_p1 }
  0x7d   : > { %p18682_p4 = pnand %p18681_p2, %p18675_p3 }
  0x7f   : > { %18685 = shalt.err (!%p18682_p4)
}
  0x80   : > { %16588 = dma.hbm_to_vmem [thread:$0]  (!%p19295_p5), %s20439_s16, 48, %s782_s30, [#allocation26]  }
  0x81   : > { %s18697_s2 = scalar_lea.vmem %s806_s23, 48  ;;  %s18704_s6 = scalar_lea.vmem %s806_s23, 64 }
  0x82   : > { %p18698_p7 = scmp.ne.s32.totalorder %s806_s23, %s18697_s2  ;;  %p18705_p10 = scmp.lt.s32.totalorder %s806_s23, %s806_s23 }
  0x83   : > { %p18706_p11 = scmp.lt.s32.totalorder %s18704_s6, %s18697_s2 }
  0x84   : > { %p18700_p8 = pnand %p18698_p7, %p19303_p6 }
  0x85   : > { %p18707_p12 = por %p18706_p11, %p18705_p10 }
  0x86   : > { %p18701_p9 = pneg %p18700_p8 }
  0x88   : > { %p18708_p1 = pnand %p18707_p12, %p18701_p9 }
  0x8a   : > { %18711 = shalt.err (!%p18708_p1)
}
  0x8b   : > { %16594 = dma.hbm_to_vmem [thread:$0]  (!%p19295_p5), %s20441_s18, 48, %s806_s23, [#allocation29]  }
  0x8c   : > { %s19113_s30 = smov [#allocation31]   ;;  %s19114_s8 = smov [#allocation6]  }
  0x8d   : > { %s829_s25 = sshll.u32 %s19113_s30, 4  ;;  %s623_s24 = sshll.u32 %s19114_s8, 4  ;;  %s830_s25 = int_to_ptr.vmem [resolvable:$true] %s829_s25  ;;  %s624_s24 = int_to_ptr.vmem [resolvable:$true] %s623_s24 }
  0x8e   : > { %s18723_s1 = scalar_lea.vmem %s830_s25, 64  ;;  %p18731_p2 = scmp.lt.s32.totalorder %s830_s25, %s830_s25 }
  0x8f   : > { %p18724_p3 = scmp.ne.s32.totalorder %s830_s25, %s18723_s1  ;;  %p18732_p4 = scmp.lt.s32.totalorder %s18723_s1, %s18723_s1 }
  0x91   : > { %p18726_p13 = pnand %p18724_p3, %p19303_p6  ;;  %p18733_p7 = por %p18732_p4, %p18731_p2 }
  0x93   : > { %p18727_p0 = pneg %p18726_p13 }
  0x95   : > { %p18734_p8 = pnand %p18733_p7, %p18727_p0 }
  0x97   : > { %18737 = shalt.err (!%p18734_p8)
}
  0x98   : > { %16600 = dma.hbm_to_vmem [thread:$0]  (!%p19295_p5), %s20443_s20, 64, %s830_s25, [#allocation32]  }
  0x99   : > { %s18749_s23 = scalar_lea.vmem %s624_s24, 3072  ;;  %p18757_p12 = scmp.lt.s32.totalorder %s624_s24, %s624_s24 }
  0x9a   : > { %p18750_p9 = scmp.ne.s32.totalorder %s624_s24, %s18749_s23  ;;  %p18758_p1 = scmp.lt.s32.totalorder %s18749_s23, %s18749_s23 }
  0x9c   : > { %p18752_p10 = pnand %p18750_p9, %p19303_p6  ;;  %p18759_p3 = por %p18758_p1, %p18757_p12 }
  0x9e   : > { %p18753_p11 = pneg %p18752_p10 }
  0xa0   : > { %p18760_p13 = pnand %p18759_p3, %p18753_p11 }
  0xa2   : > { %18763 = shalt.err (!%p18760_p13)
}
  0xa3   : > { %s20456_s6 = smov 256   ;;  %s20457_s0 = smov 16  }
  0xa4   : > { %s20486_s25 = sld [smem:[#allocation50_spill]]  ;;  %s19117_s8 = smov [#allocation9]  }
  0xa5   : > { %s647_s1 = sshll.u32 %s19117_s8, 4  ;;  %s648_s1 = int_to_ptr.vmem [resolvable:$true] %s647_s1 }
  0xa6   : > { %s18775_s22 = scalar_lea.vmem %s648_s1, 29952  ;;  %p18783_p7 = scmp.lt.s32.totalorder %s648_s1, %s648_s1 }
  0xa7   : > { %p18776_p0 = scmp.ne.s32.totalorder %s648_s1, %s18775_s22  ;;  %p18784_p8 = scmp.lt.s32.totalorder %s18775_s22, %s18775_s22 }
  0xa9   : > { %p18778_p2 = pnand %p18776_p0, %p19303_p6  ;;  %p18785_p9 = por %p18784_p8, %p18783_p7 }
  0xaa   : > { %16549 = dma.hbm_to_vmem [thread:$0]  (!%p19295_p5), %s20486_s25, 3072, %s624_s24, [#allocation5], %s20456_s6, %s20456_s6, %s20457_s0  }
  0xab   : > { %p18779_p4 = pneg %p18778_p2 }
  0xad   : > { %p18786_p10 = pnand %p18785_p9, %p18779_p4 }
  0xaf   : > { %18789 = shalt.err (!%p18786_p10)
}
  0xb0   : > { %s20458_s2 = smov 192   ;;  %s19119_s23 = smov 12  }
  0xb1   : > { %s20487_s30 = sld [smem:[#allocation52_spill]]  ;;  %s19120_s25 = smov [#allocation12]  }
  0xb2   : > { %s671_s8 = sshll.u32 %s19120_s25, 4  ;;  %s19121_s6 = smov [#allocation15]   ;;  %s672_s8 = int_to_ptr.vmem [resolvable:$true] %s671_s8 }
  0xb3   : > { %s695_s0 = sshll.u32 %s19121_s6, 4  ;;  %s18801_s22 = scalar_lea.vmem %s672_s8, 25344  ;;  %s696_s0 = int_to_ptr.vmem [resolvable:$true] %s695_s0 }
  0xb4   : > { %p18802_p11 = scmp.ne.s32.totalorder %s672_s8, %s18801_s22  ;;  %p18809_p3 = scmp.lt.s32.totalorder %s672_s8, %s672_s8 }
  0xb5   : > { %p18810_p13 = scmp.lt.s32.totalorder %s18801_s22, %s18801_s22 }
  0xb6   : > { %p18804_p12 = pnand %p18802_p11, %p19303_p6 }
  0xb7   : > { %16555 = dma.hbm_to_vmem [thread:$0]  (!%p19295_p5), %s20487_s30, 29952, %s648_s1, [#allocation8], %s20458_s2, %s20458_s2, %s19119_s23  }
  0xb8   : > { %p18805_p1 = pneg %p18804_p12  ;;  %p18811_p0 = por %p18810_p13, %p18809_p3 }
  0xba   : > { %p18812_p2 = pnand %p18811_p0, %p18805_p1 }
  0xbc   : > { %18815 = shalt.err (!%p18812_p2)
}
  0xbd   : > { %s20488_s6 = sld [smem:[#allocation54_spill]]  ;;  %s18827_s29 = scalar_lea.vmem %s696_s0, 13824 }
  0xbe   : > { %p18828_p4 = scmp.ne.s32.totalorder %s696_s0, %s18827_s29  ;;  %p18835_p9 = scmp.lt.s32.totalorder %s696_s0, %s696_s0 }
  0xbf   : > { %p18836_p10 = scmp.lt.s32.totalorder %s18827_s29, %s18827_s29 }
  0xc0   : > { %p18830_p7 = pnand %p18828_p4, %p19303_p6 }
  0xc1   : > { %p18837_p11 = por %p18836_p10, %p18835_p9 }
  0xc2   : > { %p18831_p8 = pneg %p18830_p7 }
  0xc3   : > { %16561 = dma.hbm_to_vmem [thread:$0]  (!%p19295_p5), %s20488_s6, 25344, %s672_s8, [#allocation11], %s20458_s2, %s20458_s2, %s19119_s23  }
  0xc4   : > { %p18838_p12 = pnand %p18837_p11, %p18831_p8 }
  0xc6   : > { %18841 = shalt.err (!%p18838_p12)
}
  0xc7   : > { %s19122_s30 = smov 128   ;;  %s19123_s25 = smov 8  }
  0xc8   : > { %s20489_s9 = sld [smem:[#allocation56_spill]]  ;;  %s19124_s1 = smov [#allocation18]  }
  0xc9   : > { %s719_s24 = sshll.u32 %s19124_s1, 4  ;;  %s19125_s6 = smov [#allocation21]   ;;  %s720_s24 = int_to_ptr.vmem [resolvable:$true] %s719_s24 }
  0xca   : > { %s743_s2 = sshll.u32 %s19125_s6, 4  ;;  %s18853_s29 = scalar_lea.vmem %s720_s24, 12544  ;;  %s744_s2 = int_to_ptr.vmem [resolvable:$true] %s743_s2 }
  0xcb   : > { %p18854_p1 = scmp.ne.s32.totalorder %s720_s24, %s18853_s29  ;;  %p18861_p0 = scmp.lt.s32.totalorder %s720_s24, %s720_s24 }
  0xcc   : > { %p18862_p2 = scmp.lt.s32.totalorder %s18853_s29, %s18853_s29 }
  0xcd   : > { %p18856_p3 = pnand %p18854_p1, %p19303_p6 }
  0xce   : > { %16567 = dma.hbm_to_vmem [thread:$0]  (!%p19295_p5), %s20489_s9, 13824, %s696_s0, [#allocation14], %s19122_s30, %s19122_s30, %s19123_s25  }
  0xcf   : > { %p18857_p13 = pneg %p18856_p3  ;;  %p18863_p4 = por %p18862_p2, %p18861_p0 }
  0xd1   : > { %p18864_p7 = pnand %p18863_p4, %p18857_p13 }
  0xd3   : > { %18867 = shalt.err (!%p18864_p7)
}
  0xd4   : > { %s20490_s0 = smov 64   ;;  %s18879_s1 = scalar_lea.vmem %s744_s2, 1792 }
  0xd5   : > { %16573 = dma.hbm_to_vmem [thread:$0]  (!%p19295_p5), %s20434_s11, 12544, %s720_s24, [#allocation17], %s20490_s0, %s20490_s0, %s20460_s7  }
  0xd6   : > { %p18880_p8 = scmp.ne.s32.totalorder %s744_s2, %s18879_s1  ;;  %p18887_p11 = scmp.lt.s32.totalorder %s744_s2, %s744_s2 }
  0xd7   : > { %p18888_p12 = scmp.lt.s32.totalorder %s18879_s1, %s18879_s1 }
  0xd8   : > { %p18882_p9 = pnand %p18880_p8, %p19303_p6 }
  0xd9   : > { %p18889_p1 = por %p18888_p12, %p18887_p11 }
  0xda   : > { %p18883_p10 = pneg %p18882_p9 }
  0xdc   : > { %p18890_p3 = pnand %p18889_p1, %p18883_p10 }
  0xde   : > { %18893 = shalt.err (!%p18890_p3)
}
  0xdf   : > { %16579 = dma.hbm_to_vmem [thread:$0]  (!%p19295_p5), %s20436_s13, 1792, %s744_s2, [#allocation20], %s19122_s30, %s19122_s30, %s19123_s25  }
  0xe0   : > { %s19126_s24 = smov [#allocation24]   ;;  %s19127_s8 = smov [#allocation27]  }
  0xe1   : > { %s767_s22 = sshll.u32 %s19126_s24, 4  ;;  %s791_s7 = sshll.u32 %s19127_s8, 4  ;;  %s768_s22 = int_to_ptr.vmem [resolvable:$true] %s767_s22  ;;  %s792_s7 = int_to_ptr.vmem [resolvable:$true] %s791_s7 }
  0xe2   : > { %s18905_s1 = scalar_lea.vmem %s768_s22, 16128  ;;  %p18913_p4 = scmp.lt.s32.totalorder %s768_s22, %s768_s22 }
  0xe3   : > { %p18906_p13 = scmp.ne.s32.totalorder %s768_s22, %s18905_s1  ;;  %p18914_p7 = scmp.lt.s32.totalorder %s18905_s1, %s18905_s1 }
  0xe5   : > { %p18908_p0 = pnand %p18906_p13, %p19303_p6  ;;  %p18915_p8 = por %p18914_p7, %p18913_p4 }
  0xe7   : > { %p18909_p2 = pneg %p18908_p0 }
  0xe9   : > { %p18916_p9 = pnand %p18915_p8, %p18909_p2 }
  0xeb   : > { %18919 = shalt.err (!%p18916_p9)
}
  0xec   : > { %s20491_s2 = smov 192   ;;  %s18931_s6 = scalar_lea.vmem %s792_s7, 20736 }
  0xed   : > { %16585 = dma.hbm_to_vmem [thread:$0]  (!%p19295_p5), %s20438_s15, 16128, %s768_s22, [#allocation23], %s20491_s2, %s20491_s2, %s19119_s23  }
  0xee   : > { %p18932_p10 = scmp.ne.s32.totalorder %s792_s7, %s18931_s6  ;;  %p18939_p1 = scmp.lt.s32.totalorder %s792_s7, %s792_s7 }
  0xef   : > { %p18940_p3 = scmp.lt.s32.totalorder %s18931_s6, %s18931_s6 }
  0xf0   : > { %p18934_p11 = pnand %p18932_p10, %p19303_p6 }
  0xf1   : > { %p18941_p13 = por %p18940_p3, %p18939_p1 }
  0xf2   : > { %p18935_p12 = pneg %p18934_p11 }
  0xf4   : > { %p18942_p0 = pnand %p18941_p13, %p18935_p12 }
  0xf6   : > { %18945 = shalt.err (!%p18942_p0)
}
  0xf7   : > { %16591 = dma.hbm_to_vmem [thread:$0]  (!%p19295_p5), %s20440_s17, 20736, %s792_s7, [#allocation26], %s20491_s2, %s20491_s2, %s19119_s23  }
  0xf8   : > { %s19128_s22 = smov [#allocation30]   ;;  %s19129_s1 = smov [#allocation33]  }
  0xf9   : > { %s815_s8 = sshll.u32 %s19128_s22, 4  ;;  %s839_s30 = sshll.u32 %s19129_s1, 4  ;;  %s816_s8 = int_to_ptr.vmem [resolvable:$true] %s815_s8  ;;  %s840_s30 = int_to_ptr.vmem [resolvable:$true] %s839_s30 }
  0xfa   : > { %s18957_s25 = scalar_lea.vmem %s816_s8, 33792  ;;  %p18965_p8 = scmp.lt.s32.totalorder %s816_s8, %s816_s8 }
  0xfb   : > { %p18958_p2 = scmp.ne.s32.totalorder %s816_s8, %s18957_s25  ;;  %p18966_p9 = scmp.lt.s32.totalorder %s18957_s25, %s18957_s25 }
  0xfd   : > { %p18960_p4 = pnand %p18958_p2, %p19303_p6  ;;  %p18967_p10 = por %p18966_p9, %p18965_p8 }
  0xff   : > { %p18961_p7 = pneg %p18960_p4 }
 0x101   : > { %p18968_p11 = pnand %p18967_p10, %p18961_p7 }
 0x103   : > { %18971 = shalt.err (!%p18968_p11)
}
 0x104   : > { %s20492_s6 = smov 16   ;;  %s20493_s7 = smov 256  }
 0x105   : > { %16597 = dma.hbm_to_vmem [thread:$0]  (!%p19295_p5), %s20442_s19, 33792, %s816_s8, [#allocation29], %s20493_s7, %s20493_s7, %s20492_s6  }
 0x106   : > { %s18983_s29 = scalar_lea.vmem %s840_s30, 9984  ;;  %p18991_p13 = scmp.lt.s32.totalorder %s840_s30, %s840_s30 }
 0x107   : > { %p18984_p12 = scmp.ne.s32.totalorder %s840_s30, %s18983_s29  ;;  %p18992_p0 = scmp.lt.s32.totalorder %s18983_s29, %s18983_s29 }
 0x109   : > { %p18986_p1 = pnand %p18984_p12, %p19303_p6  ;;  %p18993_p2 = por %p18992_p0, %p18991_p13 }
 0x10b   : > { %p18987_p3 = pneg %p18986_p1 }
 0x10d   : > { %p18994_p4 = pnand %p18993_p2, %p18987_p3 }
 0x10f   : > { %18997 = shalt.err (!%p18994_p4)
}
 0x110   : > { %s20494_s24 = smov 4   ;;  %s20495_s4 = sld [smem:[#allocation45_spill]] }
 0x111   : > { %16603 = dma.hbm_to_vmem [thread:$0]  (!%p19295_p5), %s20444_s21, 9984, %s840_s30, [#allocation32], %s20490_s0, %s20490_s0, %s20494_s24  }
 0x112   : > { %s19487_s3 = sadd.s32 1, %s19100_s28   ;;  %s81_s8 = sadd.s32 1, %s19096_s27 }
 0x113   : > { %s78_s25 = ssub.s32 %s19100_s28, %s19487_s3  ;;  %p88_p6 = scmp.ne.s32.totalorder %s19096_s27, %s19092_s26 }
 0x114   : > { %p79_p7 = scmp.eq.s32.totalorder %s78_s25, 0  ;;  %p89_p8 = scmp.eq.s32.totalorder %s19100_s28, 0 }
 0x115   : > { %p94_p9 = scmp.ne.s32.totalorder %s19092_s26, %s19088_s5  ;;  %p16628_p10 = scmp.lt.s32.totalorder %s19100_s28, 2 }
 0x116   : > { %s19499_s6 = scalar_select %p79_p7, %s19096_s27, %s81_s8  }
 0x117   : > { %p90_p11 = por %p89_p8, %p88_p6  ;;  %p20496_p12 = scmp.eq.s32.totalorder %s20495_s4, 0 }
 0x118   : > { %s864_s23 = sand.u32 1, %s19096_s27   ;;  %s14664_s0 = sshll.u32 %s19100_s28, 4 }
 0x119   : > { %p19503_p1 = por %p20496_p12, %p94_p9  ;;  %s20498_s29 = sld [smem:[#allocation48_spill]] }
 0x11a   : > { %s867_s5 = scalar_lea.vmem [#allocation2], %s864_s23  ;;  %p19514_p5 = pnand %p16628_p10, %p90_p11 }
 0x11b   : > { %s20497_s7 = scalar_select %p19503_p1, 1, 0 }
 0x11c   : > { %s874_s22 = sshll.u32 %s867_s5, 4  ;;  %s865_s4 = scalar_lea.sflag [#allocation3], %s864_s23  ;;  %s875_s22 = int_to_ptr.vmem [resolvable:$true] %s874_s22 }
 0x11d   : > { %p19000_p13 = pneg %p19514_p5 }
 0x11f   : > { %s19512_s24 = scalar_lea.hbm %s20498_s29, %s14664_s0  ;;  %s19003_s0 = scalar_lea.hbm %s20498_s29, 32 }
 0x120   : > { %s18998_s8 = scalar_lea.hbm %s19512_s24, 16  ;;  %p19004_p4 = scmp.lt.s32.totalorder %s19512_s24, %s20498_s29 }
 0x121   : > { %p18999_p3 = scmp.ne.s32.totalorder %s19512_s24, %s18998_s8  ;;  %p19005_p6 = scmp.lt.s32.totalorder %s19003_s0, %s18998_s8 }
 0x123   : > { %p19001_p0 = pnand %p19000_p13, %p18999_p3  ;;  %p19006_p7 = por %p19005_p6, %p19004_p4 }
 0x125   : > { %p19002_p2 = pneg %p19001_p0 }
 0x127   : > { %p19007_p8 = pnand %p19006_p7, %p19002_p2 }
 0x129   : > { %19010 = shalt.err (!%p19007_p8)
}
 0x12a   : > { %s19011_s5 = scalar_lea.vmem %s875_s22, 16  ;;  %s19130_s23 = smov [#allocation2]  }
 0x12b   : > { %p19012_p9 = scmp.ne.s32.totalorder %s875_s22, %s19011_s5  ;;  %s19016_s9 = sshll.u32 %s19130_s23, 4  ;;  %s19017_s9 = int_to_ptr.vmem [resolvable:$false] %s19016_s9 }
 0x12c   : > { %s19018_s10 = scalar_lea.vmem %s19017_s9, 32  ;;  %p19019_p12 = scmp.lt.s32.totalorder %s875_s22, %s19017_s9 }
 0x12d   : > { %p19014_p10 = pnand %p19012_p9, %p19000_p13  ;;  %p19020_p3 = scmp.lt.s32.totalorder %s19018_s10, %s19011_s5 }
 0x12f   : > { %p19015_p11 = pneg %p19014_p10  ;;  %p19021_p0 = por %p19020_p3, %p19019_p12 }
 0x131   : > { %p19022_p1 = pnand %p19021_p0, %p19015_p11 }
 0x133   : > { %19025 = shalt.err (!%p19022_p1)
}
 0x134   : > { %16607 = dma.hbm_to_vmem [thread:$0]  (!%p19514_p5), %s19512_s24, 16, %s875_s22, %s865_s4  }
 0x135   : > { %s20500_s8 = sld [smem:[#allocation46_spill]] }
 0x13b   : > { %p20501_p2 = scmp.ne.s32.totalorder %s20500_s8, 0 }
 0x13c   : > { %s885_s28 = sand.u32 (!%p20501_p2), 1, %s19092_s26   ;;  %p20502_p13 = scmp.ne.s32.totalorder (!%p20501_p2), %s20497_s7, 0 }
 0x13d   : > { %883 = sbr.rel (%p20501_p2) target bundleno = 4259 (0x10a3), region = 112  ;;  %s886_s25 = scalar_lea.sflag (!%p20501_p2), [#allocation3], %s885_s28 }
 0x13e   : > { %s19535_s0 = scalar_lea.vmem (!%p20501_p2), [#allocation2], %s885_s28 }
 0x142   : > { %19043 = dma.done.wait (%p20502_p13), %s886_s25, 16  }
 0x143   : > { %19045 = vsyncadd (%p20502_p13), %s886_s25, 4294967280  ;;  %s20503_s9 = sld [smem:[#allocation45_spill]] }
 0x149   : > { %p20504_p1 = scmp.eq.s32.totalorder %s20503_s9, 0 }
 0x14b   : > { %19047 = dma.done.wait (%p20504_p1), [#allocation5], 3392   ;;  %p20505_p4 = pmov %p20504_p1 }
 0x14c   : > { %p20506_p5 = pmov %p20504_p1 }
 0x14d   : > { %19049 = vsyncadd (%p20505_p4), [#allocation5], 4294963904 }
 0x14e   : > { %19051 = dma.done.wait (%p20506_p5), [#allocation8], 30016   ;;  %p20507_p6 = pmov %p20504_p1 }
 0x14f   : > { %p20508_p7 = pmov %p20504_p1 }
 0x150   : > { %19053 = vsyncadd (%p20507_p6), [#allocation8], 4294937280 }
 0x151   : > { %19055 = dma.done.wait (%p20508_p7), [#allocation11], 25392   ;;  %p20509_p8 = pmov %p20504_p1 }
 0x152   : > { %p20510_p9 = pmov %p20504_p1 }
 0x153   : > { %19057 = vsyncadd (%p20509_p8), [#allocation11], 4294941904 }
 0x154   : > { %19059 = dma.done.wait (%p20510_p9), [#allocation14], 13872   ;;  %p20511_p10 = pmov %p20504_p1 }
 0x155   : > { %p20512_p11 = pmov %p20504_p1 }
 0x156   : > { %19061 = vsyncadd (%p20511_p10), [#allocation14], 4294953424 }
 0x157   : > { %19063 = dma.done.wait (%p20512_p11), [#allocation17], 12576   ;;  %p20513_p12 = pmov %p20504_p1 }
 0x158   : > { %p20514_p3 = pmov %p20504_p1 }
 0x159   : > { %19065 = vsyncadd (%p20513_p12), [#allocation17], 4294954720 }
 0x15a   : > { %19067 = dma.done.wait (%p20514_p3), [#allocation20], 1808   ;;  %p20515_p0 = pmov %p20504_p1 }
 0x15c   : > { %19069 = vsyncadd (%p20515_p0), [#allocation20], 4294965488  ;;  %p20516_p2 = pmov %p20515_p0 }
 0x15d   : > { %p20517_p13 = pmov %p20515_p0 }
 0x15e   : > { %19071 = dma.done.wait (%p20516_p2), [#allocation23], 16384  }
 0x15f   : > { %19073 = vsyncadd (%p20517_p13), [#allocation23], 4294950912  ;;  %p20518_p1 = pmov %p20515_p0 }
 0x160   : > { %p20519_p4 = pmov %p20515_p0 }
 0x161   : > { %19075 = dma.done.wait (%p20518_p1), [#allocation26], 20784  }
 0x162   : > { %19077 = vsyncadd (%p20519_p4), [#allocation26], 4294946512  ;;  %p20520_p5 = pmov %p20515_p0 }
 0x163   : > { %p20521_p6 = pmov %p20515_p0 }
 0x164   : > { %19079 = dma.done.wait (%p20520_p5), [#allocation29], 33840  }
 0x165   : > { %19081 = vsyncadd (%p20521_p6), [#allocation29], 4294933456  ;;  %p20522_p7 = pmov %p20515_p0 }
 0x166   : > { %p20523_p8 = pmov %p20515_p0 }
 0x167   : > { %19083 = dma.done.wait (%p20522_p7), [#allocation32], 10048  }
 0x168   : > { %19085 = vsyncadd (%p20523_p8), [#allocation32], 4294957248  ;;  %p1040_p9 = scmp.lt.s32.totalorder %s20503_s9, 1  ;;  %v19131_v0 = vmov 0.0   ;;  %vm19132_vm0 = vmmov 0   ;;  %s20524_s22 = sld [smem:[#allocation47_spill]] }
 0x169   : > { %16373 = vmatprep.subr.bf16.mxu1 %v19131_v0  ;;  %16377 = vmatprep.mubr.msk.bf16.mxu1 %vm19132_vm0, %v19131_v0  ;;  %vm1088_vm1 = vcmask 1045504   ;;  %v16717_v8 = vld [vmem:[#allocation6 + $0x64] ss:$16 sps:$4 sm:$0x3f]   ;;  %v16714_v9 = vld [vmem:[#allocation4] sm:$0xff]   ;;  %vm1078_vm2 = vcmask 228352  }
 0x16a   : > { %s20537_s9 = smov (!%p1040_p9, %s20503_s9), 1  ;;  %v16719_v10 = vld [vmem:[#allocation6 + $0x60] ss:$16 sps:$4 sm:$0x3f]   ;;  %v16715_v13 = vld [vmem:[#allocation4 + $0x8] sm:$0xff]   ;;  %v19133_v19 = vmov 0  }
 0x16b   : > { %s16072_s10 = sshll.u32 %s20537_s9, 5  ;;  %v16720_v11 = vld [vmem:[#allocation6 + $0x2c] ss:$16 sps:$4 sm:$0x3f]   ;;  %v1226_v12 = vsel %vm1088_vm1, %v16719_v10, 0  ;;  %1448 = vmatprep.mubr.bf16.mxu0 %v19133_v19  ;;  %vm1470_vm3 = vcmask 1042432  }
 0x16c   : > { %14718 = vmatprep.subr.msk.bf16.mxu0 %vm1088_vm1, %v16720_v11  ;;  %v16716_v14 = vld [vmem:[#allocation4 + $0x10] ss:$0 sps:$4 sm:$0xff]   ;;  %v16722_v15 = vld [vmem:[#allocation6 + $0x28] ss:$16 sps:$4 sm:$0x3f]   ;;  %vm2317_vm5 = vcmask 261120  }
 0x16d   : > { %v1368_v16 = vsel %vm1088_vm1, %v16722_v15, 0  ;;  %v16723_v17 = vld [vmem:[#allocation6 + $0xc] ss:$16 sps:$4 sm:$0xff]   ;;  %v16725_v18 = vld [vmem:[#allocation6 + $0x8] ss:$16 sps:$4 sm:$0xff]   ;;  %vm4368_vm6 = vcmask 785408  }
 0x16e   : > { %s1044_s1 = scalar_lea.vmem %s20524_s22, %s16072_s10  ;;  %1429 = vmatpush1.bf16.msra.mxu0 %v1368_v16  ;;  %v16726_v20 = vld [vmem:[#allocation6 + $0x40] ss:$16 sps:$4 sm:$0xff]   ;;  %v16728_v21 = vld [vmem:[#allocation6 + $0x44] ss:$16 sps:$4 sm:$0xff]   ;;  %v16734_v28 = vld [vmem:[#allocation6 + $0x8c] ss:$16 sps:$4 sm:$0xff]  }
 0x16f   : > { %v1056_v1 = vld [vmem:[%s1044_s1 + $0x10] sm:$0xff]  ;;  %v1057_v2 = vld [vmem:[%s1044_s1 + $0x18] sm:$0xf]  ;;  %v1054_v3 = vld [vmem:[%s1044_s1] sm:$0xff]  ;;  %1430 = vmatprep.subr.bf16.mxu0 %v16723_v17  ;;  %vm1168_vm4 = vsmask.f32 1280 }
 0x170   : > { %v1059_v4 = vpack.c.bf16 %v1057_v2, %v1056_v1  ;;  %v1055_v5 = vld [vmem:[%s1044_s1 + $0x8] sm:$0xff]  ;;  %v16729_v22 = vld [vmem:[#allocation6 + $0xac] ss:$16 sps:$4 sm:$0x3f]   ;;  %s20525_s2 = sld [smem:[#allocation59_spill]]  ;;  %vm7797_vm7 = vcmask 253952  }
 0x171   : > { %v1058_v7 = vpack.c.bf16 %v1055_v5, %v1054_v3  ;;  %v16735_v23 = vld [vmem:[#allocation6 + $0x6c] ss:$16 sps:$4 sm:$0x3f]   ;;  %v16731_v24 = vld [vmem:[#allocation6 + $0xa8] ss:$16 sps:$4 sm:$0x3f]  }
 0x172   : > { %v1090_v6 = vsel %vm1088_vm1, %v1059_v4, 0  ;;  %1431 = vmatpush1.bf16.msra.mxu0 %v16725_v18  ;;  %v1520_v25 = vsel %vm1088_vm1, %v16731_v24, 0  ;;  %v16732_v32 = vld [vmem:[#allocation6 + $0x88] ss:$16 sps:$4 sm:$0xff]   ;;  %v16740_v50 = vld [vmem:[#allocation6 + $0x4c] ss:$16 sps:$4 sm:$0xff]  }
 0x173   : > { %16374 = vmatpush3.bf16.msra.mxu1 %v1090_v6  ;;  %14730 = vmatprep.subr.msk.bf16.mxu0 %vm1088_vm1, %v16729_v22  ;;  %v16737_v41 = vld [vmem:[#allocation6 + $0x68] ss:$16 sps:$4 sm:$0x3f]   ;;  %v16741_v61 = vld [vmem:[#allocation6 + $0x24] ss:$16 sps:$4 sm:$0x3f]  }
 0x174   : > { %16375 = vmatprep.subr.bf16.mxu1 %v19131_v0  ;;  %v1232_v55 = vsel %vm1088_vm1, %v16737_v41, 0  ;;  %v16738_v59 = vld [vmem:[#allocation6 + $0x48] ss:$16 sps:$4 sm:$0xff]   ;;  %v16743_v62 = vld [vmem:[#allocation6 + $0x20] ss:$16 sps:$4 sm:$0x3f]  }
 0x175   : > { %v16746_v63 = vld [vmem:[#allocation6 + $0x4] ss:$16 sps:$4 sm:$0xff]   ;;  %v1362_v1 = vsel %vm1088_vm1, %v16743_v62, 0  ;;  %v16744_v2 = vld [vmem:[#allocation6] ss:$16 sps:$4 sm:$0xff]   ;;  %s19134_s23 = smov 112  }
 0x176   : > { %v16747_v3 = vld [vmem:[#allocation6 + $0xa4] ss:$16 sps:$4 sm:$0x3f]   ;;  %v16749_v4 = vld [vmem:[#allocation6 + $0xa0] ss:$16 sps:$4 sm:$0x3f]   ;;  %s1047_s5 = scalar_lea.vmem %s20525_s2, %s20537_s9 }
 0x177   : > { %16376 = vmatpush3.bf16.msra.mxu1 %v1058_v7  ;;  %v16752_v5 = vld [vmem:[#allocation6 + $0x84] ss:$16 sps:$4 sm:$0xff]   ;;  %v1514_v6 = vsel %vm1088_vm1, %v16749_v4, 0  ;;  %v16750_v7 = vld [vmem:[#allocation6 + $0x80] ss:$16 sps:$4 sm:$0xff]   ;;  %vm7824_vm8 = vcmask 130048  }
 0x178   : > { %14704 = vmatprep.subr.msk.bf16.mxu1 %vm1088_vm1, %v16717_v8  ;;  %v16755_v8 = vld [vmem:[#allocation9 + $0x31c] ss:$12 sps:$4 sm:$0xff]   ;;  %v16758_v10 = vld [vmem:[#allocation9 + $0x304] ss:$12 sps:$4 sm:$0xff]   ;;  %v16756_v11 = vld [vmem:[#allocation9 + $0x300] ss:$12 sps:$4 sm:$0xff]  }
 0x179   : > { %v16762_v15 = vld [vmem:[#allocation9 + $0x498] ss:$12 sps:$4 sm:$0xff]   ;;  %v16765_v16 = vld [vmem:[#allocation9 + $0x2d0] ss:$12 sps:$4 sm:$0xff]   ;;  %v16767_v17 = vld [vmem:[#allocation9 + $0x2d4] ss:$12 sps:$4 sm:$0xff]  }
 0x17a   : > { %16378 = vmatmul.mubr.msk.bf16.vlgmr.msra.gmra.mxu1 %vm1078_vm2, %v16714_v9  ;;  %v16753_v9 = vld [vmem:[#allocation9 + $0x318] ss:$12 sps:$4 sm:$0xff]   ;;  %v16768_v18 = vld [vmem:[#allocation9 + $0x480] ss:$12 sps:$4 sm:$0xff]   ;;  %v16774_v24 = vld [vmem:[#allocation9 + $0x468] ss:$12 sps:$4 sm:$0xff]  }
 0x17b   : > { %16381 = vmatprep.mubr.msk.bf16.mxu1 %vm19132_vm0, %v19131_v0  ;;  %1250 = vmatpush1.bf16.msra.mxu1 %v1226_v12  ;;  %v16761_v12 = vld [vmem:[#allocation9 + $0x2ec] ss:$12 sps:$4 sm:$0xff]   ;;  %v16803_v41 = vld [vmem:[#allocation9 + $0x3c4] ss:$12 sps:$4 sm:$0xff]   ;;  %vm8269_vm9 = vcmask 1040384   ;;  %vm8272_vm10 = vcmask 1041408  }
 0x17c   : > { %1251 = vmatprep.subr.bf16.mxu1 %v16728_v21  ;;  %v16773_v21 = vld [vmem:[#allocation9 + $0x2bc] ss:$12 sps:$4 sm:$0xff]   ;;  %v16771_v22 = vld [vmem:[#allocation9 + $0x2b8] ss:$12 sps:$4 sm:$0xff]   ;;  %vm8278_vm11 = vcmask 1043456   ;;  %vm8281_vm12 = vcmask 1044480  }
 0x17d   : > { %vm8300_vm13 = vsmask.f32 4352  ;;  %vm9480_vm15 = vsmask.f32 5376  ;;  %s19135_s8 = smov 28   ;;  %s16073_s10 = sshll.u32 %s20537_s9, 4 }
 0x17e   : > { %vm8301_vm14 = vmand %vm8281_vm12, %vm8300_vm13  ;;  %s20531_s22 = sld [smem:[#allocation60_spill]] }
 0x17f   : > { %1252 = vmatpush1.bf16.msra.mxu1 %v16726_v20  ;;  %v16770_v20 = vld [vmem:[#allocation9 + $0x484] ss:$12 sps:$4 sm:$0xff]  }
 0x180   : > { %14706 = vmatprep.subr.msk.bf16.mxu1 %vm1088_vm1, %v16735_v23  ;;  %v16776_v23 = vld [vmem:[#allocation9 + $0x46c] ss:$12 sps:$4 sm:$0xff]  }
 0x182   : > { %16382 = vmatmul.mubr.msk.bf16.gmra.mxu1 %vm1078_vm2, %v16715_v13  ;;  %v16759_v13 = vld [vmem:[#allocation9 + $0x2e8] ss:$12 sps:$4 sm:$0xff]  }
 0x183   : > { %16385 = vmatprep.mubr.msk.bf16.mxu1 %vm19132_vm0, %v19131_v0 }
 0x184   : > { %s1052_s1 = scalar_lea.vmem %s20531_s22, %s16073_s10 }
 0x18a   : > { %16386 = vmatmul.mubr.msk.bf16.gmra.mxu1 %vm1078_vm2, %v16716_v14  ;;  %v16764_v14 = vld [vmem:[#allocation9 + $0x49c] ss:$12 sps:$4 sm:$0xff]  }
 0x18b   : > { %1269 = vmatprep.mubr.bf16.mxu1 %v19133_v19 }
 0x23a   : > { %v1126_v26 = vpop.f32.mrf.mxu1 }
 0x23c   : > { %v16379_v27 = vpop.f32.mrf.mxu1 }
 0x23d   : > { %v16782_v27 = vld [vmem:[#allocation9 + $0x454] ss:$12 sps:$4 sm:$0xff]  }
 0x23e   : > { %v1129_v29 = vpop.f32.mrf.mxu1 }
 0x23f   : > { %v1148_v30 = vpack.c.bf16 %v1129_v29, %v1126_v26  ;;  %v16777_v26 = vld [vmem:[#allocation9 + $0x2a0] ss:$12 sps:$4 sm:$0xff]  }
 0x240   : > { %v16380_v31 = vpop.f32.mrf.mxu1  ;;  %v16785_v29 = vld [vmem:[#allocation9 + $0x28c] ss:$12 sps:$4 sm:$0xff]  }
 0x241   : > { %14719 = vmatmul.mubr.msk.bf16.vlgmr.msra.gmra.mxu0 %vm1078_vm2, %v1148_v30  ;;  %v1170_v34 = vshrl.u32 %v1148_v30, 16  ;;  %v1173_v36 = vshll.u32 %v1148_v30, 16  ;;  %v16788_v31 = vld [vmem:[#allocation9 + $0x43c] ss:$12 sps:$4 sm:$0xff]  }
 0x242   : > { %v1134_v33 = vpop.f32.mrf.mxu1  ;;  %1581 = vmatpush1.bf16.msra.mxu0 %v1520_v25  ;;  %1600 = vmatprep.mubr.bf16.mxu0 %v19133_v19  ;;  %v16779_v25 = vld [vmem:[#allocation9 + $0x2a4] ss:$12 sps:$4 sm:$0xff]  }
 0x243   : > { %1582 = vmatprep.subr.bf16.mxu0 %v16734_v28  ;;  %v1172_v39 = vrot.slane %v1170_v34, 6  ;;  %v1175_v42 = vrot.slane %v1173_v36, 7  ;;  %v16780_v28 = vld [vmem:[#allocation9 + $0x450] ss:$12 sps:$4 sm:$0xff]   ;;  %v16792_v36 = vld [vmem:[#allocation9 + $0x420] ss:$12 sps:$4 sm:$0xff]  }
 0x244   : > { %v16383_v35 = vpop.f32.mrf.mxu1  ;;  %v16789_v34 = vld [vmem:[#allocation9 + $0x270] ss:$12 sps:$4 sm:$0xff]  }
 0x245   : > { %v1176_v51 = vor.u32 %v1175_v42, %v1172_v39  ;;  %v16794_v35 = vld [vmem:[#allocation9 + $0x424] ss:$12 sps:$4 sm:$0xff]   ;;  %v16800_v39 = vld [vmem:[#allocation9 + $0x40c] ss:$12 sps:$4 sm:$0xff]  }
 0x246   : > { %v1137_v37 = vpop.f32.mrf.mxu1  ;;  %1583 = vmatpush1.bf16.msra.mxu0 %v16732_v32  ;;  %v16786_v32 = vld [vmem:[#allocation9 + $0x438] ss:$12 sps:$4 sm:$0xff]   ;;  %v16801_v42 = vld [vmem:[#allocation9 + $0x3c0] ss:$12 sps:$4 sm:$0xff]  }
 0x247   : > { %v1149_v38 = vpack.c.bf16 %v1137_v37, %v1134_v33  ;;  %2364 = vmatprep.subr.bf16.mxu0 %v16764_v14  ;;  %v16791_v33 = vld [vmem:[#allocation9 + $0x274] ss:$12 sps:$4 sm:$0xff]   ;;  %v16797_v37 = vld [vmem:[#allocation9 + $0x3dc] ss:$12 sps:$4 sm:$0xff]  }
 0x248   : > { %v16384_v40 = vpop.f32.mrf.mxu1 }
 0x249   : > { %v1178_v43 = vshrl.u32 %v1149_v38, 16  ;;  %v1181_v44 = vshll.u32 %v1149_v38, 16  ;;  %v1471_v53 = vrot.slane %v1149_v38, 5  ;;  %v16795_v38 = vld [vmem:[#allocation9 + $0x3d8] ss:$12 sps:$4 sm:$0xff]  }
 0x24a   : > { %v1142_v45 = vpop.f32.mrf.mxu1  ;;  %v16798_v40 = vld [vmem:[#allocation9 + $0x408] ss:$12 sps:$4 sm:$0xff]  }
 0x24b   : > { %v1180_v46 = vrot.slane %v1178_v43, 6  ;;  %v1183_v47 = vrot.slane %v1181_v44, 7  ;;  %v1150_v48 = vpack.c.bf16 %v1142_v45, %v1142_v45  ;;  %v16806_v43 = vld [vmem:[#allocation9 + $0x3f4] ss:$12 sps:$4 sm:$0xff]   ;;  %v16804_v44 = vld [vmem:[#allocation9 + $0x3f0] ss:$12 sps:$4 sm:$0xff]  }
 0x24c   : > { %v16387_v49 = vpop.f32.mrf.mxu1  ;;  %v16809_v45 = vld [vmem:[#allocation9 + $0x3ac] ss:$12 sps:$4 sm:$0xff]  }
 0x24d   : > { %v1184_v52 = vor.u32 %v1183_v47, %v1180_v46  ;;  %v1472_v54 = vrot.slane %v1150_v48, 5  ;;  %v16807_v46 = vld [vmem:[#allocation9 + $0x3a8] ss:$12 sps:$4 sm:$0xff]   ;;  %v16812_v47 = vld [vmem:[#allocation9 + $0x4cc] ss:$12 sps:$4 sm:$0xff]  }
 0x24e   : > { %v1145_v56 = vpop.f32.mrf.mxu1  ;;  %v16810_v48 = vld [vmem:[#allocation9 + $0x4c8] ss:$12 sps:$4 sm:$0xff]  }
 0x24f   : > { %v1473_v57 = vsel %vm1470_vm3, %v1471_v53, %v1472_v54  ;;  %v1185_v58 = vsel %vm1168_vm4, %v1176_v51, %v1184_v52  ;;  %v16815_v49 = vld [vmem:[#allocation9 + $0x394] ss:$12 sps:$4 sm:$0xff]   ;;  %v16816_v52 = vld [vmem:[#allocation9 + $0x4b0] ss:$12 sps:$4 sm:$0xff]   ;;  %v16819_v54 = vld [vmem:[#allocation9 + $0x378] ss:$12 sps:$4 sm:$0xff]  }
 0x250   : > { %14705 = vmatmul.mubr.msk.bf16.vlgmr.msra.gmra.mxu1 %vm1078_vm2, %v1185_v58  ;;  %14731 = vmatmul.mubr.msk.bf16.vlgmr.msra.gmra.mxu0 %vm1078_vm2, %v1473_v57  ;;  %v16388_v60 = vpop.f32.mrf.mxu1  ;;  %v16818_v51 = vld [vmem:[#allocation9 + $0x4b4] ss:$12 sps:$4 sm:$0xff]   ;;  %v16821_v53 = vld [vmem:[#allocation9 + $0x37c] ss:$12 sps:$4 sm:$0xff]   ;;  %v16826_v56 = vld [vmem:[#allocation9 + $0x364] ss:$12 sps:$4 sm:$0xff]  }
 0x251   : > { %1293 = vmatpush1.bf16.msra.mxu1 %v1232_v55  ;;  %1312 = vmatprep.mubr.bf16.mxu1 %v19133_v19  ;;  %v16822_v55 = vld [vmem:[#allocation9 + $0x3e0] ss:$12 sps:$4 sm:$0xff]  }
 0x252   : > { %1294 = vmatprep.subr.bf16.mxu1 %v16740_v50  ;;  %2365 = vmatpush1.bf16.msra.mxu0 %v16762_v15  ;;  %v16813_v50 = vld [vmem:[#allocation9 + $0x390] ss:$12 sps:$4 sm:$0xff]   ;;  %v16836_v60 = vld [vmem:[#allocation9 + $0x334] ss:$12 sps:$4 sm:$0xff]  }
 0x253   : > { %2366 = vmatprep.subr.bf16.mxu0 %v16770_v20 }
 0x255   : > { %1295 = vmatpush1.bf16.msra.mxu1 %v16738_v59  ;;  %v16829_v59 = vld [vmem:[#allocation9 + $0x348] ss:$12 sps:$4 sm:$0xff]  }
 0x256   : > { %14716 = vmatprep.subr.msk.bf16.mxu1 %vm1088_vm1, %v16741_v61  ;;  %2367 = vmatpush1.bf16.msra.mxu0 %v16768_v18  ;;  %v16834_v61 = vld [vmem:[#allocation9 + $0x330] ss:$12 sps:$4 sm:$0xff]  }
 0x257   : > { %2368 = vmatprep.subr.bf16.mxu0 %v16776_v23 }
 0x258   : > { %14707 = vmatmul.mubr.msk.bf16.vlgmr.msra.gmra.mxu1 %vm1078_vm2, %v1185_v58  ;;  %v16831_v58 = vld [vmem:[#allocation9 + $0x34c] ss:$12 sps:$4 sm:$0xff]  }
 0x259   : > { %1386 = vmatpush1.bf16.msra.mxu1 %v1362_v1  ;;  %1405 = vmatprep.mubr.bf16.mxu1 %v19133_v19 }
 0x25a   : > { %1387 = vmatprep.subr.bf16.mxu1 %v16746_v63  ;;  %2369 = vmatpush1.bf16.msra.mxu0 %v16774_v24 }
 0x25b   : > { %2370 = vmatprep.subr.bf16.mxu0 %v16782_v27 }
 0x25d   : > { %1388 = vmatpush1.bf16.msra.mxu1 %v16744_v2  ;;  %v1621_v2 = vlaneseq }
 0x25e   : > { %14728 = vmatprep.subr.msk.bf16.mxu1 %vm1088_vm1, %v16747_v3  ;;  %2371 = vmatpush1.bf16.msra.mxu0 %v16780_v28 }
 0x25f   : > { %2372 = vmatprep.subr.bf16.mxu0 %v16788_v31 }
 0x260   : > { %14717 = vmatmul.mubr.msk.bf16.vlgmr.msra.gmra.mxu1 %vm1078_vm2, %v1148_v30  ;;  %v16783_v30 = vld [vmem:[#allocation9 + $0x288] ss:$12 sps:$4 sm:$0xff]  }
 0x261   : > { %1538 = vmatpush1.bf16.msra.mxu1 %v1514_v6  ;;  %1557 = vmatprep.mubr.bf16.mxu1 %v19133_v19  ;;  %v19627_v6 = vshrl.u32 %v1621_v2, 7 }
 0x262   : > { %1539 = vmatprep.subr.bf16.mxu1 %v16752_v5  ;;  %2373 = vmatpush1.bf16.msra.mxu0 %v16786_v32 }
 0x263   : > { %2374 = vmatprep.subr.bf16.mxu0 %v16794_v35  ;;  %v1635_v15 = vsub.s32 3, %v19627_v6 }
 0x265   : > { %1540 = vmatpush1.bf16.msra.mxu1 %v16750_v7 }
 0x266   : > { %2321 = vmatprep.subr.bf16.mxu1 %v16755_v8  ;;  %2375 = vmatpush1.bf16.msra.mxu0 %v16792_v36 }
 0x267   : > { %2376 = vmatprep.subr.bf16.mxu0 %v16800_v39 }
 0x268   : > { %14729 = vmatmul.mubr.msk.bf16.vlgmr.msra.gmra.mxu1 %vm1078_vm2, %v1473_v57  ;;  %v16824_v57 = vld [vmem:[#allocation9 + $0x360] ss:$12 sps:$4 sm:$0xff]  }
 0x269   : > { %2322 = vmatpush1.bf16.msra.mxu1 %v16753_v9 }
 0x26a   : > { %2323 = vmatprep.subr.bf16.mxu1 %v16758_v10  ;;  %2377 = vmatpush1.bf16.msra.mxu0 %v16798_v40  ;;  %v1619_v10 = vld [vmem:[#allocation7] sm:$0xf] }
 0x26b   : > { %2378 = vmatprep.subr.bf16.mxu0 %v16806_v43  ;;  %v1636_v24 = vrot.slane %v1619_v10, %v1635_v15  ;;  %v19639_v43 = vsub.s32 0, %v19627_v6 }
 0x26d   : > { %2324 = vmatpush1.bf16.msra.mxu1 %v16756_v11  ;;  %v19630_v11 = vsub.s32 2, %v19627_v6 }
 0x26e   : > { %2325 = vmatprep.subr.bf16.mxu1 %v16761_v12  ;;  %2379 = vmatpush1.bf16.msra.mxu0 %v16804_v44 }
 0x26f   : > { %2392 = vmatprep.subr.bf16.mxu0 %v16812_v47  ;;  %v1632_v18 = vrot.slane %v1619_v10, %v19630_v11 }
 0x271   : > { %2326 = vmatpush1.bf16.msra.mxu1 %v16759_v13 }
 0x272   : > { %2327 = vmatprep.subr.bf16.mxu1 %v16767_v17  ;;  %2393 = vmatpush2.bf16.msra.mxu0 %v16810_v48 }
 0x273   : > { %2394 = vmatprep.subr.bf16.mxu0 %v16818_v51 }
 0x275   : > { %2328 = vmatpush1.bf16.msra.mxu1 %v16765_v16 }
 0x276   : > { %2329 = vmatprep.subr.bf16.mxu1 %v16773_v21  ;;  %2395 = vmatpush2.bf16.msra.mxu0 %v16816_v52  ;;  %v1624_v52 = vrot.slane %v1619_v10, %v19639_v43 }
 0x277   : > { %16079 = vmatprep.subr.bf16.mxu0 %v16822_v55 }
 0x279   : > { %2330 = vmatpush1.bf16.msra.mxu1 %v16771_v22 }
 0x27a   : > { %2331 = vmatprep.subr.bf16.mxu1 %v16779_v25 }
 0x27d   : > { %2332 = vmatpush1.bf16.msra.mxu1 %v16777_v26 }
 0x27e   : > { %2333 = vmatprep.subr.bf16.mxu1 %v16785_v29 }
 0x281   : > { %2334 = vmatpush1.bf16.msra.mxu1 %v16783_v30 }
 0x282   : > { %2335 = vmatprep.subr.bf16.mxu1 %v16791_v33 }
 0x285   : > { %2336 = vmatpush1.bf16.msra.mxu1 %v16789_v34 }
 0x286   : > { %2337 = vmatprep.subr.bf16.mxu1 %v16797_v37 }
 0x289   : > { %2338 = vmatpush2.bf16.msra.mxu1 %v16795_v38 }
 0x28a   : > { %2339 = vmatprep.subr.bf16.mxu1 %v16803_v41 }
 0x28d   : > { %2340 = vmatpush2.bf16.msra.mxu1 %v16801_v42 }
 0x28e   : > { %2341 = vmatprep.subr.bf16.mxu1 %v16809_v45  ;;  %v19642_v45 = vsub.s32 1, %v19627_v6 }
 0x291   : > { %2342 = vmatpush2.bf16.msra.mxu1 %v16807_v46 }
 0x292   : > { %2343 = vmatprep.subr.bf16.mxu1 %v16815_v49 }
 0x295   : > { %2344 = vmatpush2.bf16.msra.mxu1 %v16813_v50 }
 0x296   : > { %2345 = vmatprep.subr.bf16.mxu1 %v16821_v53 }
 0x299   : > { %2346 = vmatpush2.bf16.msra.mxu1 %v16819_v54 }
 0x29a   : > { %2347 = vmatprep.subr.bf16.mxu1 %v16826_v56  ;;  %v1628_v56 = vrot.slane %v1619_v10, %v19642_v45 }
 0x29d   : > { %2348 = vmatpush2.bf16.msra.mxu1 %v16824_v57 }
 0x29e   : > { %2349 = vmatprep.subr.bf16.mxu1 %v16831_v58 }
 0x2a1   : > { %2350 = vmatpush2.bf16.msra.mxu1 %v16829_v59 }
 0x2a2   : > { %2351 = vmatprep.subr.bf16.mxu1 %v16836_v60 }
 0x2a5   : > { %2352 = vmatpush2.bf16.msra.mxu1 %v16834_v61 }
 0x2a6   : > { %2448 = vmatprep.subr.bf16.mxu1 %v19133_v19 }
 0x301   : > { %v1450_v62 = vpop.f32.mrf.mxu0 }
 0x303   : > { %v1452_v63 = vpop.f32.mrf.mxu0 }
 0x305   : > { %v1454_v1 = vpop.f32.mrf.mxu0 }
 0x307   : > { %v1456_v4 = vpop.f32.mrf.mxu0 }
 0x310   : > { %v1271_v3 = vpop.f32.mrf.mxu1  ;;  %v1602_v7 = vpop.f32.mrf.mxu0 }
 0x312   : > { %v1273_v5 = vpop.f32.mrf.mxu1  ;;  %v1604_v12 = vpop.f32.mrf.mxu0 }
 0x314   : > { %v1275_v8 = vpop.f32.mrf.mxu1  ;;  %v1606_v21 = vpop.f32.mrf.mxu0 }
 0x316   : > { %v1277_v9 = vpop.f32.mrf.mxu1  ;;  %v1608_v30 = vpop.f32.mrf.mxu0 }
 0x318   : > { %v1314_v13 = vpop.f32.mrf.mxu1 }
 0x319   : > { %v1451_v14 = vadd.f32 %v1450_v62, %v1314_v13 }
 0x31a   : > { %v1316_v16 = vpop.f32.mrf.mxu1 }
 0x31b   : > { %v1613_v17 = vadd.f32 %v1602_v7, %v1451_v14  ;;  %v1453_v20 = vadd.f32 %v1452_v63, %v1316_v16  ;;  %v16828_v14 = vld [vmem:[#allocation9 + $0x308] ss:$12 sps:$4 sm:$0xff]  }
 0x31c   : > { %v1318_v22 = vpop.f32.mrf.mxu1 }
 0x31d   : > { %v1614_v23 = vadd.f32 %v1604_v12, %v1453_v20  ;;  %v1455_v25 = vadd.f32 %v1454_v1, %v1318_v22  ;;  %v1643_v27 = vadd.f32 %v1632_v18, %v1613_v17 }
 0x31e   : > { %v1320_v26 = vpop.f32.mrf.mxu1 }
 0x31f   : > { %v1617_v28 = vadd.f32 %v1606_v21, %v1455_v25  ;;  %v1457_v29 = vadd.f32 %v1456_v4, %v1320_v26  ;;  %v1644_v32 = vadd.f32 %v1636_v24, %v1614_v23  ;;  %v1651_v36 = vmax.f32 %v1643_v27, 0.0  ;;  %v16823_v4 = vld [vmem:[#allocation9 + $0x320] ss:$12 sps:$4 sm:$0xff]   ;;  %v16837_v26 = vld [vmem:[#allocation9 + $0x398] ss:$12 sps:$4 sm:$0xff]  }
 0x320   : > { %v1407_v31 = vpop.f32.mrf.mxu1  ;;  %v16838_v27 = vld [vmem:[#allocation9 + $0x2d8] ss:$12 sps:$4 sm:$0xff]  }
 0x321   : > { %v1647_v33 = vadd.f32 %v1632_v18, %v1617_v28  ;;  %v1618_v34 = vadd.f32 %v1608_v30, %v1457_v29  ;;  %v1652_v40 = vmax.f32 %v1644_v32, 0.0  ;;  %v1408_v47 = vadd.f32 %v1407_v31, %v1271_v3  ;;  %v16839_v32 = vld [vmem:[#allocation9 + $0x4a0] ss:$12 sps:$4 sm:$0xff]  }
 0x322   : > { %v1409_v35 = vpop.f32.mrf.mxu1 }
 0x323   : > { %v1655_v37 = vmax.f32 %v1647_v33, 0.0  ;;  %v1648_v38 = vadd.f32 %v1636_v24, %v1618_v34  ;;  %v1410_v50 = vadd.f32 %v1409_v35, %v1273_v5  ;;  %v16833_v24 = vld [vmem:[#allocation9 + $0x2f0] ss:$12 sps:$4 sm:$0xff]   ;;  %v16840_v35 = vld [vmem:[#allocation9 + $0x380] ss:$12 sps:$4 sm:$0xff]  }
 0x324   : > { %v1411_v39 = vpop.f32.mrf.mxu1 }
 0x325   : > { %v19636_v41 = vpack.c.bf16 %v1655_v37, %v1651_v36  ;;  %v1656_v42 = vmax.f32 %v1648_v38, 0.0  ;;  %v1412_v54 = vadd.f32 %v1411_v39, %v1275_v8  ;;  %v16827_v8 = vld [vmem:[#allocation9 + $0x3c8] ss:$12 sps:$4 sm:$0xff]   ;;  %v16841_v37 = vld [vmem:[#allocation9 + $0x2c0] ss:$12 sps:$4 sm:$0xff]  }
 0x326   : > { %v1413_v44 = vpop.f32.mrf.mxu1  ;;  %v16843_v38 = vld [vmem:[#allocation9 + $0x368] ss:$12 sps:$4 sm:$0xff]  }
 0x327   : > { %v19644_v46 = vpack.c.bf16 %v1656_v42, %v1652_v40  ;;  %v1887_v48 = vshll.u32 %v19636_v41, 16  ;;  %v1885_v61 = vshrl.u32 %v19636_v41, 16  ;;  %v1414_v63 = vadd.f32 %v1413_v44, %v1277_v9  ;;  %v16832_v9 = vld [vmem:[#allocation9 + $0x3b0] ss:$12 sps:$4 sm:$0xff]   ;;  %v16842_v39 = vld [vmem:[#allocation9 + $0x488] ss:$12 sps:$4 sm:$0xff]  }
 0x328   : > { %v1559_v49 = vpop.f32.mrf.mxu1  ;;  %v16844_v40 = vld [vmem:[#allocation9 + $0x2a8] ss:$12 sps:$4 sm:$0xff]   ;;  %v16846_v42 = vld [vmem:[#allocation9 + $0x350] ss:$12 sps:$4 sm:$0xff]  }
 0x329   : > { %v1611_v51 = vadd.f32 %v1559_v49, %v1408_v47  ;;  %v1894_v53 = vshll.u32 %v19644_v46, 16  ;;  %v1889_v57 = vrot.slane %v1887_v48, 1  ;;  %v1892_v59 = vshrl.u32 %v19644_v46, 16  ;;  %v16845_v44 = vld [vmem:[#allocation9 + $0x470] ss:$12 sps:$4 sm:$0xff]  }
 0x32a   : > { %v1561_v55 = vpop.f32.mrf.mxu1  ;;  %v16847_v47 = vld [vmem:[#allocation9 + $0x290] ss:$12 sps:$4 sm:$0xff]   ;;  %v16849_v48 = vld [vmem:[#allocation9 + $0x338] ss:$12 sps:$4 sm:$0xff]  }
 0x32b   : > { %v1612_v58 = vadd.f32 %v1561_v55, %v1410_v50  ;;  %v1896_v60 = vrot.slane %v1894_v53, 1  ;;  %v1641_v1 = vadd.f32 %v1624_v52, %v1611_v51  ;;  %v19652_v7 = vor.u32 %v1889_v57, %v1885_v61  ;;  %v16848_v49 = vld [vmem:[#allocation9 + $0x458] ss:$12 sps:$4 sm:$0xff]   ;;  %v16852_v53 = vld [vmem:[#allocation9 + $0xa8] ss:$12 sps:$4 sm:$0xff]  }
 0x32c   : > { %v1563_v62 = vpop.f32.mrf.mxu1  ;;  %v16850_v50 = vld [vmem:[#allocation9 + $0x278] ss:$12 sps:$4 sm:$0xff]   ;;  %v16855_v55 = vld [vmem:[#allocation9 + $0x428] ss:$12 sps:$4 sm:$0xff]  }
 0x32d   : > { %v1615_v2 = vadd.f32 %v1563_v62, %v1412_v54  ;;  %v1897_v3 = vor.u32 %v1896_v60, %v1892_v59  ;;  %v1642_v12 = vadd.f32 %v1628_v56, %v1612_v58  ;;  %v1649_v16 = vmax.f32 %v1641_v1, 0.0  ;;  %v16854_v51 = vld [vmem:[#allocation9 + $0xac] ss:$12 sps:$4 sm:$0xff]   ;;  %v16858_v54 = vld [vmem:[#allocation9 + $0x94] ss:$12 sps:$4 sm:$0xff]  }
 0x32e   : > { %v1565_v5 = vpop.f32.mrf.mxu1  ;;  %v16862_v57 = vld [vmem:[#allocation9 + $0x7c] ss:$12 sps:$4 sm:$0xff]   ;;  %v16860_v59 = vld [vmem:[#allocation9 + $0x78] ss:$12 sps:$4 sm:$0xff]   ;;  %v16864_v62 = vld [vmem:[#allocation9 + $0x60] ss:$12 sps:$4 sm:$0xff]  }
 0x32f   : > { %v1645_v10 = vadd.f32 %v1624_v52, %v1615_v2  ;;  %v1616_v13 = vadd.f32 %v1565_v5, %v1414_v63  ;;  %14810 = vmatprep.mubr.msk.bf16.mxu0 %vm2317_vm5, %v1897_v3  ;;  %v1650_v20 = vmax.f32 %v1642_v12, 0.0  ;;  %v16851_v52 = vld [vmem:[#allocation9 + $0x440] ss:$12 sps:$4 sm:$0xff]   ;;  %v16859_v58 = vld [vmem:[#allocation9 + $0x410] ss:$12 sps:$4 sm:$0xff]  }
 0x330   : > { %2397 = vmatmul.mubr.bf16.vlgmr.msra.gmra.mxu0 %v19652_v7  ;;  %v16866_v60 = vld [vmem:[#allocation9 + $0x64] ss:$12 sps:$4 sm:$0xff]   ;;  %v16870_v63 = vld [vmem:[#allocation9 + $0x4c] ss:$12 sps:$4 sm:$0xff]   ;;  %v16868_v2 = vld [vmem:[#allocation9 + $0x48] ss:$12 sps:$4 sm:$0xff]  }
 0x331   : > { %v1653_v17 = vmax.f32 %v1645_v10, 0.0  ;;  %v1646_v18 = vadd.f32 %v1628_v56, %v1616_v13  ;;  %16080 = vmatpush3.bf16.msra.mxu0 %v16823_v4  ;;  %v16856_v56 = vld [vmem:[#allocation9 + $0x90] ss:$12 sps:$4 sm:$0xff]   ;;  %v16863_v61 = vld [vmem:[#allocation9 + $0x3f8] ss:$12 sps:$4 sm:$0xff]  }
 0x332   : > { %16081 = vmatprep.subr.bf16.mxu0 %v16827_v8  ;;  %v16867_v1 = vld [vmem:[#allocation9 + $0x4d0] ss:$12 sps:$4 sm:$0xff]   ;;  %v16874_v4 = vld [vmem:[#allocation9 + $0x34] ss:$12 sps:$4 sm:$0xff]   ;;  %v16877_v8 = vld [vmem:[#allocation9 + $0x22c] ss:$12 sps:$4 sm:$0xff]  }
 0x333   : > { %v19656_v21 = vpack.c.bf16 %v1653_v17, %v1649_v16  ;;  %v1654_v22 = vmax.f32 %v1646_v18, 0.0  ;;  %v16872_v5 = vld [vmem:[#allocation9 + $0x30] ss:$12 sps:$4 sm:$0xff]   ;;  %v16875_v12 = vld [vmem:[#allocation9 + $0x228] ss:$12 sps:$4 sm:$0xff]  }
 0x334   : > { %v16880_v10 = vld [vmem:[#allocation9 + $0x1c] ss:$12 sps:$4 sm:$0xff]   ;;  %v16878_v13 = vld [vmem:[#allocation9 + $0x18] ss:$12 sps:$4 sm:$0xff]   ;;  %v16884_v18 = vld [vmem:[#allocation9] ss:$12 sps:$4 sm:$0xff]  }
 0x335   : > { %v19658_v23 = vpack.c.bf16 %v1654_v22, %v1650_v20  ;;  %16082 = vmatpush3.bf16.msra.mxu0 %v16828_v14  ;;  %v1873_v25 = vshll.u32 %v19656_v21, 16  ;;  %v1871_v33 = vshrl.u32 %v19656_v21, 16  ;;  %v16883_v14 = vld [vmem:[#allocation9 + $0x214] ss:$12 sps:$4 sm:$0xff]   ;;  %v16881_v16 = vld [vmem:[#allocation9 + $0x210] ss:$12 sps:$4 sm:$0xff]  }
 0x336   : > { %16083 = vmatprep.subr.bf16.mxu0 %v16832_v9  ;;  %v16886_v17 = vld [vmem:[#allocation9 + $0x4] ss:$12 sps:$4 sm:$0xff]   ;;  %v16889_v9 = vld [vmem:[#allocation9 + $0x1fc] ss:$12 sps:$4 sm:$0xff]   ;;  %v16892_v22 = vld [vmem:[#allocation9 + $0x16c] ss:$12 sps:$4 sm:$0xff]  }
 0x337   : > { %v1880_v28 = vshll.u32 %v19658_v23, 16  ;;  %v1875_v29 = vrot.slane %v1873_v25, 1  ;;  %v1878_v30 = vshrl.u32 %v19658_v23, 16  ;;  %v16887_v20 = vld [vmem:[#allocation9 + $0x1f8] ss:$12 sps:$4 sm:$0xff]  }
 0x338   : > { %v16895_v25 = vld [vmem:[#allocation9 + $0x1e4] ss:$12 sps:$4 sm:$0xff]  }
 0x339   : > { %16084 = vmatpush3.bf16.msra.mxu0 %v16833_v24  ;;  %v1882_v31 = vrot.slane %v1880_v28, 1  ;;  %v1876_v36 = vor.u32 %v1875_v29, %v1871_v33  ;;  %v16890_v24 = vld [vmem:[#allocation9 + $0x168] ss:$12 sps:$4 sm:$0xff]   ;;  %v16901_v28 = vld [vmem:[#allocation9 + $0x1cc] ss:$12 sps:$4 sm:$0xff]  }
 0x33a   : > { %16085 = vmatprep.subr.bf16.mxu0 %v16837_v26  ;;  %v16893_v26 = vld [vmem:[#allocation9 + $0x1e0] ss:$12 sps:$4 sm:$0xff]   ;;  %v16899_v29 = vld [vmem:[#allocation9 + $0x1c8] ss:$12 sps:$4 sm:$0xff]   ;;  %v16905_v33 = vld [vmem:[#allocation9 + $0x1b0] ss:$12 sps:$4 sm:$0xff]  }
 0x33b   : > { %v1883_v34 = vor.u32 %v1882_v31, %v1878_v30  ;;  %v16904_v30 = vld [vmem:[#allocation9 + $0x13c] ss:$12 sps:$4 sm:$0xff]   ;;  %v16902_v31 = vld [vmem:[#allocation9 + $0x138] ss:$12 sps:$4 sm:$0xff]  }
 0x33d   : > { %16086 = vmatpush3.bf16.msra.mxu0 %v16838_v27  ;;  %2353 = vmatprep.mubr.bf16.mxu1 %v1883_v34  ;;  %v16896_v27 = vld [vmem:[#allocation9 + $0x150] ss:$12 sps:$4 sm:$0xff]  }
 0x33e   : > { %2439 = vmatprep.mubr.bf16.mxu0 %v1883_v34  ;;  %2354 = vmatmul.mubr.bf16.vlgmr.msra.gmra.mxu1 %v1876_v36  ;;  %v16910_v34 = vld [vmem:[#allocation9 + $0x124] ss:$12 sps:$4 sm:$0xff]  }
 0x33f   : > { %2449 = vmatpush1.bf16.msra.mxu1 %v16839_v32  ;;  %16087 = vmatprep.subr.bf16.mxu0 %v16840_v35  ;;  %v16907_v32 = vld [vmem:[#allocation9 + $0x1b4] ss:$12 sps:$4 sm:$0xff]  }
 0x340   : > { %14811 = vmatprep.mubr.msk.bf16.mxu1 %vm2317_vm5, %v1897_v3  ;;  %2450 = vmatprep.subr.bf16.mxu1 %v19133_v19  ;;  %v16871_v3 = vld [vmem:[#allocation9 + $0x4b8] ss:$12 sps:$4 sm:$0xff]   ;;  %v16908_v35 = vld [vmem:[#allocation9 + $0x120] ss:$12 sps:$4 sm:$0xff]  }
 0x341   : > { %16088 = vmatpush3.bf16.msra.mxu0 %v16841_v37  ;;  %v16911_v37 = vld [vmem:[#allocation9 + $0x198] ss:$12 sps:$4 sm:$0xff]  }
 0x342   : > { %16089 = vmatprep.subr.bf16.mxu0 %v16843_v38  ;;  %v16916_v38 = vld [vmem:[#allocation9 + $0x10c] ss:$12 sps:$4 sm:$0xff]  }
 0x343   : > { %2451 = vmatpush1.bf16.msra.mxu1 %v16842_v39  ;;  %v16914_v39 = vld [vmem:[#allocation9 + $0x108] ss:$12 sps:$4 sm:$0xff]  }
 0x344   : > { %2452 = vmatprep.subr.bf16.mxu1 %v19133_v19 }
 0x345   : > { %16090 = vmatpush3.bf16.msra.mxu0 %v16844_v40  ;;  %v16919_v40 = vld [vmem:[#allocation9 + $0x184] ss:$12 sps:$4 sm:$0xff]  }
 0x346   : > { %16091 = vmatprep.subr.bf16.mxu0 %v16846_v42  ;;  %v16922_v42 = vld [vmem:[#allocation9 + $0xf4] ss:$12 sps:$4 sm:$0xff]  }
 0x347   : > { %2453 = vmatpush1.bf16.msra.mxu1 %v16845_v44  ;;  %v16917_v44 = vld [vmem:[#allocation9 + $0x180] ss:$12 sps:$4 sm:$0xff]  }
 0x348   : > { %2454 = vmatprep.subr.bf16.mxu1 %v19133_v19 }
 0x349   : > { %16092 = vmatpush3.bf16.msra.mxu0 %v16847_v47  ;;  %v16920_v47 = vld [vmem:[#allocation9 + $0xf0] ss:$12 sps:$4 sm:$0xff]  }
 0x34a   : > { %16093 = vmatprep.subr.bf16.mxu0 %v16849_v48  ;;  %v16925_v48 = vld [vmem:[#allocation9 + $0x25c] ss:$12 sps:$4 sm:$0xff]  }
 0x34b   : > { %2455 = vmatpush1.bf16.msra.mxu1 %v16848_v49  ;;  %v16928_v49 = vld [vmem:[#allocation9 + $0xdc] ss:$12 sps:$4 sm:$0xff]  }
 0x34c   : > { %2456 = vmatprep.subr.bf16.mxu1 %v19133_v19 }
 0x34d   : > { %16094 = vmatpush3.bf16.msra.mxu0 %v16850_v50  ;;  %v16923_v50 = vld [vmem:[#allocation9 + $0x258] ss:$12 sps:$4 sm:$0xff]  }
 0x34e   : > { %2907 = vmatprep.subr.bf16.mxu0 %v16854_v51  ;;  %v16926_v51 = vld [vmem:[#allocation9 + $0xd8] ss:$12 sps:$4 sm:$0xff]  }
 0x34f   : > { %2457 = vmatpush1.bf16.msra.mxu1 %v16851_v52  ;;  %v16931_v52 = vld [vmem:[#allocation9 + $0x244] ss:$12 sps:$4 sm:$0xff]  }
 0x350   : > { %2440 = vmatmul.mubr.bf16.vlgmr.msra.gmra.mxu0 %v1876_v36  ;;  %2458 = vmatprep.subr.bf16.mxu1 %v19133_v19  ;;  %v16913_v36 = vld [vmem:[#allocation9 + $0x19c] ss:$12 sps:$4 sm:$0xff]  }
 0x351   : > { %2908 = vmatpush1.bf16.msra.mxu0 %v16852_v53  ;;  %2939 = vmatprep.mubr.bf16.mxu0 %v19658_v23  ;;  %v16929_v53 = vld [vmem:[#allocation9 + $0x240] ss:$12 sps:$4 sm:$0xff]  }
 0x352   : > { %2909 = vmatprep.subr.bf16.mxu0 %v16858_v54  ;;  %v16934_v54 = vld [vmem:[#allocation9 + $0xc4] ss:$12 sps:$4 sm:$0xff]  }
 0x353   : > { %2459 = vmatpush1.bf16.msra.mxu1 %v16855_v55  ;;  %v16932_v55 = vld [vmem:[#allocation9 + $0xc0] ss:$12 sps:$4 sm:$0xff]  }
 0x354   : > { %2460 = vmatprep.subr.bf16.mxu1 %v19133_v19 }
 0x355   : > { %2910 = vmatpush1.bf16.msra.mxu0 %v16856_v56  ;;  %v16935_v56 = vld [vmem:[#allocation9 + $0x230] ss:$12 sps:$4 sm:$0xff]  }
 0x356   : > { %2911 = vmatprep.subr.bf16.mxu0 %v16862_v57  ;;  %v16936_v57 = vld [vmem:[#allocation9 + $0x170] ss:$12 sps:$4 sm:$0xff]  }
 0x357   : > { %2461 = vmatpush1.bf16.msra.mxu1 %v16859_v58  ;;  %v16937_v58 = vld [vmem:[#allocation9 + $0xb0] ss:$12 sps:$4 sm:$0xff]  }
 0x358   : > { %2462 = vmatprep.subr.bf16.mxu1 %v19133_v19 }
 0x359   : > { %2912 = vmatpush1.bf16.msra.mxu0 %v16860_v59  ;;  %v16939_v59 = vld [vmem:[#allocation9 + $0x158] ss:$12 sps:$4 sm:$0xff]  }
 0x35a   : > { %2913 = vmatprep.subr.bf16.mxu0 %v16866_v60  ;;  %v16938_v60 = vld [vmem:[#allocation9 + $0x218] ss:$12 sps:$4 sm:$0xff]  }
 0x35b   : > { %2463 = vmatpush1.bf16.msra.mxu1 %v16863_v61  ;;  %v16940_v61 = vld [vmem:[#allocation9 + $0x98] ss:$12 sps:$4 sm:$0xff]  }
 0x35c   : > { %2476 = vmatprep.subr.bf16.mxu1 %v19133_v19 }
 0x35d   : > { %2914 = vmatpush1.bf16.msra.mxu0 %v16864_v62  ;;  %v16942_v62 = vld [vmem:[#allocation9 + $0x140] ss:$12 sps:$4 sm:$0xff]  }
 0x35e   : > { %2915 = vmatprep.subr.bf16.mxu0 %v16870_v63  ;;  %v16941_v63 = vld [vmem:[#allocation9 + $0x200] ss:$12 sps:$4 sm:$0xff]  }
 0x35f   : > { %2477 = vmatpush2.bf16.msra.mxu1 %v16867_v1  ;;  %v16943_v1 = vld [vmem:[#allocation9 + $0x80] ss:$12 sps:$4 sm:$0xff]  }
 0x360   : > { %2478 = vmatprep.subr.bf16.mxu1 %v19133_v19 }
 0x361   : > { %2916 = vmatpush1.bf16.msra.mxu0 %v16868_v2  ;;  %v16945_v2 = vld [vmem:[#allocation9 + $0x128] ss:$12 sps:$4 sm:$0xff]  }
 0x362   : > { %2917 = vmatprep.subr.bf16.mxu0 %v16874_v4  ;;  %v16946_v4 = vld [vmem:[#allocation9 + $0x68] ss:$12 sps:$4 sm:$0xff]  }
 0x363   : > { %2479 = vmatpush2.bf16.msra.mxu1 %v16871_v3  ;;  %v16944_v3 = vld [vmem:[#allocation9 + $0x1e8] ss:$12 sps:$4 sm:$0xff]  }
 0x364   : > { %2950 = vmatprep.subr.bf16.mxu1 %v16877_v8  ;;  %v16947_v8 = vld [vmem:[#allocation9 + $0x1d0] ss:$12 sps:$4 sm:$0xff]  }
 0x365   : > { %2918 = vmatpush1.bf16.msra.mxu0 %v16872_v5  ;;  %v16948_v5 = vld [vmem:[#allocation9 + $0x110] ss:$12 sps:$4 sm:$0xff]  }
 0x366   : > { %2481 = vmatmul.mubr.bf16.vlgmr.msra.gmra.mxu1 %v19652_v7  ;;  %2919 = vmatprep.subr.bf16.mxu0 %v16880_v10  ;;  %v16898_v7 = vld [vmem:[#allocation9 + $0x154] ss:$12 sps:$4 sm:$0xff]   ;;  %v16951_v10 = vld [vmem:[#allocation9 + $0xf8] ss:$12 sps:$4 sm:$0xff]  }
 0x367   : > { %2951 = vmatpush1.bf16.msra.mxu1 %v16875_v12  ;;  %14890 = vmatprep.mubr.msk.bf16.mxu1 %vm2317_vm5, %v19644_v46  ;;  %v16949_v12 = vld [vmem:[#allocation9 + $0x50] ss:$12 sps:$4 sm:$0xff]  }
 0x368   : > { %2952 = vmatprep.subr.bf16.mxu1 %v16883_v14  ;;  %v16952_v14 = vld [vmem:[#allocation9 + $0x38] ss:$12 sps:$4 sm:$0xff]  }
 0x369   : > { %2920 = vmatpush1.bf16.msra.mxu0 %v16878_v13  ;;  %v16950_v13 = vld [vmem:[#allocation9 + $0x1b8] ss:$12 sps:$4 sm:$0xff]  }
 0x36a   : > { %2921 = vmatprep.subr.bf16.mxu0 %v16886_v17  ;;  %v16953_v17 = vld [vmem:[#allocation9 + $0x1a0] ss:$12 sps:$4 sm:$0xff]  }
 0x36b   : > { %2953 = vmatpush1.bf16.msra.mxu1 %v16881_v16  ;;  %v16954_v16 = vld [vmem:[#allocation9 + $0xe0] ss:$12 sps:$4 sm:$0xff]  }
 0x36c   : > { %2954 = vmatprep.subr.bf16.mxu1 %v16889_v9  ;;  %v16957_v9 = vld [vmem:[#allocation9 + $0xc8] ss:$12 sps:$4 sm:$0xff]  }
 0x36d   : > { %2922 = vmatpush1.bf16.msra.mxu0 %v16884_v18  ;;  %v16955_v18 = vld [vmem:[#allocation9 + $0x20] ss:$12 sps:$4 sm:$0xff]  }
 0x36e   : > { %2923 = vmatprep.subr.bf16.mxu0 %v16892_v22  ;;  %v16958_v22 = vld [vmem:[#allocation9 + $0x8] ss:$12 sps:$4 sm:$0xff]  }
 0x36f   : > { %2955 = vmatpush1.bf16.msra.mxu1 %v16887_v20  ;;  %v16956_v20 = vld [vmem:[#allocation9 + $0x188] ss:$12 sps:$4 sm:$0xff]  }
 0x370   : > { %2956 = vmatprep.subr.bf16.mxu1 %v16895_v25  ;;  %v16959_v25 = vld [vmem:[#allocation9 + $0x260] ss:$12 sps:$4 sm:$0xff]  }
 0x371   : > { %2924 = vmatpush2.bf16.msra.mxu0 %v16890_v24  ;;  %v16962_v24 = vld [vmem:[#allocation9 + $0x58c] ss:$12 sps:$4 sm:$0xff]  }
 0x372   : > { %2925 = vmatprep.subr.bf16.mxu0 %v16898_v7  ;;  %v16966_v7 = vld [vmem:[#allocation9 + $0x574] ss:$12 sps:$4 sm:$0xff]  }
 0x373   : > { %2957 = vmatpush1.bf16.msra.mxu1 %v16893_v26  ;;  %v16960_v26 = vld [vmem:[#allocation9 + $0x588] ss:$12 sps:$4 sm:$0xff]  }
 0x374   : > { %2958 = vmatprep.subr.bf16.mxu1 %v16901_v28  ;;  %v16969_v28 = vld [vmem:[#allocation9 + $0x70c] ss:$12 sps:$4 sm:$0xff]  }
 0x375   : > { %2926 = vmatpush2.bf16.msra.mxu0 %v16896_v27  ;;  %v16963_v27 = vld [vmem:[#allocation9 + $0x248] ss:$12 sps:$4 sm:$0xff]  }
 0x376   : > { %2927 = vmatprep.subr.bf16.mxu0 %v16904_v30  ;;  %v16964_v30 = vld [vmem:[#allocation9 + $0x570] ss:$12 sps:$4 sm:$0xff]  }
 0x377   : > { %2959 = vmatpush1.bf16.msra.mxu1 %v16899_v29  ;;  %v3185_v29 = vrot.slane %v19658_v23, 1 }
 0x378   : > { %2960 = vmatprep.subr.bf16.mxu1 %v16907_v32  ;;  %v16967_v32 = vld [vmem:[#allocation9 + $0x708] ss:$12 sps:$4 sm:$0xff]  }
 0x379   : > { %2928 = vmatpush2.bf16.msra.mxu0 %v16902_v31  ;;  %v16972_v31 = vld [vmem:[#allocation9 + $0x55c] ss:$12 sps:$4 sm:$0xff]  }
 0x37a   : > { %2929 = vmatprep.subr.bf16.mxu0 %v16910_v34  ;;  %v16970_v34 = vld [vmem:[#allocation9 + $0x558] ss:$12 sps:$4 sm:$0xff]  }
 0x37b   : > { %2961 = vmatpush1.bf16.msra.mxu1 %v16905_v33  ;;  %v16975_v33 = vld [vmem:[#allocation9 + $0x6f4] ss:$12 sps:$4 sm:$0xff]  }
 0x37c   : > { %2962 = vmatprep.subr.bf16.mxu1 %v16913_v36  ;;  %v3187_v36 = vrot.slane %v19644_v46, 1 }
 0x37d   : > { %2930 = vmatpush2.bf16.msra.mxu0 %v16908_v35  ;;  %v16978_v35 = vld [vmem:[#allocation9 + $0x544] ss:$12 sps:$4 sm:$0xff]  }
 0x37e   : > { %2931 = vmatprep.subr.bf16.mxu0 %v16916_v38  ;;  %v16981_v38 = vld [vmem:[#allocation9 + $0x6dc] ss:$12 sps:$4 sm:$0xff]  }
 0x37f   : > { %2963 = vmatpush1.bf16.msra.mxu1 %v16911_v37  ;;  %v16973_v37 = vld [vmem:[#allocation9 + $0x6f0] ss:$12 sps:$4 sm:$0xff]  }
 0x380   : > { %2964 = vmatprep.subr.bf16.mxu1 %v16919_v40  ;;  %v16984_v40 = vld [vmem:[#allocation9 + $0x52c] ss:$12 sps:$4 sm:$0xff]  }
 0x381   : > { %2932 = vmatpush2.bf16.msra.mxu0 %v16914_v39  ;;  %v16976_v39 = vld [vmem:[#allocation9 + $0x540] ss:$12 sps:$4 sm:$0xff]  }
 0x382   : > { %2933 = vmatprep.subr.bf16.mxu0 %v16922_v42  ;;  %v16979_v42 = vld [vmem:[#allocation9 + $0x6d8] ss:$12 sps:$4 sm:$0xff]  }
 0x383   : > { %2965 = vmatpush1.bf16.msra.mxu1 %v16917_v44  ;;  %v16987_v44 = vld [vmem:[#allocation9 + $0x6c4] ss:$12 sps:$4 sm:$0xff]  }
 0x384   : > { %2978 = vmatprep.subr.bf16.mxu1 %v16925_v48  ;;  %v16990_v48 = vld [vmem:[#allocation9 + $0x514] ss:$12 sps:$4 sm:$0xff]  }
 0x385   : > { %2934 = vmatpush2.bf16.msra.mxu0 %v16920_v47  ;;  %v16982_v47 = vld [vmem:[#allocation9 + $0x528] ss:$12 sps:$4 sm:$0xff]  }
 0x386   : > { %2935 = vmatprep.subr.bf16.mxu0 %v16928_v49  ;;  %v16985_v49 = vld [vmem:[#allocation9 + $0x6c0] ss:$12 sps:$4 sm:$0xff]  }
 0x387   : > { %2979 = vmatpush2.bf16.msra.mxu1 %v16923_v50  ;;  %v16993_v50 = vld [vmem:[#allocation9 + $0x6ac] ss:$12 sps:$4 sm:$0xff]  }
 0x388   : > { %2980 = vmatprep.subr.bf16.mxu1 %v16931_v52  ;;  %v16996_v52 = vld [vmem:[#allocation9 + $0x4fc] ss:$12 sps:$4 sm:$0xff]  }
 0x389   : > { %2936 = vmatpush2.bf16.msra.mxu0 %v16926_v51  ;;  %v16988_v51 = vld [vmem:[#allocation9 + $0x510] ss:$12 sps:$4 sm:$0xff]  }
 0x38a   : > { %2937 = vmatprep.subr.bf16.mxu0 %v16934_v54  ;;  %v16999_v54 = vld [vmem:[#allocation9 + $0x694] ss:$12 sps:$4 sm:$0xff]  }
 0x38b   : > { %2981 = vmatpush2.bf16.msra.mxu1 %v16929_v53  ;;  %v16991_v53 = vld [vmem:[#allocation9 + $0x6a8] ss:$12 sps:$4 sm:$0xff]  }
 0x38c   : > { %3034 = vmatprep.subr.bf16.mxu1 %v19133_v19 }
 0x38d   : > { %2938 = vmatpush2.bf16.msra.mxu0 %v16932_v55  ;;  %v16994_v55 = vld [vmem:[#allocation9 + $0x4f8] ss:$12 sps:$4 sm:$0xff]  }
 0x38e   : > { %2983 = vmatmul.mubr.bf16.vlgmr.msra.gmra.mxu1 %v19636_v41  ;;  %16101 = vmatprep.subr.bf16.mxu0 %v16936_v57  ;;  %v16997_v57 = vld [vmem:[#allocation9 + $0x690] ss:$12 sps:$4 sm:$0xff]  }
 0x38f   : > { %3035 = vmatpush1.bf16.msra.mxu1 %v16935_v56  ;;  %14891 = vmatprep.mubr.msk.bf16.mxu1 %vm2317_vm5, %v19644_v46  ;;  %v17002_v56 = vld [vmem:[#allocation9 + $0x4e4] ss:$12 sps:$4 sm:$0xff]   ;;  %v17065_v46 = vld [vmem:[#allocation12 + $0x2b8] ss:$12 sps:$4 sm:$0xff]  }
 0x390   : > { %2940 = vmatmul.mubr.bf16.vlgmr.msra.gmra.mxu0 %v19656_v21  ;;  %3036 = vmatprep.subr.bf16.mxu1 %v19133_v19 }
 0x391   : > { %16102 = vmatpush3.bf16.msra.mxu0 %v16937_v58  ;;  %3025 = vmatprep.mubr.bf16.mxu0 %v19658_v23  ;;  %v17005_v58 = vld [vmem:[#allocation9 + $0x67c] ss:$12 sps:$4 sm:$0xff]  }
 0x392   : > { %16103 = vmatprep.subr.bf16.mxu0 %v16939_v59  ;;  %v17000_v59 = vld [vmem:[#allocation9 + $0x4e0] ss:$12 sps:$4 sm:$0xff]   ;;  %v17048_v23 = vld [vmem:[#allocation9 + $0x530] ss:$12 sps:$4 sm:$0xff]  }
 0x393   : > { %3037 = vmatpush1.bf16.msra.mxu1 %v16938_v60  ;;  %v17008_v60 = vld [vmem:[#allocation9 + $0x64c] ss:$12 sps:$4 sm:$0xff]  }
 0x394   : > { %3038 = vmatprep.subr.bf16.mxu1 %v19133_v19 }
 0x395   : > { %16104 = vmatpush3.bf16.msra.mxu0 %v16940_v61  ;;  %v17003_v61 = vld [vmem:[#allocation9 + $0x678] ss:$12 sps:$4 sm:$0xff]  }
 0x396   : > { %16105 = vmatprep.subr.bf16.mxu0 %v16942_v62  ;;  %v17011_v62 = vld [vmem:[#allocation9 + $0x664] ss:$12 sps:$4 sm:$0xff]  }
 0x397   : > { %3039 = vmatpush1.bf16.msra.mxu1 %v16941_v63  ;;  %v17006_v63 = vld [vmem:[#allocation9 + $0x648] ss:$12 sps:$4 sm:$0xff]  }
 0x398   : > { %3040 = vmatprep.subr.bf16.mxu1 %v19133_v19 }
 0x399   : > { %16106 = vmatpush3.bf16.msra.mxu0 %v16943_v1  ;;  %v17014_v1 = vld [vmem:[#allocation9 + $0x634] ss:$12 sps:$4 sm:$0xff]  }
 0x39a   : > { %16107 = vmatprep.subr.bf16.mxu0 %v16945_v2  ;;  %v17009_v2 = vld [vmem:[#allocation9 + $0x660] ss:$12 sps:$4 sm:$0xff]  }
 0x39b   : > { %3041 = vmatpush1.bf16.msra.mxu1 %v16944_v3  ;;  %v17017_v3 = vld [vmem:[#allocation9 + $0x73c] ss:$12 sps:$4 sm:$0xff]  }
 0x39c   : > { %3042 = vmatprep.subr.bf16.mxu1 %v19133_v19 }
 0x39d   : > { %16108 = vmatpush3.bf16.msra.mxu0 %v16946_v4  ;;  %v17012_v4 = vld [vmem:[#allocation9 + $0x630] ss:$12 sps:$4 sm:$0xff]  }
 0x39e   : > { %16109 = vmatprep.subr.bf16.mxu0 %v16948_v5  ;;  %v17020_v5 = vld [vmem:[#allocation9 + $0x61c] ss:$12 sps:$4 sm:$0xff]  }
 0x39f   : > { %3043 = vmatpush1.bf16.msra.mxu1 %v16947_v8  ;;  %v17015_v8 = vld [vmem:[#allocation9 + $0x738] ss:$12 sps:$4 sm:$0xff]  }
 0x3a0   : > { %3044 = vmatprep.subr.bf16.mxu1 %v19133_v19 }
 0x3a1   : > { %16110 = vmatpush3.bf16.msra.mxu0 %v16949_v12  ;;  %v17023_v12 = vld [vmem:[#allocation9 + $0x724] ss:$12 sps:$4 sm:$0xff]  }
 0x3a2   : > { %16111 = vmatprep.subr.bf16.mxu0 %v16951_v10  ;;  %v17018_v10 = vld [vmem:[#allocation9 + $0x618] ss:$12 sps:$4 sm:$0xff]  }
 0x3a3   : > { %3045 = vmatpush1.bf16.msra.mxu1 %v16950_v13  ;;  %v17026_v13 = vld [vmem:[#allocation9 + $0x604] ss:$12 sps:$4 sm:$0xff]  }
 0x3a4   : > { %3046 = vmatprep.subr.bf16.mxu1 %v19133_v19 }
 0x3a5   : > { %16112 = vmatpush3.bf16.msra.mxu0 %v16952_v14  ;;  %v17021_v14 = vld [vmem:[#allocation9 + $0x720] ss:$12 sps:$4 sm:$0xff]  }
 0x3a6   : > { %16113 = vmatprep.subr.bf16.mxu0 %v16954_v16  ;;  %v3186_v16 = vrot.slane %v19636_v41, 1 }
 0x3a7   : > { %3047 = vmatpush1.bf16.msra.mxu1 %v16953_v17  ;;  %v17027_v17 = vld [vmem:[#allocation9 + $0x650] ss:$12 sps:$4 sm:$0xff]  }
 0x3a8   : > { %3048 = vmatprep.subr.bf16.mxu1 %v19133_v19 }
 0x3a9   : > { %16114 = vmatpush3.bf16.msra.mxu0 %v16955_v18  ;;  %v3184_v18 = vrot.slane %v19656_v21, 1 }
 0x3aa   : > { %16115 = vmatprep.subr.bf16.mxu0 %v16957_v9  ;;  %v17024_v9 = vld [vmem:[#allocation9 + $0x600] ss:$12 sps:$4 sm:$0xff]  }
 0x3ab   : > { %3049 = vmatpush1.bf16.msra.mxu1 %v16956_v20  ;;  %v17031_v20 = vld [vmem:[#allocation9 + $0x5ec] ss:$12 sps:$4 sm:$0xff]  }
 0x3ac   : > { %3062 = vmatprep.subr.bf16.mxu1 %v19133_v19 }
 0x3ad   : > { %16116 = vmatpush3.bf16.msra.mxu0 %v16958_v22  ;;  %v17028_v22 = vld [vmem:[#allocation9 + $0x590] ss:$12 sps:$4 sm:$0xff]  }
 0x3ae   : > { %3610 = vmatprep.subr.bf16.mxu0 %v16962_v24  ;;  %v17032_v24 = vld [vmem:[#allocation9 + $0x638] ss:$12 sps:$4 sm:$0xff]  }
 0x3af   : > { %3063 = vmatpush2.bf16.msra.mxu1 %v16959_v25  ;;  %v17029_v25 = vld [vmem:[#allocation9 + $0x5e8] ss:$12 sps:$4 sm:$0xff]  }
 0x3b0   : > { %3026 = vmatmul.mubr.bf16.vlgmr.msra.gmra.mxu0 %v19656_v21  ;;  %3064 = vmatprep.subr.bf16.mxu1 %v19133_v19  ;;  %v17074_v21 = vld [vmem:[#allocation12 + $0x270] ss:$12 sps:$4 sm:$0xff]  }
 0x3b1   : > { %3611 = vmatpush1.bf16.msra.mxu0 %v16960_v26  ;;  %3642 = vmatprep.mubr.bf16.mxu0 %v3185_v29  ;;  %v17036_v26 = vld [vmem:[#allocation9 + $0x5d4] ss:$12 sps:$4 sm:$0xff]  }
 0x3b2   : > { %3612 = vmatprep.subr.bf16.mxu0 %v16966_v7  ;;  %v17033_v7 = vld [vmem:[#allocation9 + $0x578] ss:$12 sps:$4 sm:$0xff]  }
 0x3b3   : > { %3065 = vmatpush2.bf16.msra.mxu1 %v16963_v27  ;;  %v17037_v27 = vld [vmem:[#allocation9 + $0x620] ss:$12 sps:$4 sm:$0xff]  }
 0x3b4   : > { %3653 = vmatprep.subr.bf16.mxu1 %v16969_v28  ;;  %v17034_v28 = vld [vmem:[#allocation9 + $0x5d0] ss:$12 sps:$4 sm:$0xff]  }
 0x3b5   : > { %3613 = vmatpush1.bf16.msra.mxu0 %v16964_v30  ;;  %v17041_v30 = vld [vmem:[#allocation9 + $0x5bc] ss:$12 sps:$4 sm:$0xff]  }
 0x3b6   : > { %3067 = vmatmul.mubr.bf16.vlgmr.msra.gmra.mxu1 %v19636_v41  ;;  %3614 = vmatprep.subr.bf16.mxu0 %v16972_v31  ;;  %v17038_v31 = vld [vmem:[#allocation9 + $0x560] ss:$12 sps:$4 sm:$0xff]  }
 0x3b7   : > { %3654 = vmatpush1.bf16.msra.mxu1 %v16967_v32  ;;  %14970 = vmatprep.mubr.msk.bf16.mxu1 %vm2317_vm5, %v3187_v36  ;;  %v17042_v32 = vld [vmem:[#allocation9 + $0x608] ss:$12 sps:$4 sm:$0xff]  }
 0x3b8   : > { %3655 = vmatprep.subr.bf16.mxu1 %v16975_v33  ;;  %v17039_v33 = vld [vmem:[#allocation9 + $0x5b8] ss:$12 sps:$4 sm:$0xff]  }
 0x3b9   : > { %3615 = vmatpush1.bf16.msra.mxu0 %v16970_v34  ;;  %v17046_v34 = vld [vmem:[#allocation9 + $0x5a4] ss:$12 sps:$4 sm:$0xff]  }
 0x3ba   : > { %3616 = vmatprep.subr.bf16.mxu0 %v16978_v35  ;;  %v17043_v35 = vld [vmem:[#allocation9 + $0x548] ss:$12 sps:$4 sm:$0xff]  }
 0x3bb   : > { %3656 = vmatpush1.bf16.msra.mxu1 %v16973_v37  ;;  %v17047_v37 = vld [vmem:[#allocation9 + $0x5f0] ss:$12 sps:$4 sm:$0xff]  }
 0x3bc   : > { %3657 = vmatprep.subr.bf16.mxu1 %v16981_v38  ;;  %v17044_v38 = vld [vmem:[#allocation9 + $0x5a0] ss:$12 sps:$4 sm:$0xff]  }
 0x3bd   : > { %3617 = vmatpush1.bf16.msra.mxu0 %v16976_v39  ;;  %v17049_v39 = vld [vmem:[#allocation9 + $0x710] ss:$12 sps:$4 sm:$0xff]  }
 0x3be   : > { %3618 = vmatprep.subr.bf16.mxu0 %v16984_v40  ;;  %v17051_v40 = vld [vmem:[#allocation9 + $0x518] ss:$12 sps:$4 sm:$0xff]  }
 0x3bf   : > { %3658 = vmatpush1.bf16.msra.mxu1 %v16979_v42  ;;  %v17053_v42 = vld [vmem:[#allocation9 + $0x5c0] ss:$12 sps:$4 sm:$0xff]  }
 0x3c0   : > { %3659 = vmatprep.subr.bf16.mxu1 %v16987_v44  ;;  %v17052_v44 = vld [vmem:[#allocation9 + $0x6f8] ss:$12 sps:$4 sm:$0xff]  }
 0x3c1   : > { %3619 = vmatpush1.bf16.msra.mxu0 %v16982_v47  ;;  %v17054_v47 = vld [vmem:[#allocation9 + $0x500] ss:$12 sps:$4 sm:$0xff]  }
 0x3c2   : > { %3620 = vmatprep.subr.bf16.mxu0 %v16990_v48  ;;  %v17056_v48 = vld [vmem:[#allocation9 + $0x5a8] ss:$12 sps:$4 sm:$0xff]  }
 0x3c3   : > { %3660 = vmatpush1.bf16.msra.mxu1 %v16985_v49  ;;  %v17055_v49 = vld [vmem:[#allocation9 + $0x6e0] ss:$12 sps:$4 sm:$0xff]  }
 0x3c4   : > { %3661 = vmatprep.subr.bf16.mxu1 %v16993_v50  ;;  %v17057_v50 = vld [vmem:[#allocation9 + $0x4e8] ss:$12 sps:$4 sm:$0xff]  }
 0x3c5   : > { %3621 = vmatpush1.bf16.msra.mxu0 %v16988_v51  ;;  %v17058_v51 = vld [vmem:[#allocation9 + $0x6c8] ss:$12 sps:$4 sm:$0xff]  }
 0x3c6   : > { %3622 = vmatprep.subr.bf16.mxu0 %v16996_v52  ;;  %v17059_v52 = vld [vmem:[#allocation9 + $0x6b0] ss:$12 sps:$4 sm:$0xff]  }
 0x3c7   : > { %3662 = vmatpush1.bf16.msra.mxu1 %v16991_v53  ;;  %v17070_v53 = vld [vmem:[#allocation12 + $0x2a4] ss:$12 sps:$4 sm:$0xff]  }
 0x3c8   : > { %3663 = vmatprep.subr.bf16.mxu1 %v16999_v54  ;;  %v17060_v54 = vld [vmem:[#allocation9 + $0x698] ss:$12 sps:$4 sm:$0xff]  }
 0x3c9   : > { %3623 = vmatpush1.bf16.msra.mxu0 %v16994_v55  ;;  %v17068_v55 = vld [vmem:[#allocation12 + $0x2a0] ss:$12 sps:$4 sm:$0xff]  }
 0x3ca   : > { %3624 = vmatprep.subr.bf16.mxu0 %v17002_v56  ;;  %v17073_v56 = vld [vmem:[#allocation12 + $0x28c] ss:$12 sps:$4 sm:$0xff]  }
 0x3cb   : > { %3664 = vmatpush1.bf16.msra.mxu1 %v16997_v57  ;;  %v17071_v57 = vld [vmem:[#allocation12 + $0x288] ss:$12 sps:$4 sm:$0xff]  }
 0x3cc   : > { %3665 = vmatprep.subr.bf16.mxu1 %v17005_v58  ;;  %v17061_v58 = vld [vmem:[#allocation9 + $0x680] ss:$12 sps:$4 sm:$0xff]  }
 0x3cd   : > { %3625 = vmatpush1.bf16.msra.mxu0 %v17000_v59  ;;  %v17076_v59 = vld [vmem:[#allocation12 + $0x274] ss:$12 sps:$4 sm:$0xff]  }
 0x3ce   : > { %3626 = vmatprep.subr.bf16.mxu0 %v17008_v60  ;;  %v17062_v60 = vld [vmem:[#allocation9 + $0x668] ss:$12 sps:$4 sm:$0xff]  }
 0x3cf   : > { %3666 = vmatpush1.bf16.msra.mxu1 %v17003_v61  ;;  %v17079_v61 = vld [vmem:[#allocation12 + $0x25c] ss:$12 sps:$4 sm:$0xff]  }
 0x3d0   : > { %3667 = vmatprep.subr.bf16.mxu1 %v17011_v62  ;;  %v17077_v62 = vld [vmem:[#allocation12 + $0x258] ss:$12 sps:$4 sm:$0xff]  }
 0x3d1   : > { %3627 = vmatpush2.bf16.msra.mxu0 %v17006_v63  ;;  %v17063_v63 = vld [vmem:[#allocation9 + $0x740] ss:$12 sps:$4 sm:$0xff]  }
 0x3d2   : > { %3628 = vmatprep.subr.bf16.mxu0 %v17014_v1  ;;  %v17082_v1 = vld [vmem:[#allocation12 + $0x244] ss:$12 sps:$4 sm:$0xff]  }
 0x3d3   : > { %3668 = vmatpush1.bf16.msra.mxu1 %v17009_v2  ;;  %v17080_v2 = vld [vmem:[#allocation12 + $0x240] ss:$12 sps:$4 sm:$0xff]  }
 0x3d4   : > { %3681 = vmatprep.subr.bf16.mxu1 %v17017_v3  ;;  %v17064_v3 = vld [vmem:[#allocation9 + $0x728] ss:$12 sps:$4 sm:$0xff]  }
 0x3d5   : > { %3629 = vmatpush2.bf16.msra.mxu0 %v17012_v4 }
 0x3d6   : > { %3630 = vmatprep.subr.bf16.mxu0 %v17020_v5 }
 0x3d7   : > { %3682 = vmatpush2.bf16.msra.mxu1 %v17015_v8  ;;  %v17085_v8 = vld [vmem:[#allocation12 + $0x22c] ss:$12 sps:$4 sm:$0xff]  }
 0x3d8   : > { %3683 = vmatprep.subr.bf16.mxu1 %v17023_v12  ;;  %v17083_v12 = vld [vmem:[#allocation12 + $0x228] ss:$12 sps:$4 sm:$0xff]  }
 0x3d9   : > { %3631 = vmatpush2.bf16.msra.mxu0 %v17018_v10 }
 0x3da   : > { %3632 = vmatprep.subr.bf16.mxu0 %v17026_v13  ;;  %v17088_v13 = vld [vmem:[#allocation12 + $0x214] ss:$12 sps:$4 sm:$0xff]  }
 0x3db   : > { %3684 = vmatpush2.bf16.msra.mxu1 %v17021_v14  ;;  %v17086_v14 = vld [vmem:[#allocation12 + $0x210] ss:$12 sps:$4 sm:$0xff]  }
 0x3dc   : > { %16123 = vmatprep.subr.bf16.mxu1 %v17027_v17 }
 0x3dd   : > { %3633 = vmatpush2.bf16.msra.mxu0 %v17024_v9  ;;  %v17089_v9 = vld [vmem:[#allocation12 + $0x378] ss:$12 sps:$4 sm:$0xff]  }
 0x3de   : > { %3686 = vmatmul.mubr.bf16.vlgmr.msra.gmra.mxu1 %v3186_v16  ;;  %3634 = vmatprep.subr.bf16.mxu0 %v17031_v20 }
 0x3df   : > { %16124 = vmatpush3.bf16.msra.mxu1 %v17028_v22  ;;  %3728 = vmatprep.mubr.bf16.mxu1 %v3185_v29  ;;  %v17050_v29 = vld [vmem:[#allocation9 + $0x5d8] ss:$12 sps:$4 sm:$0xff]   ;;  %v17092_v22 = vld [vmem:[#allocation12 + $0x360] ss:$12 sps:$4 sm:$0xff]  }
 0x3e0   : > { %16125 = vmatprep.subr.bf16.mxu1 %v17032_v24 }
 0x3e1   : > { %3635 = vmatpush2.bf16.msra.mxu0 %v17029_v25 }
 0x3e2   : > { %3636 = vmatprep.subr.bf16.mxu0 %v17036_v26  ;;  %v17097_v26 = vld [vmem:[#allocation12 + $0x34c] ss:$12 sps:$4 sm:$0xff]  }
 0x3e3   : > { %16126 = vmatpush3.bf16.msra.mxu1 %v17033_v7  ;;  %v17095_v7 = vld [vmem:[#allocation12 + $0x348] ss:$12 sps:$4 sm:$0xff]  }
 0x3e4   : > { %16127 = vmatprep.subr.bf16.mxu1 %v17037_v27  ;;  %v17100_v27 = vld [vmem:[#allocation12 + $0x334] ss:$12 sps:$4 sm:$0xff]  }
 0x3e5   : > { %3637 = vmatpush2.bf16.msra.mxu0 %v17034_v28  ;;  %v17098_v28 = vld [vmem:[#allocation12 + $0x330] ss:$12 sps:$4 sm:$0xff]  }
 0x3e6   : > { %3638 = vmatprep.subr.bf16.mxu0 %v17041_v30 }
 0x3e7   : > { %16128 = vmatpush3.bf16.msra.mxu1 %v17038_v31  ;;  %v17103_v31 = vld [vmem:[#allocation12 + $0x31c] ss:$12 sps:$4 sm:$0xff]  }
 0x3e8   : > { %16129 = vmatprep.subr.bf16.mxu1 %v17042_v32  ;;  %v17101_v32 = vld [vmem:[#allocation12 + $0x318] ss:$12 sps:$4 sm:$0xff]  }
 0x3e9   : > { %3639 = vmatpush2.bf16.msra.mxu0 %v17039_v33 }
 0x3ea   : > { %3640 = vmatprep.subr.bf16.mxu0 %v17046_v34  ;;  %v17106_v34 = vld [vmem:[#allocation12 + $0x304] ss:$12 sps:$4 sm:$0xff]  }
 0x3eb   : > { %16130 = vmatpush3.bf16.msra.mxu1 %v17043_v35  ;;  %v17104_v35 = vld [vmem:[#allocation12 + $0x300] ss:$12 sps:$4 sm:$0xff]  }
 0x3ec   : > { %16131 = vmatprep.subr.bf16.mxu1 %v17047_v37 }
 0x3ed   : > { %3641 = vmatpush2.bf16.msra.mxu0 %v17044_v38  ;;  %v17109_v38 = vld [vmem:[#allocation12 + $0x2ec] ss:$12 sps:$4 sm:$0xff]  }
 0x3ee   : > { %3737 = vmatprep.subr.bf16.mxu0 %v19133_v19 }
 0x3ef   : > { %16132 = vmatpush3.bf16.msra.mxu1 %v17048_v23  ;;  %v17107_v23 = vld [vmem:[#allocation12 + $0x2e8] ss:$12 sps:$4 sm:$0xff]  }
 0x3f0   : > { %3643 = vmatmul.mubr.bf16.vlgmr.msra.gmra.mxu0 %v3184_v18  ;;  %16133 = vmatprep.subr.bf16.mxu1 %v17050_v29  ;;  %v2398_v30 = vpop.f32.mrf.mxu0 }
 0x3f1   : > { %3738 = vmatpush1.bf16.msra.mxu0 %v17049_v39  ;;  %14971 = vmatprep.mubr.msk.bf16.mxu0 %vm2317_vm5, %v3187_v36  ;;  %v17067_v36 = vld [vmem:[#allocation12 + $0x2bc] ss:$12 sps:$4 sm:$0xff]  }
 0x3f2   : > { %3739 = vmatprep.subr.bf16.mxu0 %v19133_v19  ;;  %v2400_v33 = vpop.f32.mrf.mxu0 }
 0x3f3   : > { %16134 = vmatpush3.bf16.msra.mxu1 %v17051_v40  ;;  %v17112_v40 = vld [vmem:[#allocation12 + $0x2d4] ss:$12 sps:$4 sm:$0xff]  }
 0x3f4   : > { %16135 = vmatprep.subr.bf16.mxu1 %v17053_v42  ;;  %v2402_v37 = vpop.f32.mrf.mxu0  ;;  %v17110_v42 = vld [vmem:[#allocation12 + $0x2d0] ss:$12 sps:$4 sm:$0xff]  }
 0x3f5   : > { %3740 = vmatpush1.bf16.msra.mxu0 %v17052_v44 }
 0x3f6   : > { %3741 = vmatprep.subr.bf16.mxu0 %v19133_v19  ;;  %v19740_v29 = vpop.f32.mrf.mxu0 }
 0x3f7   : > { %16136 = vmatpush3.bf16.msra.mxu1 %v17054_v47  ;;  %v17113_v47 = vld [vmem:[#allocation12 + $0x408] ss:$12 sps:$4 sm:$0xff]  }
 0x3f8   : > { %16137 = vmatprep.subr.bf16.mxu1 %v17056_v48  ;;  %v17115_v48 = vld [vmem:[#allocation12 + $0x40c] ss:$12 sps:$4 sm:$0xff]  }
 0x3f9   : > { %3742 = vmatpush1.bf16.msra.mxu0 %v17055_v49 }
 0x3fa   : > { %3743 = vmatprep.subr.bf16.mxu0 %v19133_v19 }
 0x3fb   : > { %16138 = vmatpush3.bf16.msra.mxu1 %v17057_v50 }
 0x3fc   : > { %4372 = vmatprep.subr.bf16.mxu1 %v17067_v36 }
 0x3fd   : > { %3744 = vmatpush1.bf16.msra.mxu0 %v17058_v51 }
 0x3fe   : > { %3729 = vmatmul.mubr.bf16.vlgmr.msra.gmra.mxu1 %v3184_v18  ;;  %3745 = vmatprep.subr.bf16.mxu0 %v19133_v19  ;;  %v19725_v4 = vpop.f32.mrf.mxu1  ;;  %v17091_v18 = vld [vmem:[#allocation12 + $0x37c] ss:$12 sps:$4 sm:$0xff]  }
 0x3ff   : > { %4373 = vmatpush1.bf16.msra.mxu1 %v17065_v46  ;;  %v2399_v46 = vadd.f32 %v2398_v30, %v19725_v4  ;;  %v17127_v4 = vld [vmem:[#allocation12 + $0x3c4] ss:$12 sps:$4 sm:$0xff]  }
 0x400   : > { %4374 = vmatprep.subr.bf16.mxu1 %v17070_v53  ;;  %v19730_v5 = vpop.f32.mrf.mxu1 }
 0x401   : > { %3746 = vmatpush1.bf16.msra.mxu0 %v17059_v52  ;;  %v2401_v52 = vadd.f32 %v2400_v33, %v19730_v5  ;;  %v17125_v5 = vld [vmem:[#allocation12 + $0x3c0] ss:$12 sps:$4 sm:$0xff]  }
 0x402   : > { %3747 = vmatprep.subr.bf16.mxu0 %v19133_v19  ;;  %v19732_v10 = vpop.f32.mrf.mxu1 }
 0x403   : > { %4375 = vmatpush1.bf16.msra.mxu1 %v17068_v55 }
 0x404   : > { %4376 = vmatprep.subr.bf16.mxu1 %v17073_v56  ;;  %v19734_v17 = vpop.f32.mrf.mxu1  ;;  %v2403_v56 = vadd.f32 %v2402_v37, %v19732_v10  ;;  %v17133_v10 = vld [vmem:[#allocation12 + $0x390] ss:$12 sps:$4 sm:$0xff]  }
 0x405   : > { %3748 = vmatpush1.bf16.msra.mxu0 %v17060_v54 }
 0x406   : > { %3749 = vmatprep.subr.bf16.mxu0 %v19133_v19 }
 0x407   : > { %4377 = vmatpush1.bf16.msra.mxu1 %v17071_v57 }
 0x408   : > { %4378 = vmatprep.subr.bf16.mxu1 %v17076_v59 }
 0x409   : > { %3750 = vmatpush1.bf16.msra.mxu0 %v17061_v58 }
 0x40a   : > { %3751 = vmatprep.subr.bf16.mxu0 %v19133_v19 }
 0x40b   : > { %4379 = vmatpush1.bf16.msra.mxu1 %v17074_v21 }
 0x40c   : > { %4380 = vmatprep.subr.bf16.mxu1 %v17079_v61 }
 0x40d   : > { %3752 = vmatpush1.bf16.msra.mxu0 %v17062_v60 }
 0x40e   : > { %3765 = vmatprep.subr.bf16.mxu0 %v19133_v19 }
 0x40f   : > { %4381 = vmatpush1.bf16.msra.mxu1 %v17077_v62  ;;  %v17119_v62 = vld [vmem:[#allocation12 + $0x3f4] ss:$12 sps:$4 sm:$0xff]  }
 0x410   : > { %4382 = vmatprep.subr.bf16.mxu1 %v17082_v1  ;;  %v16095_v39 = vpop.f32.mrf.mxu0  ;;  %v17117_v1 = vld [vmem:[#allocation12 + $0x3f0] ss:$12 sps:$4 sm:$0xff]  }
 0x411   : > { %3766 = vmatpush2.bf16.msra.mxu0 %v17063_v63 }
 0x412   : > { %3767 = vmatprep.subr.bf16.mxu0 %v19133_v19  ;;  %v16096_v44 = vpop.f32.mrf.mxu0 }
 0x413   : > { %4383 = vmatpush1.bf16.msra.mxu1 %v17080_v2  ;;  %v17123_v2 = vld [vmem:[#allocation12 + $0x3dc] ss:$12 sps:$4 sm:$0xff]  }
 0x414   : > { %4384 = vmatprep.subr.bf16.mxu1 %v17085_v8  ;;  %v16098_v49 = vpop.f32.mrf.mxu0  ;;  %v17131_v8 = vld [vmem:[#allocation12 + $0x3ac] ss:$12 sps:$4 sm:$0xff]  }
 0x415   : > { %3768 = vmatpush2.bf16.msra.mxu0 %v17064_v3  ;;  %v17121_v3 = vld [vmem:[#allocation12 + $0x3d8] ss:$12 sps:$4 sm:$0xff]  }
 0x416   : > { %4419 = vmatprep.subr.bf16.mxu0 %v17115_v48  ;;  %v16099_v50 = vpop.f32.mrf.mxu0 }
 0x417   : > { %4385 = vmatpush1.bf16.msra.mxu1 %v17083_v12  ;;  %v17129_v12 = vld [vmem:[#allocation12 + $0x3a8] ss:$12 sps:$4 sm:$0xff]  }
 0x418   : > { %3770 = vmatmul.mubr.bf16.vlgmr.msra.gmra.mxu0 %v3186_v16  ;;  %4386 = vmatprep.subr.bf16.mxu1 %v17088_v13  ;;  %v17094_v16 = vld [vmem:[#allocation12 + $0x364] ss:$12 sps:$4 sm:$0xff]   ;;  %v17135_v13 = vld [vmem:[#allocation12 + $0x394] ss:$12 sps:$4 sm:$0xff]  }
 0x419   : > { %4447 = vmatprep.mubr.bf16.mxu0 %v19133_v19  ;;  %4420 = vmatpush1.bf16.msra.mxu0 %v17113_v47  ;;  %v2405_v47 = vadd.f32 %v19740_v29, %v19734_v17 }
 0x41a   : > { %4421 = vmatprep.subr.bf16.mxu0 %v17119_v62 }
 0x41b   : > { %4387 = vmatpush1.bf16.msra.mxu1 %v17086_v14  ;;  %v17137_v14 = vld [vmem:[#allocation12 + $0x380] ss:$12 sps:$4 sm:$0xff]  }
 0x41c   : > { %4388 = vmatprep.subr.bf16.mxu1 %v17091_v18 }
 0x41d   : > { %4422 = vmatpush1.bf16.msra.mxu0 %v17117_v1 }
 0x41e   : > { %4423 = vmatprep.subr.bf16.mxu0 %v17123_v2 }
 0x41f   : > { %4389 = vmatpush2.bf16.msra.mxu1 %v17089_v9 }
 0x420   : > { %4390 = vmatprep.subr.bf16.mxu1 %v17094_v16  ;;  %v16097_v16 = vadd.f32 %v16096_v44, %v16095_v39  ;;  %v19752_v44 = vld [vmem:[#allocation10] sm:$0x7] }
 0x421   : > { %4424 = vmatpush1.bf16.msra.mxu0 %v17121_v3 }
 0x422   : > { %4425 = vmatprep.subr.bf16.mxu0 %v17127_v4 }
 0x423   : > { %4391 = vmatpush2.bf16.msra.mxu1 %v17092_v22 }
 0x424   : > { %4392 = vmatprep.subr.bf16.mxu1 %v17097_v26 }
 0x425   : > { %4426 = vmatpush1.bf16.msra.mxu0 %v17125_v5 }
 0x426   : > { %v19736_v41 = vpop.f32.mrf.mxu1  ;;  %4427 = vmatprep.subr.bf16.mxu0 %v17131_v8 }
 0x427   : > { %4393 = vmatpush2.bf16.msra.mxu1 %v17095_v7  ;;  %v2483_v22 = vadd.f32 %v16097_v16, %v19736_v41  ;;  %v17116_v16 = vld [vmem:[#allocation12 + $0x410] ss:$12 sps:$4 sm:$0xff]  }
 0x428   : > { %v2484_v20 = vpop.f32.mrf.mxu1  ;;  %4394 = vmatprep.subr.bf16.mxu1 %v17100_v27  ;;  %v16100_v27 = vadd.f32 %v16099_v50, %v16098_v49 }
 0x429   : > { %4428 = vmatpush1.bf16.msra.mxu0 %v17129_v12 }
 0x42a   : > { %v19738_v24 = vpop.f32.mrf.mxu1  ;;  %4429 = vmatprep.subr.bf16.mxu0 %v17135_v13 }
 0x42b   : > { %4395 = vmatpush2.bf16.msra.mxu1 %v17098_v28 }
 0x42c   : > { %v2487_v25 = vpop.f32.mrf.mxu1  ;;  %4396 = vmatprep.subr.bf16.mxu1 %v17103_v31 }
 0x42d   : > { %4430 = vmatpush1.bf16.msra.mxu0 %v17133_v10 }
 0x42e   : > { %16145 = vmatprep.subr.bf16.mxu0 %v17137_v14 }
 0x42f   : > { %4397 = vmatpush2.bf16.msra.mxu1 %v17101_v32  ;;  %v2486_v32 = vadd.f32 %v16100_v27, %v19738_v24  ;;  %v17128_v27 = vld [vmem:[#allocation12 + $0x3c8] ss:$12 sps:$4 sm:$0xff]  }
 0x430   : > { %4398 = vmatprep.subr.bf16.mxu1 %v17106_v34 }
 0x433   : > { %4399 = vmatpush2.bf16.msra.mxu1 %v17104_v35 }
 0x434   : > { %4400 = vmatprep.subr.bf16.mxu1 %v17109_v38 }
 0x437   : > { %4401 = vmatpush2.bf16.msra.mxu1 %v17107_v23 }
 0x438   : > { %4402 = vmatprep.subr.bf16.mxu1 %v17112_v40 }
 0x43b   : > { %4403 = vmatpush2.bf16.msra.mxu1 %v17110_v42 }
 0x43c   : > { %16389 = vmatprep.subr.bf16.mxu1 %v19131_v0 }
 0x44e   : > { %v2984_v51 = vpop.f32.mrf.mxu1 }
 0x450   : > { %v2941_v36 = vpop.f32.mrf.mxu0  ;;  %v2986_v54 = vpop.f32.mrf.mxu1 }
 0x451   : > { %v2942_v53 = vadd.f32 %v2941_v36, %v2399_v46  ;;  %v3789_v46 = vrot.slane %v19752_v44, %v19639_v43 }
 0x452   : > { %v2943_v55 = vpop.f32.mrf.mxu0  ;;  %v2988_v61 = vpop.f32.mrf.mxu1 }
 0x453   : > { %v2985_v57 = vadd.f32 %v2984_v51, %v2942_v53  ;;  %v2944_v58 = vadd.f32 %v2943_v55, %v2401_v52 }
 0x454   : > { %v2945_v59 = vpop.f32.mrf.mxu0  ;;  %v2990_v26 = vpop.f32.mrf.mxu1 }
 0x455   : > { %v2987_v21 = vadd.f32 %v2986_v54, %v2944_v58  ;;  %v2946_v60 = vadd.f32 %v2945_v59, %v2403_v56  ;;  %v3793_v54 = vrot.slane %v19752_v44, %v19642_v45 }
 0x456   : > { %v2947_v18 = vpop.f32.mrf.mxu0 }
 0x457   : > { %v2989_v63 = vadd.f32 %v2988_v61, %v2946_v60  ;;  %v2948_v50 = vadd.f32 %v2947_v18, %v2405_v47 }
 0x459   : > { %v2991_v59 = vadd.f32 %v2990_v26, %v2948_v50  ;;  %v17124_v26 = vld [vmem:[#allocation12 + $0x3e0] ss:$12 sps:$4 sm:$0xff]  }
 0x470   : > { %v16117_v9 = vpop.f32.mrf.mxu0 }
 0x472   : > { %v16118_v20 = vpop.f32.mrf.mxu0 }
 0x473   : > { %v16119_v25 = vadd.f32 %v16118_v20, %v16117_v9 }
 0x474   : > { %v16120_v7 = vpop.f32.mrf.mxu0 }
 0x475   : > { %v3028_v28 = vadd.f32 %v16119_v25, %v2483_v22  ;;  %v17120_v22 = vld [vmem:[#allocation12 + $0x3f8] ss:$12 sps:$4 sm:$0xff]  }
 0x476   : > { %v16121_v30 = vpop.f32.mrf.mxu0  ;;  %v3068_v31 = vpop.f32.mrf.mxu1 }
 0x477   : > { %v16122_v33 = vadd.f32 %v16121_v30, %v16120_v7  ;;  %v19748_v34 = vadd.f32 %v3068_v31, %v3028_v28  ;;  %v17132_v30 = vld [vmem:[#allocation12 + $0x3b0] ss:$12 sps:$4 sm:$0xff]  }
 0x478   : > { %v3070_v35 = vpop.f32.mrf.mxu1 }
 0x479   : > { %v3031_v37 = vadd.f32 %v16122_v33, %v2486_v32 }
 0x47a   : > { %v3071_v38 = vpop.f32.mrf.mxu1 }
 0x47b   : > { %v19750_v23 = vadd.f32 %v3071_v38, %v3031_v37  ;;  %v17136_v37 = vld [vmem:[#allocation12 + $0x398] ss:$12 sps:$4 sm:$0xff]  }
 0x47c   : > { %v3073_v39 = vpop.f32.mrf.mxu1 }
 0x47d   : > { %v17140_v39 = vld [vmem:[#allocation12 + $0x1fc] ss:$12 sps:$4 sm:$0xff]  }
 0x49e   : > { %v3687_v40 = vpop.f32.mrf.mxu1 }
 0x4a0   : > { %v3689_v41 = vpop.f32.mrf.mxu1 }
 0x4a2   : > { %v3691_v49 = vpop.f32.mrf.mxu1 }
 0x4a4   : > { %v3693_v56 = vpop.f32.mrf.mxu1 }
 0x4b0   : > { %v3644_v42 = vpop.f32.mrf.mxu0 }
 0x4b1   : > { %v3688_v48 = vadd.f32 %v3687_v40, %v3644_v42  ;;  %v3797_v42 = vrot.slane %v19752_v44, %v19630_v11  ;;  %v17141_v44 = vld [vmem:[#allocation12 + $0x2c0] ss:$12 sps:$4 sm:$0xff]  }
 0x4b2   : > { %v3646_v24 = vpop.f32.mrf.mxu0 }
 0x4b3   : > { %v3778_v51 = vadd.f32 %v3688_v48, %v2985_v57  ;;  %v3690_v36 = vadd.f32 %v3689_v41, %v3646_v24 }
 0x4b4   : > { %v3648_v52 = vpop.f32.mrf.mxu0 }
 0x4b5   : > { %v3779_v53 = vadd.f32 %v3690_v36, %v2987_v21  ;;  %v3692_v55 = vadd.f32 %v3691_v49, %v3648_v52  ;;  %v3801_v60 = vadd.f32 %v3789_v46, %v3778_v51 }
 0x4b6   : > { %v3650_v58 = vpop.f32.mrf.mxu0 }
 0x4b7   : > { %v3781_v17 = vadd.f32 %v3692_v55, %v2989_v63  ;;  %v3694_v29 = vadd.f32 %v3693_v56, %v3650_v58  ;;  %v3802_v61 = vadd.f32 %v3793_v54, %v3779_v53  ;;  %v3807_v57 = vmax.f32 %v3801_v60, 0.0  ;;  %v17138_v55 = vld [vmem:[#allocation12 + $0x1f8] ss:$12 sps:$4 sm:$0xff]   ;;  %v17142_v58 = vld [vmem:[#allocation12 + $0x368] ss:$12 sps:$4 sm:$0xff]  }
 0x4b8   : > { %v17146_v60 = vld [vmem:[#allocation12 + $0x2a8] ss:$12 sps:$4 sm:$0xff]  }
 0x4b9   : > { %v3804_v62 = vadd.f32 %v3789_v46, %v3781_v17  ;;  %v3782_v1 = vadd.f32 %v3694_v29, %v2991_v59  ;;  %v3808_v4 = vmax.f32 %v3802_v61, 0.0  ;;  %v17145_v59 = vld [vmem:[#allocation12 + $0x1e4] ss:$12 sps:$4 sm:$0xff]   ;;  %v17150_v29 = vld [vmem:[#allocation12 + $0x1cc] ss:$12 sps:$4 sm:$0xff]  }
 0x4ba   : > { %v17147_v17 = vld [vmem:[#allocation12 + $0x350] ss:$12 sps:$4 sm:$0xff]   ;;  %v17148_v61 = vld [vmem:[#allocation12 + $0x1c8] ss:$12 sps:$4 sm:$0xff]  }
 0x4bb   : > { %v3810_v2 = vmax.f32 %v3804_v62, 0.0  ;;  %v3805_v3 = vadd.f32 %v3793_v54, %v3782_v1  ;;  %v17151_v62 = vld [vmem:[#allocation12 + $0x290] ss:$12 sps:$4 sm:$0xff]   ;;  %v17152_v1 = vld [vmem:[#allocation12 + $0x338] ss:$12 sps:$4 sm:$0xff]  }
 0x4bd   : > { %v19760_v5 = vpack.c.bf16 %v3810_v2, %v3807_v57  ;;  %v3811_v21 = vmax.f32 %v3805_v3, 0.0  ;;  %v17155_v57 = vld [vmem:[#allocation12 + $0x1b4] ss:$12 sps:$4 sm:$0xff]   ;;  %v17153_v2 = vld [vmem:[#allocation12 + $0x1b0] ss:$12 sps:$4 sm:$0xff]  }
 0x4be   : > { %v16139_v25 = vpop.f32.mrf.mxu1  ;;  %v17156_v3 = vld [vmem:[#allocation12 + $0x278] ss:$12 sps:$4 sm:$0xff]  }
 0x4bf   : > { %v19762_v8 = vpack.c.bf16 %v3811_v21, %v3808_v4  ;;  %v3996_v12 = vshll.u32 %v19760_v5, 16  ;;  %v3994_v18 = vshrl.u32 %v19760_v5, 16  ;;  %v17157_v4 = vld [vmem:[#allocation12 + $0x320] ss:$12 sps:$4 sm:$0xff]   ;;  %v17160_v21 = vld [vmem:[#allocation12 + $0x19c] ss:$12 sps:$4 sm:$0xff]  }
 0x4c0   : > { %v16140_v7 = vpop.f32.mrf.mxu1 }
 0x4c1   : > { %v4003_v10 = vshll.u32 %v19762_v8, 16  ;;  %v3998_v13 = vrot.slane %v3996_v12, 1  ;;  %v4001_v63 = vshrl.u32 %v19762_v8, 16  ;;  %v16141_v31 = vadd.f32 %v16140_v7, %v16139_v25  ;;  %v17158_v12 = vld [vmem:[#allocation12 + $0x198] ss:$12 sps:$4 sm:$0xff]  }
 0x4c2   : > { %v16142_v28 = vpop.f32.mrf.mxu1  ;;  %v17170_v25 = vld [vmem:[#allocation12 + $0xb0] ss:$12 sps:$4 sm:$0xff]   ;;  %v17172_v7 = vld [vmem:[#allocation12 + $0x158] ss:$12 sps:$4 sm:$0xff]  }
 0x4c3   : > { %v4005_v14 = vrot.slane %v4003_v10, 1  ;;  %v19768_v20 = vor.u32 %v3998_v13, %v3994_v18  ;;  %v17161_v10 = vld [vmem:[#allocation12 + $0x260] ss:$12 sps:$4 sm:$0xff]   ;;  %v17162_v13 = vld [vmem:[#allocation12 + $0x308] ss:$12 sps:$4 sm:$0xff]  }
 0x4c4   : > { %v16143_v32 = vpop.f32.mrf.mxu1  ;;  %v17166_v18 = vld [vmem:[#allocation12 + $0x248] ss:$12 sps:$4 sm:$0xff]  }
 0x4c5   : > { %v4006_v9 = vor.u32 %v4005_v14, %v4001_v63  ;;  %v16144_v40 = vadd.f32 %v16143_v32, %v16142_v28  ;;  %v17165_v63 = vld [vmem:[#allocation12 + $0x184] ss:$12 sps:$4 sm:$0xff]   ;;  %v17163_v14 = vld [vmem:[#allocation12 + $0x180] ss:$12 sps:$4 sm:$0xff]   ;;  %v17175_v32 = vld [vmem:[#allocation12 + $0xa8] ss:$12 sps:$4 sm:$0xff]  }
 0x4c6   : > { %v17174_v28 = vld [vmem:[#allocation12 + $0x98] ss:$12 sps:$4 sm:$0xff]  }
 0x4c7   : > { %4404 = vmatprep.mubr.bf16.mxu1 %v4006_v9 }
 0x4c8   : > { %4405 = vmatmul.mubr.bf16.vlgmr.msra.gmra.mxu1 %v19768_v20 }
 0x4c9   : > { %16390 = vmatpush3.bf16.msra.mxu1 %v17116_v16  ;;  %16401 = vmatprep.mubr.msk.bf16.mxu1 %vm19132_vm0, %v19131_v0  ;;  %v17168_v16 = vld [vmem:[#allocation12 + $0x170] ss:$12 sps:$4 sm:$0xff]  }
 0x4ca   : > { %16391 = vmatprep.subr.bf16.mxu1 %v19131_v0 }
 0x4cd   : > { %16392 = vmatpush3.bf16.msra.mxu1 %v17120_v22  ;;  %v17169_v22 = vld [vmem:[#allocation12 + $0x230] ss:$12 sps:$4 sm:$0xff]  }
 0x4ce   : > { %16393 = vmatprep.subr.bf16.mxu1 %v19131_v0 }
 0x4d1   : > { %16394 = vmatpush3.bf16.msra.mxu1 %v17124_v26  ;;  %v17171_v26 = vld [vmem:[#allocation12 + $0x2d8] ss:$12 sps:$4 sm:$0xff]  }
 0x4d2   : > { %16395 = vmatprep.subr.bf16.mxu1 %v19131_v0 }
 0x4d5   : > { %16396 = vmatpush3.bf16.msra.mxu1 %v17128_v27  ;;  %v17173_v27 = vld [vmem:[#allocation12 + $0x218] ss:$12 sps:$4 sm:$0xff]  }
 0x4d6   : > { %16397 = vmatprep.subr.bf16.mxu1 %v19131_v0 }
 0x4d8   : > { %v3771_v33 = vpop.f32.mrf.mxu0 }
 0x4d9   : > { %v3772_v35 = vadd.f32 %v16141_v31, %v3771_v33  ;;  %16398 = vmatpush3.bf16.msra.mxu1 %v17132_v30  ;;  %v17177_v30 = vld [vmem:[#allocation12 + $0xac] ss:$12 sps:$4 sm:$0xff]  }
 0x4da   : > { %v3773_v38 = vpop.f32.mrf.mxu0  ;;  %16399 = vmatprep.subr.bf16.mxu1 %v19131_v0  ;;  %v17178_v31 = vld [vmem:[#allocation12 + $0x140] ss:$12 sps:$4 sm:$0xff]  }
 0x4db   : > { %v3780_v41 = vadd.f32 %v3772_v35, %v19748_v34  ;;  %v17179_v33 = vld [vmem:[#allocation12 + $0x80] ss:$12 sps:$4 sm:$0xff]   ;;  %v17180_v38 = vld [vmem:[#allocation12 + $0x90] ss:$12 sps:$4 sm:$0xff]  }
 0x4dc   : > { %v3774_v47 = vpop.f32.mrf.mxu0  ;;  %v17182_v35 = vld [vmem:[#allocation12 + $0x94] ss:$12 sps:$4 sm:$0xff]  }
 0x4dd   : > { %v3775_v48 = vadd.f32 %v16144_v40, %v3774_v47  ;;  %16400 = vmatpush3.bf16.msra.mxu1 %v17136_v37  ;;  %v3803_v24 = vadd.f32 %v3797_v42, %v3780_v41  ;;  %v17183_v37 = vld [vmem:[#allocation12 + $0x128] ss:$12 sps:$4 sm:$0xff]   ;;  %v17188_v41 = vld [vmem:[#allocation12 + $0x110] ss:$12 sps:$4 sm:$0xff]  }
 0x4de   : > { %v3776_v49 = vpop.f32.mrf.mxu0  ;;  %4941 = vmatprep.subr.bf16.mxu1 %v17140_v39  ;;  %v17184_v39 = vld [vmem:[#allocation12 + $0x68] ss:$12 sps:$4 sm:$0xff]   ;;  %v17189_v47 = vld [vmem:[#allocation12 + $0x50] ss:$12 sps:$4 sm:$0xff]  }
 0x4df   : > { %v3783_v50 = vadd.f32 %v3775_v48, %v19750_v23  ;;  %v3809_v46 = vmax.f32 %v3803_v24, 0.0  ;;  %v17143_v23 = vld [vmem:[#allocation12 + $0x1e0] ss:$12 sps:$4 sm:$0xff]   ;;  %v17187_v40 = vld [vmem:[#allocation12 + $0x7c] ss:$12 sps:$4 sm:$0xff]  }
 0x4e0   : > { %v17192_v48 = vld [vmem:[#allocation12 + $0x64] ss:$12 sps:$4 sm:$0xff]  }
 0x4e1   : > { %v3806_v51 = vadd.f32 %v3797_v42, %v3783_v50  ;;  %v17185_v42 = vld [vmem:[#allocation12 + $0x78] ss:$12 sps:$4 sm:$0xff]  }
 0x4e2   : > { %v17193_v49 = vld [vmem:[#allocation12 + $0xf8] ss:$12 sps:$4 sm:$0xff]  }
 0x4e3   : > { %v3812_v36 = vmax.f32 %v3806_v51, 0.0  ;;  %v17194_v24 = vld [vmem:[#allocation12 + $0x38] ss:$12 sps:$4 sm:$0xff]   ;;  %v17198_v51 = vld [vmem:[#allocation12 + $0xe0] ss:$12 sps:$4 sm:$0xff]  }
 0x4e4   : > { %v17197_v50 = vld [vmem:[#allocation12 + $0x4c] ss:$12 sps:$4 sm:$0xff]  }
 0x4e5   : > { %v19782_v52 = vpack.c.bf16 %v3812_v36, %v3809_v46  ;;  %v17195_v46 = vld [vmem:[#allocation12 + $0x48] ss:$12 sps:$4 sm:$0xff]   ;;  %v17199_v36 = vld [vmem:[#allocation12 + $0x20] ss:$12 sps:$4 sm:$0xff]  }
 0x4e7   : > { %v4010_v53 = vshll.u32 %v19782_v52, 16  ;;  %v4008_v34 = vshrl.u32 %v19782_v52, 16 }
 0x4e9   : > { %v4012_v54 = vrot.slane %v4010_v53, 1  ;;  %v17202_v53 = vld [vmem:[#allocation12 + $0x34] ss:$12 sps:$4 sm:$0xff]  }
 0x4eb   : > { %v4013_v56 = vor.u32 %v4012_v54, %v4008_v34  ;;  %v17203_v34 = vld [vmem:[#allocation12 + $0xc8] ss:$12 sps:$4 sm:$0xff]   ;;  %v17200_v54 = vld [vmem:[#allocation12 + $0x30] ss:$12 sps:$4 sm:$0xff]  }
 0x4ed   : > { %15038 = vmatmul.mubr.msk.bf16.vlgmr.msra.gmra.mxu0 %vm4368_vm6, %v4013_v56  ;;  %16402 = vmatmul.mubr.msk.bf16.vlgmr.msra.gmra.mxu1 %vm4368_vm6, %v4013_v56  ;;  %v17210_v56 = vld [vmem:[#allocation12 + $0x4cc] ss:$12 sps:$4 sm:$0xff]  }
 0x4ee   : > { %16146 = vmatpush3.bf16.msra.mxu0 %v17141_v44  ;;  %4942 = vmatpush1.bf16.msra.mxu1 %v17138_v55  ;;  %v17204_v55 = vld [vmem:[#allocation12 + $0x8] ss:$12 sps:$4 sm:$0xff]  }
 0x4ef   : > { %4490 = vmatprep.mubr.bf16.mxu0 %v4006_v9  ;;  %16147 = vmatprep.subr.bf16.mxu0 %v17142_v58  ;;  %v17167_v9 = vld [vmem:[#allocation12 + $0x2f0] ss:$12 sps:$4 sm:$0xff]   ;;  %v17205_v58 = vld [vmem:[#allocation12 + $0x18] ss:$12 sps:$4 sm:$0xff]  }
 0x4f0   : > { %4943 = vmatprep.subr.bf16.mxu1 %v17145_v59  ;;  %4969 = vmatprep.mubr.bf16.mxu1 %v19133_v19  ;;  %v17207_v44 = vld [vmem:[#allocation12 + $0x1c] ss:$12 sps:$4 sm:$0xff]  }
 0x4f1   : > { %v17208_v59 = vld [vmem:[#allocation12 + $0x4c8] ss:$12 sps:$4 sm:$0xff]  }
 0x4f2   : > { %16148 = vmatpush3.bf16.msra.mxu0 %v17146_v60  ;;  %4944 = vmatpush1.bf16.msra.mxu1 %v17143_v23  ;;  %v17213_v23 = vld [vmem:[#allocation12 + $0x4] ss:$12 sps:$4 sm:$0xff]   ;;  %v17216_v60 = vld [vmem:[#allocation12 + $0x4b4] ss:$12 sps:$4 sm:$0xff]  }
 0x4f3   : > { %16149 = vmatprep.subr.bf16.mxu0 %v17147_v17  ;;  %4945 = vmatprep.subr.bf16.mxu1 %v17150_v29  ;;  %v5155_v17 = vrot.slane %v19762_v8, 1  ;;  %v17211_v29 = vld [vmem:[#allocation12] ss:$12 sps:$4 sm:$0xff]  }
 0x4f6   : > { %16150 = vmatpush3.bf16.msra.mxu0 %v17151_v62  ;;  %4946 = vmatpush1.bf16.msra.mxu1 %v17148_v61  ;;  %v17214_v61 = vld [vmem:[#allocation12 + $0x4b0] ss:$12 sps:$4 sm:$0xff]   ;;  %v17219_v62 = vld [vmem:[#allocation12 + $0x16c] ss:$12 sps:$4 sm:$0xff]  }
 0x4f7   : > { %16151 = vmatprep.subr.bf16.mxu0 %v17152_v1  ;;  %4947 = vmatprep.subr.bf16.mxu1 %v17155_v57  ;;  %v17222_v1 = vld [vmem:[#allocation12 + $0x49c] ss:$12 sps:$4 sm:$0xff]  }
 0x4f8   : > { %v17217_v57 = vld [vmem:[#allocation12 + $0x168] ss:$12 sps:$4 sm:$0xff]  }
 0x4fa   : > { %16152 = vmatpush3.bf16.msra.mxu0 %v17156_v3  ;;  %4948 = vmatpush1.bf16.msra.mxu1 %v17153_v2  ;;  %v17220_v2 = vld [vmem:[#allocation12 + $0x498] ss:$12 sps:$4 sm:$0xff]   ;;  %v17225_v3 = vld [vmem:[#allocation12 + $0x154] ss:$12 sps:$4 sm:$0xff]  }
 0x4fb   : > { %16153 = vmatprep.subr.bf16.mxu0 %v17157_v4  ;;  %4949 = vmatprep.subr.bf16.mxu1 %v17160_v21  ;;  %v17228_v4 = vld [vmem:[#allocation12 + $0x484] ss:$12 sps:$4 sm:$0xff]  }
 0x4fc   : > { %v17223_v21 = vld [vmem:[#allocation12 + $0x150] ss:$12 sps:$4 sm:$0xff]  }
 0x4fe   : > { %16154 = vmatpush3.bf16.msra.mxu0 %v17161_v10  ;;  %4950 = vmatpush1.bf16.msra.mxu1 %v17158_v12  ;;  %v17226_v12 = vld [vmem:[#allocation12 + $0x480] ss:$12 sps:$4 sm:$0xff]   ;;  %v17231_v10 = vld [vmem:[#allocation12 + $0x13c] ss:$12 sps:$4 sm:$0xff]  }
 0x4ff   : > { %16155 = vmatprep.subr.bf16.mxu0 %v17162_v13  ;;  %4951 = vmatprep.subr.bf16.mxu1 %v17165_v63  ;;  %v17234_v13 = vld [vmem:[#allocation12 + $0x46c] ss:$12 sps:$4 sm:$0xff]  }
 0x500   : > { %v17229_v63 = vld [vmem:[#allocation12 + $0x138] ss:$12 sps:$4 sm:$0xff]  }
 0x502   : > { %16156 = vmatpush3.bf16.msra.mxu0 %v17166_v18  ;;  %4952 = vmatpush1.bf16.msra.mxu1 %v17163_v14  ;;  %v17232_v14 = vld [vmem:[#allocation12 + $0x468] ss:$12 sps:$4 sm:$0xff]   ;;  %v17237_v18 = vld [vmem:[#allocation12 + $0x124] ss:$12 sps:$4 sm:$0xff]  }
 0x503   : > { %16157 = vmatprep.subr.bf16.mxu0 %v17167_v9  ;;  %16174 = vmatprep.subr.bf16.mxu1 %v17168_v16  ;;  %v17240_v9 = vld [vmem:[#allocation12 + $0x454] ss:$12 sps:$4 sm:$0xff]  }
 0x504   : > { %v17235_v16 = vld [vmem:[#allocation12 + $0x120] ss:$12 sps:$4 sm:$0xff]  }
 0x505   : > { %15106 = vmatmul.mubr.msk.bf16.vlgmr.msra.gmra.mxu1 %vm4368_vm6, %v19782_v52 }
 0x506   : > { %16158 = vmatpush3.bf16.msra.mxu0 %v17169_v22  ;;  %16175 = vmatpush3.bf16.msra.mxu1 %v17170_v25  ;;  %v17238_v22 = vld [vmem:[#allocation12 + $0x450] ss:$12 sps:$4 sm:$0xff]   ;;  %v17243_v25 = vld [vmem:[#allocation12 + $0x10c] ss:$12 sps:$4 sm:$0xff]  }
 0x507   : > { %5012 = vmatprep.mubr.bf16.mxu1 %v19762_v8  ;;  %16159 = vmatprep.subr.bf16.mxu0 %v17171_v26  ;;  %v17246_v26 = vld [vmem:[#allocation12 + $0x43c] ss:$12 sps:$4 sm:$0xff]  }
 0x508   : > { %16176 = vmatprep.subr.bf16.mxu1 %v17172_v7  ;;  %v17241_v7 = vld [vmem:[#allocation12 + $0x108] ss:$12 sps:$4 sm:$0xff]  }
 0x50a   : > { %16160 = vmatpush3.bf16.msra.mxu0 %v17173_v27  ;;  %16177 = vmatpush3.bf16.msra.mxu1 %v17174_v28  ;;  %v17244_v27 = vld [vmem:[#allocation12 + $0x438] ss:$12 sps:$4 sm:$0xff]   ;;  %v17249_v28 = vld [vmem:[#allocation12 + $0xf4] ss:$12 sps:$4 sm:$0xff]  }
 0x50b   : > { %4894 = vmatprep.subr.bf16.mxu0 %v17177_v30  ;;  %16178 = vmatprep.subr.bf16.mxu1 %v17178_v31  ;;  %v17252_v30 = vld [vmem:[#allocation12 + $0x424] ss:$12 sps:$4 sm:$0xff]  }
 0x50c   : > { %v17247_v31 = vld [vmem:[#allocation12 + $0xf0] ss:$12 sps:$4 sm:$0xff]  }
 0x50d   : > { %4491 = vmatmul.mubr.bf16.vlgmr.msra.gmra.mxu0 %v19768_v20  ;;  %v17190_v20 = vld [vmem:[#allocation12 + $0x60] ss:$12 sps:$4 sm:$0xff]  }
 0x50e   : > { %4895 = vmatpush1.bf16.msra.mxu0 %v17175_v32  ;;  %4926 = vmatprep.mubr.bf16.mxu0 %v19762_v8  ;;  %v17250_v32 = vld [vmem:[#allocation12 + $0x420] ss:$12 sps:$4 sm:$0xff]  }
 0x50f   : > { %16179 = vmatpush3.bf16.msra.mxu1 %v17179_v33  ;;  %4896 = vmatprep.subr.bf16.mxu0 %v17182_v35  ;;  %v17255_v33 = vld [vmem:[#allocation12 + $0xdc] ss:$12 sps:$4 sm:$0xff]   ;;  %v17258_v35 = vld [vmem:[#allocation12 + $0x58c] ss:$12 sps:$4 sm:$0xff]  }
 0x510   : > { %16180 = vmatprep.subr.bf16.mxu1 %v17183_v37  ;;  %v17253_v37 = vld [vmem:[#allocation12 + $0xd8] ss:$12 sps:$4 sm:$0xff]   ;;  %v17325_v8 = vld [vmem:[#allocation12 + $0x500] ss:$12 sps:$4 sm:$0xff]  }
 0x512   : > { %4897 = vmatpush1.bf16.msra.mxu0 %v17180_v38  ;;  %v17256_v38 = vld [vmem:[#allocation12 + $0x588] ss:$12 sps:$4 sm:$0xff]  }
 0x513   : > { %16181 = vmatpush3.bf16.msra.mxu1 %v17184_v39  ;;  %4898 = vmatprep.subr.bf16.mxu0 %v17187_v40  ;;  %v17261_v39 = vld [vmem:[#allocation12 + $0xc4] ss:$12 sps:$4 sm:$0xff]   ;;  %v17264_v40 = vld [vmem:[#allocation12 + $0x574] ss:$12 sps:$4 sm:$0xff]  }
 0x514   : > { %16182 = vmatprep.subr.bf16.mxu1 %v17188_v41  ;;  %v17259_v41 = vld [vmem:[#allocation12 + $0xc0] ss:$12 sps:$4 sm:$0xff]  }
 0x516   : > { %4899 = vmatpush1.bf16.msra.mxu0 %v17185_v42  ;;  %v17262_v42 = vld [vmem:[#allocation12 + $0x570] ss:$12 sps:$4 sm:$0xff]  }
 0x517   : > { %16183 = vmatpush3.bf16.msra.mxu1 %v17189_v47  ;;  %4900 = vmatprep.subr.bf16.mxu0 %v17192_v48  ;;  %v17267_v47 = vld [vmem:[#allocation12 + $0x55c] ss:$12 sps:$4 sm:$0xff]   ;;  %v17268_v48 = vld [vmem:[#allocation12 + $0x200] ss:$12 sps:$4 sm:$0xff]  }
 0x518   : > { %16184 = vmatprep.subr.bf16.mxu1 %v17193_v49  ;;  %v17265_v49 = vld [vmem:[#allocation12 + $0x558] ss:$12 sps:$4 sm:$0xff]  }
 0x51a   : > { %4901 = vmatpush1.bf16.msra.mxu0 %v17190_v20  ;;  %v17271_v20 = vld [vmem:[#allocation12 + $0x544] ss:$12 sps:$4 sm:$0xff]  }
 0x51b   : > { %16185 = vmatpush3.bf16.msra.mxu1 %v17194_v24  ;;  %4902 = vmatprep.subr.bf16.mxu0 %v17197_v50  ;;  %v17272_v24 = vld [vmem:[#allocation12 + $0x1e8] ss:$12 sps:$4 sm:$0xff]   ;;  %v17269_v50 = vld [vmem:[#allocation12 + $0x540] ss:$12 sps:$4 sm:$0xff]  }
 0x51c   : > { %16186 = vmatprep.subr.bf16.mxu1 %v17198_v51  ;;  %v17275_v51 = vld [vmem:[#allocation12 + $0x52c] ss:$12 sps:$4 sm:$0xff]  }
 0x51e   : > { %4903 = vmatpush1.bf16.msra.mxu0 %v17195_v46  ;;  %v17276_v46 = vld [vmem:[#allocation12 + $0x1d0] ss:$12 sps:$4 sm:$0xff]  }
 0x51f   : > { %16187 = vmatpush3.bf16.msra.mxu1 %v17199_v36  ;;  %4904 = vmatprep.subr.bf16.mxu0 %v17202_v53  ;;  %v17273_v36 = vld [vmem:[#allocation12 + $0x528] ss:$12 sps:$4 sm:$0xff]  }
 0x520   : > { %16188 = vmatprep.subr.bf16.mxu1 %v17203_v34  ;;  %v17279_v53 = vld [vmem:[#allocation12 + $0x514] ss:$12 sps:$4 sm:$0xff]   ;;  %v17280_v34 = vld [vmem:[#allocation12 + $0x1b8] ss:$12 sps:$4 sm:$0xff]  }
 0x522   : > { %4905 = vmatpush1.bf16.msra.mxu0 %v17200_v54  ;;  %v17277_v54 = vld [vmem:[#allocation12 + $0x510] ss:$12 sps:$4 sm:$0xff]  }
 0x523   : > { %16189 = vmatpush3.bf16.msra.mxu1 %v17204_v55  ;;  %4906 = vmatprep.subr.bf16.mxu0 %v17207_v44  ;;  %v17283_v55 = vld [vmem:[#allocation12 + $0x4fc] ss:$12 sps:$4 sm:$0xff]   ;;  %v17284_v44 = vld [vmem:[#allocation12 + $0x1a0] ss:$12 sps:$4 sm:$0xff]  }
 0x524   : > { %5514 = vmatprep.subr.bf16.mxu1 %v17210_v56  ;;  %v17281_v56 = vld [vmem:[#allocation12 + $0x4f8] ss:$12 sps:$4 sm:$0xff]  }
 0x526   : > { %5013 = vmatmul.mubr.bf16.vlgmr.msra.gmra.mxu1 %v19760_v5  ;;  %4907 = vmatpush1.bf16.msra.mxu0 %v17205_v58  ;;  %v17287_v58 = vld [vmem:[#allocation12 + $0x4e4] ss:$12 sps:$4 sm:$0xff]  }
 0x527   : > { %5515 = vmatpush1.bf16.msra.mxu1 %v17208_v59  ;;  %5546 = vmatprep.mubr.bf16.mxu1 %v5155_v17  ;;  %v17288_v59 = vld [vmem:[#allocation12 + $0x188] ss:$12 sps:$4 sm:$0xff]  }
 0x528   : > { %4908 = vmatprep.subr.bf16.mxu0 %v17213_v23  ;;  %5516 = vmatprep.subr.bf16.mxu1 %v17216_v60  ;;  %v17285_v23 = vld [vmem:[#allocation12 + $0x4e0] ss:$12 sps:$4 sm:$0xff]   ;;  %v17291_v60 = vld [vmem:[#allocation12 + $0x61c] ss:$12 sps:$4 sm:$0xff]  }
 0x52a   : > { %4909 = vmatpush1.bf16.msra.mxu0 %v17211_v29  ;;  %v17289_v29 = vld [vmem:[#allocation12 + $0x618] ss:$12 sps:$4 sm:$0xff]  }
 0x52b   : > { %5517 = vmatpush1.bf16.msra.mxu1 %v17214_v61  ;;  %4910 = vmatprep.subr.bf16.mxu0 %v17219_v62  ;;  %v17292_v61 = vld [vmem:[#allocation12 + $0x620] ss:$12 sps:$4 sm:$0xff]   ;;  %v17295_v62 = vld [vmem:[#allocation12 + $0x604] ss:$12 sps:$4 sm:$0xff]  }
 0x52c   : > { %5518 = vmatprep.subr.bf16.mxu1 %v17222_v1  ;;  %v5154_v1 = vrot.slane %v19760_v5, 1 }
 0x52e   : > { %4911 = vmatpush2.bf16.msra.mxu0 %v17217_v57  ;;  %v17293_v57 = vld [vmem:[#allocation12 + $0x600] ss:$12 sps:$4 sm:$0xff]  }
 0x52f   : > { %5519 = vmatpush1.bf16.msra.mxu1 %v17220_v2  ;;  %4912 = vmatprep.subr.bf16.mxu0 %v17225_v3  ;;  %v17296_v2 = vld [vmem:[#allocation12 + $0x608] ss:$12 sps:$4 sm:$0xff]   ;;  %v17299_v3 = vld [vmem:[#allocation12 + $0x5ec] ss:$12 sps:$4 sm:$0xff]  }
 0x530   : > { %5520 = vmatprep.subr.bf16.mxu1 %v17228_v4  ;;  %v17297_v4 = vld [vmem:[#allocation12 + $0x5e8] ss:$12 sps:$4 sm:$0xff]  }
 0x532   : > { %4913 = vmatpush2.bf16.msra.mxu0 %v17223_v21  ;;  %v17300_v21 = vld [vmem:[#allocation12 + $0x5f0] ss:$12 sps:$4 sm:$0xff]  }
 0x533   : > { %5521 = vmatpush1.bf16.msra.mxu1 %v17226_v12  ;;  %4914 = vmatprep.subr.bf16.mxu0 %v17231_v10  ;;  %v17303_v12 = vld [vmem:[#allocation12 + $0x5d4] ss:$12 sps:$4 sm:$0xff]   ;;  %v17301_v10 = vld [vmem:[#allocation12 + $0x5d0] ss:$12 sps:$4 sm:$0xff]  }
 0x534   : > { %5522 = vmatprep.subr.bf16.mxu1 %v17234_v13  ;;  %v17304_v13 = vld [vmem:[#allocation12 + $0x5d8] ss:$12 sps:$4 sm:$0xff]  }
 0x536   : > { %4915 = vmatpush2.bf16.msra.mxu0 %v17229_v63  ;;  %v17307_v63 = vld [vmem:[#allocation12 + $0x5bc] ss:$12 sps:$4 sm:$0xff]  }
 0x537   : > { %5523 = vmatpush1.bf16.msra.mxu1 %v17232_v14  ;;  %4916 = vmatprep.subr.bf16.mxu0 %v17237_v18  ;;  %v17305_v14 = vld [vmem:[#allocation12 + $0x5b8] ss:$12 sps:$4 sm:$0xff]   ;;  %v17308_v18 = vld [vmem:[#allocation12 + $0x5c0] ss:$12 sps:$4 sm:$0xff]  }
 0x538   : > { %5524 = vmatprep.subr.bf16.mxu1 %v17240_v9  ;;  %v17311_v9 = vld [vmem:[#allocation12 + $0x5a4] ss:$12 sps:$4 sm:$0xff]  }
 0x53a   : > { %4917 = vmatpush2.bf16.msra.mxu0 %v17235_v16  ;;  %v17309_v16 = vld [vmem:[#allocation12 + $0x5a0] ss:$12 sps:$4 sm:$0xff]  }
 0x53b   : > { %5525 = vmatpush1.bf16.msra.mxu1 %v17238_v22  ;;  %4918 = vmatprep.subr.bf16.mxu0 %v17243_v25  ;;  %v17312_v22 = vld [vmem:[#allocation12 + $0x5a8] ss:$12 sps:$4 sm:$0xff]   ;;  %v17313_v25 = vld [vmem:[#allocation12 + $0x590] ss:$12 sps:$4 sm:$0xff]  }
 0x53c   : > { %5526 = vmatprep.subr.bf16.mxu1 %v17246_v26  ;;  %v17314_v26 = vld [vmem:[#allocation12 + $0x4d0] ss:$12 sps:$4 sm:$0xff]  }
 0x53e   : > { %4919 = vmatpush2.bf16.msra.mxu0 %v17241_v7  ;;  %v5156_v7 = vrot.slane %v19782_v52, 1 }
 0x53f   : > { %5527 = vmatpush1.bf16.msra.mxu1 %v17244_v27  ;;  %4920 = vmatprep.subr.bf16.mxu0 %v17249_v28  ;;  %v17315_v27 = vld [vmem:[#allocation12 + $0x578] ss:$12 sps:$4 sm:$0xff]  }
 0x540   : > { %5528 = vmatprep.subr.bf16.mxu1 %v17252_v30  ;;  %v17316_v28 = vld [vmem:[#allocation12 + $0x4b8] ss:$12 sps:$4 sm:$0xff]   ;;  %v17317_v30 = vld [vmem:[#allocation12 + $0x560] ss:$12 sps:$4 sm:$0xff]  }
 0x542   : > { %4921 = vmatpush2.bf16.msra.mxu0 %v17247_v31  ;;  %v17318_v31 = vld [vmem:[#allocation12 + $0x4a0] ss:$12 sps:$4 sm:$0xff]  }
 0x543   : > { %5529 = vmatpush1.bf16.msra.mxu1 %v17250_v32  ;;  %4922 = vmatprep.subr.bf16.mxu0 %v17255_v33  ;;  %v17319_v32 = vld [vmem:[#allocation12 + $0x548] ss:$12 sps:$4 sm:$0xff]   ;;  %v17321_v33 = vld [vmem:[#allocation12 + $0x530] ss:$12 sps:$4 sm:$0xff]  }
 0x544   : > { %5530 = vmatprep.subr.bf16.mxu1 %v17258_v35  ;;  %v17322_v35 = vld [vmem:[#allocation12 + $0x470] ss:$12 sps:$4 sm:$0xff]  }
 0x546   : > { %4923 = vmatpush2.bf16.msra.mxu0 %v17253_v37  ;;  %v17323_v37 = vld [vmem:[#allocation12 + $0x518] ss:$12 sps:$4 sm:$0xff]  }
 0x547   : > { %5531 = vmatpush2.bf16.msra.mxu1 %v17256_v38  ;;  %4924 = vmatprep.subr.bf16.mxu0 %v17261_v39  ;;  %v17324_v38 = vld [vmem:[#allocation12 + $0x458] ss:$12 sps:$4 sm:$0xff]   ;;  %v17327_v39 = vld [vmem:[#allocation12 + $0x4e8] ss:$12 sps:$4 sm:$0xff]  }
 0x548   : > { %5532 = vmatprep.subr.bf16.mxu1 %v17264_v40  ;;  %v17328_v40 = vld [vmem:[#allocation12 + $0x428] ss:$12 sps:$4 sm:$0xff]  }
 0x54a   : > { %4925 = vmatpush2.bf16.msra.mxu0 %v17259_v41  ;;  %v17331_v41 = vld [vmem:[#allocation15 + $0x194] ss:$8 sps:$4 sm:$0xff]  }
 0x54b   : > { %5533 = vmatpush2.bf16.msra.mxu1 %v17262_v42  ;;  %16405 = vmatprep.subr.bf16.mxu0 %v19131_v0  ;;  %v17329_v42 = vld [vmem:[#allocation15 + $0x190] ss:$8 sps:$4 sm:$0xff]  }
 0x54c   : > { %5534 = vmatprep.subr.bf16.mxu1 %v17267_v47  ;;  %v17334_v47 = vld [vmem:[#allocation15 + $0x184] ss:$8 sps:$4 sm:$0xff]  }
 0x54d   : > { %4927 = vmatmul.mubr.bf16.vlgmr.msra.gmra.mxu0 %v19760_v5  ;;  %v17341_v5 = vld [vmem:[#allocation15 + $0x150] ss:$8 sps:$4 sm:$0xff]  }
 0x54e   : > { %16406 = vmatpush3.bf16.msra.mxu0 %v17268_v48  ;;  %16417 = vmatprep.mubr.msk.bf16.mxu0 %vm19132_vm0, %v19131_v0  ;;  %v17332_v48 = vld [vmem:[#allocation15 + $0x180] ss:$8 sps:$4 sm:$0xff]  }
 0x54f   : > { %5535 = vmatpush2.bf16.msra.mxu1 %v17265_v49  ;;  %16407 = vmatprep.subr.bf16.mxu0 %v19131_v0 }
 0x550   : > { %5536 = vmatprep.subr.bf16.mxu1 %v17271_v20  ;;  %v17337_v20 = vld [vmem:[#allocation15 + $0x174] ss:$8 sps:$4 sm:$0xff]  }
 0x552   : > { %16408 = vmatpush3.bf16.msra.mxu0 %v17272_v24  ;;  %v17335_v24 = vld [vmem:[#allocation15 + $0x170] ss:$8 sps:$4 sm:$0xff]  }
 0x553   : > { %5537 = vmatpush2.bf16.msra.mxu1 %v17269_v50  ;;  %16409 = vmatprep.subr.bf16.mxu0 %v19131_v0 }
 0x554   : > { %5538 = vmatprep.subr.bf16.mxu1 %v17275_v51  ;;  %v17340_v51 = vld [vmem:[#allocation15 + $0x164] ss:$8 sps:$4 sm:$0xff]  }
 0x556   : > { %16410 = vmatpush3.bf16.msra.mxu0 %v17276_v46  ;;  %v17338_v46 = vld [vmem:[#allocation15 + $0x160] ss:$8 sps:$4 sm:$0xff]  }
 0x557   : > { %5539 = vmatpush2.bf16.msra.mxu1 %v17273_v36  ;;  %16411 = vmatprep.subr.bf16.mxu0 %v19131_v0 }
 0x558   : > { %5540 = vmatprep.subr.bf16.mxu1 %v17279_v53  ;;  %v17343_v53 = vld [vmem:[#allocation15 + $0x154] ss:$8 sps:$4 sm:$0xff]  }
 0x55a   : > { %16412 = vmatpush3.bf16.msra.mxu0 %v17280_v34 }
 0x55b   : > { %5541 = vmatpush2.bf16.msra.mxu1 %v17277_v54  ;;  %16413 = vmatprep.subr.bf16.mxu0 %v19131_v0  ;;  %v17346_v54 = vld [vmem:[#allocation15 + $0x144] ss:$8 sps:$4 sm:$0xff]  }
 0x55c   : > { %5542 = vmatprep.subr.bf16.mxu1 %v17283_v55 }
 0x55e   : > { %16414 = vmatpush3.bf16.msra.mxu0 %v17284_v44  ;;  %v17344_v44 = vld [vmem:[#allocation15 + $0x140] ss:$8 sps:$4 sm:$0xff]  }
 0x55f   : > { %5543 = vmatpush2.bf16.msra.mxu1 %v17281_v56  ;;  %16415 = vmatprep.subr.bf16.mxu0 %v19131_v0 }
 0x560   : > { %5544 = vmatprep.subr.bf16.mxu1 %v17287_v58  ;;  %v17349_v58 = vld [vmem:[#allocation15 + $0x134] ss:$8 sps:$4 sm:$0xff]  }
 0x562   : > { %16416 = vmatpush3.bf16.msra.mxu0 %v17288_v59 }
 0x563   : > { %5545 = vmatpush2.bf16.msra.mxu1 %v17285_v23  ;;  %5561 = vmatprep.subr.bf16.mxu0 %v17291_v60  ;;  %v17347_v23 = vld [vmem:[#allocation15 + $0x130] ss:$8 sps:$4 sm:$0xff]  }
 0x564   : > { %16421 = vmatprep.subr.bf16.mxu1 %v19131_v0 }
 0x565   : > { %16418 = vmatmul.mubr.msk.bf16.vlgmr.msra.gmra.mxu0 %vm4368_vm6, %v19782_v52  ;;  %v17320_v52 = vld [vmem:[#allocation12 + $0x488] ss:$12 sps:$4 sm:$0xff]  }
 0x566   : > { %5547 = vmatmul.mubr.bf16.vlgmr.msra.gmra.mxu1 %v5154_v1  ;;  %5562 = vmatpush1.bf16.msra.mxu0 %v17289_v29  ;;  %v17352_v29 = vld [vmem:[#allocation15 + $0x124] ss:$8 sps:$4 sm:$0xff]  }
 0x567   : > { %16422 = vmatpush3.bf16.msra.mxu1 %v17292_v61  ;;  %5563 = vmatprep.subr.bf16.mxu0 %v17295_v62  ;;  %v17350_v61 = vld [vmem:[#allocation15 + $0x120] ss:$8 sps:$4 sm:$0xff]   ;;  %v17355_v62 = vld [vmem:[#allocation15 + $0x214] ss:$8 sps:$4 sm:$0xff]  }
 0x568   : > { %16423 = vmatprep.subr.bf16.mxu1 %v19131_v0  ;;  %5589 = vmatprep.mubr.bf16.mxu0 %v19133_v19 }
 0x569   : > { %16433 = vmatprep.mubr.msk.bf16.mxu1 %vm19132_vm0, %v19131_v0 }
 0x56a   : > { %5564 = vmatpush1.bf16.msra.mxu0 %v17293_v57  ;;  %v17358_v57 = vld [vmem:[#allocation15 + $0x204] ss:$8 sps:$4 sm:$0xff]  }
 0x56b   : > { %16424 = vmatpush3.bf16.msra.mxu1 %v17296_v2  ;;  %5565 = vmatprep.subr.bf16.mxu0 %v17299_v3  ;;  %v17356_v2 = vld [vmem:[#allocation15 + $0x200] ss:$8 sps:$4 sm:$0xff]  }
 0x56c   : > { %16425 = vmatprep.subr.bf16.mxu1 %v19131_v0 }
 0x56e   : > { %5566 = vmatpush1.bf16.msra.mxu0 %v17297_v4  ;;  %v17361_v4 = vld [vmem:[#allocation15 + $0x1f4] ss:$8 sps:$4 sm:$0xff]  }
 0x56f   : > { %16426 = vmatpush3.bf16.msra.mxu1 %v17300_v21  ;;  %5567 = vmatprep.subr.bf16.mxu0 %v17303_v12  ;;  %v17359_v21 = vld [vmem:[#allocation15 + $0x1f0] ss:$8 sps:$4 sm:$0xff]  }
 0x570   : > { %16427 = vmatprep.subr.bf16.mxu1 %v19131_v0 }
 0x572   : > { %5568 = vmatpush1.bf16.msra.mxu0 %v17301_v10  ;;  %v17364_v10 = vld [vmem:[#allocation15 + $0x1e4] ss:$8 sps:$4 sm:$0xff]  }
 0x573   : > { %16428 = vmatpush3.bf16.msra.mxu1 %v17304_v13  ;;  %5569 = vmatprep.subr.bf16.mxu0 %v17307_v63  ;;  %v17362_v13 = vld [vmem:[#allocation15 + $0x1e0] ss:$8 sps:$4 sm:$0xff]  }
 0x574   : > { %16429 = vmatprep.subr.bf16.mxu1 %v19131_v0 }
 0x576   : > { %5570 = vmatpush1.bf16.msra.mxu0 %v17305_v14  ;;  %v17367_v14 = vld [vmem:[#allocation15 + $0x1d4] ss:$8 sps:$4 sm:$0xff]  }
 0x577   : > { %16430 = vmatpush3.bf16.msra.mxu1 %v17308_v18  ;;  %5571 = vmatprep.subr.bf16.mxu0 %v17311_v9  ;;  %v17365_v18 = vld [vmem:[#allocation15 + $0x1d0] ss:$8 sps:$4 sm:$0xff]  }
 0x578   : > { %16431 = vmatprep.subr.bf16.mxu1 %v19131_v0 }
 0x57a   : > { %5572 = vmatpush1.bf16.msra.mxu0 %v17309_v16  ;;  %v17370_v16 = vld [vmem:[#allocation15 + $0x1c4] ss:$8 sps:$4 sm:$0xff]  }
 0x57b   : > { %16432 = vmatpush3.bf16.msra.mxu1 %v17312_v22  ;;  %16203 = vmatprep.subr.bf16.mxu0 %v17313_v25  ;;  %v17368_v25 = vld [vmem:[#allocation15 + $0x1c0] ss:$8 sps:$4 sm:$0xff]  }
 0x57d   : > { %15174 = vmatmul.mubr.msk.bf16.vlgmr.msra.gmra.mxu0 %vm4368_vm6, %v5156_v7 }
 0x57e   : > { %16434 = vmatmul.mubr.msk.bf16.vlgmr.msra.gmra.mxu1 %vm4368_vm6, %v5156_v7  ;;  %16204 = vmatpush3.bf16.msra.mxu0 %v17314_v26  ;;  %v17373_v7 = vld [vmem:[#allocation15 + $0x1b4] ss:$8 sps:$4 sm:$0xff]  }
 0x57f   : > { %5632 = vmatprep.mubr.bf16.mxu0 %v5155_v17  ;;  %16205 = vmatprep.subr.bf16.mxu0 %v17315_v27  ;;  %v17326_v17 = vld [vmem:[#allocation12 + $0x440] ss:$12 sps:$4 sm:$0xff]  }
 0x580   : > { %6072 = vmatprep.mubr.bf16.mxu1 %v19133_v19 }
 0x582   : > { %16206 = vmatpush3.bf16.msra.mxu0 %v17316_v28 }
 0x583   : > { %16207 = vmatprep.subr.bf16.mxu0 %v17317_v30 }
 0x586   : > { %16208 = vmatpush3.bf16.msra.mxu0 %v17318_v31  ;;  %v17371_v31 = vld [vmem:[#allocation15 + $0x1b0] ss:$8 sps:$4 sm:$0xff]  }
 0x587   : > { %16209 = vmatprep.subr.bf16.mxu0 %v17319_v32 }
 0x588   : > { %v19829_v49 = vpop.f32.mrf.mxu1 }
 0x58a   : > { %16210 = vmatpush3.bf16.msra.mxu0 %v17320_v52  ;;  %v19831_v50 = vpop.f32.mrf.mxu1  ;;  %v17376_v52 = vld [vmem:[#allocation15 + $0x1a4] ss:$8 sps:$4 sm:$0xff]  }
 0x58b   : > { %16211 = vmatprep.subr.bf16.mxu0 %v17321_v33 }
 0x58c   : > { %v19833_v36 = vpop.f32.mrf.mxu1 }
 0x58e   : > { %16212 = vmatpush3.bf16.msra.mxu0 %v17322_v35  ;;  %v19835_v34 = vpop.f32.mrf.mxu1 }
 0x58f   : > { %16213 = vmatprep.subr.bf16.mxu0 %v17323_v37  ;;  %v17374_v37 = vld [vmem:[#allocation15 + $0x1a0] ss:$8 sps:$4 sm:$0xff]  }
 0x592   : > { %16214 = vmatpush3.bf16.msra.mxu0 %v17324_v38  ;;  %v17379_v38 = vld [vmem:[#allocation15 + $0x114] ss:$8 sps:$4 sm:$0xff]  }
 0x593   : > { %16215 = vmatprep.subr.bf16.mxu0 %v17325_v8  ;;  %v17385_v8 = vld [vmem:[#allocation15 + $0x234] ss:$8 sps:$4 sm:$0xff]  }
 0x594   : > { %6052 = vmatprep.subr.bf16.mxu1 %v17385_v8 }
 0x596   : > { %16216 = vmatpush3.bf16.msra.mxu0 %v17326_v17  ;;  %v17383_v17 = vld [vmem:[#allocation15 + $0x230] ss:$8 sps:$4 sm:$0xff]  }
 0x597   : > { %16217 = vmatprep.subr.bf16.mxu0 %v17327_v39  ;;  %6053 = vmatpush1.bf16.msra.mxu1 %v17383_v17  ;;  %v17391_v39 = vld [vmem:[#allocation15 + $0x224] ss:$8 sps:$4 sm:$0xff]  }
 0x598   : > { %6054 = vmatprep.subr.bf16.mxu1 %v17391_v39 }
 0x59a   : > { %16218 = vmatpush3.bf16.msra.mxu0 %v17328_v40  ;;  %v17389_v40 = vld [vmem:[#allocation15 + $0x220] ss:$8 sps:$4 sm:$0xff]  }
 0x59b   : > { %5999 = vmatprep.subr.bf16.mxu0 %v17331_v41  ;;  %6055 = vmatpush1.bf16.msra.mxu1 %v17389_v40  ;;  %v17397_v41 = vld [vmem:[#allocation15 + $0x74] ss:$8 sps:$4 sm:$0xff]  }
 0x59c   : > { %6263 = vmatprep.subr.bf16.mxu1 %v17397_v41 }
 0x59d   : > { %5633 = vmatmul.mubr.bf16.vlgmr.msra.gmra.mxu0 %v5154_v1  ;;  %v17353_v1 = vld [vmem:[#allocation15 + $0x210] ss:$8 sps:$4 sm:$0xff]  }
 0x59e   : > { %6000 = vmatpush1.bf16.msra.mxu0 %v17329_v42 }
 0x59f   : > { %6001 = vmatprep.subr.bf16.mxu0 %v17334_v47 }
 0x5a2   : > { %6002 = vmatpush1.bf16.msra.mxu0 %v17332_v48 }
 0x5a3   : > { %6003 = vmatprep.subr.bf16.mxu0 %v17337_v20 }
 0x5a6   : > { %6004 = vmatpush1.bf16.msra.mxu0 %v17335_v24 }
 0x5a7   : > { %6005 = vmatprep.subr.bf16.mxu0 %v17340_v51 }
 0x5aa   : > { %6006 = vmatpush1.bf16.msra.mxu0 %v17338_v46 }
 0x5ab   : > { %6007 = vmatprep.subr.bf16.mxu0 %v17343_v53 }
 0x5ad   : > { %v4533_v55 = vpop.f32.mrf.mxu1  ;;  %v19837_v3 = vpop.f32.mrf.mxu0 }
 0x5ae   : > { %6008 = vmatpush1.bf16.msra.mxu0 %v17341_v5 }
 0x5af   : > { %v16403_v56 = vpop.f32.mrf.mxu1  ;;  %6009 = vmatprep.subr.bf16.mxu0 %v17346_v54  ;;  %v19839_v12 = vpop.f32.mrf.mxu0 }
 0x5b1   : > { %v4536_v59 = vpop.f32.mrf.mxu1  ;;  %v19841_v63 = vpop.f32.mrf.mxu0 }
 0x5b2   : > { %6010 = vmatpush1.bf16.msra.mxu0 %v17344_v44 }
 0x5b3   : > { %v16404_v60 = vpop.f32.mrf.mxu1  ;;  %6011 = vmatprep.subr.bf16.mxu0 %v17349_v58  ;;  %v19843_v9 = vpop.f32.mrf.mxu0 }
 0x5b6   : > { %6012 = vmatpush1.bf16.msra.mxu0 %v17347_v23 }
 0x5b7   : > { %6013 = vmatprep.subr.bf16.mxu0 %v17352_v29 }
 0x5ba   : > { %6014 = vmatpush1.bf16.msra.mxu0 %v17350_v61 }
 0x5bb   : > { %6015 = vmatprep.subr.bf16.mxu0 %v17355_v62 }
 0x5be   : > { %6016 = vmatpush2.bf16.msra.mxu0 %v17353_v1 }
 0x5bf   : > { %6017 = vmatprep.subr.bf16.mxu0 %v17358_v57  ;;  %v4450_v57 = vadd.f32 %v19837_v3, %v19829_v49 }
 0x5c2   : > { %6018 = vmatpush2.bf16.msra.mxu0 %v17356_v2 }
 0x5c3   : > { %6019 = vmatprep.subr.bf16.mxu0 %v17361_v4  ;;  %v4452_v4 = vadd.f32 %v19839_v12, %v19831_v50 }
 0x5c5   : > { %v4971_v42 = vpop.f32.mrf.mxu1 }
 0x5c6   : > { %6020 = vmatpush2.bf16.msra.mxu0 %v17359_v21 }
 0x5c7   : > { %6021 = vmatprep.subr.bf16.mxu0 %v17364_v10  ;;  %v4973_v47 = vpop.f32.mrf.mxu1  ;;  %v4454_v10 = vadd.f32 %v19841_v63, %v19833_v36 }
 0x5c9   : > { %v4975_v48 = vpop.f32.mrf.mxu1 }
 0x5ca   : > { %6022 = vmatpush2.bf16.msra.mxu0 %v17362_v13 }
 0x5cb   : > { %6023 = vmatprep.subr.bf16.mxu0 %v17367_v14  ;;  %v4977_v20 = vpop.f32.mrf.mxu1 }
 0x5cd   : > { %v16161_v22 = vpop.f32.mrf.mxu0 }
 0x5ce   : > { %6024 = vmatpush2.bf16.msra.mxu0 %v17365_v18  ;;  %v19861_v18 = vld [vmem:[#allocation13] sm:$0x7] }
 0x5cf   : > { %v16162_v26 = vpop.f32.mrf.mxu0  ;;  %6025 = vmatprep.subr.bf16.mxu0 %v17370_v16  ;;  %v5693_v3 = vrot.slane %v19861_v18, %v19639_v43 }
 0x5d0   : > { %v16163_v27 = vadd.f32 %v16162_v26, %v16161_v22  ;;  %v4456_v22 = vadd.f32 %v19843_v9, %v19835_v34 }
 0x5d1   : > { %v16164_v28 = vpop.f32.mrf.mxu0 }
 0x5d2   : > { %v4534_v30 = vadd.f32 %v16163_v27, %v4533_v55  ;;  %6026 = vmatpush2.bf16.msra.mxu0 %v17368_v25 }
 0x5d3   : > { %v16165_v32 = vpop.f32.mrf.mxu0  ;;  %6027 = vmatprep.subr.bf16.mxu0 %v17373_v7 }
 0x5d4   : > { %v16166_v33 = vadd.f32 %v16165_v32, %v16164_v28 }
 0x5d6   : > { %v19845_v35 = vadd.f32 %v16166_v33, %v4536_v59  ;;  %6028 = vmatpush2.bf16.msra.mxu0 %v17371_v31 }
 0x5d7   : > { %6029 = vmatprep.subr.bf16.mxu0 %v17376_v52  ;;  %v5697_v52 = vrot.slane %v19861_v18, %v19642_v45 }
 0x5da   : > { %6030 = vmatpush2.bf16.msra.mxu0 %v17374_v37 }
 0x5db   : > { %6316 = vmatprep.subr.bf16.mxu0 %v17379_v38 }
 0x5e6   : > { %v16190_v51 = vpop.f32.mrf.mxu1 }
 0x5e8   : > { %v16191_v53 = vpop.f32.mrf.mxu1 }
 0x5e9   : > { %v16192_v54 = vadd.f32 %v16191_v53, %v16190_v51 }
 0x5ea   : > { %v19851_v60 = vpop.f32.mrf.mxu1 }
 0x5eb   : > { %v5015_v44 = vadd.f32 %v16192_v54, %v4534_v30 }
 0x5ec   : > { %v19853_v61 = vpop.f32.mrf.mxu1 }
 0x60d   : > { %v4928_v24 = vpop.f32.mrf.mxu0 }
 0x60e   : > { %v4929_v21 = vadd.f32 %v4928_v24, %v4450_v57  ;;  %v17382_v57 = vld [vmem:[#allocation15 + $0x104] ss:$8 sps:$4 sm:$0xff]  }
 0x60f   : > { %v4930_v46 = vpop.f32.mrf.mxu0 }
 0x610   : > { %v4931_v13 = vadd.f32 %v4930_v46, %v4452_v4  ;;  %v4972_v25 = vadd.f32 %v4971_v42, %v4929_v21  ;;  %v17388_v4 = vld [vmem:[#allocation15 + $0x2b4] ss:$8 sps:$4 sm:$0xff]  }
 0x611   : > { %v4932_v5 = vpop.f32.mrf.mxu0 }
 0x612   : > { %v4933_v26 = vadd.f32 %v4932_v5, %v4454_v10  ;;  %v4974_v12 = vadd.f32 %v4973_v47, %v4931_v13  ;;  %v16195_v13 = vadd.f32 %v19853_v61, %v19851_v60  ;;  %v17386_v61 = vld [vmem:[#allocation15 + $0x2b0] ss:$8 sps:$4 sm:$0xff]  }
 0x613   : > { %v4934_v55 = vpop.f32.mrf.mxu0 }
 0x614   : > { %v4935_v27 = vadd.f32 %v4934_v55, %v4456_v22  ;;  %v4976_v31 = vadd.f32 %v4975_v48, %v4933_v26  ;;  %v5018_v26 = vadd.f32 %v16195_v13, %v19845_v35  ;;  %v17440_v13 = vld [vmem:[#allocation15 + $0x320] ss:$8 sps:$4 sm:$0xff]  }
 0x616   : > { %v4978_v37 = vadd.f32 %v4977_v20, %v4935_v27 }
 0x625   : > { %v5055_v56 = vpop.f32.mrf.mxu0 }
 0x626   : > { %v19847_v58 = vadd.f32 %v5055_v56, %v5015_v44  ;;  %v5548_v62 = vpop.f32.mrf.mxu1 }
 0x627   : > { %v16419_v59 = vpop.f32.mrf.mxu0 }
 0x628   : > { %v5550_v1 = vpop.f32.mrf.mxu1 }
 0x629   : > { %v19849_v23 = vpop.f32.mrf.mxu0 }
 0x62a   : > { %v5552_v2 = vpop.f32.mrf.mxu1 }
 0x62b   : > { %v16420_v29 = vpop.f32.mrf.mxu0 }
 0x62c   : > { %v5554_v14 = vpop.f32.mrf.mxu1 }
 0x63d   : > { %v5591_v16 = vpop.f32.mrf.mxu0 }
 0x63e   : > { %v5592_v7 = vadd.f32 %v5591_v16, %v5548_v62  ;;  %v5675_v49 = vpop.f32.mrf.mxu1  ;;  %v17377_v62 = vld [vmem:[#allocation15 + $0x110] ss:$8 sps:$4 sm:$0xff]  }
 0x63f   : > { %v5593_v50 = vpop.f32.mrf.mxu0 }
 0x640   : > { %v5682_v28 = vadd.f32 %v5592_v7, %v4972_v25  ;;  %v5594_v36 = vadd.f32 %v5593_v50, %v5550_v1  ;;  %v16435_v63 = vpop.f32.mrf.mxu1 }
 0x641   : > { %v5595_v30 = vpop.f32.mrf.mxu0 }
 0x642   : > { %v5683_v32 = vadd.f32 %v5594_v36, %v4974_v12  ;;  %v5596_v34 = vadd.f32 %v5595_v30, %v5552_v2  ;;  %v5678_v9 = vpop.f32.mrf.mxu1  ;;  %v5705_v38 = vadd.f32 %v5693_v3, %v5682_v28  ;;  %v17380_v2 = vld [vmem:[#allocation15 + $0x100] ss:$8 sps:$4 sm:$0xff]   ;;  %v5059_v12 = vadd.f32 %v19849_v23, %v5018_v26  ;;  %v17454_v26 = vld [vmem:[#allocation15 + $0x304] ss:$8 sps:$4 sm:$0xff]  }
 0x643   : > { %v5597_v33 = vpop.f32.mrf.mxu0 }
 0x644   : > { %v5685_v8 = vadd.f32 %v5596_v34, %v4976_v31  ;;  %v5598_v17 = vadd.f32 %v5597_v33, %v5554_v14  ;;  %v16436_v39 = vpop.f32.mrf.mxu1  ;;  %v5706_v40 = vadd.f32 %v5697_v52, %v5683_v32  ;;  %v5711_v47 = vmax.f32 %v5705_v38, 0.0  ;;  %v17395_v34 = vld [vmem:[#allocation15 + $0x70] ss:$8 sps:$4 sm:$0xff]   ;;  %v17403_v33 = vld [vmem:[#allocation15 + $0x64] ss:$8 sps:$4 sm:$0xff]  }
 0x645   : > { %v17406_v38 = vld [vmem:[#allocation15 + $0x284] ss:$8 sps:$4 sm:$0xff]   ;;  %v17404_v39 = vld [vmem:[#allocation15 + $0x280] ss:$8 sps:$4 sm:$0xff]  }
 0x646   : > { %v5708_v41 = vadd.f32 %v5693_v3, %v5685_v8  ;;  %v5686_v42 = vadd.f32 %v5598_v17, %v4978_v37  ;;  %v5712_v46 = vmax.f32 %v5706_v40, 0.0  ;;  %v5701_v3 = vrot.slane %v19861_v18, %v19630_v11  ;;  %v17398_v37 = vld [vmem:[#allocation15 + $0x290] ss:$8 sps:$4 sm:$0xff]   ;;  %v17401_v8 = vld [vmem:[#allocation15 + $0x60] ss:$8 sps:$4 sm:$0xff]  }
 0x647   : > { %v17409_v17 = vld [vmem:[#allocation15 + $0x54] ss:$8 sps:$4 sm:$0xff]  }
 0x648   : > { %v5714_v24 = vmax.f32 %v5708_v41, 0.0  ;;  %v5709_v51 = vadd.f32 %v5697_v52, %v5686_v42  ;;  %v17400_v52 = vld [vmem:[#allocation15 + $0x294] ss:$8 sps:$4 sm:$0xff]   ;;  %v17407_v41 = vld [vmem:[#allocation15 + $0x50] ss:$8 sps:$4 sm:$0xff]  }
 0x649   : > { %v17412_v40 = vld [vmem:[#allocation15 + $0x274] ss:$8 sps:$4 sm:$0xff]   ;;  %v17415_v42 = vld [vmem:[#allocation15 + $0x44] ss:$8 sps:$4 sm:$0xff]  }
 0x64a   : > { %v19869_v48 = vpack.c.bf16 %v5714_v24, %v5711_v47  ;;  %v5715_v53 = vmax.f32 %v5709_v51, 0.0  ;;  %v17410_v47 = vld [vmem:[#allocation15 + $0x270] ss:$8 sps:$4 sm:$0xff]   ;;  %v17418_v24 = vld [vmem:[#allocation15 + $0x264] ss:$8 sps:$4 sm:$0xff]  }
 0x64b   : > { %v17413_v51 = vld [vmem:[#allocation15 + $0x40] ss:$8 sps:$4 sm:$0xff]  }
 0x64c   : > { %v5718_v5 = vpack.c.bf16 %v5715_v53, %v5712_v46  ;;  %v5796_v54 = vshll.u32 %v19869_v48, 16  ;;  %v5794_v59 = vshrl.u32 %v19869_v48, 16  ;;  %v17421_v46 = vld [vmem:[#allocation15 + $0x34] ss:$8 sps:$4 sm:$0xff]   ;;  %v17416_v53 = vld [vmem:[#allocation15 + $0x260] ss:$8 sps:$4 sm:$0xff]  }
 0x64e   : > { %v5803_v55 = vshll.u32 %v5718_v5, 16  ;;  %v5798_v44 = vrot.slane %v5796_v54, 1  ;;  %v5801_v20 = vshrl.u32 %v5718_v5, 16  ;;  %v6386_v32 = vrot.slane %v5718_v5, 1  ;;  %v17419_v54 = vld [vmem:[#allocation15 + $0x30] ss:$8 sps:$4 sm:$0xff]  }
 0x650   : > { %v5805_v56 = vrot.slane %v5803_v55, 1  ;;  %v5799_v1 = vor.u32 %v5798_v44, %v5794_v59  ;;  %v17427_v55 = vld [vmem:[#allocation15 + $0x24] ss:$8 sps:$4 sm:$0xff]   ;;  %v17422_v44 = vld [vmem:[#allocation15 + $0x250] ss:$8 sps:$4 sm:$0xff]  }
 0x651   : > { %v17433_v59 = vld [vmem:[#allocation15 + $0x14] ss:$8 sps:$4 sm:$0xff]  }
 0x652   : > { %v5806_v29 = vor.u32 %v5805_v56, %v5801_v20  ;;  %v17430_v20 = vld [vmem:[#allocation15 + $0x244] ss:$8 sps:$4 sm:$0xff]   ;;  %v17425_v56 = vld [vmem:[#allocation15 + $0x20] ss:$8 sps:$4 sm:$0xff]  }
 0x654   : > { %6031 = vmatprep.mubr.bf16.mxu0 %v5806_v29  ;;  %v17428_v29 = vld [vmem:[#allocation15 + $0x240] ss:$8 sps:$4 sm:$0xff]  }
 0x655   : > { %6032 = vmatmul.mubr.bf16.vlgmr.msra.gmra.mxu0 %v5799_v1  ;;  %v17431_v1 = vld [vmem:[#allocation15 + $0x10] ss:$8 sps:$4 sm:$0xff]  }
 0x656   : > { %6317 = vmatpush1.bf16.msra.mxu0 %v17377_v62  ;;  %6336 = vmatprep.mubr.bf16.mxu0 %v19133_v19  ;;  %v17436_v62 = vld [vmem:[#allocation15 + $0x334] ss:$8 sps:$4 sm:$0xff]  }
 0x657   : > { %6318 = vmatprep.subr.bf16.mxu0 %v17382_v57  ;;  %v17439_v57 = vld [vmem:[#allocation15 + $0x4] ss:$8 sps:$4 sm:$0xff]  }
 0x65a   : > { %6319 = vmatpush1.bf16.msra.mxu0 %v17380_v2  ;;  %v17434_v2 = vld [vmem:[#allocation15 + $0x330] ss:$8 sps:$4 sm:$0xff]  }
 0x65b   : > { %6573 = vmatprep.subr.bf16.mxu0 %v17388_v4  ;;  %v17442_v4 = vld [vmem:[#allocation15 + $0x324] ss:$8 sps:$4 sm:$0xff]  }
 0x65d   : > { %v16219_v21 = vpop.f32.mrf.mxu0 }
 0x65f   : > { %v16220_v10 = vpop.f32.mrf.mxu0 }
 0x660   : > { %v16221_v14 = vadd.f32 %v16220_v10, %v16219_v21  ;;  %v17437_v21 = vld [vmem:[#allocation15] ss:$8 sps:$4 sm:$0xff]   ;;  %v17445_v10 = vld [vmem:[#allocation15 + $0xf4] ss:$8 sps:$4 sm:$0xff]  }
 0x661   : > { %v16222_v16 = vpop.f32.mrf.mxu0 }
 0x662   : > { %v5676_v22 = vadd.f32 %v16221_v14, %v5675_v49  ;;  %v17394_v49 = vld [vmem:[#allocation15 + $0x2a4] ss:$8 sps:$4 sm:$0xff]   ;;  %v17448_v14 = vld [vmem:[#allocation15 + $0x314] ss:$8 sps:$4 sm:$0xff]  }
 0x663   : > { %v16223_v25 = vpop.f32.mrf.mxu0 }
 0x664   : > { %v5684_v7 = vadd.f32 %v5676_v22, %v19847_v58  ;;  %v16224_v50 = vadd.f32 %v16223_v25, %v16222_v16  ;;  %v17392_v58 = vld [vmem:[#allocation15 + $0x2a0] ss:$8 sps:$4 sm:$0xff]   ;;  %v17443_v16 = vld [vmem:[#allocation15 + $0xf0] ss:$8 sps:$4 sm:$0xff]   ;;  %v17451_v22 = vld [vmem:[#allocation15 + $0xe4] ss:$8 sps:$4 sm:$0xff]  }
 0x665   : > { %v17446_v25 = vld [vmem:[#allocation15 + $0x310] ss:$8 sps:$4 sm:$0xff]  }
 0x666   : > { %v5679_v27 = vadd.f32 %v16224_v50, %v5678_v9  ;;  %v5707_v28 = vadd.f32 %v5701_v3, %v5684_v7  ;;  %v17449_v7 = vld [vmem:[#allocation15 + $0xe0] ss:$8 sps:$4 sm:$0xff]  }
 0x667   : > { %v17452_v50 = vld [vmem:[#allocation15 + $0x300] ss:$8 sps:$4 sm:$0xff]  }
 0x668   : > { %v5687_v36 = vadd.f32 %v5679_v27, %v5059_v12  ;;  %v5713_v30 = vmax.f32 %v5707_v28, 0.0  ;;  %v17460_v12 = vld [vmem:[#allocation15 + $0x2f4] ss:$8 sps:$4 sm:$0xff]   ;;  %v17455_v27 = vld [vmem:[#allocation15 + $0xd0] ss:$8 sps:$4 sm:$0xff]  }
 0x669   : > { %v17463_v28 = vld [vmem:[#allocation15 + $0xc4] ss:$8 sps:$4 sm:$0xff]  }
 0x66a   : > { %v5710_v63 = vadd.f32 %v5701_v3, %v5687_v36  ;;  %v17457_v3 = vld [vmem:[#allocation15 + $0xd4] ss:$8 sps:$4 sm:$0xff]   ;;  %v17458_v36 = vld [vmem:[#allocation15 + $0x2f0] ss:$8 sps:$4 sm:$0xff]  }
 0x66c   : > { %v5716_v60 = vmax.f32 %v5710_v63, 0.0  ;;  %v17466_v63 = vld [vmem:[#allocation15 + $0x2e4] ss:$8 sps:$4 sm:$0xff]  }
 0x66e   : > { %v19881_v31 = vpack.c.bf16 %v5716_v60, %v5713_v30  ;;  %v17461_v30 = vld [vmem:[#allocation15 + $0xc0] ss:$8 sps:$4 sm:$0xff]   ;;  %v17469_v60 = vld [vmem:[#allocation15 + $0xb4] ss:$8 sps:$4 sm:$0xff]  }
 0x670   : > { %15249 = vmatmul.mubr.msk.bf16.vlgmr.msra.gmra.mxu0 %vm2317_vm5, %v19881_v31  ;;  %v5810_v35 = vshll.u32 %v19881_v31, 16  ;;  %v5808_v23 = vshrl.u32 %v19881_v31, 16 }
 0x671   : > { %6574 = vmatpush1.bf16.msra.mxu0 %v17386_v61  ;;  %6605 = vmatprep.mubr.bf16.mxu0 %v6386_v32  ;;  %v17464_v61 = vld [vmem:[#allocation15 + $0x2e0] ss:$8 sps:$4 sm:$0xff]   ;;  %v17467_v32 = vld [vmem:[#allocation15 + $0xb0] ss:$8 sps:$4 sm:$0xff]  }
 0x672   : > { %6575 = vmatprep.subr.bf16.mxu0 %v17394_v49  ;;  %v5812_v18 = vrot.slane %v5810_v35, 1  ;;  %v17472_v49 = vld [vmem:[#allocation15 + $0x2d4] ss:$8 sps:$4 sm:$0xff]   ;;  %v17475_v35 = vld [vmem:[#allocation15 + $0xa4] ss:$8 sps:$4 sm:$0xff]  }
 0x674   : > { %v5813_v9 = vor.u32 %v5812_v18, %v5808_v23  ;;  %v17478_v23 = vld [vmem:[#allocation15 + $0x2c4] ss:$8 sps:$4 sm:$0xff]   ;;  %v17473_v18 = vld [vmem:[#allocation15 + $0xa0] ss:$8 sps:$4 sm:$0xff]  }
 0x675   : > { %6576 = vmatpush1.bf16.msra.mxu0 %v17392_v58  ;;  %v17470_v58 = vld [vmem:[#allocation15 + $0x2d0] ss:$8 sps:$4 sm:$0xff]  }
 0x676   : > { %15212 = vmatmul.mubr.msk.bf16.vlgmr.msra.gmra.mxu1 %vm2317_vm5, %v5813_v9  ;;  %6577 = vmatprep.subr.bf16.mxu0 %v17400_v52  ;;  %v17481_v52 = vld [vmem:[#allocation15 + $0x94] ss:$8 sps:$4 sm:$0xff]   ;;  %v17479_v9 = vld [vmem:[#allocation15 + $0x90] ss:$8 sps:$4 sm:$0xff]  }
 0x677   : > { %6264 = vmatpush1.bf16.msra.mxu1 %v17395_v34  ;;  %6295 = vmatprep.mubr.bf16.mxu1 %v5718_v5  ;;  %v17424_v5 = vld [vmem:[#allocation15 + $0x254] ss:$8 sps:$4 sm:$0xff]   ;;  %v17476_v34 = vld [vmem:[#allocation15 + $0x2c0] ss:$8 sps:$4 sm:$0xff]  }
 0x678   : > { %6265 = vmatprep.subr.bf16.mxu1 %v17403_v33  ;;  %v17484_v33 = vld [vmem:[#allocation15 + $0x84] ss:$8 sps:$4 sm:$0xff]  }
 0x679   : > { %6578 = vmatpush1.bf16.msra.mxu0 %v17398_v37  ;;  %v6385_v37 = vrot.slane %v19869_v48, 1 }
 0x67a   : > { %6579 = vmatprep.subr.bf16.mxu0 %v17406_v38  ;;  %v17482_v38 = vld [vmem:[#allocation15 + $0x80] ss:$8 sps:$4 sm:$0xff]  }
 0x67b   : > { %6266 = vmatpush1.bf16.msra.mxu1 %v17401_v8  ;;  %v17487_v8 = vld [vmem:[#allocation15 + $0x354] ss:$8 sps:$4 sm:$0xff]  }
 0x67c   : > { %6267 = vmatprep.subr.bf16.mxu1 %v17409_v17  ;;  %v17485_v17 = vld [vmem:[#allocation15 + $0x350] ss:$8 sps:$4 sm:$0xff]  }
 0x67d   : > { %6580 = vmatpush1.bf16.msra.mxu0 %v17404_v39  ;;  %v17490_v39 = vld [vmem:[#allocation15 + $0x344] ss:$8 sps:$4 sm:$0xff]  }
 0x67e   : > { %6581 = vmatprep.subr.bf16.mxu0 %v17412_v40  ;;  %v17488_v40 = vld [vmem:[#allocation15 + $0x340] ss:$8 sps:$4 sm:$0xff]  }
 0x67f   : > { %6268 = vmatpush1.bf16.msra.mxu1 %v17407_v41  ;;  %v6387_v41 = vrot.slane %v19881_v31, 1  ;;  %v17498_v31 = vld [vmem:[#allocation18 + $0x90] sm:$0xff]  }
 0x680   : > { %6269 = vmatprep.subr.bf16.mxu1 %v17415_v42  ;;  %v17491_v42 = vld [vmem:[#allocation18 + $0x38] sm:$0xff]  }
 0x681   : > { %6582 = vmatpush1.bf16.msra.mxu0 %v17410_v47  ;;  %v17492_v47 = vld [vmem:[#allocation18 + $0xa8] sm:$0xff]  }
 0x682   : > { %6583 = vmatprep.subr.bf16.mxu0 %v17418_v24  ;;  %v17494_v24 = vld [vmem:[#allocation18 + $0xa0] sm:$0xff]  }
 0x683   : > { %6270 = vmatpush1.bf16.msra.mxu1 %v17413_v51  ;;  %v17493_v51 = vld [vmem:[#allocation18 + $0x30] sm:$0xff]  }
 0x684   : > { %6271 = vmatprep.subr.bf16.mxu1 %v17421_v46  ;;  %v17495_v46 = vld [vmem:[#allocation18 + $0x28] sm:$0xff]  }
 0x685   : > { %6584 = vmatpush1.bf16.msra.mxu0 %v17416_v53  ;;  %v17497_v53 = vld [vmem:[#allocation18 + $0x20] sm:$0xff]  }
 0x686   : > { %6585 = vmatprep.subr.bf16.mxu0 %v17424_v5  ;;  %v17500_v5 = vld [vmem:[#allocation18 + $0x88] sm:$0xff]  }
 0x687   : > { %6272 = vmatpush1.bf16.msra.mxu1 %v17419_v54  ;;  %v17499_v54 = vld [vmem:[#allocation18 + $0x18] sm:$0xff]  }
 0x688   : > { %6273 = vmatprep.subr.bf16.mxu1 %v17427_v55  ;;  %v17502_v55 = vld [vmem:[#allocation18 + $0x80] sm:$0xff]  }
 0x689   : > { %6586 = vmatpush1.bf16.msra.mxu0 %v17422_v44  ;;  %v17501_v44 = vld [vmem:[#allocation18 + $0x10] sm:$0xff]  }
 0x68a   : > { %6587 = vmatprep.subr.bf16.mxu0 %v17430_v20  ;;  %v17504_v20 = vld [vmem:[#allocation18 + $0x78] sm:$0xff]  }
 0x68b   : > { %6274 = vmatpush1.bf16.msra.mxu1 %v17425_v56  ;;  %v17503_v56 = vld [vmem:[#allocation18 + $0x8] sm:$0xff]  }
 0x68c   : > { %6275 = vmatprep.subr.bf16.mxu1 %v17433_v59  ;;  %v17505_v59 = vld [vmem:[#allocation18] sm:$0xff]  }
 0x68d   : > { %6588 = vmatpush1.bf16.msra.mxu0 %v17428_v29  ;;  %v17506_v29 = vld [vmem:[#allocation18 + $0x70] sm:$0xff]  }
 0x68e   : > { %6589 = vmatprep.subr.bf16.mxu0 %v17436_v62  ;;  %v17507_v62 = vld [vmem:[#allocation18 + $0x68] sm:$0xff]  }
 0x68f   : > { %6276 = vmatpush1.bf16.msra.mxu1 %v17431_v1  ;;  %v17508_v1 = vld [vmem:[#allocation18 + $0xd8] sm:$0xff]  }
 0x690   : > { %6277 = vmatprep.subr.bf16.mxu1 %v17439_v57  ;;  %v17509_v57 = vld [vmem:[#allocation18 + $0x60] sm:$0xff]  }
 0x691   : > { %6590 = vmatpush2.bf16.msra.mxu0 %v17434_v2  ;;  %v17510_v2 = vld [vmem:[#allocation18 + $0xd0] sm:$0xff]  }
 0x692   : > { %6591 = vmatprep.subr.bf16.mxu0 %v17442_v4  ;;  %v17511_v4 = vld [vmem:[#allocation18 + $0x58] sm:$0xff]  }
 0x693   : > { %6278 = vmatpush1.bf16.msra.mxu1 %v17437_v21  ;;  %v17512_v21 = vld [vmem:[#allocation18 + $0xc8] sm:$0xff]  }
 0x694   : > { %6279 = vmatprep.subr.bf16.mxu1 %v17445_v10  ;;  %v17513_v10 = vld [vmem:[#allocation18 + $0x50] sm:$0xff]  }
 0x695   : > { %6592 = vmatpush2.bf16.msra.mxu0 %v17440_v13  ;;  %v17514_v13 = vld [vmem:[#allocation18 + $0xc0] sm:$0xff]  }
 0x696   : > { %6593 = vmatprep.subr.bf16.mxu0 %v17448_v14  ;;  %v17515_v14 = vld [vmem:[#allocation18 + $0x48] sm:$0xff]  }
 0x697   : > { %6280 = vmatpush2.bf16.msra.mxu1 %v17443_v16  ;;  %v17516_v16 = vld [vmem:[#allocation18 + $0xb8] sm:$0xff]  }
 0x698   : > { %6281 = vmatprep.subr.bf16.mxu1 %v17451_v22  ;;  %v17517_v22 = vld [vmem:[#allocation18 + $0x40] sm:$0xff]  }
 0x699   : > { %6594 = vmatpush2.bf16.msra.mxu0 %v17446_v25  ;;  %v17518_v25 = vld [vmem:[#allocation18 + $0xb0] sm:$0xff]  }
 0x69a   : > { %6595 = vmatprep.subr.bf16.mxu0 %v17454_v26 }
 0x69b   : > { %6282 = vmatpush2.bf16.msra.mxu1 %v17449_v7 }
 0x69c   : > { %6283 = vmatprep.subr.bf16.mxu1 %v17457_v3 }
 0x69d   : > { %6596 = vmatpush2.bf16.msra.mxu0 %v17452_v50 }
 0x69e   : > { %6597 = vmatprep.subr.bf16.mxu0 %v17460_v12 }
 0x69f   : > { %6284 = vmatpush2.bf16.msra.mxu1 %v17455_v27 }
 0x6a0   : > { %6285 = vmatprep.subr.bf16.mxu1 %v17463_v28 }
 0x6a1   : > { %6598 = vmatpush2.bf16.msra.mxu0 %v17458_v36 }
 0x6a2   : > { %6599 = vmatprep.subr.bf16.mxu0 %v17466_v63 }
 0x6a3   : > { %6286 = vmatpush2.bf16.msra.mxu1 %v17461_v30 }
 0x6a4   : > { %6287 = vmatprep.subr.bf16.mxu1 %v17469_v60 }
 0x6a5   : > { %6600 = vmatpush2.bf16.msra.mxu0 %v17464_v61 }
 0x6a6   : > { %6601 = vmatprep.subr.bf16.mxu0 %v17472_v49 }
 0x6a7   : > { %6288 = vmatpush2.bf16.msra.mxu1 %v17467_v32 }
 0x6a8   : > { %6289 = vmatprep.subr.bf16.mxu1 %v17475_v35 }
 0x6a9   : > { %6602 = vmatpush2.bf16.msra.mxu0 %v17470_v58 }
 0x6aa   : > { %6603 = vmatprep.subr.bf16.mxu0 %v17478_v23 }
 0x6ab   : > { %6290 = vmatpush2.bf16.msra.mxu1 %v17473_v18 }
 0x6ac   : > { %6291 = vmatprep.subr.bf16.mxu1 %v17481_v52 }
 0x6ad   : > { %6604 = vmatpush2.bf16.msra.mxu0 %v17476_v34 }
 0x6ae   : > { %6954 = vmatprep.subr.bf16.mxu0 %v19133_v19 }
 0x6af   : > { %6292 = vmatpush2.bf16.msra.mxu1 %v17479_v9 }
 0x6b0   : > { %6606 = vmatmul.mubr.bf16.vlgmr.msra.gmra.mxu0 %v6385_v37  ;;  %6293 = vmatprep.subr.bf16.mxu1 %v17484_v33 }
 0x6b1   : > { %6955 = vmatpush1.bf16.msra.mxu0 %v17492_v47 }
 0x6b2   : > { %6956 = vmatprep.subr.bf16.mxu0 %v19133_v19 }
 0x6b3   : > { %6294 = vmatpush2.bf16.msra.mxu1 %v17482_v38  ;;  %v6657_v38 = vld [vmem:[#allocation16] sm:$0x3] }
 0x6b4   : > { %6626 = vmatprep.subr.bf16.mxu1 %v17487_v8 }
 0x6b5   : > { %6957 = vmatpush1.bf16.msra.mxu0 %v17494_v24 }
 0x6b6   : > { %6296 = vmatmul.mubr.bf16.vlgmr.msra.gmra.mxu1 %v19869_v48  ;;  %v17496_v48 = vld [vmem:[#allocation18 + $0x98] sm:$0xff]   ;;  %6958 = vmatprep.subr.bf16.mxu0 %v19133_v19 }
 0x6b7   : > { %6627 = vmatpush1.bf16.msra.mxu1 %v17485_v17  ;;  %6646 = vmatprep.mubr.bf16.mxu1 %v19133_v19 }
 0x6b8   : > { %6628 = vmatprep.subr.bf16.mxu1 %v17490_v39 }
 0x6b9   : > { %6959 = vmatpush1.bf16.msra.mxu0 %v17496_v48  ;;  %v6666_v48 = vrot.slane %v6657_v38, %v19642_v45 }
 0x6ba   : > { %6960 = vmatprep.subr.bf16.mxu0 %v19133_v19 }
 0x6bb   : > { %6629 = vmatpush1.bf16.msra.mxu1 %v17488_v40 }
 0x6bc   : > { %6791 = vmatprep.subr.bf16.mxu1 %v19133_v19 }
 0x6bd   : > { %6961 = vmatpush1.bf16.msra.mxu0 %v17498_v31 }
 0x6be   : > { %15286 = vmatmul.mubr.msk.bf16.vlgmr.msra.gmra.mxu1 %vm2317_vm5, %v6387_v41  ;;  %6962 = vmatprep.subr.bf16.mxu0 %v19133_v19  ;;  %v6662_v41 = vrot.slane %v6657_v38, %v19639_v43 }
 0x6bf   : > { %6792 = vmatpush1.bf16.msra.mxu1 %v17491_v42 }
 0x6c0   : > { %6793 = vmatprep.subr.bf16.mxu1 %v19133_v19 }
 0x6c1   : > { %6963 = vmatpush1.bf16.msra.mxu0 %v17500_v5 }
 0x6c2   : > { %6964 = vmatprep.subr.bf16.mxu0 %v19133_v19 }
 0x6c3   : > { %6794 = vmatpush1.bf16.msra.mxu1 %v17493_v51 }
 0x6c4   : > { %6795 = vmatprep.subr.bf16.mxu1 %v19133_v19 }
 0x6c5   : > { %6965 = vmatpush1.bf16.msra.mxu0 %v17502_v55 }
 0x6c6   : > { %6966 = vmatprep.subr.bf16.mxu0 %v19133_v19 }
 0x6c7   : > { %6796 = vmatpush1.bf16.msra.mxu1 %v17495_v46 }
 0x6c8   : > { %6797 = vmatprep.subr.bf16.mxu1 %v19133_v19 }
 0x6c9   : > { %6967 = vmatpush1.bf16.msra.mxu0 %v17504_v20 }
 0x6ca   : > { %6968 = vmatprep.subr.bf16.mxu0 %v19133_v19 }
 0x6cb   : > { %6798 = vmatpush1.bf16.msra.mxu1 %v17497_v53 }
 0x6cc   : > { %6799 = vmatprep.subr.bf16.mxu1 %v19133_v19 }
 0x6cd   : > { %6969 = vmatpush1.bf16.msra.mxu0 %v17506_v29 }
 0x6ce   : > { %6974 = vmatprep.subr.bf16.mxu0 %v19133_v19 }
 0x6cf   : > { %6800 = vmatpush1.bf16.msra.mxu1 %v17499_v54 }
 0x6d0   : > { %6801 = vmatprep.subr.bf16.mxu1 %v19133_v19 }
 0x6d1   : > { %6975 = vmatpush2.bf16.msra.mxu0 %v17508_v1  ;;  %v17520_v1 = vld [vmem:[#allocation18 + $0x188] sm:$0xff]  }
 0x6d2   : > { %6976 = vmatprep.subr.bf16.mxu0 %v19133_v19 }
 0x6d3   : > { %6802 = vmatpush1.bf16.msra.mxu1 %v17501_v44 }
 0x6d4   : > { %6803 = vmatprep.subr.bf16.mxu1 %v19133_v19 }
 0x6d5   : > { %6977 = vmatpush2.bf16.msra.mxu0 %v17510_v2 }
 0x6d6   : > { %6978 = vmatprep.subr.bf16.mxu0 %v19133_v19 }
 0x6d7   : > { %6804 = vmatpush1.bf16.msra.mxu1 %v17503_v56 }
 0x6d8   : > { %6805 = vmatprep.subr.bf16.mxu1 %v19133_v19 }
 0x6d9   : > { %6979 = vmatpush2.bf16.msra.mxu0 %v17512_v21  ;;  %v17522_v21 = vld [vmem:[#allocation18 + $0x180] sm:$0xff]  }
 0x6da   : > { %6980 = vmatprep.subr.bf16.mxu0 %v19133_v19 }
 0x6db   : > { %6806 = vmatpush1.bf16.msra.mxu1 %v17505_v59  ;;  %v17519_v59 = vld [vmem:[#allocation18 + $0x118] sm:$0xff]  }
 0x6dc   : > { %6811 = vmatprep.subr.bf16.mxu1 %v19133_v19 }
 0x6dd   : > { %6981 = vmatpush2.bf16.msra.mxu0 %v17514_v13  ;;  %v17524_v13 = vld [vmem:[#allocation18 + $0x178] sm:$0xff]  }
 0x6de   : > { %6982 = vmatprep.subr.bf16.mxu0 %v19133_v19 }
 0x6df   : > { %6812 = vmatpush2.bf16.msra.mxu1 %v17507_v62 }
 0x6e0   : > { %6813 = vmatprep.subr.bf16.mxu1 %v19133_v19 }
 0x6e1   : > { %6983 = vmatpush2.bf16.msra.mxu0 %v17516_v16  ;;  %v17526_v16 = vld [vmem:[#allocation18 + $0x170] sm:$0xff]  }
 0x6e2   : > { %6984 = vmatprep.subr.bf16.mxu0 %v19133_v19 }
 0x6e3   : > { %6814 = vmatpush2.bf16.msra.mxu1 %v17509_v57 }
 0x6e4   : > { %6815 = vmatprep.subr.bf16.mxu1 %v19133_v19 }
 0x6e5   : > { %6985 = vmatpush2.bf16.msra.mxu0 %v17518_v25  ;;  %v17528_v25 = vld [vmem:[#allocation18 + $0x168] sm:$0xff]  }
 0x6e6   : > { %7276 = vmatprep.subr.bf16.mxu0 %v19133_v19 }
 0x6e7   : > { %6816 = vmatpush2.bf16.msra.mxu1 %v17511_v4  ;;  %v17521_v4 = vld [vmem:[#allocation18 + $0x110] sm:$0xff]  }
 0x6e8   : > { %6817 = vmatprep.subr.bf16.mxu1 %v19133_v19 }
 0x6eb   : > { %6818 = vmatpush2.bf16.msra.mxu1 %v17513_v10  ;;  %v17523_v10 = vld [vmem:[#allocation18 + $0x108] sm:$0xff]  }
 0x6ec   : > { %6819 = vmatprep.subr.bf16.mxu1 %v19133_v19 }
 0x6ef   : > { %6820 = vmatpush2.bf16.msra.mxu1 %v17515_v14  ;;  %v17525_v14 = vld [vmem:[#allocation18 + $0x100] sm:$0xff]  }
 0x6f0   : > { %6821 = vmatprep.subr.bf16.mxu1 %v19133_v19 }
 0x6f3   : > { %6822 = vmatpush2.bf16.msra.mxu1 %v17517_v22  ;;  %v17527_v22 = vld [vmem:[#allocation18 + $0xf8] sm:$0xff]  }
 0x6f4   : > { %7116 = vmatprep.subr.bf16.mxu1 %v19133_v19 }
 0x715   : > { %v6033_v26 = vpop.f32.mrf.mxu0 }
 0x717   : > { %v6035_v7 = vpop.f32.mrf.mxu0 }
 0x719   : > { %v6037_v3 = vpop.f32.mrf.mxu0 }
 0x71a   : > { %v17531_v3 = vld [vmem:[#allocation18 + $0xe8] sm:$0xff]  }
 0x71b   : > { %v6038_v50 = vpop.f32.mrf.mxu0 }
 0x71c   : > { %v17532_v50 = vld [vmem:[#allocation18 + $0x158] sm:$0xff]  }
 0x730   : > { %v6338_v12 = vpop.f32.mrf.mxu0 }
 0x732   : > { %v6340_v27 = vpop.f32.mrf.mxu0 }
 0x734   : > { %v6342_v28 = vpop.f32.mrf.mxu0 }
 0x735   : > { %v17535_v28 = vld [vmem:[#allocation18 + $0x148] sm:$0xff]  }
 0x736   : > { %v6074_v36 = vpop.f32.mrf.mxu1  ;;  %v6343_v63 = vpop.f32.mrf.mxu0 }
 0x737   : > { %v6075_v30 = vadd.f32 %v6074_v36, %v6033_v26  ;;  %v17529_v26 = vld [vmem:[#allocation18 + $0xf0] sm:$0xff]   ;;  %v17536_v36 = vld [vmem:[#allocation18 + $0x1b8] sm:$0xff]   ;;  %v17537_v63 = vld [vmem:[#allocation18 + $0x140] sm:$0xff]  }
 0x738   : > { %v6076_v60 = vpop.f32.mrf.mxu1 }
 0x739   : > { %v6077_v61 = vadd.f32 %v6076_v60, %v6035_v7  ;;  %v17530_v7 = vld [vmem:[#allocation18 + $0x160] sm:$0xff]   ;;  %v17539_v60 = vld [vmem:[#allocation18 + $0x138] sm:$0xff]  }
 0x73a   : > { %v6078_v49 = vpop.f32.mrf.mxu1 }
 0x73b   : > { %v17541_v49 = vld [vmem:[#allocation18 + $0x130] sm:$0xff]  }
 0x73c   : > { %v6079_v32 = vpop.f32.mrf.mxu1 }
 0x73d   : > { %v17542_v32 = vld [vmem:[#allocation18 + $0x1a0] sm:$0xff]  }
 0x770   : > { %v6607_v35 = vpop.f32.mrf.mxu0 }
 0x772   : > { %v6609_v58 = vpop.f32.mrf.mxu0 }
 0x774   : > { %v6611_v23 = vpop.f32.mrf.mxu0 }
 0x775   : > { %v17545_v23 = vld [vmem:[#allocation18 + $0x120] sm:$0xff]  }
 0x776   : > { %v6297_v18 = vpop.f32.mrf.mxu1  ;;  %v6612_v52 = vpop.f32.mrf.mxu0 }
 0x777   : > { %v6298_v33 = vadd.f32 %v6297_v18, %v6075_v30  ;;  %v17538_v30 = vld [vmem:[#allocation18 + $0x1b0] sm:$0xff]   ;;  %v17547_v52 = vld [vmem:[#allocation18 + $0x1f8] sm:$0xff]  }
 0x778   : > { %v6299_v34 = vpop.f32.mrf.mxu1  ;;  %v17546_v18 = vld [vmem:[#allocation18 + $0x190] sm:$0xff]  }
 0x779   : > { %v6300_v8 = vadd.f32 %v6299_v34, %v6077_v61  ;;  %v6339_v39 = vadd.f32 %v6338_v12, %v6298_v33  ;;  %v17533_v12 = vld [vmem:[#allocation18 + $0xe0] sm:$0xff]   ;;  %v17540_v61 = vld [vmem:[#allocation18 + $0x1a8] sm:$0xff]  }
 0x77a   : > { %v6301_v9 = vpop.f32.mrf.mxu1  ;;  %v17548_v33 = vld [vmem:[#allocation18 + $0x268] sm:$0xff]  }
 0x77b   : > { %v6341_v47 = vadd.f32 %v6340_v27, %v6300_v8  ;;  %v17534_v27 = vld [vmem:[#allocation18 + $0x150] sm:$0xff]  }
 0x77c   : > { %v6302_v37 = vpop.f32.mrf.mxu1  ;;  %v17549_v8 = vld [vmem:[#allocation18 + $0x1f0] sm:$0xff]  }
 0x77e   : > { %v6648_v17 = vpop.f32.mrf.mxu1 }
 0x77f   : > { %v6649_v40 = vadd.f32 %v6648_v17, %v6607_v35  ;;  %v17543_v35 = vld [vmem:[#allocation18 + $0x128] sm:$0xff]   ;;  %v17550_v17 = vld [vmem:[#allocation18 + $0x260] sm:$0xff]  }
 0x780   : > { %v6650_v42 = vpop.f32.mrf.mxu1 }
 0x781   : > { %v6655_v24 = vadd.f32 %v6649_v40, %v6339_v39  ;;  %v6651_v51 = vadd.f32 %v6650_v42, %v6609_v58  ;;  %v17544_v58 = vld [vmem:[#allocation18 + $0x198] sm:$0xff]   ;;  %v17551_v39 = vld [vmem:[#allocation18 + $0x1e8] sm:$0xff]   ;;  %v17554_v42 = vld [vmem:[#allocation18 + $0x250] sm:$0xff]  }
 0x782   : > { %v6652_v46 = vpop.f32.mrf.mxu1  ;;  %v17552_v40 = vld [vmem:[#allocation18 + $0x258] sm:$0xff]  }
 0x783   : > { %v6669_v31 = vadd.f32 %v6662_v41, %v6655_v24  ;;  %v6656_v53 = vadd.f32 %v6651_v51, %v6341_v47  ;;  %v17553_v41 = vld [vmem:[#allocation18 + $0x1e0] sm:$0xff]   ;;  %v17555_v47 = vld [vmem:[#allocation18 + $0x1d8] sm:$0xff]   ;;  %v17556_v24 = vld [vmem:[#allocation18 + $0x248] sm:$0xff]  }
 0x784   : > { %v6653_v5 = vpop.f32.mrf.mxu1  ;;  %v17557_v51 = vld [vmem:[#allocation18 + $0x1d0] sm:$0xff]   ;;  %v17559_v46 = vld [vmem:[#allocation18 + $0x1c8] sm:$0xff]  }
 0x785   : > { %v6671_v54 = vmax.f32 %v6669_v31, 0.0  ;;  %v6670_v55 = vadd.f32 %v6666_v48, %v6656_v53  ;;  %v17558_v48 = vld [vmem:[#allocation18 + $0x240] sm:$0xff]   ;;  %v17560_v31 = vld [vmem:[#allocation18 + $0x238] sm:$0xff]   ;;  %v17562_v5 = vld [vmem:[#allocation18 + $0x230] sm:$0xff]  }
 0x786   : > { %v17561_v53 = vld [vmem:[#allocation18 + $0x1c0] sm:$0xff]  }
 0x787   : > { %v6672_v44 = vmax.f32 %v6670_v55, 0.0  ;;  %v19925_v20 = vpack.c.bf16 %v6671_v54, %v6671_v54  ;;  %v17563_v54 = vld [vmem:[#allocation18 + $0x228] sm:$0xff]   ;;  %v17564_v55 = vld [vmem:[#allocation18 + $0x298] sm:$0xff]  }
 0x789   : > { %v19927_v56 = vpack.c.bf16 %v6672_v44, %v6672_v44  ;;  %v19937_v57 = vshrl.u32 %v19925_v20, 16  ;;  %v7026_v34 = vrot.slane %v19925_v20, 1  ;;  %v17565_v44 = vld [vmem:[#allocation18 + $0x220] sm:$0xff]  }
 0x78b   : > { %15301 = vmatprep.mubr.msk.bf16.mxu1 %vm4368_vm6, %v19927_v56  ;;  %v19932_v29 = vshrl.u32 %v19927_v56, 16  ;;  %v7027_v62 = vrot.slane %v19927_v56, 1  ;;  %v7347_v9 = vrot.slane %v19927_v56, 2  ;;  %v7186_v37 = vrot.slane %v19937_v57, 1 }
 0x78c   : > { %6824 = vmatmul.mubr.bf16.vlgmr.msra.gmra.mxu1 %v19925_v20 }
 0x78d   : > { %7117 = vmatpush1.bf16.msra.mxu1 %v17519_v59  ;;  %15316 = vmatprep.mubr.msk.bf16.mxu0 %vm4368_vm6, %v19932_v29  ;;  %v7187_v2 = vrot.slane %v19932_v29, 1  ;;  %v7507_v38 = vrot.slane %v19932_v29, 2  ;;  %v17566_v59 = vld [vmem:[#allocation18 + $0x290] sm:$0xff]   ;;  %v17567_v29 = vld [vmem:[#allocation18 + $0x218] sm:$0xff]  }
 0x78e   : > { %15331 = vmatprep.mubr.msk.bf16.mxu1 %vm4368_vm6, %v7027_v62  ;;  %6987 = vmatmul.mubr.bf16.vlgmr.msra.gmra.mxu0 %v19937_v57  ;;  %v17568_v62 = vld [vmem:[#allocation18 + $0x288] sm:$0xff]  }
 0x78f   : > { %7277 = vmatpush1.bf16.msra.mxu0 %v17520_v1  ;;  %7118 = vmatprep.subr.bf16.mxu1 %v19133_v19  ;;  %v17569_v1 = vld [vmem:[#allocation18 + $0x210] sm:$0xff]  }
 0x790   : > { %15346 = vmatprep.mubr.msk.bf16.mxu0 %vm4368_vm6, %v7187_v2  ;;  %7278 = vmatprep.subr.bf16.mxu0 %v19133_v19  ;;  %v17570_v2 = vld [vmem:[#allocation18 + $0x280] sm:$0xff]  }
 0x791   : > { %7119 = vmatpush1.bf16.msra.mxu1 %v17521_v4  ;;  %v17571_v4 = vld [vmem:[#allocation18 + $0x208] sm:$0xff]  }
 0x792   : > { %7120 = vmatprep.subr.bf16.mxu1 %v19133_v19 }
 0x793   : > { %7279 = vmatpush1.bf16.msra.mxu0 %v17522_v21  ;;  %v17572_v21 = vld [vmem:[#allocation18 + $0x278] sm:$0xff]  }
 0x794   : > { %7280 = vmatprep.subr.bf16.mxu0 %v19133_v19 }
 0x795   : > { %7121 = vmatpush1.bf16.msra.mxu1 %v17523_v10  ;;  %v17573_v10 = vld [vmem:[#allocation18 + $0x200] sm:$0xff]  }
 0x796   : > { %7122 = vmatprep.subr.bf16.mxu1 %v19133_v19 }
 0x797   : > { %7281 = vmatpush1.bf16.msra.mxu0 %v17524_v13  ;;  %v17574_v13 = vld [vmem:[#allocation18 + $0x270] sm:$0xff]  }
 0x798   : > { %7282 = vmatprep.subr.bf16.mxu0 %v19133_v19 }
 0x799   : > { %7123 = vmatpush1.bf16.msra.mxu1 %v17525_v14  ;;  %v17575_v14 = vld [vmem:[#allocation18 + $0x2d8] sm:$0xff]  }
 0x79a   : > { %7124 = vmatprep.subr.bf16.mxu1 %v19133_v19 }
 0x79b   : > { %7283 = vmatpush1.bf16.msra.mxu0 %v17526_v16  ;;  %v7346_v16 = vrot.slane %v19925_v20, 2 }
 0x79c   : > { %7284 = vmatprep.subr.bf16.mxu0 %v19133_v19 }
 0x79d   : > { %7125 = vmatpush1.bf16.msra.mxu1 %v17527_v22  ;;  %v7667_v22 = vrot.slane %v19927_v56, 3  ;;  %v17579_v56 = vld [vmem:[#allocation18 + $0x2b8] sm:$0xff]  }
 0x79e   : > { %7126 = vmatprep.subr.bf16.mxu1 %v19133_v19 }
 0x79f   : > { %7285 = vmatpush1.bf16.msra.mxu0 %v17528_v25  ;;  %v7506_v25 = vrot.slane %v19937_v57, 2  ;;  %v17580_v57 = vld [vmem:[#allocation18 + $0x2b0] sm:$0xff]  }
 0x7a0   : > { %7286 = vmatprep.subr.bf16.mxu0 %v19133_v19 }
 0x7a1   : > { %7127 = vmatpush1.bf16.msra.mxu1 %v17529_v26  ;;  %v17576_v26 = vld [vmem:[#allocation18 + $0x2d0] sm:$0xff]  }
 0x7a2   : > { %7128 = vmatprep.subr.bf16.mxu1 %v19133_v19 }
 0x7a3   : > { %7287 = vmatpush1.bf16.msra.mxu0 %v17530_v7  ;;  %v17577_v7 = vld [vmem:[#allocation18 + $0x2c8] sm:$0xff]  }
 0x7a4   : > { %7288 = vmatprep.subr.bf16.mxu0 %v19133_v19 }
 0x7a5   : > { %7129 = vmatpush1.bf16.msra.mxu1 %v17531_v3  ;;  %v17578_v3 = vld [vmem:[#allocation18 + $0x2c0] sm:$0xff]  }
 0x7a6   : > { %7130 = vmatprep.subr.bf16.mxu1 %v19133_v19 }
 0x7a7   : > { %7289 = vmatpush1.bf16.msra.mxu0 %v17532_v50  ;;  %v17581_v50 = vld [vmem:[#allocation18 + $0x2a8] sm:$0xff]  }
 0x7a8   : > { %7290 = vmatprep.subr.bf16.mxu0 %v19133_v19 }
 0x7a9   : > { %7131 = vmatpush1.bf16.msra.mxu1 %v17533_v12  ;;  %v17582_v12 = vld [vmem:[#allocation18 + $0x2a0] sm:$0xff]  }
 0x7aa   : > { %7136 = vmatprep.subr.bf16.mxu1 %v19133_v19 }
 0x7ab   : > { %7291 = vmatpush1.bf16.msra.mxu0 %v17534_v27  ;;  %v17583_v27 = vld [vmem:[#allocation18 + $0x308] sm:$0xff]  }
 0x7ac   : > { %7296 = vmatprep.subr.bf16.mxu0 %v19133_v19 }
 0x7ad   : > { %7137 = vmatpush2.bf16.msra.mxu1 %v17535_v28  ;;  %v17584_v28 = vld [vmem:[#allocation18 + $0x300] sm:$0xff]  }
 0x7ae   : > { %7138 = vmatprep.subr.bf16.mxu1 %v19133_v19 }
 0x7af   : > { %7297 = vmatpush2.bf16.msra.mxu0 %v17536_v36  ;;  %v17585_v36 = vld [vmem:[#allocation18 + $0x2f8] sm:$0xff]  }
 0x7b0   : > { %7298 = vmatprep.subr.bf16.mxu0 %v19133_v19 }
 0x7b1   : > { %7139 = vmatpush2.bf16.msra.mxu1 %v17537_v63  ;;  %v17586_v63 = vld [vmem:[#allocation18 + $0x2f0] sm:$0xff]  }
 0x7b2   : > { %7140 = vmatprep.subr.bf16.mxu1 %v19133_v19 }
 0x7b3   : > { %7299 = vmatpush2.bf16.msra.mxu0 %v17538_v30  ;;  %v17587_v30 = vld [vmem:[#allocation18 + $0x2e8] sm:$0xff]  }
 0x7b4   : > { %7300 = vmatprep.subr.bf16.mxu0 %v19133_v19 }
 0x7b5   : > { %7141 = vmatpush2.bf16.msra.mxu1 %v17539_v60  ;;  %v17588_v60 = vld [vmem:[#allocation18 + $0x2e0] sm:$0xff]  }
 0x7b6   : > { %7142 = vmatprep.subr.bf16.mxu1 %v19133_v19 }
 0x7b7   : > { %7301 = vmatpush2.bf16.msra.mxu0 %v17540_v61  ;;  %v7666_v61 = vrot.slane %v19925_v20, 3 }
 0x7b8   : > { %7302 = vmatprep.subr.bf16.mxu0 %v19133_v19 }
 0x7b9   : > { %7143 = vmatpush2.bf16.msra.mxu1 %v17541_v49  ;;  %v6675_v49 = vld [vmem:[#allocation19] sm:$0x1] }
 0x7ba   : > { %7144 = vmatprep.subr.bf16.mxu1 %v19133_v19 }
 0x7bb   : > { %7303 = vmatpush2.bf16.msra.mxu0 %v17542_v32 }
 0x7bc   : > { %7304 = vmatprep.subr.bf16.mxu0 %v19133_v19 }
 0x7bd   : > { %7145 = vmatpush2.bf16.msra.mxu1 %v17543_v35 }
 0x7be   : > { %7146 = vmatprep.subr.bf16.mxu1 %v19133_v19 }
 0x7bf   : > { %7305 = vmatpush2.bf16.msra.mxu0 %v17544_v58 }
 0x7c0   : > { %7306 = vmatprep.subr.bf16.mxu0 %v19133_v19 }
 0x7c1   : > { %7147 = vmatpush2.bf16.msra.mxu1 %v17545_v23 }
 0x7c2   : > { %7436 = vmatprep.subr.bf16.mxu1 %v19133_v19 }
 0x7c3   : > { %7307 = vmatpush2.bf16.msra.mxu0 %v17546_v18 }
 0x7c4   : > { %7149 = vmatmul.mubr.bf16.vlgmr.msra.gmra.mxu1 %v7026_v34  ;;  %7596 = vmatprep.subr.bf16.mxu0 %v19133_v19 }
 0x7c5   : > { %7437 = vmatpush1.bf16.msra.mxu1 %v17547_v52  ;;  %15361 = vmatprep.mubr.msk.bf16.mxu1 %vm4368_vm6, %v7347_v9 }
 0x7c6   : > { %7309 = vmatmul.mubr.bf16.vlgmr.msra.gmra.mxu0 %v7186_v37  ;;  %7438 = vmatprep.subr.bf16.mxu1 %v19133_v19 }
 0x7c7   : > { %7597 = vmatpush1.bf16.msra.mxu0 %v17548_v33  ;;  %15376 = vmatprep.mubr.msk.bf16.mxu0 %vm4368_vm6, %v7507_v38 }
 0x7c8   : > { %7598 = vmatprep.subr.bf16.mxu0 %v19133_v19 }
 0x7c9   : > { %7439 = vmatpush1.bf16.msra.mxu1 %v17549_v8 }
 0x7ca   : > { %7440 = vmatprep.subr.bf16.mxu1 %v19133_v19 }
 0x7cb   : > { %7599 = vmatpush1.bf16.msra.mxu0 %v17550_v17 }
 0x7cc   : > { %7600 = vmatprep.subr.bf16.mxu0 %v19133_v19 }
 0x7cd   : > { %7441 = vmatpush1.bf16.msra.mxu1 %v17551_v39 }
 0x7ce   : > { %7442 = vmatprep.subr.bf16.mxu1 %v19133_v19 }
 0x7cf   : > { %7601 = vmatpush1.bf16.msra.mxu0 %v17552_v40 }
 0x7d0   : > { %7602 = vmatprep.subr.bf16.mxu0 %v19133_v19 }
 0x7d1   : > { %7443 = vmatpush1.bf16.msra.mxu1 %v17553_v41 }
 0x7d2   : > { %7444 = vmatprep.subr.bf16.mxu1 %v19133_v19 }
 0x7d3   : > { %7603 = vmatpush1.bf16.msra.mxu0 %v17554_v42  ;;  %v17589_v42 = vld [vmem:[#allocation21] ss:$8 sps:$4 sm:$0xff]  }
 0x7d4   : > { %7604 = vmatprep.subr.bf16.mxu0 %v19133_v19 }
 0x7d5   : > { %7445 = vmatpush1.bf16.msra.mxu1 %v17555_v47  ;;  %v17591_v47 = vld [vmem:[#allocation21 + $0x4] ss:$8 sps:$4 sm:$0xff]  }
 0x7d6   : > { %7446 = vmatprep.subr.bf16.mxu1 %v19133_v19 }
 0x7d7   : > { %7605 = vmatpush1.bf16.msra.mxu0 %v17556_v24 }
 0x7d8   : > { %7606 = vmatprep.subr.bf16.mxu0 %v19133_v19 }
 0x7d9   : > { %7447 = vmatpush1.bf16.msra.mxu1 %v17557_v51 }
 0x7da   : > { %7448 = vmatprep.subr.bf16.mxu1 %v19133_v19 }
 0x7db   : > { %7607 = vmatpush1.bf16.msra.mxu0 %v17558_v48 }
 0x7dc   : > { %7608 = vmatprep.subr.bf16.mxu0 %v19133_v19 }
 0x7dd   : > { %7449 = vmatpush1.bf16.msra.mxu1 %v17559_v46 }
 0x7de   : > { %7450 = vmatprep.subr.bf16.mxu1 %v19133_v19 }
 0x7df   : > { %7609 = vmatpush1.bf16.msra.mxu0 %v17560_v31 }
 0x7e0   : > { %7610 = vmatprep.subr.bf16.mxu0 %v19133_v19 }
 0x7e1   : > { %7451 = vmatpush1.bf16.msra.mxu1 %v17561_v53 }
 0x7e2   : > { %7456 = vmatprep.subr.bf16.mxu1 %v19133_v19 }
 0x7e3   : > { %7611 = vmatpush1.bf16.msra.mxu0 %v17562_v5 }
 0x7e4   : > { %7616 = vmatprep.subr.bf16.mxu0 %v19133_v19 }
 0x7e5   : > { %7457 = vmatpush2.bf16.msra.mxu1 %v17563_v54 }
 0x7e6   : > { %7458 = vmatprep.subr.bf16.mxu1 %v19133_v19 }
 0x7e7   : > { %7617 = vmatpush2.bf16.msra.mxu0 %v17564_v55 }
 0x7e8   : > { %7618 = vmatprep.subr.bf16.mxu0 %v19133_v19 }
 0x7e9   : > { %7459 = vmatpush2.bf16.msra.mxu1 %v17565_v44 }
 0x7ea   : > { %7460 = vmatprep.subr.bf16.mxu1 %v19133_v19 }
 0x7eb   : > { %7619 = vmatpush2.bf16.msra.mxu0 %v17566_v59 }
 0x7ec   : > { %7620 = vmatprep.subr.bf16.mxu0 %v19133_v19 }
 0x7ed   : > { %7461 = vmatpush2.bf16.msra.mxu1 %v17567_v29 }
 0x7ee   : > { %7462 = vmatprep.subr.bf16.mxu1 %v19133_v19 }
 0x7ef   : > { %7621 = vmatpush2.bf16.msra.mxu0 %v17568_v62 }
 0x7f0   : > { %7622 = vmatprep.subr.bf16.mxu0 %v19133_v19 }
 0x7f1   : > { %7463 = vmatpush2.bf16.msra.mxu1 %v17569_v1 }
 0x7f2   : > { %7464 = vmatprep.subr.bf16.mxu1 %v19133_v19 }
 0x7f3   : > { %7623 = vmatpush2.bf16.msra.mxu0 %v17570_v2 }
 0x7f4   : > { %7624 = vmatprep.subr.bf16.mxu0 %v19133_v19 }
 0x7f5   : > { %7465 = vmatpush2.bf16.msra.mxu1 %v17571_v4 }
 0x7f6   : > { %7466 = vmatprep.subr.bf16.mxu1 %v19133_v19 }
 0x7f7   : > { %7625 = vmatpush2.bf16.msra.mxu0 %v17572_v21 }
 0x7f8   : > { %7626 = vmatprep.subr.bf16.mxu0 %v19133_v19 }
 0x7f9   : > { %7467 = vmatpush2.bf16.msra.mxu1 %v17573_v10 }
 0x7fa   : > { %7756 = vmatprep.subr.bf16.mxu1 %v19133_v19 }
 0x7fb   : > { %7627 = vmatpush2.bf16.msra.mxu0 %v17574_v13 }
 0x7fc   : > { %7469 = vmatmul.mubr.bf16.vlgmr.msra.gmra.mxu1 %v7346_v16  ;;  %7842 = vmatprep.subr.bf16.mxu0 %v17591_v47  ;;  %v17594_v16 = vld [vmem:[#allocation21 + $0x24] ss:$8 sps:$4 sm:$0xff]  }
 0x7fd   : > { %7757 = vmatpush1.bf16.msra.mxu1 %v17575_v14  ;;  %15391 = vmatprep.mubr.msk.bf16.mxu1 %vm4368_vm6, %v7667_v22  ;;  %v17592_v22 = vld [vmem:[#allocation21 + $0x20] ss:$8 sps:$4 sm:$0xff]   ;;  %v17636_v47 = vld [vmem:[#allocation24 + $0x16c] ss:$12 sps:$4 sm:$0xff]  }
 0x7fe   : > { %7629 = vmatmul.mubr.bf16.vlgmr.msra.gmra.mxu0 %v7506_v25  ;;  %7758 = vmatprep.subr.bf16.mxu1 %v19133_v19  ;;  %v17597_v25 = vld [vmem:[#allocation21 + $0x14] ss:$8 sps:$4 sm:$0xff]  }
 0x7ff   : > { %7860 = vmatprep.mubr.bf16.mxu0 %v19133_v19  ;;  %7843 = vmatpush1.bf16.msra.mxu0 %v17589_v42  ;;  %v17633_v42 = vld [vmem:[#allocation24 + $0x188] ss:$12 sps:$4 sm:$0xff]  }
 0x800   : > { %7904 = vmatprep.subr.bf16.mxu0 %v17597_v25  ;;  %v17665_v25 = vld [vmem:[#allocation24 + $0x218] ss:$12 sps:$4 sm:$0xff]  }
 0x801   : > { %7759 = vmatpush1.bf16.msra.mxu1 %v17576_v26  ;;  %v17600_v26 = vld [vmem:[#allocation21 + $0x44] ss:$8 sps:$4 sm:$0xff]  }
 0x802   : > { %7760 = vmatprep.subr.bf16.mxu1 %v19133_v19 }
 0x805   : > { %7761 = vmatpush1.bf16.msra.mxu1 %v17577_v7 }
 0x806   : > { %7762 = vmatprep.subr.bf16.mxu1 %v19133_v19 }
 0x809   : > { %7763 = vmatpush1.bf16.msra.mxu1 %v17578_v3  ;;  %v7799_v3 = vld [vmem:[%s19535_s0] sm:$0x1]  ;;  %s20530_s0 = sld [smem:[#allocation58_spill]] }
 0x80a   : > { %7764 = vmatprep.subr.bf16.mxu1 %v19133_v19 }
 0x80d   : > { %7765 = vmatpush1.bf16.msra.mxu1 %v17579_v56 }
 0x80e   : > { %7766 = vmatprep.subr.bf16.mxu1 %v19133_v19 }
 0x811   : > { %7767 = vmatpush1.bf16.msra.mxu1 %v17580_v57 }
 0x812   : > { %7768 = vmatprep.subr.bf16.mxu1 %v19133_v19 }
 0x815   : > { %7769 = vmatpush1.bf16.msra.mxu1 %v17581_v50 }
 0x816   : > { %7770 = vmatprep.subr.bf16.mxu1 %v19133_v19 }
 0x819   : > { %7771 = vmatpush1.bf16.msra.mxu1 %v17582_v12  ;;  %v17595_v12 = vld [vmem:[#allocation21 + $0x10] ss:$8 sps:$4 sm:$0xff]  }
 0x81a   : > { %7776 = vmatprep.subr.bf16.mxu1 %v19133_v19 }
 0x81d   : > { %7777 = vmatpush2.bf16.msra.mxu1 %v17583_v27  ;;  %v17598_v27 = vld [vmem:[#allocation21 + $0x40] ss:$8 sps:$4 sm:$0xff]  }
 0x81e   : > { %7778 = vmatprep.subr.bf16.mxu1 %v19133_v19 }
 0x821   : > { %7779 = vmatpush2.bf16.msra.mxu1 %v17584_v28 }
 0x822   : > { %7780 = vmatprep.subr.bf16.mxu1 %v19133_v19 }
 0x825   : > { %7781 = vmatpush2.bf16.msra.mxu1 %v17585_v36  ;;  %v17603_v36 = vld [vmem:[#allocation21 + $0x34] ss:$8 sps:$4 sm:$0xff]  }
 0x826   : > { %7782 = vmatprep.subr.bf16.mxu1 %v19133_v19 }
 0x829   : > { %7783 = vmatpush2.bf16.msra.mxu1 %v17586_v63  ;;  %v17606_v63 = vld [vmem:[#allocation21 + $0x64] ss:$8 sps:$4 sm:$0xff]  }
 0x82a   : > { %7784 = vmatprep.subr.bf16.mxu1 %v19133_v19 }
 0x82d   : > { %7785 = vmatpush2.bf16.msra.mxu1 %v17587_v30  ;;  %v17601_v30 = vld [vmem:[#allocation21 + $0x30] ss:$8 sps:$4 sm:$0xff]  }
 0x82e   : > { %7786 = vmatprep.subr.bf16.mxu1 %v19133_v19 }
 0x831   : > { %7787 = vmatpush2.bf16.msra.mxu1 %v17588_v60  ;;  %v17604_v60 = vld [vmem:[#allocation21 + $0x60] ss:$8 sps:$4 sm:$0xff]  }
 0x832   : > { %7964 = vmatprep.subr.bf16.mxu1 %v17594_v16  ;;  %v17662_v16 = vld [vmem:[#allocation24 + $0x210] ss:$12 sps:$4 sm:$0xff]  }
 0x834   : > { %7789 = vmatmul.mubr.bf16.vlgmr.msra.gmra.mxu1 %v7666_v61  ;;  %v17609_v61 = vld [vmem:[#allocation21 + $0x54] ss:$8 sps:$4 sm:$0xff]  }
 0x835   : > { %7982 = vmatprep.mubr.bf16.mxu1 %v19133_v19  ;;  %7965 = vmatpush1.bf16.msra.mxu1 %v17592_v22  ;;  %v17664_v22 = vld [vmem:[#allocation24 + $0x214] ss:$12 sps:$4 sm:$0xff]  }
 0x836   : > { %8084 = vmatprep.subr.bf16.mxu1 %v17600_v26  ;;  %v17668_v26 = vld [vmem:[#allocation24 + $0xac] ss:$12 sps:$4 sm:$0xff]  }
 0x84c   : > { %v6825_v32 = vpop.f32.mrf.mxu1 }
 0x84d   : > { %v6831_v35 = vadd.f32 %v6825_v32, %v6675_v49  ;;  %v17607_v49 = vld [vmem:[#allocation21 + $0x50] ss:$8 sps:$4 sm:$0xff]   ;;  %v17612_v32 = vld [vmem:[#allocation24 + $0x1fc] ss:$12 sps:$4 sm:$0xff]  }
 0x84e   : > { %v6827_v58 = vpop.f32.mrf.mxu1  ;;  %v6988_v23 = vpop.f32.mrf.mxu0 }
 0x84f   : > { %v6994_v18 = vadd.f32 %v6988_v23, %v6831_v35  ;;  %v17613_v35 = vld [vmem:[#allocation24 + $0x200] ss:$12 sps:$4 sm:$0xff]   ;;  %v17617_v58 = vld [vmem:[#allocation24 + $0x1e8] ss:$12 sps:$4 sm:$0xff]   ;;  %v17610_v23 = vld [vmem:[#allocation24 + $0x1f8] ss:$12 sps:$4 sm:$0xff]  }
 0x850   : > { %v6828_v52 = vpop.f32.mrf.mxu1  ;;  %v6990_v34 = vpop.f32.mrf.mxu0 }
 0x851   : > { %v17614_v52 = vld [vmem:[#allocation24 + $0x1e0] ss:$12 sps:$4 sm:$0xff]  }
 0x852   : > { %v6829_v9 = vpop.f32.mrf.mxu1  ;;  %v6991_v33 = vpop.f32.mrf.mxu0  ;;  %v17620_v34 = vld [vmem:[#allocation24 + $0x1cc] ss:$12 sps:$4 sm:$0xff]  }
 0x853   : > { %v17618_v9 = vld [vmem:[#allocation24 + $0x1c8] ss:$12 sps:$4 sm:$0xff]   ;;  %v17621_v33 = vld [vmem:[#allocation24 + $0x1d0] ss:$12 sps:$4 sm:$0xff]  }
 0x854   : > { %v6992_v37 = vpop.f32.mrf.mxu0 }
 0x855   : > { %v17624_v37 = vld [vmem:[#allocation24 + $0x1b4] ss:$12 sps:$4 sm:$0xff]  }
 0x884   : > { %v7150_v38 = vpop.f32.mrf.mxu1 }
 0x885   : > { %v7156_v8 = vadd.f32 %v7150_v38, %v6994_v18  ;;  %v17616_v18 = vld [vmem:[#allocation24 + $0x1e4] ss:$12 sps:$4 sm:$0xff]  }
 0x886   : > { %v7152_v17 = vpop.f32.mrf.mxu1  ;;  %v7310_v39 = vpop.f32.mrf.mxu0  ;;  %v17622_v38 = vld [vmem:[#allocation24 + $0x1b0] ss:$12 sps:$4 sm:$0xff]  }
 0x887   : > { %v7316_v40 = vadd.f32 %v7310_v39, %v7156_v8  ;;  %v17625_v8 = vld [vmem:[#allocation24 + $0x1b8] ss:$12 sps:$4 sm:$0xff]   ;;  %v17628_v17 = vld [vmem:[#allocation24 + $0x19c] ss:$12 sps:$4 sm:$0xff]  }
 0x888   : > { %v7153_v20 = vpop.f32.mrf.mxu1  ;;  %v7312_v41 = vpop.f32.mrf.mxu0  ;;  %v17626_v39 = vld [vmem:[#allocation24 + $0x198] ss:$12 sps:$4 sm:$0xff]  }
 0x889   : > { %v17632_v20 = vld [vmem:[#allocation24 + $0x184] ss:$12 sps:$4 sm:$0xff]   ;;  %v17630_v41 = vld [vmem:[#allocation24 + $0x180] ss:$12 sps:$4 sm:$0xff]  }
 0x88a   : > { %v7154_v24 = vpop.f32.mrf.mxu1  ;;  %v7313_v51 = vpop.f32.mrf.mxu0 }
 0x88b   : > { %v17634_v24 = vld [vmem:[#allocation24 + $0x168] ss:$12 sps:$4 sm:$0xff]   ;;  %v17637_v51 = vld [vmem:[#allocation24 + $0x170] ss:$12 sps:$4 sm:$0xff]  }
 0x88c   : > { %v7314_v48 = vpop.f32.mrf.mxu0 }
 0x88d   : > { %v17640_v48 = vld [vmem:[#allocation24 + $0x154] ss:$12 sps:$4 sm:$0xff]  }
 0x8bc   : > { %v7470_v46 = vpop.f32.mrf.mxu1 }
 0x8bd   : > { %v7476_v29 = vadd.f32 %v7470_v46, %v7316_v40  ;;  %v17629_v40 = vld [vmem:[#allocation24 + $0x1a0] ss:$12 sps:$4 sm:$0xff]   ;;  %v17638_v46 = vld [vmem:[#allocation24 + $0x150] ss:$12 sps:$4 sm:$0xff]  }
 0x8be   : > { %v7472_v31 = vpop.f32.mrf.mxu1  ;;  %v7630_v53 = vpop.f32.mrf.mxu0 }
 0x8bf   : > { %v7636_v62 = vadd.f32 %v7630_v53, %v7476_v29  ;;  %v17641_v31 = vld [vmem:[#allocation24 + $0x158] ss:$12 sps:$4 sm:$0xff]   ;;  %v17652_v29 = vld [vmem:[#allocation24 + $0x25c] ss:$12 sps:$4 sm:$0xff]  }
 0x8c0   : > { %v7473_v5 = vpop.f32.mrf.mxu1  ;;  %v7632_v54 = vpop.f32.mrf.mxu0  ;;  %v17644_v53 = vld [vmem:[#allocation24 + $0x28c] ss:$12 sps:$4 sm:$0xff]  }
 0x8c1   : > { %v17642_v5 = vld [vmem:[#allocation24 + $0x288] ss:$12 sps:$4 sm:$0xff]   ;;  %v17645_v54 = vld [vmem:[#allocation24 + $0x290] ss:$12 sps:$4 sm:$0xff]  }
 0x8c2   : > { %v7474_v55 = vpop.f32.mrf.mxu1  ;;  %v7633_v44 = vpop.f32.mrf.mxu0 }
 0x8c3   : > { %v17648_v55 = vld [vmem:[#allocation24 + $0x274] ss:$12 sps:$4 sm:$0xff]   ;;  %v17646_v44 = vld [vmem:[#allocation24 + $0x270] ss:$12 sps:$4 sm:$0xff]  }
 0x8c4   : > { %v7634_v59 = vpop.f32.mrf.mxu0 }
 0x8c5   : > { %v17649_v59 = vld [vmem:[#allocation24 + $0x278] ss:$12 sps:$4 sm:$0xff]  }
 0x8f4   : > { %v7790_v1 = vpop.f32.mrf.mxu1 }
 0x8f5   : > { %v7796_v2 = vadd.f32 %v7790_v1, %v7636_v62  ;;  %v17650_v62 = vld [vmem:[#allocation24 + $0x258] ss:$12 sps:$4 sm:$0xff]   ;;  %v17653_v1 = vld [vmem:[#allocation24 + $0x260] ss:$12 sps:$4 sm:$0xff]  }
 0x8f6   : > { %v7792_v4 = vpop.f32.mrf.mxu1 }
 0x8f7   : > { %7798 = vst.msk [vmem:[%s1047_s5] sm:$0x1] %vm7797_vm7, %v7796_v2  ;;  %v7800_v21 = vmul.f32 0.5, %v7796_v2  ;;  %v17654_v4 = vld [vmem:[#allocation24 + $0x240] ss:$12 sps:$4 sm:$0xff]  }
 0x8f8   : > { %v7793_v10 = vpop.f32.mrf.mxu1 }
 0x8f9   : > { %v7801_v13 = vmul.f32 1.442695, %v7800_v21  ;;  %v17657_v21 = vld [vmem:[#allocation24 + $0x248] ss:$12 sps:$4 sm:$0xff]   ;;  %v17660_v10 = vld [vmem:[#allocation24 + $0x22c] ss:$12 sps:$4 sm:$0xff]  }
 0x8fa   : > { %v7794_v14 = vpop.f32.mrf.mxu1 }
 0x8fb   : > { %18468 = vpow2.f32 %v7801_v13  ;;  %v17658_v13 = vld [vmem:[#allocation24 + $0x228] ss:$12 sps:$4 sm:$0xff]   ;;  %v17661_v14 = vld [vmem:[#allocation24 + $0x230] ss:$12 sps:$4 sm:$0xff]  }
 0x908   : > { %v18469_v7 = vpop.eup %18468 }
 0x909   : > { %7804 = vrot.lane.b32.xlu0 %v18469_v7, %s19134_s23 }
 0x97b   : > { %v7805_v56 = vpop.permute.xlu0 %7804 }
 0x97c   : > { %v7807_v57 = vmul.f32 %v7805_v56, %v7799_v3 }
 0x97e   : > { %v7808_v50 = vadd.f32 %v7807_v57, %v7796_v2  ;;  %v17656_v2 = vld [vmem:[#allocation24 + $0x244] ss:$12 sps:$4 sm:$0xff]  }
 0x980   : > { %v7809_v28 = vpack.c.bf16 %v7808_v50, %v7808_v50 }
 0x982   : > { %15394 = vmatmul.mubr.msk.bf16.vlgmr.msra.gmra.mxu0 %vm7824_vm8, %v7809_v28  ;;  %15400 = vmatmul.mubr.msk.bf16.vlgmr.msra.gmra.mxu1 %vm7824_vm8, %v7809_v28 }
 0x983   : > { %7905 = vmatpush1.bf16.msra.mxu0 %v17595_v12  ;;  %8085 = vmatpush1.bf16.msra.mxu1 %v17598_v27  ;;  %v20058_v27 = vld [vmem:[#allocation22] sm:$0x7f] }
 0x984   : > { %7922 = vmatprep.mubr.bf16.mxu0 %v19133_v19  ;;  %8102 = vmatprep.mubr.bf16.mxu1 %v19133_v19 }
 0x985   : > { %8024 = vmatprep.subr.bf16.mxu0 %v17603_v36  ;;  %8204 = vmatprep.subr.bf16.mxu1 %v17606_v63  ;;  %v7886_v63 = vrot.slane %v20058_v27, 1 }
 0x98a   : > { %15397 = vmatmul.mubr.msk.bf16.vlgmr.msra.gmra.mxu0 %vm7824_vm8, %v7809_v28  ;;  %15406 = vmatmul.mubr.msk.bf16.vlgmr.msra.gmra.mxu1 %vm7824_vm8, %v7809_v28 }
 0x98b   : > { %8025 = vmatpush1.bf16.msra.mxu0 %v17601_v30  ;;  %8205 = vmatpush1.bf16.msra.mxu1 %v17604_v60  ;;  %v20061_v30 = vld [vmem:[#allocation22 + $0x8] sm:$0x7f] }
 0x98c   : > { %8042 = vmatprep.mubr.bf16.mxu0 %v19133_v19  ;;  %8222 = vmatprep.mubr.bf16.mxu1 %v19133_v19 }
 0x98d   : > { %8144 = vmatprep.subr.bf16.mxu0 %v17609_v61  ;;  %8702 = vmatprep.subr.bf16.mxu1 %v19133_v19 }
 0x992   : > { %15403 = vmatmul.mubr.msk.bf16.vlgmr.msra.gmra.mxu0 %vm7824_vm8, %v7809_v28  ;;  %15412 = vmatmul.mubr.msk.bf16.vlgmr.msra.gmra.mxu1 %vm7824_vm8, %v7809_v28 }
 0x993   : > { %8145 = vmatpush1.bf16.msra.mxu0 %v17607_v49  ;;  %8162 = vmatprep.mubr.bf16.mxu0 %v19133_v19  ;;  %v7887_v49 = vrot.slane %v20061_v30, 1 }
 0x994   : > { %8659 = vmatprep.subr.bf16.mxu0 %v17612_v32  ;;  %8703 = vmatpush1.bf16.msra.mxu1 %v17613_v35 }
 0x995   : > { %8704 = vmatprep.subr.bf16.mxu1 %v19133_v19 }
 0x998   : > { %8705 = vmatpush1.bf16.msra.mxu1 %v17617_v58 }
 0x999   : > { %8706 = vmatprep.subr.bf16.mxu1 %v19133_v19 }
 0x99a   : > { %15409 = vmatmul.mubr.msk.bf16.vlgmr.msra.gmra.mxu0 %vm7824_vm8, %v7809_v28  ;;  %vm14348_vm8 = vcmask 455680  }
 0x99b   : > { %8660 = vmatpush1.bf16.msra.mxu0 %v17610_v23  ;;  %v7946_v23 = vrot.slane %v20058_v27, 2 }
 0x99c   : > { %8661 = vmatprep.subr.bf16.mxu0 %v17616_v18  ;;  %8707 = vmatpush1.bf16.msra.mxu1 %v17621_v33  ;;  %v7947_v33 = vrot.slane %v20061_v30, 2 }
 0x99d   : > { %8708 = vmatprep.subr.bf16.mxu1 %v19133_v19 }
 0x99f   : > { %8662 = vmatpush1.bf16.msra.mxu0 %v17614_v52 }
 0x9a0   : > { %8663 = vmatprep.subr.bf16.mxu0 %v17620_v34  ;;  %8709 = vmatpush1.bf16.msra.mxu1 %v17625_v8 }
 0x9a1   : > { %8710 = vmatprep.subr.bf16.mxu1 %v19133_v19 }
 0x9a3   : > { %8664 = vmatpush1.bf16.msra.mxu0 %v17618_v9  ;;  %v8006_v9 = vrot.slane %v20058_v27, 3 }
 0x9a4   : > { %8665 = vmatprep.subr.bf16.mxu0 %v17624_v37  ;;  %8711 = vmatpush1.bf16.msra.mxu1 %v17629_v40  ;;  %v8066_v40 = vrot.slane %v20058_v27, 4 }
 0x9a5   : > { %8712 = vmatprep.subr.bf16.mxu1 %v19133_v19 }
 0x9a7   : > { %8666 = vmatpush1.bf16.msra.mxu0 %v17622_v38 }
 0x9a8   : > { %8667 = vmatprep.subr.bf16.mxu0 %v17628_v17  ;;  %8713 = vmatpush1.bf16.msra.mxu1 %v17633_v42  ;;  %v8007_v17 = vrot.slane %v20061_v30, 3 }
 0x9a9   : > { %8714 = vmatprep.subr.bf16.mxu1 %v19133_v19 }
 0x9ab   : > { %8668 = vmatpush1.bf16.msra.mxu0 %v17626_v39 }
 0x9ac   : > { %8669 = vmatprep.subr.bf16.mxu0 %v17632_v20  ;;  %8715 = vmatpush1.bf16.msra.mxu1 %v17637_v51 }
 0x9ad   : > { %8716 = vmatprep.subr.bf16.mxu1 %v19133_v19 }
 0x9af   : > { %8670 = vmatpush1.bf16.msra.mxu0 %v17630_v41 }
 0x9b0   : > { %8671 = vmatprep.subr.bf16.mxu0 %v17636_v47  ;;  %8717 = vmatpush1.bf16.msra.mxu1 %v17641_v31 }
 0x9b1   : > { %8722 = vmatprep.subr.bf16.mxu1 %v19133_v19 }
 0x9b3   : > { %8672 = vmatpush1.bf16.msra.mxu0 %v17634_v24 }
 0x9b4   : > { %8673 = vmatprep.subr.bf16.mxu0 %v17640_v48  ;;  %8723 = vmatpush2.bf16.msra.mxu1 %v17645_v54  ;;  %v8067_v48 = vrot.slane %v20061_v30, 4 }
 0x9b5   : > { %8724 = vmatprep.subr.bf16.mxu1 %v19133_v19 }
 0x9b7   : > { %8674 = vmatpush1.bf16.msra.mxu0 %v17638_v46  ;;  %v8186_v46 = vrot.slane %v20058_v27, 6 }
 0x9b8   : > { %8679 = vmatprep.subr.bf16.mxu0 %v17644_v53  ;;  %8725 = vmatpush2.bf16.msra.mxu1 %v17649_v59 }
 0x9b9   : > { %8726 = vmatprep.subr.bf16.mxu1 %v19133_v19 }
 0x9bb   : > { %8680 = vmatpush2.bf16.msra.mxu0 %v17642_v5 }
 0x9bc   : > { %8681 = vmatprep.subr.bf16.mxu0 %v17648_v55  ;;  %8727 = vmatpush2.bf16.msra.mxu1 %v17653_v1 }
 0x9bd   : > { %8728 = vmatprep.subr.bf16.mxu1 %v19133_v19 }
 0x9bf   : > { %8682 = vmatpush2.bf16.msra.mxu0 %v17646_v44 }
 0x9c0   : > { %8683 = vmatprep.subr.bf16.mxu0 %v17652_v29  ;;  %8729 = vmatpush2.bf16.msra.mxu1 %v17657_v21 }
 0x9c1   : > { %8730 = vmatprep.subr.bf16.mxu1 %v19133_v19 }
 0x9c3   : > { %8684 = vmatpush2.bf16.msra.mxu0 %v17650_v62  ;;  %v8187_v62 = vrot.slane %v20061_v30, 6 }
 0x9c4   : > { %8685 = vmatprep.subr.bf16.mxu0 %v17656_v2  ;;  %8731 = vmatpush2.bf16.msra.mxu1 %v17661_v14 }
 0x9c5   : > { %8732 = vmatprep.subr.bf16.mxu1 %v19133_v19 }
 0x9c7   : > { %8686 = vmatpush2.bf16.msra.mxu0 %v17654_v4 }
 0x9c8   : > { %8687 = vmatprep.subr.bf16.mxu0 %v17660_v10  ;;  %8733 = vmatpush2.bf16.msra.mxu1 %v17665_v25 }
 0x9c9   : > { %9012 = vmatprep.subr.bf16.mxu1 %v19133_v19 }
 0x9cb   : > { %8688 = vmatpush2.bf16.msra.mxu0 %v17658_v13  ;;  %v8126_v13 = vrot.slane %v20058_v27, 5 }
 0x9cc   : > { %8689 = vmatprep.subr.bf16.mxu0 %v17664_v22 }
 0x9cf   : > { %8690 = vmatpush2.bf16.msra.mxu0 %v17662_v16 }
 0x9d0   : > { %8969 = vmatprep.subr.bf16.mxu0 %v17668_v26 }
 0xa42   : > { %v7862_v7 = vpop.f32.mrf.mxu0  ;;  %v7984_v3 = vpop.f32.mrf.mxu1 }
 0xa43   : > { %v7985_v39 = vadd.f32 %v7984_v3, %v7946_v23  ;;  %v7863_v42 = vadd.f32 %v7862_v7, %v20058_v27 }
 0xa44   : > { %v7864_v56 = vpop.f32.mrf.mxu0  ;;  %v7986_v57 = vpop.f32.mrf.mxu1 }
 0xa45   : > { %v7987_v51 = vadd.f32 %v7986_v57, %v7947_v33  ;;  %v7865_v5 = vadd.f32 %v7864_v56, %v20061_v30  ;;  %v7991_v59 = vmax.f32 %v7985_v39, 0.0  ;;  %v7869_v4 = vmax.f32 %v7863_v42, 0.0 }
 0xa46   : > { %v7866_v50 = vpop.f32.mrf.mxu0  ;;  %v7988_v12 = vpop.f32.mrf.mxu1  ;;  %v8127_v57 = vrot.slane %v20061_v30, 5 }
 0xa47   : > { %v7992_v14 = vmax.f32 %v7987_v51, 0.0  ;;  %v7870_v7 = vmax.f32 %v7865_v5, 0.0  ;;  %v8241_v50 = vrot.slane %v7991_v59, 6 }
 0xa48   : > { %v7867_v28 = vpop.f32.mrf.mxu0  ;;  %v7989_v36 = vpop.f32.mrf.mxu1 }
 0xa4a   : > { %v7924_v60 = vpop.f32.mrf.mxu0  ;;  %v8104_v61 = vpop.f32.mrf.mxu1 }
 0xa4b   : > { %v7925_v58 = vadd.f32 %v7924_v60, %v7886_v63  ;;  %v8105_v29 = vadd.f32 %v8104_v61, %v8066_v40  ;;  %v8242_v61 = vrot.slane %v7992_v14, 6  ;;  %v17666_v14 = vld [vmem:[#allocation24 + $0xa8] ss:$12 sps:$4 sm:$0xff]  }
 0xa4c   : > { %v7926_v32 = vpop.f32.mrf.mxu0  ;;  %v8106_v35 = vpop.f32.mrf.mxu1 }
 0xa4d   : > { %v7927_v34 = vadd.f32 %v7926_v32, %v7887_v49  ;;  %v7931_v8 = vmax.f32 %v7925_v58, 0.0  ;;  %v8107_v16 = vadd.f32 %v8106_v35, %v8067_v48  ;;  %v8111_v12 = vmax.f32 %v8105_v29, 0.0 }
 0xa4e   : > { %v7928_v18 = vpop.f32.mrf.mxu0  ;;  %v8108_v52 = vpop.f32.mrf.mxu1 }
 0xa4f   : > { %v7932_v47 = vmax.f32 %v7927_v34, 0.0  ;;  %v8235_v54 = vrot.slane %v7931_v8, 7  ;;  %v8112_v49 = vmax.f32 %v8107_v16, 0.0  ;;  %v8253_v30 = vrot.slane %v8111_v12, 4  ;;  %v17669_v16 = vld [vmem:[#allocation24 + $0xb0] ss:$12 sps:$4 sm:$0xff]  }
 0xa50   : > { %v7929_v37 = vpop.f32.mrf.mxu0  ;;  %v8109_v38 = vpop.f32.mrf.mxu1  ;;  %v17678_v12 = vld [vmem:[#allocation24 + $0x60] ss:$12 sps:$4 sm:$0xff]  }
 0xa51   : > { %v8236_v21 = vrot.slane %v7932_v47, 7  ;;  %v8270_v3 = vsel %vm8269_vm9, %v7869_v4, %v8235_v54 }
 0xa52   : > { %v8044_v20 = vpop.f32.mrf.mxu0  ;;  %v8224_v41 = vpop.f32.mrf.mxu1  ;;  %v8273_v32 = vsel %vm8272_vm10, %v8270_v3, %v8241_v50  ;;  %v17676_v3 = vld [vmem:[#allocation24 + $0x7c] ss:$12 sps:$4 sm:$0xff]   ;;  %v17680_v50 = vld [vmem:[#allocation24 + $0x64] ss:$12 sps:$4 sm:$0xff]  }
 0xa53   : > { %v8045_v24 = vadd.f32 %v8044_v20, %v8006_v9  ;;  %v8225_v22 = vadd.f32 %v8224_v41, %v8186_v46  ;;  %v8271_v63 = vsel %vm8269_vm9, %v7870_v7, %v8236_v21  ;;  %v17673_v7 = vld [vmem:[#allocation24 + $0x98] ss:$12 sps:$4 sm:$0xff]  }
 0xa54   : > { %v8046_v31 = vpop.f32.mrf.mxu0  ;;  %v8226_v53 = vpop.f32.mrf.mxu1  ;;  %v8274_v34 = vsel %vm8272_vm10, %v8271_v63, %v8242_v61  ;;  %v17682_v63 = vld [vmem:[#allocation24 + $0x48] ss:$12 sps:$4 sm:$0xff]   ;;  %v17686_v61 = vld [vmem:[#allocation24 + $0x30] ss:$12 sps:$4 sm:$0xff]  }
 0xa55   : > { %v8051_v55 = vmax.f32 %v8045_v24, 0.0  ;;  %v8047_v44 = vadd.f32 %v8046_v31, %v8007_v17  ;;  %v8227_v28 = vadd.f32 %v8226_v53, %v8187_v62  ;;  %v8231_v35 = vmax.f32 %v8225_v22, 0.0 }
 0xa56   : > { %v8048_v1 = vpop.f32.mrf.mxu0  ;;  %v8228_v2 = vpop.f32.mrf.mxu1  ;;  %v8254_v17 = vrot.slane %v8112_v49, 4  ;;  %v17689_v49 = vld [vmem:[#allocation24 + $0x38] ss:$12 sps:$4 sm:$0xff]  }
 0xa57   : > { %v8052_v10 = vmax.f32 %v8047_v44, 0.0  ;;  %v8247_v56 = vrot.slane %v8051_v55, 5  ;;  %v8232_v9 = vmax.f32 %v8227_v28, 0.0  ;;  %v8265_v39 = vrot.slane %v8231_v35, 2  ;;  %v17681_v28 = vld [vmem:[#allocation24 + $0x68] ss:$12 sps:$4 sm:$0xff]  }
 0xa58   : > { %v8049_v25 = vpop.f32.mrf.mxu0  ;;  %v8229_v26 = vpop.f32.mrf.mxu1  ;;  %v17690_v35 = vld [vmem:[#allocation24 + $0x18] ss:$12 sps:$4 sm:$0xff]  }
 0xa59   : > { %v8248_v60 = vrot.slane %v8052_v10, 5  ;;  %v8276_v23 = vsel %vm1470_vm3, %v8273_v32, %v8247_v56  ;;  %v8266_v47 = vrot.slane %v8232_v9, 2  ;;  %v17672_v25 = vld [vmem:[#allocation24 + $0x94] ss:$12 sps:$4 sm:$0xff]   ;;  %v17670_v26 = vld [vmem:[#allocation24 + $0x90] ss:$12 sps:$4 sm:$0xff]  }
 0xa5a   : > { %v8164_v36 = vpop.f32.mrf.mxu0  ;;  %v8279_v40 = vsel %vm8278_vm11, %v8276_v23, %v8253_v30  ;;  %v17674_v56 = vld [vmem:[#allocation24 + $0x78] ss:$12 sps:$4 sm:$0xff]   ;;  %v17692_v32 = vld [vmem:[#allocation24 + $0x1c] ss:$12 sps:$4 sm:$0xff]   ;;  %v17701_v9 = vld [vmem:[#allocation24 + $0x140] ss:$12 sps:$4 sm:$0xff]  }
 0xa5b   : > { %v8165_v27 = vadd.f32 %v8164_v36, %v8126_v13  ;;  %v8277_v37 = vsel %vm1470_vm3, %v8274_v34, %v8248_v60  ;;  %v17684_v36 = vld [vmem:[#allocation24 + $0x4c] ss:$12 sps:$4 sm:$0xff]   ;;  %v17685_v60 = vld [vmem:[#allocation24 + $0x50] ss:$12 sps:$4 sm:$0xff]   ;;  %vm9481_vm3 = vmand %vm1088_vm1, %vm9480_vm15 }
 0xa5c   : > { %v8166_v58 = vpop.f32.mrf.mxu0  ;;  %v8280_v51 = vsel %vm8278_vm11, %v8277_v37, %v8254_v17  ;;  %v17696_v23 = vld [vmem:[#allocation24 + $0x4] ss:$12 sps:$4 sm:$0xff]   ;;  %v17700_v30 = vld [vmem:[#allocation24 + $0x13c] ss:$12 sps:$4 sm:$0xff]   ;;  %v17702_v37 = vld [vmem:[#allocation24 + $0x120] ss:$12 sps:$4 sm:$0xff]  }
 0xa5d   : > { %v8171_v18 = vmax.f32 %v8165_v27, 0.0  ;;  %v8167_v52 = vadd.f32 %v8166_v58, %v8127_v57  ;;  %v17677_v57 = vld [vmem:[#allocation24 + $0x80] ss:$12 sps:$4 sm:$0xff]   ;;  %v17698_v34 = vld [vmem:[#allocation24 + $0x138] ss:$12 sps:$4 sm:$0xff]  }
 0xa5e   : > { %v8168_v33 = vpop.f32.mrf.mxu0  ;;  %v17688_v27 = vld [vmem:[#allocation24 + $0x34] ss:$12 sps:$4 sm:$0xff]  }
 0xa5f   : > { %v8259_v38 = vrot.slane %v8171_v18, 3  ;;  %v8172_v8 = vmax.f32 %v8167_v52, 0.0  ;;  %v17693_v58 = vld [vmem:[#allocation24 + $0x20] ss:$12 sps:$4 sm:$0xff]   ;;  %v17697_v52 = vld [vmem:[#allocation24 + $0x8] ss:$12 sps:$4 sm:$0xff]  }
 0xa60   : > { %v8169_v20 = vpop.f32.mrf.mxu0  ;;  %v17694_v18 = vld [vmem:[#allocation24] ss:$12 sps:$4 sm:$0xff]   ;;  %v17704_v33 = vld [vmem:[#allocation24 + $0x124] ss:$12 sps:$4 sm:$0xff]   ;;  %v17706_v17 = vld [vmem:[#allocation24 + $0x108] ss:$12 sps:$4 sm:$0xff]  }
 0xa61   : > { %v8282_v41 = vsel %vm8281_vm12, %v8279_v40, %v8259_v38  ;;  %v8260_v42 = vrot.slane %v8172_v8, 3  ;;  %v17705_v38 = vld [vmem:[#allocation24 + $0x128] ss:$12 sps:$4 sm:$0xff]   ;;  %v17708_v8 = vld [vmem:[#allocation24 + $0x10c] ss:$12 sps:$4 sm:$0xff]  }
 0xa62   : > { %v8284_v24 = vsel %vm1088_vm1, %v8282_v41, %v8265_v39  ;;  %v17709_v39 = vld [vmem:[#allocation24 + $0x110] ss:$12 sps:$4 sm:$0xff]   ;;  %v17712_v40 = vld [vmem:[#allocation24 + $0xf4] ss:$12 sps:$4 sm:$0xff]   ;;  %v17713_v41 = vld [vmem:[#allocation24 + $0xf8] ss:$12 sps:$4 sm:$0xff]  }
 0xa63   : > { %v8286_v48 = vpack.c.bf16 %v8284_v24, %v8284_v24  ;;  %v8283_v46 = vsel %vm8281_vm12, %v8280_v51, %v8260_v42  ;;  %v17710_v20 = vld [vmem:[#allocation24 + $0xf0] ss:$12 sps:$4 sm:$0xff]   ;;  %v17717_v24 = vld [vmem:[#allocation24 + $0xe0] ss:$12 sps:$4 sm:$0xff]  }
 0xa64   : > { %v8285_v31 = vsel %vm1088_vm1, %v8283_v46, %v8266_v47  ;;  %v17716_v42 = vld [vmem:[#allocation24 + $0xdc] ss:$12 sps:$4 sm:$0xff]   ;;  %v17714_v47 = vld [vmem:[#allocation24 + $0xd8] ss:$12 sps:$4 sm:$0xff]   ;;  %vm11164_vm1 = vsmask.f32 6400 }
 0xa65   : > { %v8290_v53 = vrot.slane %v8286_v48, 7  ;;  %v8287_v5 = vpack.c.bf16 %v8285_v31, %v8285_v31  ;;  %v17720_v51 = vld [vmem:[#allocation24 + $0xc4] ss:$12 sps:$4 sm:$0xff]   ;;  %v17718_v48 = vld [vmem:[#allocation24 + $0xc0] ss:$12 sps:$4 sm:$0xff]  }
 0xa66   : > { %v17721_v46 = vld [vmem:[#allocation24 + $0xc8] ss:$12 sps:$4 sm:$0xff]   ;;  %v17724_v31 = vld [vmem:[#allocation24 + $0x34c] ss:$12 sps:$4 sm:$0xff]  }
 0xa67   : > { %v8294_v54 = vsel %vm8269_vm9, 0, %v8290_v53  ;;  %v8291_v55 = vrot.slane %v8287_v5, 7  ;;  %v17722_v53 = vld [vmem:[#allocation24 + $0x348] ss:$12 sps:$4 sm:$0xff]   ;;  %v17725_v5 = vld [vmem:[#allocation24 + $0x350] ss:$12 sps:$4 sm:$0xff]  }
 0xa68   : > { %v20090_v44 = vsel %vm8301_vm14, %v8294_v54, 0 }
 0xa69   : > { %v8297_v59 = vsel %vm8269_vm9, 0, %v8291_v55  ;;  %v8420_v29 = vshll.u32 %v20090_v44, 16  ;;  %v8418_v10 = vshrl.u32 %v20090_v44, 16  ;;  %v17728_v55 = vld [vmem:[#allocation24 + $0x334] ss:$12 sps:$4 sm:$0xff]  }
 0xa6a   : > { %v20094_v62 = vsel %vm8301_vm14, %v8297_v59, 0  ;;  %v17726_v59 = vld [vmem:[#allocation24 + $0x330] ss:$12 sps:$4 sm:$0xff]  }
 0xa6b   : > { %v8427_v1 = vshll.u32 %v20094_v62, 16  ;;  %v8422_v2 = vrot.slane %v8420_v29, 1  ;;  %v8425_v4 = vshrl.u32 %v20094_v62, 16  ;;  %v9113_v54 = vrot.slane %v20094_v62, 1  ;;  %v17729_v29 = vld [vmem:[#allocation24 + $0x338] ss:$12 sps:$4 sm:$0xff]  }
 0xa6d   : > { %v8429_v21 = vrot.slane %v8427_v1, 1  ;;  %v8423_v22 = vor.u32 %v8422_v2, %v8418_v10  ;;  %v17732_v1 = vld [vmem:[#allocation24 + $0x31c] ss:$12 sps:$4 sm:$0xff]   ;;  %v17730_v2 = vld [vmem:[#allocation24 + $0x318] ss:$12 sps:$4 sm:$0xff]  }
 0xa6e   : > { %v17737_v10 = vld [vmem:[#allocation24 + $0x308] ss:$12 sps:$4 sm:$0xff]  }
 0xa6f   : > { %v8430_v13 = vor.u32 %v8429_v21, %v8425_v4  ;;  %v17736_v4 = vld [vmem:[#allocation24 + $0x304] ss:$12 sps:$4 sm:$0xff]   ;;  %v17734_v21 = vld [vmem:[#allocation24 + $0x300] ss:$12 sps:$4 sm:$0xff]  }
 0xa71   : > { %15455 = vmatprep.mubr.msk.bf16.mxu0 %vm4368_vm6, %v8430_v13  ;;  %15456 = vmatprep.mubr.msk.bf16.mxu1 %vm4368_vm6, %v8430_v13  ;;  %v17740_v13 = vld [vmem:[#allocation24 + $0x2ec] ss:$12 sps:$4 sm:$0xff]  }
 0xa72   : > { %8692 = vmatmul.mubr.bf16.vlgmr.msra.gmra.mxu0 %v8423_v22  ;;  %8735 = vmatmul.mubr.bf16.vlgmr.msra.gmra.mxu1 %v8423_v22  ;;  %v17744_v22 = vld [vmem:[#allocation24 + $0x2d4] ss:$12 sps:$4 sm:$0xff]  }
 0xa73   : > { %8970 = vmatpush1.bf16.msra.mxu0 %v17666_v14  ;;  %9013 = vmatpush1.bf16.msra.mxu1 %v17669_v16  ;;  %v17738_v14 = vld [vmem:[#allocation24 + $0x2e8] ss:$12 sps:$4 sm:$0xff]   ;;  %v17741_v16 = vld [vmem:[#allocation24 + $0x2f0] ss:$12 sps:$4 sm:$0xff]  }
 0xa74   : > { %15499 = vmatprep.mubr.msk.bf16.mxu0 %vm4368_vm6, %v20094_v62  ;;  %15500 = vmatprep.mubr.msk.bf16.mxu1 %vm4368_vm6, %v20094_v62  ;;  %v17733_v62 = vld [vmem:[#allocation24 + $0x320] ss:$12 sps:$4 sm:$0xff]  }
 0xa75   : > { %8971 = vmatprep.subr.bf16.mxu0 %v17672_v25  ;;  %9014 = vmatprep.subr.bf16.mxu1 %v19133_v19  ;;  %v17742_v25 = vld [vmem:[#allocation24 + $0x2d0] ss:$12 sps:$4 sm:$0xff]  }
 0xa77   : > { %8972 = vmatpush1.bf16.msra.mxu0 %v17670_v26  ;;  %9015 = vmatpush1.bf16.msra.mxu1 %v17673_v7  ;;  %v17745_v26 = vld [vmem:[#allocation24 + $0x2d8] ss:$12 sps:$4 sm:$0xff]   ;;  %v17748_v7 = vld [vmem:[#allocation24 + $0x2bc] ss:$12 sps:$4 sm:$0xff]  }
 0xa78   : > { %8973 = vmatprep.subr.bf16.mxu0 %v17676_v3  ;;  %9016 = vmatprep.subr.bf16.mxu1 %v19133_v19  ;;  %v17746_v3 = vld [vmem:[#allocation24 + $0x2b8] ss:$12 sps:$4 sm:$0xff]  }
 0xa7b   : > { %8974 = vmatpush1.bf16.msra.mxu0 %v17674_v56  ;;  %9017 = vmatpush1.bf16.msra.mxu1 %v17677_v57  ;;  %v17749_v56 = vld [vmem:[#allocation24 + $0x2c0] ss:$12 sps:$4 sm:$0xff]   ;;  %v17752_v57 = vld [vmem:[#allocation24 + $0x2a4] ss:$12 sps:$4 sm:$0xff]  }
 0xa7c   : > { %8975 = vmatprep.subr.bf16.mxu0 %v17680_v50  ;;  %9018 = vmatprep.subr.bf16.mxu1 %v19133_v19  ;;  %v17750_v50 = vld [vmem:[#allocation24 + $0x2a0] ss:$12 sps:$4 sm:$0xff]  }
 0xa7f   : > { %8976 = vmatpush1.bf16.msra.mxu0 %v17678_v12  ;;  %9019 = vmatpush1.bf16.msra.mxu1 %v17681_v28  ;;  %v17753_v12 = vld [vmem:[#allocation24 + $0x2a8] ss:$12 sps:$4 sm:$0xff]  }
 0xa80   : > { %8977 = vmatprep.subr.bf16.mxu0 %v17684_v36  ;;  %9020 = vmatprep.subr.bf16.mxu1 %v19133_v19  ;;  %v17756_v28 = vld [vmem:[#allocation24 + $0x3dc] ss:$12 sps:$4 sm:$0xff]   ;;  %v17754_v36 = vld [vmem:[#allocation24 + $0x3d8] ss:$12 sps:$4 sm:$0xff]  }
 0xa83   : > { %8978 = vmatpush1.bf16.msra.mxu0 %v17682_v63  ;;  %9021 = vmatpush1.bf16.msra.mxu1 %v17685_v60  ;;  %v17757_v63 = vld [vmem:[#allocation24 + $0x3e0] ss:$12 sps:$4 sm:$0xff]   ;;  %v17760_v60 = vld [vmem:[#allocation24 + $0x3c4] ss:$12 sps:$4 sm:$0xff]  }
 0xa84   : > { %8979 = vmatprep.subr.bf16.mxu0 %v17688_v27  ;;  %9022 = vmatprep.subr.bf16.mxu1 %v19133_v19  ;;  %v17758_v27 = vld [vmem:[#allocation24 + $0x3c0] ss:$12 sps:$4 sm:$0xff]  }
 0xa87   : > { %8980 = vmatpush1.bf16.msra.mxu0 %v17686_v61  ;;  %9023 = vmatpush1.bf16.msra.mxu1 %v17689_v49  ;;  %v17761_v61 = vld [vmem:[#allocation24 + $0x3c8] ss:$12 sps:$4 sm:$0xff]   ;;  %v17764_v49 = vld [vmem:[#allocation24 + $0x3ac] ss:$12 sps:$4 sm:$0xff]  }
 0xa88   : > { %8981 = vmatprep.subr.bf16.mxu0 %v17692_v32  ;;  %9024 = vmatprep.subr.bf16.mxu1 %v19133_v19  ;;  %v17762_v32 = vld [vmem:[#allocation24 + $0x3a8] ss:$12 sps:$4 sm:$0xff]  }
 0xa8b   : > { %8982 = vmatpush1.bf16.msra.mxu0 %v17690_v35  ;;  %9025 = vmatpush1.bf16.msra.mxu1 %v17693_v58  ;;  %v17765_v35 = vld [vmem:[#allocation24 + $0x3b0] ss:$12 sps:$4 sm:$0xff]   ;;  %v17768_v58 = vld [vmem:[#allocation24 + $0x394] ss:$12 sps:$4 sm:$0xff]  }
 0xa8c   : > { %8983 = vmatprep.subr.bf16.mxu0 %v17696_v23  ;;  %9026 = vmatprep.subr.bf16.mxu1 %v19133_v19  ;;  %v17766_v23 = vld [vmem:[#allocation24 + $0x390] ss:$12 sps:$4 sm:$0xff]  }
 0xa8f   : > { %8984 = vmatpush1.bf16.msra.mxu0 %v17694_v18  ;;  %9027 = vmatpush1.bf16.msra.mxu1 %v17697_v52  ;;  %v17769_v18 = vld [vmem:[#allocation24 + $0x398] ss:$12 sps:$4 sm:$0xff]   ;;  %v17772_v52 = vld [vmem:[#allocation24 + $0x37c] ss:$12 sps:$4 sm:$0xff]  }
 0xa90   : > { %8989 = vmatprep.subr.bf16.mxu0 %v17700_v30  ;;  %9032 = vmatprep.subr.bf16.mxu1 %v19133_v19  ;;  %v17770_v30 = vld [vmem:[#allocation24 + $0x378] ss:$12 sps:$4 sm:$0xff]  }
 0xa93   : > { %8990 = vmatpush2.bf16.msra.mxu0 %v17698_v34  ;;  %9033 = vmatpush2.bf16.msra.mxu1 %v17701_v9  ;;  %v17773_v34 = vld [vmem:[#allocation24 + $0x380] ss:$12 sps:$4 sm:$0xff]   ;;  %v17776_v9 = vld [vmem:[#allocation24 + $0x364] ss:$12 sps:$4 sm:$0xff]  }
 0xa94   : > { %8991 = vmatprep.subr.bf16.mxu0 %v17704_v33  ;;  %9034 = vmatprep.subr.bf16.mxu1 %v19133_v19  ;;  %v17774_v33 = vld [vmem:[#allocation24 + $0x360] ss:$12 sps:$4 sm:$0xff]  }
 0xa97   : > { %8992 = vmatpush2.bf16.msra.mxu0 %v17702_v37  ;;  %9035 = vmatpush2.bf16.msra.mxu1 %v17705_v38  ;;  %v17777_v37 = vld [vmem:[#allocation24 + $0x368] ss:$12 sps:$4 sm:$0xff]   ;;  %v9112_v38 = vrot.slane %v20090_v44, 1 }
 0xa98   : > { %8993 = vmatprep.subr.bf16.mxu0 %v17708_v8  ;;  %9036 = vmatprep.subr.bf16.mxu1 %v19133_v19  ;;  %v17778_v8 = vld [vmem:[#allocation27 + $0x258] ss:$12 sps:$4 sm:$0xff]  }
 0xa9b   : > { %8994 = vmatpush2.bf16.msra.mxu0 %v17706_v17  ;;  %9037 = vmatpush2.bf16.msra.mxu1 %v17709_v39  ;;  %v17780_v17 = vld [vmem:[#allocation27 + $0x25c] ss:$12 sps:$4 sm:$0xff]   ;;  %v17783_v39 = vld [vmem:[#allocation27 + $0x244] ss:$12 sps:$4 sm:$0xff]  }
 0xa9c   : > { %8995 = vmatprep.subr.bf16.mxu0 %v17712_v40  ;;  %9038 = vmatprep.subr.bf16.mxu1 %v19133_v19  ;;  %v17781_v40 = vld [vmem:[#allocation27 + $0x240] ss:$12 sps:$4 sm:$0xff]  }
 0xa9f   : > { %8996 = vmatpush2.bf16.msra.mxu0 %v17710_v20  ;;  %9039 = vmatpush2.bf16.msra.mxu1 %v17713_v41  ;;  %v17786_v20 = vld [vmem:[#allocation27 + $0x22c] ss:$12 sps:$4 sm:$0xff]   ;;  %v17784_v41 = vld [vmem:[#allocation27 + $0x228] ss:$12 sps:$4 sm:$0xff]  }
 0xaa0   : > { %8997 = vmatprep.subr.bf16.mxu0 %v17716_v42  ;;  %9040 = vmatprep.subr.bf16.mxu1 %v19133_v19  ;;  %v17789_v42 = vld [vmem:[#allocation27 + $0x214] ss:$12 sps:$4 sm:$0xff]  }
 0xaa3   : > { %8998 = vmatpush2.bf16.msra.mxu0 %v17714_v47  ;;  %9041 = vmatpush2.bf16.msra.mxu1 %v17717_v24  ;;  %v17787_v47 = vld [vmem:[#allocation27 + $0x210] ss:$12 sps:$4 sm:$0xff]   ;;  %v17790_v24 = vld [vmem:[#allocation27 + $0x1f8] ss:$12 sps:$4 sm:$0xff]  }
 0xaa4   : > { %8999 = vmatprep.subr.bf16.mxu0 %v17720_v51  ;;  %9042 = vmatprep.subr.bf16.mxu1 %v19133_v19  ;;  %v17795_v51 = vld [vmem:[#allocation27 + $0x1e4] ss:$12 sps:$4 sm:$0xff]  }
 0xaa7   : > { %9000 = vmatpush2.bf16.msra.mxu0 %v17718_v48  ;;  %9043 = vmatpush2.bf16.msra.mxu1 %v17721_v46  ;;  %v17793_v48 = vld [vmem:[#allocation27 + $0x1e0] ss:$12 sps:$4 sm:$0xff]  }
 0xaa8   : > { %9342 = vmatprep.subr.bf16.mxu0 %v17724_v31  ;;  %9385 = vmatprep.subr.bf16.mxu1 %v19133_v19  ;;  %v17798_v46 = vld [vmem:[#allocation27 + $0x1cc] ss:$12 sps:$4 sm:$0xff]   ;;  %v17796_v31 = vld [vmem:[#allocation27 + $0x1c8] ss:$12 sps:$4 sm:$0xff]  }
 0xaaa   : > { %9002 = vmatmul.mubr.bf16.vlgmr.msra.gmra.mxu0 %v20090_v44  ;;  %9045 = vmatmul.mubr.bf16.vlgmr.msra.gmra.mxu1 %v20090_v44  ;;  %v17792_v44 = vld [vmem:[#allocation27 + $0x1fc] ss:$12 sps:$4 sm:$0xff]  }
 0xaab   : > { %9343 = vmatpush1.bf16.msra.mxu0 %v17722_v53  ;;  %15543 = vmatprep.mubr.msk.bf16.mxu0 %vm4368_vm6, %v9113_v54  ;;  %v17801_v53 = vld [vmem:[#allocation27 + $0x1b4] ss:$12 sps:$4 sm:$0xff]  }
 0xaac   : > { %9386 = vmatpush1.bf16.msra.mxu1 %v17725_v5  ;;  %15544 = vmatprep.mubr.msk.bf16.mxu1 %vm4368_vm6, %v9113_v54  ;;  %v17799_v5 = vld [vmem:[#allocation27 + $0x1b0] ss:$12 sps:$4 sm:$0xff]  }
 0xaad   : > { %9344 = vmatprep.subr.bf16.mxu0 %v17728_v55  ;;  %9387 = vmatprep.subr.bf16.mxu1 %v19133_v19  ;;  %v17804_v54 = vld [vmem:[#allocation27 + $0x31c] ss:$12 sps:$4 sm:$0xff]   ;;  %v17802_v55 = vld [vmem:[#allocation27 + $0x318] ss:$12 sps:$4 sm:$0xff]  }
 0xaaf   : > { %9345 = vmatpush1.bf16.msra.mxu0 %v17726_v59  ;;  %v17807_v59 = vld [vmem:[#allocation27 + $0x304] ss:$12 sps:$4 sm:$0xff]  }
 0xab0   : > { %9388 = vmatpush1.bf16.msra.mxu1 %v17729_v29  ;;  %9346 = vmatprep.subr.bf16.mxu0 %v17732_v1  ;;  %v17805_v29 = vld [vmem:[#allocation27 + $0x300] ss:$12 sps:$4 sm:$0xff]  }
 0xab1   : > { %9389 = vmatprep.subr.bf16.mxu1 %v19133_v19  ;;  %v17810_v1 = vld [vmem:[#allocation27 + $0x2ec] ss:$12 sps:$4 sm:$0xff]  }
 0xab3   : > { %9347 = vmatpush1.bf16.msra.mxu0 %v17730_v2  ;;  %v17808_v2 = vld [vmem:[#allocation27 + $0x2e8] ss:$12 sps:$4 sm:$0xff]  }
 0xab4   : > { %9390 = vmatpush1.bf16.msra.mxu1 %v17733_v62  ;;  %9348 = vmatprep.subr.bf16.mxu0 %v17736_v4  ;;  %v17813_v62 = vld [vmem:[#allocation27 + $0x2d4] ss:$12 sps:$4 sm:$0xff]   ;;  %v17811_v4 = vld [vmem:[#allocation27 + $0x2d0] ss:$12 sps:$4 sm:$0xff]  }
 0xab5   : > { %9391 = vmatprep.subr.bf16.mxu1 %v19133_v19 }
 0xab7   : > { %9349 = vmatpush1.bf16.msra.mxu0 %v17734_v21  ;;  %v17816_v21 = vld [vmem:[#allocation27 + $0x2bc] ss:$12 sps:$4 sm:$0xff]  }
 0xab8   : > { %9392 = vmatpush1.bf16.msra.mxu1 %v17737_v10  ;;  %9350 = vmatprep.subr.bf16.mxu0 %v17740_v13  ;;  %v17814_v10 = vld [vmem:[#allocation27 + $0x2b8] ss:$12 sps:$4 sm:$0xff]  }
 0xab9   : > { %9393 = vmatprep.subr.bf16.mxu1 %v19133_v19  ;;  %v17819_v13 = vld [vmem:[#allocation27 + $0x2a4] ss:$12 sps:$4 sm:$0xff]  }
 0xabb   : > { %9351 = vmatpush1.bf16.msra.mxu0 %v17738_v14  ;;  %v17817_v14 = vld [vmem:[#allocation27 + $0x2a0] ss:$12 sps:$4 sm:$0xff]  }
 0xabc   : > { %9394 = vmatpush1.bf16.msra.mxu1 %v17741_v16  ;;  %9352 = vmatprep.subr.bf16.mxu0 %v17744_v22  ;;  %v17822_v16 = vld [vmem:[#allocation27 + $0x34c] ss:$12 sps:$4 sm:$0xff]   ;;  %v17820_v22 = vld [vmem:[#allocation27 + $0x348] ss:$12 sps:$4 sm:$0xff]  }
 0xabd   : > { %9395 = vmatprep.subr.bf16.mxu1 %v19133_v19 }
 0xabf   : > { %9353 = vmatpush1.bf16.msra.mxu0 %v17742_v25 }
 0xac0   : > { %9396 = vmatpush1.bf16.msra.mxu1 %v17745_v26  ;;  %9354 = vmatprep.subr.bf16.mxu0 %v17748_v7  ;;  %v17825_v26 = vld [vmem:[#allocation27 + $0x28c] ss:$12 sps:$4 sm:$0xff]   ;;  %v17823_v7 = vld [vmem:[#allocation27 + $0x288] ss:$12 sps:$4 sm:$0xff]  }
 0xac1   : > { %9397 = vmatprep.subr.bf16.mxu1 %v19133_v19 }
 0xac3   : > { %9355 = vmatpush1.bf16.msra.mxu0 %v17746_v3  ;;  %v17828_v3 = vld [vmem:[#allocation27 + $0x334] ss:$12 sps:$4 sm:$0xff]  }
 0xac4   : > { %9398 = vmatpush1.bf16.msra.mxu1 %v17749_v56  ;;  %9356 = vmatprep.subr.bf16.mxu0 %v17752_v57  ;;  %v17826_v57 = vld [vmem:[#allocation27 + $0x330] ss:$12 sps:$4 sm:$0xff]  }
 0xac5   : > { %9399 = vmatprep.subr.bf16.mxu1 %v19133_v19 }
 0xac7   : > { %9357 = vmatpush1.bf16.msra.mxu0 %v17750_v50 }
 0xac8   : > { %9400 = vmatpush1.bf16.msra.mxu1 %v17753_v12  ;;  %9362 = vmatprep.subr.bf16.mxu0 %v17756_v28  ;;  %v17831_v12 = vld [vmem:[#allocation27 + $0x274] ss:$12 sps:$4 sm:$0xff]   ;;  %v17829_v28 = vld [vmem:[#allocation27 + $0x270] ss:$12 sps:$4 sm:$0xff]  }
 0xac9   : > { %9405 = vmatprep.subr.bf16.mxu1 %v19133_v19 }
 0xacb   : > { %9363 = vmatpush2.bf16.msra.mxu0 %v17754_v36  ;;  %v17832_v36 = vld [vmem:[#allocation27 + $0x320] ss:$12 sps:$4 sm:$0xff]  }
 0xacc   : > { %9406 = vmatpush2.bf16.msra.mxu1 %v17757_v63  ;;  %9364 = vmatprep.subr.bf16.mxu0 %v17760_v60  ;;  %v17836_v60 = vld [vmem:[#allocation27 + $0x19c] ss:$12 sps:$4 sm:$0xff]  }
 0xacd   : > { %9407 = vmatprep.subr.bf16.mxu1 %v19133_v19 }
 0xacf   : > { %9365 = vmatpush2.bf16.msra.mxu0 %v17758_v27 }
 0xad0   : > { %9408 = vmatpush2.bf16.msra.mxu1 %v17761_v61  ;;  %9366 = vmatprep.subr.bf16.mxu0 %v17764_v49 }
 0xad1   : > { %9409 = vmatprep.subr.bf16.mxu1 %v19133_v19 }
 0xad3   : > { %9367 = vmatpush2.bf16.msra.mxu0 %v17762_v32 }
 0xad4   : > { %9410 = vmatpush2.bf16.msra.mxu1 %v17765_v35  ;;  %9368 = vmatprep.subr.bf16.mxu0 %v17768_v58 }
 0xad5   : > { %9411 = vmatprep.subr.bf16.mxu1 %v19133_v19 }
 0xad7   : > { %9369 = vmatpush2.bf16.msra.mxu0 %v17766_v23 }
 0xad8   : > { %9412 = vmatpush2.bf16.msra.mxu1 %v17769_v18  ;;  %9370 = vmatprep.subr.bf16.mxu0 %v17772_v52 }
 0xad9   : > { %9413 = vmatprep.subr.bf16.mxu1 %v19133_v19 }
 0xadb   : > { %9371 = vmatpush2.bf16.msra.mxu0 %v17770_v30 }
 0xadc   : > { %9414 = vmatpush2.bf16.msra.mxu1 %v17773_v34  ;;  %9372 = vmatprep.subr.bf16.mxu0 %v17776_v9 }
 0xadd   : > { %9415 = vmatprep.subr.bf16.mxu1 %v19133_v19 }
 0xadf   : > { %9373 = vmatpush2.bf16.msra.mxu0 %v17774_v33  ;;  %v9432_v33 = vld [vmem:[#allocation25] sm:$0x7] }
 0xae0   : > { %9416 = vmatpush2.bf16.msra.mxu1 %v17777_v37  ;;  %9944 = vmatprep.subr.bf16.mxu0 %v17780_v17 }
 0xae1   : > { %9999 = vmatprep.subr.bf16.mxu1 %v17822_v16 }
 0xae2   : > { %9375 = vmatmul.mubr.bf16.vlgmr.msra.gmra.mxu0 %v9112_v38 }
 0xae3   : > { %9418 = vmatmul.mubr.bf16.vlgmr.msra.gmra.mxu1 %v9112_v38  ;;  %9945 = vmatpush1.bf16.msra.mxu0 %v17778_v8 }
 0xae4   : > { %10019 = vmatprep.mubr.bf16.mxu1 %v19133_v19  ;;  %9946 = vmatprep.subr.bf16.mxu0 %v17783_v39 }
 0xae5   : > { %10000 = vmatpush1.bf16.msra.mxu1 %v17820_v22 }
 0xae6   : > { %10001 = vmatprep.subr.bf16.mxu1 %v17828_v3 }
 0xae7   : > { %9947 = vmatpush1.bf16.msra.mxu0 %v17781_v40  ;;  %v9437_v40 = vrot.slane %v9432_v33, %v19639_v43 }
 0xae8   : > { %9948 = vmatprep.subr.bf16.mxu0 %v17786_v20 }
 0xae9   : > { %10002 = vmatpush1.bf16.msra.mxu1 %v17826_v57 }
 0xaea   : > { %16232 = vmatprep.subr.bf16.mxu1 %v17832_v36 }
 0xaeb   : > { %9949 = vmatpush1.bf16.msra.mxu0 %v17784_v41 }
 0xaec   : > { %9950 = vmatprep.subr.bf16.mxu0 %v17789_v42  ;;  %v9445_v42 = vrot.slane %v9432_v33, %v19630_v11 }
 0xaef   : > { %9951 = vmatpush1.bf16.msra.mxu0 %v17787_v47 }
 0xaf0   : > { %9952 = vmatprep.subr.bf16.mxu0 %v17792_v44 }
 0xaf3   : > { %9953 = vmatpush1.bf16.msra.mxu0 %v17790_v24 }
 0xaf4   : > { %9954 = vmatprep.subr.bf16.mxu0 %v17795_v51  ;;  %v9441_v51 = vrot.slane %v9432_v33, %v19642_v45 }
 0xaf7   : > { %9955 = vmatpush1.bf16.msra.mxu0 %v17793_v48 }
 0xaf8   : > { %9956 = vmatprep.subr.bf16.mxu0 %v17798_v46 }
 0xafb   : > { %9957 = vmatpush1.bf16.msra.mxu0 %v17796_v31 }
 0xafc   : > { %9958 = vmatprep.subr.bf16.mxu0 %v17801_v53 }
 0xaff   : > { %9959 = vmatpush1.bf16.msra.mxu0 %v17799_v5 }
 0xb00   : > { %9960 = vmatprep.subr.bf16.mxu0 %v17804_v54 }
 0xb03   : > { %9961 = vmatpush2.bf16.msra.mxu0 %v17802_v55 }
 0xb04   : > { %9962 = vmatprep.subr.bf16.mxu0 %v17807_v59 }
 0xb07   : > { %9963 = vmatpush2.bf16.msra.mxu0 %v17805_v29 }
 0xb08   : > { %9964 = vmatprep.subr.bf16.mxu0 %v17810_v1 }
 0xb0b   : > { %9965 = vmatpush2.bf16.msra.mxu0 %v17808_v2 }
 0xb0c   : > { %9966 = vmatprep.subr.bf16.mxu0 %v17813_v62 }
 0xb0f   : > { %9967 = vmatpush2.bf16.msra.mxu0 %v17811_v4 }
 0xb10   : > { %9968 = vmatprep.subr.bf16.mxu0 %v17816_v21 }
 0xb13   : > { %9969 = vmatpush2.bf16.msra.mxu0 %v17814_v10 }
 0xb14   : > { %9970 = vmatprep.subr.bf16.mxu0 %v17819_v13 }
 0xb17   : > { %9971 = vmatpush2.bf16.msra.mxu0 %v17817_v14 }
 0xb18   : > { %9972 = vmatprep.subr.bf16.mxu0 %v17825_v26 }
 0xb1b   : > { %9973 = vmatpush2.bf16.msra.mxu0 %v17823_v7 }
 0xb1c   : > { %9974 = vmatprep.subr.bf16.mxu0 %v17831_v12 }
 0xb1f   : > { %9975 = vmatpush2.bf16.msra.mxu0 %v17829_v28 }
 0xb20   : > { %10457 = vmatprep.subr.bf16.mxu0 %v17836_v60 }
 0xb32   : > { %v8736_v25 = vpop.f32.mrf.mxu1  ;;  %v8693_v35 = vpop.f32.mrf.mxu0 }
 0xb34   : > { %v8738_v56 = vpop.f32.mrf.mxu1  ;;  %v8695_v58 = vpop.f32.mrf.mxu0 }
 0xb36   : > { %v8739_v50 = vpop.f32.mrf.mxu1  ;;  %v8697_v23 = vpop.f32.mrf.mxu0 }
 0xb38   : > { %v8741_v63 = vpop.f32.mrf.mxu1  ;;  %v8699_v18 = vpop.f32.mrf.mxu0 }
 0xb6a   : > { %v9046_v27 = vpop.f32.mrf.mxu1  ;;  %v9003_v52 = vpop.f32.mrf.mxu0 }
 0xb6b   : > { %v9004_v37 = vadd.f32 %v9003_v52, %v8693_v35  ;;  %v9047_v38 = vadd.f32 %v9046_v27, %v8736_v25 }
 0xb6c   : > { %v9048_v61 = vpop.f32.mrf.mxu1  ;;  %v9005_v30 = vpop.f32.mrf.mxu0 }
 0xb6d   : > { %v9006_v17 = vadd.f32 %v9005_v30, %v8695_v58  ;;  %v17833_v30 = vld [vmem:[#allocation27 + $0x260] ss:$12 sps:$4 sm:$0xff]  }
 0xb6e   : > { %v9049_v49 = vpop.f32.mrf.mxu1  ;;  %v9007_v34 = vpop.f32.mrf.mxu0 }
 0xb6f   : > { %v9008_v44 = vadd.f32 %v9007_v34, %v8697_v23  ;;  %v9050_v46 = vadd.f32 %v9049_v49, %v8739_v50 }
 0xb70   : > { %v9051_v32 = vpop.f32.mrf.mxu1  ;;  %v9009_v9 = vpop.f32.mrf.mxu0 }
 0xb71   : > { %v9010_v53 = vadd.f32 %v9009_v9, %v8699_v18 }
 0xba2   : > { %v9376_v8 = vpop.f32.mrf.mxu0 }
 0xba3   : > { %v9426_v39 = vadd.f32 %v9376_v8, %v9004_v37  ;;  %v9419_v20 = vpop.f32.mrf.mxu1  ;;  %v17834_v8 = vld [vmem:[#allocation27 + $0x198] ss:$12 sps:$4 sm:$0xff]  }
 0xba4   : > { %v9428_v41 = vadd.f32 %v9419_v20, %v9047_v38  ;;  %v9378_v47 = vpop.f32.mrf.mxu0  ;;  %v17838_v20 = vld [vmem:[#allocation27 + $0x248] ss:$12 sps:$4 sm:$0xff]  }
 0xba5   : > { %v9427_v24 = vadd.f32 %v9378_v47, %v9006_v17  ;;  %v9421_v48 = vpop.f32.mrf.mxu1  ;;  %v9449_v5 = vadd.f32 %v9437_v40, %v9426_v39  ;;  %v17837_v17 = vld [vmem:[#allocation27 + $0x308] ss:$12 sps:$4 sm:$0xff]   ;;  %v17844_v47 = vld [vmem:[#allocation27 + $0x170] ss:$12 sps:$4 sm:$0xff]  }
 0xba6   : > { %v9380_v31 = vpop.f32.mrf.mxu0  ;;  %v9451_v59 = vadd.f32 %v9445_v42, %v9428_v41  ;;  %v17842_v41 = vld [vmem:[#allocation27 + $0x2f0] ss:$12 sps:$4 sm:$0xff]   ;;  %v17848_v48 = vld [vmem:[#allocation27 + $0x158] ss:$12 sps:$4 sm:$0xff]  }
 0xba7   : > { %v9429_v54 = vadd.f32 %v9380_v31, %v9008_v44  ;;  %v9422_v55 = vpop.f32.mrf.mxu1  ;;  %v9450_v2 = vadd.f32 %v9441_v51, %v9427_v24  ;;  %v9455_v13 = vmax.f32 %v9449_v5, 0.0  ;;  %v17843_v44 = vld [vmem:[#allocation27 + $0x230] ss:$12 sps:$4 sm:$0xff]   ;;  %v17845_v24 = vld [vmem:[#allocation27 + $0x2d8] ss:$12 sps:$4 sm:$0xff]  }
 0xba8   : > { %v9431_v29 = vadd.f32 %v9422_v55, %v9050_v46  ;;  %v9382_v1 = vpop.f32.mrf.mxu0  ;;  %v9457_v22 = vmax.f32 %v9451_v59, 0.0  ;;  %v17847_v46 = vld [vmem:[#allocation27 + $0x218] ss:$12 sps:$4 sm:$0xff]   ;;  %v17849_v31 = vld [vmem:[#allocation27 + $0x2c0] ss:$12 sps:$4 sm:$0xff]  }
 0xba9   : > { %v9452_v62 = vadd.f32 %v9437_v40, %v9429_v54  ;;  %v9430_v4 = vadd.f32 %v9382_v1, %v9010_v53  ;;  %v9424_v21 = vpop.f32.mrf.mxu1  ;;  %v9456_v26 = vmax.f32 %v9450_v2, 0.0  ;;  %v17841_v40 = vld [vmem:[#allocation27 + $0x184] ss:$12 sps:$4 sm:$0xff]   ;;  %v17852_v5 = vld [vmem:[#allocation27 + $0x140] ss:$12 sps:$4 sm:$0xff]  }
 0xbaa   : > { %v9454_v10 = vadd.f32 %v9445_v42, %v9431_v29  ;;  %v17839_v42 = vld [vmem:[#allocation27 + $0x180] ss:$12 sps:$4 sm:$0xff]   ;;  %v17850_v53 = vld [vmem:[#allocation27 + $0x98] ss:$12 sps:$4 sm:$0xff]   ;;  %v17853_v55 = vld [vmem:[#allocation27 + $0x2a8] ss:$12 sps:$4 sm:$0xff]  }
 0xbab   : > { %v9458_v14 = vmax.f32 %v9452_v62, 0.0  ;;  %v9453_v16 = vadd.f32 %v9441_v51, %v9430_v4  ;;  %v17846_v51 = vld [vmem:[#allocation27 + $0xb0] ss:$12 sps:$4 sm:$0xff]   ;;  %v17851_v54 = vld [vmem:[#allocation27 + $0x200] ss:$12 sps:$4 sm:$0xff]  }
 0xbac   : > { %v9460_v25 = vmax.f32 %v9454_v10, 0.0  ;;  %v17854_v59 = vld [vmem:[#allocation27 + $0x80] ss:$12 sps:$4 sm:$0xff]   ;;  %v17856_v29 = vld [vmem:[#allocation27 + $0x128] ss:$12 sps:$4 sm:$0xff]  }
 0xbad   : > { %v9461_v7 = vpack.c.bf16 %v9458_v14, %v9455_v13  ;;  %v9459_v3 = vmax.f32 %v9453_v16, 0.0  ;;  %v17855_v1 = vld [vmem:[#allocation27 + $0x1e8] ss:$12 sps:$4 sm:$0xff]   ;;  %v17857_v2 = vld [vmem:[#allocation27 + $0x290] ss:$12 sps:$4 sm:$0xff]  }
 0xbae   : > { %v9463_v56 = vpack.c.bf16 %v9460_v25, %v9457_v22  ;;  %v17858_v62 = vld [vmem:[#allocation27 + $0x68] ss:$12 sps:$4 sm:$0xff]   ;;  %v17860_v4 = vld [vmem:[#allocation27 + $0x110] ss:$12 sps:$4 sm:$0xff]   ;;  %v17861_v10 = vld [vmem:[#allocation27 + $0x278] ss:$12 sps:$4 sm:$0xff]  }
 0xbaf   : > { %v9467_v57 = vrot.slane %v9461_v7, 7  ;;  %v9462_v50 = vpack.c.bf16 %v9459_v3, %v9456_v26  ;;  %v17859_v21 = vld [vmem:[#allocation27 + $0x1d0] ss:$12 sps:$4 sm:$0xff]   ;;  %v17864_v14 = vld [vmem:[#allocation27 + $0xf8] ss:$12 sps:$4 sm:$0xff]  }
 0xbb0   : > { %v9469_v12 = vrot.slane %v9463_v56, 7  ;;  %v17862_v13 = vld [vmem:[#allocation27 + $0x50] ss:$12 sps:$4 sm:$0xff]   ;;  %v17863_v16 = vld [vmem:[#allocation27 + $0x1b8] ss:$12 sps:$4 sm:$0xff]  }
 0xbb1   : > { %v9471_v28 = vsel %vm8269_vm9, 0, %v9467_v57  ;;  %v9468_v36 = vrot.slane %v9462_v50, 7  ;;  %v17865_v22 = vld [vmem:[#allocation27 + $0x38] ss:$12 sps:$4 sm:$0xff]   ;;  %v17867_v25 = vld [vmem:[#allocation27 + $0xe0] ss:$12 sps:$4 sm:$0xff]  }
 0xbb2   : > { %v20144_v63 = vsel %vm9481_vm3, %v9471_v28, 0  ;;  %v9477_v60 = vsel %vm8269_vm9, 0, %v9469_v12  ;;  %v17866_v26 = vld [vmem:[#allocation27 + $0x350] ss:$12 sps:$4 sm:$0xff]   ;;  %v17868_v7 = vld [vmem:[#allocation27 + $0x20] ss:$12 sps:$4 sm:$0xff]  }
 0xbb3   : > { %v20147_v27 = vsel %vm9481_vm3, %v9477_v60, 0  ;;  %v9474_v61 = vsel %vm8269_vm9, 0, %v9468_v36  ;;  %v9633_v49 = vshll.u32 %v20144_v63, 16  ;;  %v9631_v37 = vshrl.u32 %v20144_v63, 16  ;;  %v17870_v3 = vld [vmem:[#allocation27 + $0xc8] ss:$12 sps:$4 sm:$0xff]  }
 0xbb4   : > { %v9647_v32 = vshll.u32 %v20147_v27, 16  ;;  %v20152_v35 = vsel %vm9481_vm3, %v9474_v61, 0  ;;  %v9645_v23 = vshrl.u32 %v20147_v27, 16  ;;  %v17869_v56 = vld [vmem:[#allocation27 + $0x338] ss:$12 sps:$4 sm:$0xff]  }
 0xbb5   : > { %v9640_v58 = vshll.u32 %v20152_v35, 16  ;;  %v9635_v52 = vrot.slane %v9633_v49, 1  ;;  %v9638_v34 = vshrl.u32 %v20152_v35, 16  ;;  %v17873_v57 = vld [vmem:[#allocation27 + $0xac] ss:$12 sps:$4 sm:$0xff]  }
 0xbb6   : > { %v9649_v18 = vrot.slane %v9647_v32, 1  ;;  %v17874_v50 = vld [vmem:[#allocation27 + $0x8] ss:$12 sps:$4 sm:$0xff]   ;;  %v17878_v36 = vld [vmem:[#allocation27 + $0x1a0] ss:$12 sps:$4 sm:$0xff]  }
 0xbb7   : > { %v9642_v9 = vrot.slane %v9640_v58, 1  ;;  %v20162_v39 = vor.u32 %v9635_v52, %v9631_v37  ;;  %v17871_v12 = vld [vmem:[#allocation27 + $0xa8] ss:$12 sps:$4 sm:$0xff]   ;;  %v17875_v60 = vld [vmem:[#allocation27 + $0x90] ss:$12 sps:$4 sm:$0xff]  }
 0xbb8   : > { %v20157_v33 = vor.u32 %v9649_v18, %v9645_v23  ;;  %v17877_v28 = vld [vmem:[#allocation27 + $0x94] ss:$12 sps:$4 sm:$0xff]   ;;  %v17881_v61 = vld [vmem:[#allocation27 + $0x7c] ss:$12 sps:$4 sm:$0xff]   ;;  %v17885_v32 = vld [vmem:[#allocation27 + $0x40c] ss:$12 sps:$4 sm:$0xff]  }
 0xbb9   : > { %v9643_v38 = vor.u32 %v9642_v9, %v9638_v34  ;;  %v17882_v49 = vld [vmem:[#allocation27 + $0x188] ss:$12 sps:$4 sm:$0xff]   ;;  %v17879_v58 = vld [vmem:[#allocation27 + $0x78] ss:$12 sps:$4 sm:$0xff]   ;;  %v10647_v34 = vrot.slane %v20152_v35, 1 }
 0xbba   : > { %15599 = vmatmul.mubr.msk.bf16.vlgmr.msra.gmra.mxu1 %vm2317_vm5, %v20157_v33  ;;  %v17888_v23 = vld [vmem:[#allocation27 + $0x64] ss:$12 sps:$4 sm:$0xff]   ;;  %v17883_v18 = vld [vmem:[#allocation27 + $0x408] ss:$12 sps:$4 sm:$0xff]   ;;  %v17894_v9 = vld [vmem:[#allocation27 + $0x4c] ss:$12 sps:$4 sm:$0xff]  }
 0xbbb   : > { %16233 = vmatpush3.bf16.msra.mxu1 %v17833_v30  ;;  %9976 = vmatprep.mubr.bf16.mxu0 %v9643_v38  ;;  %v17891_v52 = vld [vmem:[#allocation27 + $0x3f4] ss:$12 sps:$4 sm:$0xff]   ;;  %v17897_v37 = vld [vmem:[#allocation27 + $0x3dc] ss:$12 sps:$4 sm:$0xff]  }
 0xbbc   : > { %10062 = vmatprep.mubr.bf16.mxu1 %v9643_v38  ;;  %9977 = vmatmul.mubr.bf16.vlgmr.msra.gmra.mxu0 %v20162_v39  ;;  %v17886_v30 = vld [vmem:[#allocation27 + $0x60] ss:$12 sps:$4 sm:$0xff]   ;;  %v17892_v38 = vld [vmem:[#allocation27 + $0x48] ss:$12 sps:$4 sm:$0xff]  }
 0xbbd   : > { %16234 = vmatprep.subr.bf16.mxu1 %v17837_v17  ;;  %10458 = vmatpush1.bf16.msra.mxu0 %v17834_v8  ;;  %v17900_v8 = vld [vmem:[#allocation27 + $0x34] ss:$12 sps:$4 sm:$0xff]   ;;  %v17895_v17 = vld [vmem:[#allocation27 + $0x3d8] ss:$12 sps:$4 sm:$0xff]  }
 0xbbe   : > { %10459 = vmatprep.subr.bf16.mxu0 %v17841_v40  ;;  %10477 = vmatprep.mubr.bf16.mxu0 %v19133_v19  ;;  %v17898_v40 = vld [vmem:[#allocation27 + $0x30] ss:$12 sps:$4 sm:$0xff]  }
 0xbbf   : > { %16235 = vmatpush3.bf16.msra.mxu1 %v17838_v20  ;;  %v17906_v20 = vld [vmem:[#allocation27 + $0x1c] ss:$12 sps:$4 sm:$0xff]  }
 0xbc0   : > { %16236 = vmatprep.subr.bf16.mxu1 %v17842_v41  ;;  %v17901_v41 = vld [vmem:[#allocation27 + $0x3c0] ss:$12 sps:$4 sm:$0xff]  }
 0xbc1   : > { %10460 = vmatpush1.bf16.msra.mxu0 %v17839_v42  ;;  %v17909_v42 = vld [vmem:[#allocation27 + $0x3ac] ss:$12 sps:$4 sm:$0xff]  }
 0xbc2   : > { %16257 = vmatprep.subr.bf16.mxu0 %v17844_v47  ;;  %v17904_v47 = vld [vmem:[#allocation27 + $0x18] ss:$12 sps:$4 sm:$0xff]  }
 0xbc3   : > { %16237 = vmatpush3.bf16.msra.mxu1 %v17843_v44  ;;  %v17912_v44 = vld [vmem:[#allocation27 + $0x4] ss:$12 sps:$4 sm:$0xff]  }
 0xbc4   : > { %16238 = vmatprep.subr.bf16.mxu1 %v17845_v24  ;;  %15655 = vmatmul.mubr.msk.bf16.vlgmr.msra.gmra.mxu0 %vm2317_vm5, %v20147_v27  ;;  %v17907_v24 = vld [vmem:[#allocation27 + $0x3a8] ss:$12 sps:$4 sm:$0xff]  }
 0xbc5   : > { %16258 = vmatpush3.bf16.msra.mxu0 %v17846_v51  ;;  %10520 = vmatprep.mubr.bf16.mxu0 %v20152_v35  ;;  %v17915_v51 = vld [vmem:[#allocation27 + $0x394] ss:$12 sps:$4 sm:$0xff]  }
 0xbc6   : > { %16259 = vmatprep.subr.bf16.mxu0 %v17848_v48  ;;  %v17910_v48 = vld [vmem:[#allocation27] ss:$12 sps:$4 sm:$0xff]  }
 0xbc7   : > { %16239 = vmatpush3.bf16.msra.mxu1 %v17847_v46  ;;  %v17918_v46 = vld [vmem:[#allocation27 + $0x16c] ss:$12 sps:$4 sm:$0xff]  }
 0xbc8   : > { %16240 = vmatprep.subr.bf16.mxu1 %v17849_v31  ;;  %v17913_v31 = vld [vmem:[#allocation27 + $0x390] ss:$12 sps:$4 sm:$0xff]  }
 0xbc9   : > { %16260 = vmatpush3.bf16.msra.mxu0 %v17850_v53  ;;  %v17921_v53 = vld [vmem:[#allocation27 + $0x37c] ss:$12 sps:$4 sm:$0xff]  }
 0xbca   : > { %16261 = vmatprep.subr.bf16.mxu0 %v17852_v5  ;;  %v17916_v5 = vld [vmem:[#allocation27 + $0x168] ss:$12 sps:$4 sm:$0xff]  }
 0xbcb   : > { %16241 = vmatpush3.bf16.msra.mxu1 %v17851_v54  ;;  %v17924_v54 = vld [vmem:[#allocation27 + $0x154] ss:$12 sps:$4 sm:$0xff]  }
 0xbcc   : > { %16242 = vmatprep.subr.bf16.mxu1 %v17853_v55  ;;  %v17919_v55 = vld [vmem:[#allocation27 + $0x378] ss:$12 sps:$4 sm:$0xff]  }
 0xbcd   : > { %16262 = vmatpush3.bf16.msra.mxu0 %v17854_v59  ;;  %v17927_v59 = vld [vmem:[#allocation27 + $0x364] ss:$12 sps:$4 sm:$0xff]  }
 0xbce   : > { %16263 = vmatprep.subr.bf16.mxu0 %v17856_v29  ;;  %v17922_v29 = vld [vmem:[#allocation27 + $0x150] ss:$12 sps:$4 sm:$0xff]  }
 0xbcf   : > { %16243 = vmatpush3.bf16.msra.mxu1 %v17855_v1  ;;  %v17930_v1 = vld [vmem:[#allocation27 + $0x13c] ss:$12 sps:$4 sm:$0xff]  }
 0xbd0   : > { %16244 = vmatprep.subr.bf16.mxu1 %v17857_v2  ;;  %v17925_v2 = vld [vmem:[#allocation27 + $0x360] ss:$12 sps:$4 sm:$0xff]  }
 0xbd1   : > { %16264 = vmatpush3.bf16.msra.mxu0 %v17858_v62  ;;  %v17933_v62 = vld [vmem:[#allocation27 + $0x4cc] ss:$12 sps:$4 sm:$0xff]  }
 0xbd2   : > { %16265 = vmatprep.subr.bf16.mxu0 %v17860_v4  ;;  %v17928_v4 = vld [vmem:[#allocation27 + $0x138] ss:$12 sps:$4 sm:$0xff]  }
 0xbd3   : > { %16245 = vmatpush3.bf16.msra.mxu1 %v17859_v21  ;;  %v17936_v21 = vld [vmem:[#allocation27 + $0x124] ss:$12 sps:$4 sm:$0xff]  }
 0xbd4   : > { %16246 = vmatprep.subr.bf16.mxu1 %v17861_v10  ;;  %v17931_v10 = vld [vmem:[#allocation27 + $0x4c8] ss:$12 sps:$4 sm:$0xff]  }
 0xbd5   : > { %16266 = vmatpush3.bf16.msra.mxu0 %v17862_v13  ;;  %v17939_v13 = vld [vmem:[#allocation27 + $0x4b4] ss:$12 sps:$4 sm:$0xff]  }
 0xbd6   : > { %16267 = vmatprep.subr.bf16.mxu0 %v17864_v14  ;;  %v17934_v14 = vld [vmem:[#allocation27 + $0x120] ss:$12 sps:$4 sm:$0xff]  }
 0xbd7   : > { %16247 = vmatpush3.bf16.msra.mxu1 %v17863_v16  ;;  %v17942_v16 = vld [vmem:[#allocation27 + $0x10c] ss:$12 sps:$4 sm:$0xff]  }
 0xbd8   : > { %16437 = vmatprep.subr.bf16.mxu1 %v19131_v0 }
 0xbd9   : > { %16268 = vmatpush3.bf16.msra.mxu0 %v17865_v22  ;;  %v17937_v22 = vld [vmem:[#allocation27 + $0x4b0] ss:$12 sps:$4 sm:$0xff]  }
 0xbda   : > { %10063 = vmatmul.mubr.bf16.vlgmr.msra.gmra.mxu1 %v20162_v39  ;;  %16269 = vmatprep.subr.bf16.mxu0 %v17867_v25  ;;  %v17903_v39 = vld [vmem:[#allocation27 + $0x3c4] ss:$12 sps:$4 sm:$0xff]   ;;  %v17945_v25 = vld [vmem:[#allocation27 + $0x49c] ss:$12 sps:$4 sm:$0xff]  }
 0xbdb   : > { %16438 = vmatpush3.bf16.msra.mxu1 %v17866_v26  ;;  %16441 = vmatprep.mubr.msk.bf16.mxu1 %vm19132_vm0, %v19131_v0  ;;  %v17940_v26 = vld [vmem:[#allocation27 + $0x108] ss:$12 sps:$4 sm:$0xff]  }
 0xbdc   : > { %16439 = vmatprep.subr.bf16.mxu1 %v19131_v0 }
 0xbdd   : > { %16270 = vmatpush3.bf16.msra.mxu0 %v17868_v7  ;;  %v17948_v7 = vld [vmem:[#allocation27 + $0xf4] ss:$12 sps:$4 sm:$0xff]  }
 0xbde   : > { %16271 = vmatprep.subr.bf16.mxu0 %v17870_v3  ;;  %v17943_v3 = vld [vmem:[#allocation27 + $0x498] ss:$12 sps:$4 sm:$0xff]  }
 0xbdf   : > { %16440 = vmatpush3.bf16.msra.mxu1 %v17869_v56  ;;  %v17951_v56 = vld [vmem:[#allocation27 + $0x484] ss:$12 sps:$4 sm:$0xff]  }
 0xbe0   : > { %10402 = vmatprep.subr.bf16.mxu1 %v17873_v57  ;;  %v17946_v57 = vld [vmem:[#allocation27 + $0xf0] ss:$12 sps:$4 sm:$0xff]  }
 0xbe1   : > { %16272 = vmatpush3.bf16.msra.mxu0 %v17874_v50  ;;  %v17954_v50 = vld [vmem:[#allocation27 + $0xdc] ss:$12 sps:$4 sm:$0xff]  }
 0xbe2   : > { %16442 = vmatmul.mubr.msk.bf16.vlgmr.msra.gmra.mxu1 %vm2317_vm5, %v20157_v33  ;;  %16445 = vmatprep.subr.bf16.mxu0 %v19131_v0  ;;  %v17889_v33 = vld [vmem:[#allocation27 + $0x3f0] ss:$12 sps:$4 sm:$0xff]  }
 0xbe3   : > { %10403 = vmatpush1.bf16.msra.mxu1 %v17871_v12  ;;  %10434 = vmatprep.mubr.bf16.mxu1 %v20152_v35  ;;  %v17949_v12 = vld [vmem:[#allocation27 + $0x480] ss:$12 sps:$4 sm:$0xff]   ;;  %v17987_v35 = vld [vmem:[#allocation27 + $0x398] ss:$12 sps:$4 sm:$0xff]  }
 0xbe4   : > { %10521 = vmatmul.mubr.bf16.vlgmr.msra.gmra.mxu0 %v20144_v63  ;;  %10404 = vmatprep.subr.bf16.mxu1 %v17877_v28  ;;  %v17957_v28 = vld [vmem:[#allocation27 + $0x46c] ss:$12 sps:$4 sm:$0xff]  }
 0xbe5   : > { %16446 = vmatpush3.bf16.msra.mxu0 %v17878_v36  ;;  %16449 = vmatprep.mubr.msk.bf16.mxu0 %vm19132_vm0, %v19131_v0  ;;  %v17952_v36 = vld [vmem:[#allocation27 + $0xd8] ss:$12 sps:$4 sm:$0xff]  }
 0xbe6   : > { %16447 = vmatprep.subr.bf16.mxu0 %v19131_v0 }
 0xbe7   : > { %10405 = vmatpush1.bf16.msra.mxu1 %v17875_v60  ;;  %v17960_v60 = vld [vmem:[#allocation27 + $0xc4] ss:$12 sps:$4 sm:$0xff]  }
 0xbe8   : > { %10406 = vmatprep.subr.bf16.mxu1 %v17881_v61  ;;  %v17955_v61 = vld [vmem:[#allocation27 + $0x468] ss:$12 sps:$4 sm:$0xff]  }
 0xbe9   : > { %16448 = vmatpush3.bf16.msra.mxu0 %v17882_v49  ;;  %v17963_v49 = vld [vmem:[#allocation27 + $0x454] ss:$12 sps:$4 sm:$0xff]  }
 0xbea   : > { %10942 = vmatprep.subr.bf16.mxu0 %v17885_v32  ;;  %v17958_v32 = vld [vmem:[#allocation27 + $0xc0] ss:$12 sps:$4 sm:$0xff]  }
 0xbeb   : > { %10407 = vmatpush1.bf16.msra.mxu1 %v17879_v58  ;;  %v17966_v58 = vld [vmem:[#allocation27 + $0x4fc] ss:$12 sps:$4 sm:$0xff]  }
 0xbec   : > { %16450 = vmatmul.mubr.msk.bf16.vlgmr.msra.gmra.mxu0 %vm2317_vm5, %v20147_v27  ;;  %10408 = vmatprep.subr.bf16.mxu1 %v17888_v23  ;;  %v17961_v23 = vld [vmem:[#allocation27 + $0x450] ss:$12 sps:$4 sm:$0xff]  }
 0xbed   : > { %10943 = vmatpush1.bf16.msra.mxu0 %v17883_v18  ;;  %10974 = vmatprep.mubr.bf16.mxu0 %v10647_v34  ;;  %v17969_v18 = vld [vmem:[#allocation27 + $0x43c] ss:$12 sps:$4 sm:$0xff]  }
 0xbee   : > { %10944 = vmatprep.subr.bf16.mxu0 %v17891_v52  ;;  %v17964_v52 = vld [vmem:[#allocation27 + $0x4f8] ss:$12 sps:$4 sm:$0xff]  }
 0xbef   : > { %10409 = vmatpush1.bf16.msra.mxu1 %v17886_v30  ;;  %v17972_v30 = vld [vmem:[#allocation27 + $0x4e4] ss:$12 sps:$4 sm:$0xff]  }
 0xbf0   : > { %10410 = vmatprep.subr.bf16.mxu1 %v17894_v9  ;;  %v17967_v9 = vld [vmem:[#allocation27 + $0x438] ss:$12 sps:$4 sm:$0xff]  }
 0xbf1   : > { %10945 = vmatpush1.bf16.msra.mxu0 %v17889_v33  ;;  %v17975_v33 = vld [vmem:[#allocation27 + $0x424] ss:$12 sps:$4 sm:$0xff]  }
 0xbf2   : > { %10946 = vmatprep.subr.bf16.mxu0 %v17897_v37  ;;  %v17970_v37 = vld [vmem:[#allocation27 + $0x4e0] ss:$12 sps:$4 sm:$0xff]  }
 0xbf3   : > { %10411 = vmatpush1.bf16.msra.mxu1 %v17892_v38  ;;  %v17976_v38 = vld [vmem:[#allocation27 + $0x4d0] ss:$12 sps:$4 sm:$0xff]  }
 0xbf4   : > { %10412 = vmatprep.subr.bf16.mxu1 %v17900_v8  ;;  %v17973_v8 = vld [vmem:[#allocation27 + $0x420] ss:$12 sps:$4 sm:$0xff]  }
 0xbf5   : > { %10947 = vmatpush1.bf16.msra.mxu0 %v17895_v17  ;;  %v17977_v17 = vld [vmem:[#allocation27 + $0x410] ss:$12 sps:$4 sm:$0xff]  }
 0xbf6   : > { %10948 = vmatprep.subr.bf16.mxu0 %v17903_v39  ;;  %v10648_v39 = vrot.slane %v20147_v27, 1  ;;  %v17982_v27 = vld [vmem:[#allocation27 + $0x488] ss:$12 sps:$4 sm:$0xff]  }
 0xbf7   : > { %10413 = vmatpush1.bf16.msra.mxu1 %v17898_v40  ;;  %v17978_v40 = vld [vmem:[#allocation27 + $0x4b8] ss:$12 sps:$4 sm:$0xff]  }
 0xbf8   : > { %10414 = vmatprep.subr.bf16.mxu1 %v17906_v20  ;;  %v10646_v20 = vrot.slane %v20144_v63, 1 }
 0xbf9   : > { %10949 = vmatpush1.bf16.msra.mxu0 %v17901_v41  ;;  %v17979_v41 = vld [vmem:[#allocation27 + $0x3f8] ss:$12 sps:$4 sm:$0xff]  }
 0xbfa   : > { %10950 = vmatprep.subr.bf16.mxu0 %v17909_v42  ;;  %v17980_v42 = vld [vmem:[#allocation27 + $0x4a0] ss:$12 sps:$4 sm:$0xff]  }
 0xbfb   : > { %10415 = vmatpush1.bf16.msra.mxu1 %v17904_v47  ;;  %v17981_v47 = vld [vmem:[#allocation27 + $0x3e0] ss:$12 sps:$4 sm:$0xff]  }
 0xbfc   : > { %10416 = vmatprep.subr.bf16.mxu1 %v17912_v44  ;;  %v17983_v44 = vld [vmem:[#allocation27 + $0x3c8] ss:$12 sps:$4 sm:$0xff]  }
 0xbfd   : > { %10951 = vmatpush1.bf16.msra.mxu0 %v17907_v24  ;;  %v17984_v24 = vld [vmem:[#allocation27 + $0x470] ss:$12 sps:$4 sm:$0xff]  }
 0xbfe   : > { %10952 = vmatprep.subr.bf16.mxu0 %v17915_v51  ;;  %v17986_v51 = vld [vmem:[#allocation27 + $0x458] ss:$12 sps:$4 sm:$0xff]  }
 0xbff   : > { %10417 = vmatpush1.bf16.msra.mxu1 %v17910_v48  ;;  %v17989_v48 = vld [vmem:[#allocation27 + $0x380] ss:$12 sps:$4 sm:$0xff]  }
 0xc00   : > { %10418 = vmatprep.subr.bf16.mxu1 %v17918_v46  ;;  %v17990_v46 = vld [vmem:[#allocation27 + $0x428] ss:$12 sps:$4 sm:$0xff]  }
 0xc01   : > { %10953 = vmatpush1.bf16.msra.mxu0 %v17913_v31  ;;  %v17991_v31 = vld [vmem:[#allocation27 + $0x368] ss:$12 sps:$4 sm:$0xff]  }
 0xc02   : > { %10954 = vmatprep.subr.bf16.mxu0 %v17921_v53  ;;  %v17992_v53 = vld [vmem:[#allocation27 + $0x500] ss:$12 sps:$4 sm:$0xff]  }
 0xc03   : > { %10419 = vmatpush2.bf16.msra.mxu1 %v17916_v5  ;;  %v17993_v5 = vld [vmem:[#allocation27 + $0x4e8] ss:$12 sps:$4 sm:$0xff]  }
 0xc04   : > { %10420 = vmatprep.subr.bf16.mxu1 %v17924_v54  ;;  %v17996_v54 = vld [vmem:[#allocation30 + $0x3a4] ss:$16 sps:$4 sm:$0xff]  }
 0xc05   : > { %10955 = vmatpush1.bf16.msra.mxu0 %v17919_v55  ;;  %v17994_v55 = vld [vmem:[#allocation30 + $0x3a0] ss:$16 sps:$4 sm:$0xff]  }
 0xc06   : > { %10956 = vmatprep.subr.bf16.mxu0 %v17927_v59  ;;  %v17999_v59 = vld [vmem:[#allocation30 + $0x384] ss:$16 sps:$4 sm:$0xff]  }
 0xc07   : > { %10421 = vmatpush2.bf16.msra.mxu1 %v17922_v29  ;;  %v17997_v29 = vld [vmem:[#allocation30 + $0x380] ss:$16 sps:$4 sm:$0xff]  }
 0xc08   : > { %10422 = vmatprep.subr.bf16.mxu1 %v17930_v1  ;;  %v18002_v1 = vld [vmem:[#allocation30 + $0x364] ss:$16 sps:$4 sm:$0xff]  }
 0xc09   : > { %10957 = vmatpush1.bf16.msra.mxu0 %v17925_v2  ;;  %v18000_v2 = vld [vmem:[#allocation30 + $0x360] ss:$16 sps:$4 sm:$0xff]  }
 0xc0a   : > { %10958 = vmatprep.subr.bf16.mxu0 %v17933_v62  ;;  %v18005_v62 = vld [vmem:[#allocation30 + $0x344] ss:$16 sps:$4 sm:$0xff]  }
 0xc0b   : > { %10423 = vmatpush2.bf16.msra.mxu1 %v17928_v4  ;;  %v18003_v4 = vld [vmem:[#allocation30 + $0x340] ss:$16 sps:$4 sm:$0xff]  }
 0xc0c   : > { %10424 = vmatprep.subr.bf16.mxu1 %v17936_v21  ;;  %v18008_v21 = vld [vmem:[#allocation30 + $0x324] ss:$16 sps:$4 sm:$0xff]  }
 0xc0d   : > { %10959 = vmatpush2.bf16.msra.mxu0 %v17931_v10  ;;  %v18011_v10 = vld [vmem:[#allocation30 + $0x304] ss:$16 sps:$4 sm:$0xff]  }
 0xc0e   : > { %10960 = vmatprep.subr.bf16.mxu0 %v17939_v13  ;;  %v18009_v13 = vld [vmem:[#allocation30 + $0x300] ss:$16 sps:$4 sm:$0xff]  }
 0xc0f   : > { %10425 = vmatpush2.bf16.msra.mxu1 %v17934_v14  ;;  %v18014_v14 = vld [vmem:[#allocation30 + $0x2e4] ss:$16 sps:$4 sm:$0xff]  }
 0xc10   : > { %10426 = vmatprep.subr.bf16.mxu1 %v17942_v16  ;;  %v18012_v16 = vld [vmem:[#allocation30 + $0x2e0] ss:$16 sps:$4 sm:$0xff]  }
 0xc11   : > { %10961 = vmatpush2.bf16.msra.mxu0 %v17937_v22  ;;  %v18017_v22 = vld [vmem:[#allocation30 + $0x2c4] ss:$16 sps:$4 sm:$0xff]  }
 0xc12   : > { %10962 = vmatprep.subr.bf16.mxu0 %v17945_v25  ;;  %v18015_v25 = vld [vmem:[#allocation30 + $0x2c0] ss:$16 sps:$4 sm:$0xff]  }
 0xc13   : > { %10427 = vmatpush2.bf16.msra.mxu1 %v17940_v26  ;;  %v18020_v26 = vld [vmem:[#allocation30 + $0x4a4] ss:$16 sps:$4 sm:$0xff]  }
 0xc14   : > { %10428 = vmatprep.subr.bf16.mxu1 %v17948_v7  ;;  %v18018_v7 = vld [vmem:[#allocation30 + $0x4a0] ss:$16 sps:$4 sm:$0xff]  }
 0xc15   : > { %10963 = vmatpush2.bf16.msra.mxu0 %v17943_v3  ;;  %v18023_v3 = vld [vmem:[#allocation30 + $0x484] ss:$16 sps:$4 sm:$0xff]  }
 0xc16   : > { %10964 = vmatprep.subr.bf16.mxu0 %v17951_v56  ;;  %v18021_v56 = vld [vmem:[#allocation30 + $0x480] ss:$16 sps:$4 sm:$0xff]  }
 0xc17   : > { %10429 = vmatpush2.bf16.msra.mxu1 %v17946_v57  ;;  %v18026_v57 = vld [vmem:[#allocation30 + $0x464] ss:$16 sps:$4 sm:$0xff]  }
 0xc18   : > { %10430 = vmatprep.subr.bf16.mxu1 %v17954_v50  ;;  %v18024_v50 = vld [vmem:[#allocation30 + $0x460] ss:$16 sps:$4 sm:$0xff]  }
 0xc19   : > { %10965 = vmatpush2.bf16.msra.mxu0 %v17949_v12  ;;  %v18029_v12 = vld [vmem:[#allocation30 + $0x444] ss:$16 sps:$4 sm:$0xff]  }
 0xc1a   : > { %10966 = vmatprep.subr.bf16.mxu0 %v17957_v28 }
 0xc1b   : > { %10431 = vmatpush2.bf16.msra.mxu1 %v17952_v36  ;;  %v18027_v36 = vld [vmem:[#allocation30 + $0x440] ss:$16 sps:$4 sm:$0xff]  }
 0xc1c   : > { %10432 = vmatprep.subr.bf16.mxu1 %v17960_v60 }
 0xc1d   : > { %10967 = vmatpush2.bf16.msra.mxu0 %v17955_v61 }
 0xc1e   : > { %10968 = vmatprep.subr.bf16.mxu0 %v17963_v49  ;;  %v18032_v49 = vld [vmem:[#allocation30 + $0x424] ss:$16 sps:$4 sm:$0xff]  }
 0xc1f   : > { %10433 = vmatpush2.bf16.msra.mxu1 %v17958_v32 }
 0xc20   : > { %10997 = vmatprep.subr.bf16.mxu1 %v17966_v58 }
 0xc21   : > { %10969 = vmatpush2.bf16.msra.mxu0 %v17961_v23 }
 0xc22   : > { %10435 = vmatmul.mubr.bf16.vlgmr.msra.gmra.mxu1 %v20144_v63  ;;  %10970 = vmatprep.subr.bf16.mxu0 %v17969_v18  ;;  %v17985_v63 = vld [vmem:[#allocation27 + $0x3b0] ss:$12 sps:$4 sm:$0xff]  }
 0xc23   : > { %10998 = vmatpush1.bf16.msra.mxu1 %v17964_v52  ;;  %11017 = vmatprep.mubr.bf16.mxu1 %v19133_v19  ;;  %v18030_v52 = vld [vmem:[#allocation30 + $0x420] ss:$16 sps:$4 sm:$0xff]  }
 0xc24   : > { %10999 = vmatprep.subr.bf16.mxu1 %v17972_v30 }
 0xc25   : > { %10971 = vmatpush2.bf16.msra.mxu0 %v17967_v9  ;;  %v18035_v9 = vld [vmem:[#allocation30 + $0x404] ss:$16 sps:$4 sm:$0xff]  }
 0xc26   : > { %10972 = vmatprep.subr.bf16.mxu0 %v17975_v33 }
 0xc27   : > { %11000 = vmatpush1.bf16.msra.mxu1 %v17970_v37 }
 0xc28   : > { %16282 = vmatprep.subr.bf16.mxu1 %v17976_v38 }
 0xc29   : > { %10973 = vmatpush2.bf16.msra.mxu0 %v17973_v8 }
 0xc2a   : > { %15711 = vmatmul.mubr.msk.bf16.vlgmr.msra.gmra.mxu1 %vm2317_vm5, %v10648_v39 }
 0xc2b   : > { %16283 = vmatpush3.bf16.msra.mxu1 %v17977_v17  ;;  %11060 = vmatprep.mubr.bf16.mxu1 %v10647_v34  ;;  %v17988_v34 = vld [vmem:[#allocation27 + $0x440] ss:$12 sps:$4 sm:$0xff]   ;;  %v18033_v17 = vld [vmem:[#allocation30 + $0x400] ss:$16 sps:$4 sm:$0xff]  }
 0xc2c   : > { %10975 = vmatmul.mubr.bf16.vlgmr.msra.gmra.mxu0 %v10646_v20  ;;  %16284 = vmatprep.subr.bf16.mxu1 %v17978_v40  ;;  %v18036_v40 = vld [vmem:[#allocation30 + $0x3e0] ss:$16 sps:$4 sm:$0xff]  }
 0xc2d   : > { %11887 = vmatprep.mubr.bf16.mxu0 %v19133_v19 }
 0xc2f   : > { %16285 = vmatpush3.bf16.msra.mxu1 %v17979_v41  ;;  %v18039_v41 = vld [vmem:[#allocation30 + $0x3c0] ss:$16 sps:$4 sm:$0xff]  }
 0xc30   : > { %16286 = vmatprep.subr.bf16.mxu1 %v17980_v42  ;;  %v18044_v42 = vld [vmem:[#allocation30 + $0x564] ss:$16 sps:$4 sm:$0xff]  }
 0xc31   : > { %11859 = vmatprep.subr.bf16.mxu0 %v18044_v42 }
 0xc33   : > { %16287 = vmatpush3.bf16.msra.mxu1 %v17981_v47  ;;  %v18047_v47 = vld [vmem:[#allocation30 + $0x56c] ss:$16 sps:$4 sm:$0xff]  }
 0xc34   : > { %16288 = vmatprep.subr.bf16.mxu1 %v17982_v27  ;;  %v18042_v27 = vld [vmem:[#allocation30 + $0x560] ss:$16 sps:$4 sm:$0xff]  }
 0xc35   : > { %11860 = vmatpush1.bf16.msra.mxu0 %v18042_v27 }
 0xc37   : > { %16289 = vmatpush3.bf16.msra.mxu1 %v17983_v44  ;;  %v18050_v44 = vld [vmem:[#allocation30 + $0x544] ss:$16 sps:$4 sm:$0xff]  }
 0xc38   : > { %16290 = vmatprep.subr.bf16.mxu1 %v17984_v24  ;;  %11861 = vmatprep.subr.bf16.mxu0 %v18050_v44 }
 0xc3b   : > { %16291 = vmatpush3.bf16.msra.mxu1 %v17985_v63  ;;  %v18048_v63 = vld [vmem:[#allocation30 + $0x540] ss:$16 sps:$4 sm:$0xff]  }
 0xc3c   : > { %16292 = vmatprep.subr.bf16.mxu1 %v17986_v51  ;;  %11862 = vmatpush1.bf16.msra.mxu0 %v18048_v63  ;;  %v18056_v51 = vld [vmem:[#allocation30 + $0x524] ss:$16 sps:$4 sm:$0xff]  }
 0xc3d   : > { %11863 = vmatprep.subr.bf16.mxu0 %v18056_v51 }
 0xc3f   : > { %16293 = vmatpush3.bf16.msra.mxu1 %v17987_v35 }
 0xc40   : > { %16294 = vmatprep.subr.bf16.mxu1 %v17988_v34 }
 0xc43   : > { %16295 = vmatpush3.bf16.msra.mxu1 %v17989_v48  ;;  %v18054_v48 = vld [vmem:[#allocation30 + $0x520] ss:$16 sps:$4 sm:$0xff]  }
 0xc44   : > { %16296 = vmatprep.subr.bf16.mxu1 %v17990_v46  ;;  %11864 = vmatpush1.bf16.msra.mxu0 %v18054_v48 }
 0xc47   : > { %16297 = vmatpush3.bf16.msra.mxu1 %v17991_v31 }
 0xc48   : > { %16453 = vmatprep.subr.bf16.mxu1 %v19131_v0 }
 0xc4a   : > { %11061 = vmatmul.mubr.bf16.vlgmr.msra.gmra.mxu1 %v10646_v20  ;;  %v18041_v20 = vld [vmem:[#allocation30 + $0x3c4] ss:$16 sps:$4 sm:$0xff]  }
 0xc4b   : > { %16454 = vmatpush3.bf16.msra.mxu1 %v17992_v53  ;;  %16457 = vmatprep.mubr.msk.bf16.mxu1 %vm19132_vm0, %v19131_v0  ;;  %v18062_v53 = vld [vmem:[#allocation30 + $0x504] ss:$16 sps:$4 sm:$0xff]   ;;  %vm11163_vm0 = vcmask 1046528  }
 0xc4c   : > { %16455 = vmatprep.subr.bf16.mxu1 %v19131_v0  ;;  %v18006_v0 = vld [vmem:[#allocation30 + $0x320] ss:$16 sps:$4 sm:$0xff]   ;;  %11865 = vmatprep.subr.bf16.mxu0 %v18062_v53  ;;  %vm20223_vm4 = vmand %vm11163_vm0, %vm11164_vm1 }
 0xc4f   : > { %16456 = vmatpush3.bf16.msra.mxu1 %v17993_v5 }
 0xc50   : > { %11812 = vmatprep.subr.bf16.mxu1 %v17996_v54 }
 0xc52   : > { %16458 = vmatmul.mubr.msk.bf16.vlgmr.msra.gmra.mxu1 %vm2317_vm5, %v10648_v39  ;;  %v18038_v39 = vld [vmem:[#allocation30 + $0x3e4] ss:$16 sps:$4 sm:$0xff]  }
 0xc53   : > { %11813 = vmatpush1.bf16.msra.mxu1 %v17994_v55  ;;  %v18060_v55 = vld [vmem:[#allocation30 + $0x500] ss:$16 sps:$4 sm:$0xff]  }
 0xc54   : > { %11814 = vmatprep.subr.bf16.mxu1 %v17999_v59  ;;  %11866 = vmatpush1.bf16.msra.mxu0 %v18060_v55 }
 0xc57   : > { %11815 = vmatpush1.bf16.msra.mxu1 %v17997_v29 }
 0xc58   : > { %11816 = vmatprep.subr.bf16.mxu1 %v18002_v1  ;;  %v18068_v1 = vld [vmem:[#allocation30 + $0x4e4] ss:$16 sps:$4 sm:$0xff]  }
 0xc59   : > { %11867 = vmatprep.subr.bf16.mxu0 %v18068_v1 }
 0xc5b   : > { %11817 = vmatpush1.bf16.msra.mxu1 %v18000_v2 }
 0xc5c   : > { %11818 = vmatprep.subr.bf16.mxu1 %v18005_v62 }
 0xc5f   : > { %11819 = vmatpush1.bf16.msra.mxu1 %v18003_v4  ;;  %v18066_v4 = vld [vmem:[#allocation30 + $0x4e0] ss:$16 sps:$4 sm:$0xff]  }
 0xc60   : > { %11820 = vmatprep.subr.bf16.mxu1 %v18008_v21  ;;  %11868 = vmatpush1.bf16.msra.mxu0 %v18066_v4 }
 0xc63   : > { %11821 = vmatpush1.bf16.msra.mxu1 %v18006_v0 }
 0xc64   : > { %11822 = vmatprep.subr.bf16.mxu1 %v18011_v10 }
 0xc67   : > { %11823 = vmatpush1.bf16.msra.mxu1 %v18009_v13  ;;  %v18074_v13 = vld [vmem:[#allocation30 + $0x4c4] ss:$16 sps:$4 sm:$0xff]  }
 0xc68   : > { %11824 = vmatprep.subr.bf16.mxu1 %v18014_v14  ;;  %11869 = vmatprep.subr.bf16.mxu0 %v18074_v13 }
 0xc6b   : > { %11825 = vmatpush1.bf16.msra.mxu1 %v18012_v16 }
 0xc6c   : > { %11826 = vmatprep.subr.bf16.mxu1 %v18017_v22  ;;  %v18072_v22 = vld [vmem:[#allocation30 + $0x4c0] ss:$16 sps:$4 sm:$0xff]  }
 0xc6d   : > { %11870 = vmatpush1.bf16.msra.mxu0 %v18072_v22  ;;  %v18087_v22 = vld [vmem:[#allocation30 + $0xc0] ss:$16 sps:$4 sm:$0xff]  }
 0xc6f   : > { %11827 = vmatpush1.bf16.msra.mxu1 %v18015_v25 }
 0xc70   : > { %11828 = vmatprep.subr.bf16.mxu1 %v18020_v26 }
 0xc73   : > { %11829 = vmatpush2.bf16.msra.mxu1 %v18018_v7  ;;  %v18080_v7 = vld [vmem:[#allocation30 + $0x3ac] ss:$16 sps:$4 sm:$0xff]  }
 0xc74   : > { %11830 = vmatprep.subr.bf16.mxu1 %v18023_v3  ;;  %11898 = vmatprep.subr.bf16.mxu0 %v18080_v7 }
 0xc77   : > { %11831 = vmatpush2.bf16.msra.mxu1 %v18021_v56 }
 0xc78   : > { %11832 = vmatprep.subr.bf16.mxu1 %v18026_v57 }
 0xc7a   : > { %v10021_v28 = vpop.f32.mrf.mxu1 }
 0xc7b   : > { %11833 = vmatpush2.bf16.msra.mxu1 %v18024_v50 }
 0xc7c   : > { %v10023_v60 = vpop.f32.mrf.mxu1  ;;  %v9978_v61 = vpop.f32.mrf.mxu0  ;;  %11834 = vmatprep.subr.bf16.mxu1 %v18029_v12 }
 0xc7d   : > { %v20200_v32 = vadd.f32 %v10021_v28, %v9978_v61 }
 0xc7e   : > { %v10025_v58 = vpop.f32.mrf.mxu1  ;;  %v9980_v23 = vpop.f32.mrf.mxu0 }
 0xc7f   : > { %v20202_v18 = vadd.f32 %v10023_v60, %v9980_v23  ;;  %11835 = vmatpush2.bf16.msra.mxu1 %v18027_v36 }
 0xc80   : > { %v9982_v30 = vpop.f32.mrf.mxu0  ;;  %11836 = vmatprep.subr.bf16.mxu1 %v18032_v49  ;;  %v10027_v37 = vpop.f32.mrf.mxu1 }
 0xc81   : > { %v20204_v33 = vadd.f32 %v10025_v58, %v9982_v30 }
 0xc82   : > { %v9984_v38 = vpop.f32.mrf.mxu0 }
 0xc83   : > { %v20206_v8 = vadd.f32 %v10027_v37, %v9984_v38  ;;  %11837 = vmatpush2.bf16.msra.mxu1 %v18030_v52 }
 0xc84   : > { %11838 = vmatprep.subr.bf16.mxu1 %v18035_v9  ;;  %v10479_v24 = vpop.f32.mrf.mxu0 }
 0xc86   : > { %v10481_v35 = vpop.f32.mrf.mxu0 }
 0xc87   : > { %11839 = vmatpush2.bf16.msra.mxu1 %v18033_v17 }
 0xc88   : > { %11840 = vmatprep.subr.bf16.mxu1 %v18038_v39  ;;  %v10483_v5 = vpop.f32.mrf.mxu0 }
 0xc8a   : > { %v10485_v2 = vpop.f32.mrf.mxu0 }
 0xc8b   : > { %11841 = vmatpush2.bf16.msra.mxu1 %v18036_v40  ;;  %v20214_v40 = vld [vmem:[#allocation28] sm:$0x7] }
 0xc8c   : > { %11842 = vmatprep.subr.bf16.mxu1 %v18041_v20  ;;  %v11121_v44 = vrot.slane %v20214_v40, %v19639_v43 }
 0xc8f   : > { %11843 = vmatpush2.bf16.msra.mxu1 %v18039_v41 }
 0xc90   : > { %11945 = vmatprep.subr.bf16.mxu1 %v18047_v47 }
 0xc9a   : > { %v16248_v34 = vpop.f32.mrf.mxu1 }
 0xc9c   : > { %v16249_v46 = vpop.f32.mrf.mxu1 }
 0xc9d   : > { %v16250_v31 = vadd.f32 %v16249_v46, %v16248_v34 }
 0xc9e   : > { %v16251_v54 = vpop.f32.mrf.mxu1 }
 0xca0   : > { %v16252_v59 = vpop.f32.mrf.mxu1 }
 0xca1   : > { %v16253_v29 = vadd.f32 %v16252_v59, %v16251_v54  ;;  %v11125_v54 = vrot.slane %v20214_v40, %v19642_v45 }
 0xca2   : > { %v10105_v62 = vpop.f32.mrf.mxu1 }
 0xca3   : > { %v10106_v21 = vadd.f32 %v16250_v31, %v10105_v62 }
 0xca4   : > { %v16443_v0 = vpop.f32.mrf.mxu1  ;;  %v16273_v10 = vpop.f32.mrf.mxu0 }
 0xca6   : > { %v10108_v14 = vpop.f32.mrf.mxu1  ;;  %v16274_v16 = vpop.f32.mrf.mxu0 }
 0xca7   : > { %v10109_v25 = vadd.f32 %v16253_v29, %v10108_v14  ;;  %v16275_v26 = vadd.f32 %v16274_v16, %v16273_v10 }
 0xca8   : > { %v16444_v3 = vpop.f32.mrf.mxu1  ;;  %v16276_v56 = vpop.f32.mrf.mxu0 }
 0xca9   : > { %v10523_v57 = vadd.f32 %v16275_v26, %v10106_v21 }
 0xcaa   : > { %v16277_v50 = vpop.f32.mrf.mxu0 }
 0xcab   : > { %v16278_v12 = vadd.f32 %v16277_v50, %v16276_v56 }
 0xcac   : > { %v10563_v28 = vpop.f32.mrf.mxu0 }
 0xcad   : > { %v20208_v36 = vadd.f32 %v10563_v28, %v10523_v57  ;;  %v10526_v60 = vadd.f32 %v16278_v12, %v10109_v25 }
 0xcae   : > { %v16451_v61 = vpop.f32.mrf.mxu0 }
 0xcb0   : > { %v10566_v49 = vpop.f32.mrf.mxu0 }
 0xcb1   : > { %v20210_v58 = vadd.f32 %v10566_v49, %v10526_v60 }
 0xcb2   : > { %v16452_v23 = vpop.f32.mrf.mxu0 }
 0xcb3   : > { %v18045_v23 = vld [vmem:[#allocation30 + $0x568] ss:$16 sps:$4 sm:$0xff]  }
 0xce2   : > { %v10436_v52 = vpop.f32.mrf.mxu1 }
 0xce3   : > { %v10437_v38 = vadd.f32 %v10436_v52, %v20200_v32 }
 0xce4   : > { %v10438_v30 = vpop.f32.mrf.mxu1 }
 0xce5   : > { %v10439_v39 = vadd.f32 %v10438_v30, %v20202_v18  ;;  %v10480_v42 = vadd.f32 %v10479_v24, %v10437_v38  ;;  %v18053_v30 = vld [vmem:[#allocation30 + $0x54c] ss:$16 sps:$4 sm:$0xff]  }
 0xce6   : > { %v10440_v9 = vpop.f32.mrf.mxu1  ;;  %v18059_v38 = vld [vmem:[#allocation30 + $0x52c] ss:$16 sps:$4 sm:$0xff]  }
 0xce7   : > { %v10441_v47 = vadd.f32 %v10440_v9, %v20204_v33  ;;  %v10482_v34 = vadd.f32 %v10481_v35, %v10439_v39  ;;  %v18051_v9 = vld [vmem:[#allocation30 + $0x548] ss:$16 sps:$4 sm:$0xff]  }
 0xce8   : > { %v10442_v37 = vpop.f32.mrf.mxu1  ;;  %v18057_v39 = vld [vmem:[#allocation30 + $0x528] ss:$16 sps:$4 sm:$0xff]  }
 0xce9   : > { %v10443_v48 = vadd.f32 %v10442_v37, %v20206_v8  ;;  %v10484_v18 = vadd.f32 %v10483_v5, %v10441_v47 }
 0xcea   : > { %v11019_v17 = vpop.f32.mrf.mxu1 }
 0xceb   : > { %v10486_v59 = vadd.f32 %v10485_v2, %v10443_v48 }
 0xcec   : > { %v11021_v20 = vpop.f32.mrf.mxu1  ;;  %v10976_v41 = vpop.f32.mrf.mxu0 }
 0xced   : > { %v11020_v27 = vadd.f32 %v11019_v17, %v10976_v41  ;;  %v18065_v41 = vld [vmem:[#allocation30 + $0x50c] ss:$16 sps:$4 sm:$0xff]  }
 0xcee   : > { %v11023_v63 = vpop.f32.mrf.mxu1  ;;  %v10978_v51 = vpop.f32.mrf.mxu0 }
 0xcef   : > { %v11110_v32 = vadd.f32 %v11020_v27, %v10480_v42  ;;  %v11022_v46 = vadd.f32 %v11021_v20, %v10978_v51  ;;  %v18063_v27 = vld [vmem:[#allocation30 + $0x508] ss:$16 sps:$4 sm:$0xff]  }
 0xcf0   : > { %v10980_v31 = vpop.f32.mrf.mxu0  ;;  %v11025_v55 = vpop.f32.mrf.mxu1 }
 0xcf1   : > { %v11111_v53 = vadd.f32 %v11022_v46, %v10482_v34  ;;  %v11024_v24 = vadd.f32 %v11023_v63, %v10980_v31  ;;  %v11133_v29 = vadd.f32 %v11121_v44, %v11110_v32  ;;  %v18071_v63 = vld [vmem:[#allocation30 + $0x4ec] ss:$16 sps:$4 sm:$0xff]   ;;  %v11129_v46 = vrot.slane %v20214_v40, %v19630_v11  ;;  %v18069_v31 = vld [vmem:[#allocation30 + $0x4e8] ss:$16 sps:$4 sm:$0xff]  }
 0xcf2   : > { %v10982_v33 = vpop.f32.mrf.mxu0 }
 0xcf3   : > { %v11113_v1 = vadd.f32 %v11024_v24, %v10484_v18  ;;  %v11026_v62 = vadd.f32 %v11025_v55, %v10982_v33  ;;  %v11134_v4 = vadd.f32 %v11125_v54, %v11111_v53  ;;  %v11139_v0 = vmax.f32 %v11133_v29, 0.0  ;;  %v18077_v53 = vld [vmem:[#allocation30 + $0x4cc] ss:$16 sps:$4 sm:$0xff]   ;;  %v18083_v29 = vld [vmem:[#allocation30 + $0xe4] ss:$16 sps:$4 sm:$0xff]  }
 0xcf5   : > { %v11136_v21 = vadd.f32 %v11121_v44, %v11113_v1  ;;  %v11114_v35 = vadd.f32 %v11026_v62, %v10486_v59  ;;  %v11140_v5 = vmax.f32 %v11134_v4, 0.0  ;;  %v18075_v59 = vld [vmem:[#allocation30 + $0x4c8] ss:$16 sps:$4 sm:$0xff]  }
 0xcf7   : > { %v11142_v8 = vmax.f32 %v11136_v21, 0.0  ;;  %v11137_v10 = vadd.f32 %v11125_v54, %v11114_v35 }
 0xcf9   : > { %v11145_v13 = vpack.c.bf16 %v11142_v8, %v11139_v0  ;;  %v11143_v14 = vmax.f32 %v11137_v10, 0.0  ;;  %v18078_v10 = vld [vmem:[#allocation30 + $0x3a8] ss:$16 sps:$4 sm:$0xff]  }
 0xcfb   : > { %v11151_v16 = vrot.slane %v11145_v13, 7  ;;  %v11146_v2 = vpack.c.bf16 %v11143_v14, %v11140_v5  ;;  %v18081_v5 = vld [vmem:[#allocation30 + $0xe0] ss:$16 sps:$4 sm:$0xff]   ;;  %v18086_v14 = vld [vmem:[#allocation30 + $0x38c] ss:$16 sps:$4 sm:$0xff]  }
 0xcfd   : > { %v11155_v25 = vsel %vm8269_vm9, 0, %v11151_v16  ;;  %v11152_v26 = vrot.slane %v11146_v2, 7  ;;  %v18089_v16 = vld [vmem:[#allocation30 + $0xc4] ss:$16 sps:$4 sm:$0xff]   ;;  %v18084_v2 = vld [vmem:[#allocation30 + $0x388] ss:$16 sps:$4 sm:$0xff]  }
 0xcfe   : > { %v20230_v7 = vsel %vm20223_vm4, %v11155_v25, 0  ;;  %v18092_v25 = vld [vmem:[#allocation30 + $0x36c] ss:$16 sps:$4 sm:$0xff]  }
 0xcff   : > { %v11158_v3 = vsel %vm8269_vm9, 0, %v11152_v26  ;;  %v11349_v56 = vshll.u32 %v20230_v7, 16  ;;  %v11347_v61 = vshrl.u32 %v20230_v7, 16  ;;  %v18095_v26 = vld [vmem:[#allocation30 + $0xa4] ss:$16 sps:$4 sm:$0xff]  }
 0xd00   : > { %v20236_v57 = vsel %vm20223_vm4, %v11158_v3, 0  ;;  %v18090_v3 = vld [vmem:[#allocation30 + $0x368] ss:$16 sps:$4 sm:$0xff]  }
 0xd01   : > { %v11356_v50 = vshll.u32 %v20236_v57, 16  ;;  %v11351_v12 = vrot.slane %v11349_v56, 1  ;;  %v11354_v28 = vshrl.u32 %v20236_v57, 16  ;;  %v18093_v56 = vld [vmem:[#allocation30 + $0xa0] ss:$16 sps:$4 sm:$0xff]  }
 0xd03   : > { %v11358_v60 = vrot.slane %v11356_v50, 1  ;;  %v20243_v52 = vor.u32 %v11351_v12, %v11347_v61  ;;  %v18098_v50 = vld [vmem:[#allocation30 + $0x34c] ss:$16 sps:$4 sm:$0xff]   ;;  %v18101_v12 = vld [vmem:[#allocation30 + $0x84] ss:$16 sps:$4 sm:$0xff]  }
 0xd04   : > { %v18104_v61 = vld [vmem:[#allocation30 + $0x32c] ss:$16 sps:$4 sm:$0xff]  }
 0xd05   : > { %v20241_v49 = vor.u32 %v11358_v60, %v11354_v28  ;;  %v18096_v28 = vld [vmem:[#allocation30 + $0x348] ss:$16 sps:$4 sm:$0xff]   ;;  %v18099_v60 = vld [vmem:[#allocation30 + $0x80] ss:$16 sps:$4 sm:$0xff]  }
 0xd07   : > { %11844 = vmatprep.mubr.bf16.mxu1 %v20241_v49 }
 0xd08   : > { %11845 = vmatmul.mubr.bf16.vlgmr.msra.gmra.mxu1 %v20243_v52 }
 0xd09   : > { %11946 = vmatpush1.bf16.msra.mxu1 %v18045_v23  ;;  %11973 = vmatprep.mubr.bf16.mxu1 %v19133_v19  ;;  %v18102_v23 = vld [vmem:[#allocation30 + $0x328] ss:$16 sps:$4 sm:$0xff]  }
 0xd0a   : > { %v16298_v37 = vpop.f32.mrf.mxu1  ;;  %11947 = vmatprep.subr.bf16.mxu1 %v18053_v30  ;;  %v18105_v30 = vld [vmem:[#allocation30 + $0x60] ss:$16 sps:$4 sm:$0xff]  }
 0xd0c   : > { %v16299_v17 = vpop.f32.mrf.mxu1 }
 0xd0d   : > { %11948 = vmatpush1.bf16.msra.mxu1 %v18051_v9  ;;  %v16300_v47 = vadd.f32 %v16299_v17, %v16298_v37  ;;  %v18110_v9 = vld [vmem:[#allocation30 + $0x30c] ss:$16 sps:$4 sm:$0xff]   ;;  %v18113_v37 = vld [vmem:[#allocation30 + $0x44] ss:$16 sps:$4 sm:$0xff]   ;;  %v18111_v17 = vld [vmem:[#allocation30 + $0x40] ss:$16 sps:$4 sm:$0xff]  }
 0xd0e   : > { %v16301_v20 = vpop.f32.mrf.mxu1  ;;  %11949 = vmatprep.subr.bf16.mxu1 %v18059_v38  ;;  %v18108_v38 = vld [vmem:[#allocation30 + $0x308] ss:$16 sps:$4 sm:$0xff]  }
 0xd10   : > { %v16302_v42 = vpop.f32.mrf.mxu1 }
 0xd11   : > { %11950 = vmatpush1.bf16.msra.mxu1 %v18057_v39  ;;  %v16303_v48 = vadd.f32 %v16302_v42, %v16301_v20  ;;  %v18116_v39 = vld [vmem:[#allocation30 + $0x2ec] ss:$16 sps:$4 sm:$0xff]   ;;  %v18119_v20 = vld [vmem:[#allocation30 + $0x24] ss:$16 sps:$4 sm:$0xff]   ;;  %v18117_v42 = vld [vmem:[#allocation30 + $0x20] ss:$16 sps:$4 sm:$0xff]  }
 0xd12   : > { %v11103_v44 = vpop.f32.mrf.mxu1  ;;  %11951 = vmatprep.subr.bf16.mxu1 %v18065_v41  ;;  %v18114_v41 = vld [vmem:[#allocation30 + $0x2e8] ss:$16 sps:$4 sm:$0xff]  }
 0xd13   : > { %v11104_v51 = vadd.f32 %v16300_v47, %v11103_v44  ;;  %v18122_v47 = vld [vmem:[#allocation30 + $0x2cc] ss:$16 sps:$4 sm:$0xff]   ;;  %v18120_v44 = vld [vmem:[#allocation30 + $0x2c8] ss:$16 sps:$4 sm:$0xff]  }
 0xd14   : > { %v16459_v34 = vpop.f32.mrf.mxu1 }
 0xd15   : > { %v11112_v32 = vadd.f32 %v11104_v51, %v20208_v36  ;;  %11952 = vmatpush1.bf16.msra.mxu1 %v18063_v27  ;;  %v18125_v27 = vld [vmem:[#allocation30 + $0x4] ss:$16 sps:$4 sm:$0xff]   ;;  %v18128_v51 = vld [vmem:[#allocation30 + $0x4ac] ss:$16 sps:$4 sm:$0xff]  }
 0xd16   : > { %v11106_v18 = vpop.f32.mrf.mxu1  ;;  %11953 = vmatprep.subr.bf16.mxu1 %v18071_v63  ;;  %v18123_v63 = vld [vmem:[#allocation30] ss:$16 sps:$4 sm:$0xff]   ;;  %v18131_v34 = vld [vmem:[#allocation30 + $0x1e4] ss:$16 sps:$4 sm:$0xff]  }
 0xd17   : > { %v11107_v54 = vadd.f32 %v16303_v48, %v11106_v18  ;;  %v11135_v55 = vadd.f32 %v11129_v46, %v11112_v32  ;;  %v18126_v48 = vld [vmem:[#allocation30 + $0x4a8] ss:$16 sps:$4 sm:$0xff]   ;;  %v18129_v32 = vld [vmem:[#allocation30 + $0x1e0] ss:$16 sps:$4 sm:$0xff]  }
 0xd18   : > { %v16460_v24 = vpop.f32.mrf.mxu1  ;;  %v18132_v18 = vld [vmem:[#allocation30 + $0x488] ss:$16 sps:$4 sm:$0xff]  }
 0xd19   : > { %v11115_v33 = vadd.f32 %v11107_v54, %v20210_v58  ;;  %11954 = vmatpush1.bf16.msra.mxu1 %v18069_v31  ;;  %v11141_v62 = vmax.f32 %v11135_v55, 0.0  ;;  %v18137_v31 = vld [vmem:[#allocation30 + $0x1c4] ss:$16 sps:$4 sm:$0xff]   ;;  %v18140_v54 = vld [vmem:[#allocation30 + $0x46c] ss:$16 sps:$4 sm:$0xff]  }
 0xd1a   : > { %11955 = vmatprep.subr.bf16.mxu1 %v18077_v53  ;;  %v18135_v53 = vld [vmem:[#allocation30 + $0x1c0] ss:$16 sps:$4 sm:$0xff]   ;;  %v18143_v24 = vld [vmem:[#allocation30 + $0x1a4] ss:$16 sps:$4 sm:$0xff]   ;;  %v18138_v55 = vld [vmem:[#allocation30 + $0x468] ss:$16 sps:$4 sm:$0xff]  }
 0xd1b   : > { %v11138_v1 = vadd.f32 %v11129_v46, %v11115_v33  ;;  %v18134_v46 = vld [vmem:[#allocation30 + $0x48c] ss:$16 sps:$4 sm:$0xff]   ;;  %v18141_v33 = vld [vmem:[#allocation30 + $0x1a0] ss:$16 sps:$4 sm:$0xff]  }
 0xd1d   : > { %v11144_v36 = vmax.f32 %v11138_v1, 0.0  ;;  %11956 = vmatpush1.bf16.msra.mxu1 %v18075_v59  ;;  %v18146_v59 = vld [vmem:[#allocation30 + $0x44c] ss:$16 sps:$4 sm:$0xff]   ;;  %v18144_v1 = vld [vmem:[#allocation30 + $0x448] ss:$16 sps:$4 sm:$0xff]  }
 0xd1e   : > { %12426 = vmatprep.subr.bf16.mxu1 %v18083_v29  ;;  %v18149_v29 = vld [vmem:[#allocation30 + $0x184] ss:$16 sps:$4 sm:$0xff]  }
 0xd1f   : > { %v11147_v40 = vpack.c.bf16 %v11144_v36, %v11141_v62  ;;  %v18147_v62 = vld [vmem:[#allocation30 + $0x180] ss:$16 sps:$4 sm:$0xff]   ;;  %v18152_v36 = vld [vmem:[#allocation30 + $0x42c] ss:$16 sps:$4 sm:$0xff]  }
 0xd21   : > { %v11153_v4 = vrot.slane %v11147_v40, 7  ;;  %v18155_v40 = vld [vmem:[#allocation30 + $0x164] ss:$16 sps:$4 sm:$0xff]  }
 0xd23   : > { %v11161_v21 = vsel %vm8269_vm9, 0, %v11153_v4  ;;  %v18150_v4 = vld [vmem:[#allocation30 + $0x428] ss:$16 sps:$4 sm:$0xff]  }
 0xd24   : > { %v20255_v35 = vsel %vm20223_vm4, %v11161_v21, 0  ;;  %v18153_v21 = vld [vmem:[#allocation30 + $0x160] ss:$16 sps:$4 sm:$0xff]  }
 0xd25   : > { %v11363_v0 = vshll.u32 %v20255_v35, 16  ;;  %v11361_v58 = vshrl.u32 %v20255_v35, 16 }
 0xd27   : > { %v11365_v8 = vrot.slane %v11363_v0, 1  ;;  %v18158_v0 = vld [vmem:[#allocation30 + $0x40c] ss:$16 sps:$4 sm:$0xff]  }
 0xd29   : > { %v11366_v13 = vor.u32 %v11365_v8, %v11361_v58  ;;  %v18161_v58 = vld [vmem:[#allocation30 + $0x144] ss:$16 sps:$4 sm:$0xff]   ;;  %v18156_v8 = vld [vmem:[#allocation30 + $0x408] ss:$16 sps:$4 sm:$0xff]  }
 0xd2b   : > { %15801 = vmatmul.mubr.msk.bf16.vlgmr.msra.gmra.mxu0 %vm4368_vm6, %v11366_v13  ;;  %15802 = vmatmul.mubr.msk.bf16.vlgmr.msra.gmra.mxu1 %vm4368_vm6, %v11366_v13  ;;  %v18167_v13 = vld [vmem:[#allocation30 + $0x124] ss:$16 sps:$4 sm:$0xff]  }
 0xd2c   : > { %11899 = vmatpush1.bf16.msra.mxu0 %v18078_v10  ;;  %12427 = vmatpush1.bf16.msra.mxu1 %v18081_v5  ;;  %v18159_v10 = vld [vmem:[#allocation30 + $0x140] ss:$16 sps:$4 sm:$0xff]   ;;  %v18164_v5 = vld [vmem:[#allocation30 + $0x3ec] ss:$16 sps:$4 sm:$0xff]  }
 0xd2d   : > { %11930 = vmatprep.mubr.bf16.mxu0 %v20241_v49  ;;  %12458 = vmatprep.mubr.bf16.mxu1 %v20236_v57  ;;  %v18107_v49 = vld [vmem:[#allocation30 + $0x64] ss:$16 sps:$4 sm:$0xff]  }
 0xd2e   : > { %11900 = vmatprep.subr.bf16.mxu0 %v18086_v14  ;;  %12428 = vmatprep.subr.bf16.mxu1 %v18089_v16  ;;  %v18162_v14 = vld [vmem:[#allocation30 + $0x3e8] ss:$16 sps:$4 sm:$0xff]   ;;  %v18165_v16 = vld [vmem:[#allocation30 + $0x120] ss:$16 sps:$4 sm:$0xff]  }
 0xd30   : > { %11901 = vmatpush1.bf16.msra.mxu0 %v18084_v2  ;;  %12429 = vmatpush1.bf16.msra.mxu1 %v18087_v22  ;;  %v18170_v2 = vld [vmem:[#allocation30 + $0x3cc] ss:$16 sps:$4 sm:$0xff]   ;;  %v18173_v22 = vld [vmem:[#allocation30 + $0x104] ss:$16 sps:$4 sm:$0xff]  }
 0xd31   : > { %11902 = vmatprep.subr.bf16.mxu0 %v18092_v25  ;;  %12430 = vmatprep.subr.bf16.mxu1 %v18095_v26  ;;  %v18168_v25 = vld [vmem:[#allocation30 + $0x3c8] ss:$16 sps:$4 sm:$0xff]   ;;  %v18171_v26 = vld [vmem:[#allocation30 + $0x100] ss:$16 sps:$4 sm:$0xff]  }
 0xd34   : > { %11903 = vmatpush1.bf16.msra.mxu0 %v18090_v3  ;;  %12431 = vmatpush1.bf16.msra.mxu1 %v18093_v56  ;;  %v18176_v3 = vld [vmem:[#allocation30 + $0x2a4] ss:$16 sps:$4 sm:$0xff]   ;;  %v18179_v56 = vld [vmem:[#allocation30 + $0x2ac] ss:$16 sps:$4 sm:$0xff]  }
 0xd35   : > { %11904 = vmatprep.subr.bf16.mxu0 %v18098_v50  ;;  %12432 = vmatprep.subr.bf16.mxu1 %v18101_v12  ;;  %v18174_v50 = vld [vmem:[#allocation30 + $0x2a0] ss:$16 sps:$4 sm:$0xff]   ;;  %v18177_v12 = vld [vmem:[#allocation30 + $0x2a8] ss:$16 sps:$4 sm:$0xff]  }
 0xd38   : > { %11905 = vmatpush1.bf16.msra.mxu0 %v18096_v28  ;;  %12433 = vmatpush1.bf16.msra.mxu1 %v18099_v60  ;;  %v18182_v28 = vld [vmem:[#allocation30 + $0x284] ss:$16 sps:$4 sm:$0xff]   ;;  %v18185_v60 = vld [vmem:[#allocation30 + $0x28c] ss:$16 sps:$4 sm:$0xff]  }
 0xd39   : > { %11906 = vmatprep.subr.bf16.mxu0 %v18104_v61  ;;  %12434 = vmatprep.subr.bf16.mxu1 %v18107_v49  ;;  %v18180_v61 = vld [vmem:[#allocation30 + $0x280] ss:$16 sps:$4 sm:$0xff]   ;;  %v18183_v49 = vld [vmem:[#allocation30 + $0x288] ss:$16 sps:$4 sm:$0xff]  }
 0xd3c   : > { %11907 = vmatpush1.bf16.msra.mxu0 %v18102_v23  ;;  %12435 = vmatpush1.bf16.msra.mxu1 %v18105_v30  ;;  %v18188_v23 = vld [vmem:[#allocation30 + $0x264] ss:$16 sps:$4 sm:$0xff]   ;;  %v18191_v30 = vld [vmem:[#allocation30 + $0x26c] ss:$16 sps:$4 sm:$0xff]  }
 0xd3d   : > { %11908 = vmatprep.subr.bf16.mxu0 %v18110_v9  ;;  %12436 = vmatprep.subr.bf16.mxu1 %v18113_v37  ;;  %v18186_v9 = vld [vmem:[#allocation30 + $0x260] ss:$16 sps:$4 sm:$0xff]   ;;  %v18189_v37 = vld [vmem:[#allocation30 + $0x268] ss:$16 sps:$4 sm:$0xff]  }
 0xd40   : > { %11909 = vmatpush1.bf16.msra.mxu0 %v18108_v38  ;;  %12437 = vmatpush1.bf16.msra.mxu1 %v18111_v17  ;;  %v18197_v38 = vld [vmem:[#allocation30 + $0x24c] ss:$16 sps:$4 sm:$0xff]   ;;  %v18192_v17 = vld [vmem:[#allocation30 + $0x240] ss:$16 sps:$4 sm:$0xff]  }
 0xd41   : > { %11910 = vmatprep.subr.bf16.mxu0 %v18116_v39  ;;  %12438 = vmatprep.subr.bf16.mxu1 %v18119_v20  ;;  %v18195_v39 = vld [vmem:[#allocation30 + $0x248] ss:$16 sps:$4 sm:$0xff]   ;;  %v18200_v20 = vld [vmem:[#allocation30 + $0x224] ss:$16 sps:$4 sm:$0xff]  }
 0xd44   : > { %11911 = vmatpush1.bf16.msra.mxu0 %v18114_v41  ;;  %12439 = vmatpush1.bf16.msra.mxu1 %v18117_v42  ;;  %v18203_v41 = vld [vmem:[#allocation30 + $0x22c] ss:$16 sps:$4 sm:$0xff]   ;;  %v18198_v42 = vld [vmem:[#allocation30 + $0x220] ss:$16 sps:$4 sm:$0xff]  }
 0xd45   : > { %11912 = vmatprep.subr.bf16.mxu0 %v18122_v47  ;;  %12440 = vmatprep.subr.bf16.mxu1 %v18125_v27  ;;  %v18201_v47 = vld [vmem:[#allocation30 + $0x228] ss:$16 sps:$4 sm:$0xff]   ;;  %v18206_v27 = vld [vmem:[#allocation30 + $0x204] ss:$16 sps:$4 sm:$0xff]  }
 0xd48   : > { %11913 = vmatpush1.bf16.msra.mxu0 %v18120_v44  ;;  %12441 = vmatpush1.bf16.msra.mxu1 %v18123_v63  ;;  %v18209_v44 = vld [vmem:[#allocation30 + $0x20c] ss:$16 sps:$4 sm:$0xff]   ;;  %v18204_v63 = vld [vmem:[#allocation30 + $0x200] ss:$16 sps:$4 sm:$0xff]  }
 0xd49   : > { %11914 = vmatprep.subr.bf16.mxu0 %v18128_v51  ;;  %12442 = vmatprep.subr.bf16.mxu1 %v18131_v34  ;;  %v18207_v51 = vld [vmem:[#allocation30 + $0x208] ss:$16 sps:$4 sm:$0xff]   ;;  %v18212_v34 = vld [vmem:[#allocation30 + $0xec] ss:$16 sps:$4 sm:$0xff]  }
 0xd4c   : > { %11915 = vmatpush2.bf16.msra.mxu0 %v18126_v48  ;;  %12443 = vmatpush2.bf16.msra.mxu1 %v18129_v32  ;;  %v18215_v48 = vld [vmem:[#allocation30 + $0x664] ss:$16 sps:$4 sm:$0xff]   ;;  %v18210_v32 = vld [vmem:[#allocation30 + $0xe8] ss:$16 sps:$4 sm:$0xff]  }
 0xd4d   : > { %11916 = vmatprep.subr.bf16.mxu0 %v18134_v46  ;;  %12444 = vmatprep.subr.bf16.mxu1 %v18137_v31  ;;  %v18213_v46 = vld [vmem:[#allocation30 + $0x660] ss:$16 sps:$4 sm:$0xff]   ;;  %v18218_v31 = vld [vmem:[#allocation30 + $0xcc] ss:$16 sps:$4 sm:$0xff]  }
 0xd50   : > { %11917 = vmatpush2.bf16.msra.mxu0 %v18132_v18  ;;  %12445 = vmatpush2.bf16.msra.mxu1 %v18135_v53  ;;  %v18221_v18 = vld [vmem:[#allocation30 + $0x644] ss:$16 sps:$4 sm:$0xff]   ;;  %v12691_v53 = vrot.slane %v20236_v57, 1 }
 0xd51   : > { %11918 = vmatprep.subr.bf16.mxu0 %v18140_v54  ;;  %12446 = vmatprep.subr.bf16.mxu1 %v18143_v24  ;;  %v18216_v54 = vld [vmem:[#allocation30 + $0xc8] ss:$16 sps:$4 sm:$0xff]   ;;  %v18219_v24 = vld [vmem:[#allocation30 + $0x640] ss:$16 sps:$4 sm:$0xff]  }
 0xd54   : > { %11919 = vmatpush2.bf16.msra.mxu0 %v18138_v55  ;;  %12447 = vmatpush2.bf16.msra.mxu1 %v18141_v33  ;;  %v18224_v55 = vld [vmem:[#allocation30 + $0xac] ss:$16 sps:$4 sm:$0xff]   ;;  %v18227_v33 = vld [vmem:[#allocation30 + $0x624] ss:$16 sps:$4 sm:$0xff]  }
 0xd55   : > { %11920 = vmatprep.subr.bf16.mxu0 %v18146_v59  ;;  %12448 = vmatprep.subr.bf16.mxu1 %v18149_v29  ;;  %v18222_v59 = vld [vmem:[#allocation30 + $0xa8] ss:$16 sps:$4 sm:$0xff]   ;;  %v18225_v29 = vld [vmem:[#allocation30 + $0x620] ss:$16 sps:$4 sm:$0xff]  }
 0xd58   : > { %11921 = vmatpush2.bf16.msra.mxu0 %v18144_v1  ;;  %12449 = vmatpush2.bf16.msra.mxu1 %v18147_v62  ;;  %v18230_v1 = vld [vmem:[#allocation30 + $0x8c] ss:$16 sps:$4 sm:$0xff]   ;;  %v18233_v62 = vld [vmem:[#allocation30 + $0x604] ss:$16 sps:$4 sm:$0xff]  }
 0xd59   : > { %11922 = vmatprep.subr.bf16.mxu0 %v18152_v36  ;;  %12450 = vmatprep.subr.bf16.mxu1 %v18155_v40  ;;  %v18228_v36 = vld [vmem:[#allocation30 + $0x88] ss:$16 sps:$4 sm:$0xff]   ;;  %v18231_v40 = vld [vmem:[#allocation30 + $0x600] ss:$16 sps:$4 sm:$0xff]  }
 0xd5c   : > { %11923 = vmatpush2.bf16.msra.mxu0 %v18150_v4  ;;  %12451 = vmatpush2.bf16.msra.mxu1 %v18153_v21  ;;  %v18236_v4 = vld [vmem:[#allocation30 + $0x6c] ss:$16 sps:$4 sm:$0xff]   ;;  %v18239_v21 = vld [vmem:[#allocation30 + $0x5e4] ss:$16 sps:$4 sm:$0xff]  }
 0xd5d   : > { %11924 = vmatprep.subr.bf16.mxu0 %v18158_v0  ;;  %12452 = vmatprep.subr.bf16.mxu1 %v18161_v58  ;;  %v18234_v0 = vld [vmem:[#allocation30 + $0x68] ss:$16 sps:$4 sm:$0xff]   ;;  %v18237_v58 = vld [vmem:[#allocation30 + $0x5e0] ss:$16 sps:$4 sm:$0xff]  }
 0xd60   : > { %11925 = vmatpush2.bf16.msra.mxu0 %v18156_v8  ;;  %12453 = vmatpush2.bf16.msra.mxu1 %v18159_v10  ;;  %v18242_v8 = vld [vmem:[#allocation30 + $0x4c] ss:$16 sps:$4 sm:$0xff]   ;;  %v18245_v10 = vld [vmem:[#allocation30 + $0x5c4] ss:$16 sps:$4 sm:$0xff]  }
 0xd61   : > { %11926 = vmatprep.subr.bf16.mxu0 %v18164_v5  ;;  %12454 = vmatprep.subr.bf16.mxu1 %v18167_v13  ;;  %v18240_v5 = vld [vmem:[#allocation30 + $0x48] ss:$16 sps:$4 sm:$0xff]   ;;  %v18243_v13 = vld [vmem:[#allocation30 + $0x5c0] ss:$16 sps:$4 sm:$0xff]  }
 0xd64   : > { %11927 = vmatpush2.bf16.msra.mxu0 %v18162_v14  ;;  %12455 = vmatpush2.bf16.msra.mxu1 %v18165_v16  ;;  %v18248_v14 = vld [vmem:[#allocation30 + $0x2c] ss:$16 sps:$4 sm:$0xff]   ;;  %v18251_v16 = vld [vmem:[#allocation30 + $0x5a4] ss:$16 sps:$4 sm:$0xff]  }
 0xd65   : > { %11928 = vmatprep.subr.bf16.mxu0 %v18170_v2  ;;  %12456 = vmatprep.subr.bf16.mxu1 %v18173_v22  ;;  %v18246_v2 = vld [vmem:[#allocation30 + $0x28] ss:$16 sps:$4 sm:$0xff]   ;;  %v18249_v22 = vld [vmem:[#allocation30 + $0x5a0] ss:$16 sps:$4 sm:$0xff]  }
 0xd68   : > { %11929 = vmatpush2.bf16.msra.mxu0 %v18168_v25  ;;  %12457 = vmatpush2.bf16.msra.mxu1 %v18171_v26  ;;  %v18254_v25 = vld [vmem:[#allocation30 + $0xc] ss:$16 sps:$4 sm:$0xff]   ;;  %v18257_v26 = vld [vmem:[#allocation30 + $0x584] ss:$16 sps:$4 sm:$0xff]  }
 0xd69   : > { %12473 = vmatprep.subr.bf16.mxu0 %v18176_v3  ;;  %12559 = vmatprep.subr.bf16.mxu1 %v18179_v56  ;;  %v18252_v3 = vld [vmem:[#allocation30 + $0x8] ss:$16 sps:$4 sm:$0xff]   ;;  %v18255_v56 = vld [vmem:[#allocation30 + $0x580] ss:$16 sps:$4 sm:$0xff]  }
 0xd6b   : > { %11931 = vmatmul.mubr.bf16.vlgmr.msra.gmra.mxu0 %v20243_v52  ;;  %12459 = vmatmul.mubr.bf16.vlgmr.msra.gmra.mxu1 %v20230_v7  ;;  %v18194_v52 = vld [vmem:[#allocation30 + $0x244] ss:$16 sps:$4 sm:$0xff]  }
 0xd6c   : > { %12474 = vmatpush1.bf16.msra.mxu0 %v18174_v50  ;;  %12560 = vmatpush1.bf16.msra.mxu1 %v18177_v12  ;;  %v18260_v50 = vld [vmem:[#allocation30 + $0x1ec] ss:$16 sps:$4 sm:$0xff]   ;;  %v18263_v12 = vld [vmem:[#allocation30 + $0x764] ss:$16 sps:$4 sm:$0xff]  }
 0xd6d   : > { %12475 = vmatprep.subr.bf16.mxu0 %v18182_v28  ;;  %12561 = vmatprep.subr.bf16.mxu1 %v18185_v60  ;;  %v18258_v28 = vld [vmem:[#allocation30 + $0x1e8] ss:$16 sps:$4 sm:$0xff]   ;;  %v18261_v60 = vld [vmem:[#allocation30 + $0x760] ss:$16 sps:$4 sm:$0xff]  }
 0xd6e   : > { %12501 = vmatprep.mubr.bf16.mxu0 %v19133_v19  ;;  %12587 = vmatprep.mubr.bf16.mxu1 %v19133_v19 }
 0xd70   : > { %12476 = vmatpush1.bf16.msra.mxu0 %v18180_v61  ;;  %12562 = vmatpush1.bf16.msra.mxu1 %v18183_v49  ;;  %v18266_v61 = vld [vmem:[#allocation30 + $0x1cc] ss:$16 sps:$4 sm:$0xff]   ;;  %v18269_v49 = vld [vmem:[#allocation30 + $0x744] ss:$16 sps:$4 sm:$0xff]  }
 0xd71   : > { %12477 = vmatprep.subr.bf16.mxu0 %v18188_v23  ;;  %12563 = vmatprep.subr.bf16.mxu1 %v18191_v30  ;;  %v18264_v23 = vld [vmem:[#allocation30 + $0x1c8] ss:$16 sps:$4 sm:$0xff]   ;;  %v18267_v30 = vld [vmem:[#allocation30 + $0x740] ss:$16 sps:$4 sm:$0xff]  }
 0xd74   : > { %12478 = vmatpush1.bf16.msra.mxu0 %v18186_v9  ;;  %12564 = vmatpush1.bf16.msra.mxu1 %v18189_v37  ;;  %v18272_v9 = vld [vmem:[#allocation30 + $0x1ac] ss:$16 sps:$4 sm:$0xff]   ;;  %v18275_v37 = vld [vmem:[#allocation30 + $0x724] ss:$16 sps:$4 sm:$0xff]  }
 0xd75   : > { %12479 = vmatprep.subr.bf16.mxu0 %v18194_v52  ;;  %12565 = vmatprep.subr.bf16.mxu1 %v18197_v38  ;;  %v18270_v52 = vld [vmem:[#allocation30 + $0x1a8] ss:$16 sps:$4 sm:$0xff]   ;;  %v18273_v38 = vld [vmem:[#allocation30 + $0x720] ss:$16 sps:$4 sm:$0xff]  }
 0xd78   : > { %12480 = vmatpush1.bf16.msra.mxu0 %v18192_v17  ;;  %12566 = vmatpush1.bf16.msra.mxu1 %v18195_v39  ;;  %v18278_v17 = vld [vmem:[#allocation30 + $0x18c] ss:$16 sps:$4 sm:$0xff]   ;;  %v18281_v39 = vld [vmem:[#allocation30 + $0x704] ss:$16 sps:$4 sm:$0xff]  }
 0xd79   : > { %12481 = vmatprep.subr.bf16.mxu0 %v18200_v20  ;;  %12567 = vmatprep.subr.bf16.mxu1 %v18203_v41  ;;  %v18276_v20 = vld [vmem:[#allocation30 + $0x188] ss:$16 sps:$4 sm:$0xff]   ;;  %v18279_v41 = vld [vmem:[#allocation30 + $0x700] ss:$16 sps:$4 sm:$0xff]  }
 0xd7c   : > { %12482 = vmatpush1.bf16.msra.mxu0 %v18198_v42  ;;  %12568 = vmatpush1.bf16.msra.mxu1 %v18201_v47  ;;  %v18284_v42 = vld [vmem:[#allocation30 + $0x16c] ss:$16 sps:$4 sm:$0xff]   ;;  %v18287_v47 = vld [vmem:[#allocation30 + $0x6e4] ss:$16 sps:$4 sm:$0xff]  }
 0xd7d   : > { %12483 = vmatprep.subr.bf16.mxu0 %v18206_v27  ;;  %12569 = vmatprep.subr.bf16.mxu1 %v18209_v44  ;;  %v18282_v27 = vld [vmem:[#allocation30 + $0x168] ss:$16 sps:$4 sm:$0xff]   ;;  %v18285_v44 = vld [vmem:[#allocation30 + $0x6e0] ss:$16 sps:$4 sm:$0xff]  }
 0xd80   : > { %12484 = vmatpush1.bf16.msra.mxu0 %v18204_v63  ;;  %12570 = vmatpush1.bf16.msra.mxu1 %v18207_v51  ;;  %v18290_v63 = vld [vmem:[#allocation30 + $0x14c] ss:$16 sps:$4 sm:$0xff]   ;;  %v18293_v51 = vld [vmem:[#allocation30 + $0x6c4] ss:$16 sps:$4 sm:$0xff]  }
 0xd81   : > { %12512 = vmatprep.subr.bf16.mxu0 %v18212_v34  ;;  %13138 = vmatprep.subr.bf16.mxu1 %v18215_v48  ;;  %v18288_v34 = vld [vmem:[#allocation30 + $0x148] ss:$16 sps:$4 sm:$0xff]   ;;  %v18291_v48 = vld [vmem:[#allocation30 + $0x6c0] ss:$16 sps:$4 sm:$0xff]  }
 0xd83   : > { %15891 = vmatmul.mubr.msk.bf16.vlgmr.msra.gmra.mxu0 %vm4368_vm6, %v20255_v35  ;;  %15892 = vmatmul.mubr.msk.bf16.vlgmr.msra.gmra.mxu1 %vm4368_vm6, %v20255_v35 }
 0xd84   : > { %12513 = vmatpush1.bf16.msra.mxu0 %v18210_v32  ;;  %12544 = vmatprep.mubr.bf16.mxu0 %v20236_v57  ;;  %v18296_v32 = vld [vmem:[#allocation30 + $0x12c] ss:$16 sps:$4 sm:$0xff]   ;;  %v18360_v57 = vld [vmem:[#allocation30 + $0x5a8] ss:$16 sps:$4 sm:$0xff]  }
 0xd85   : > { %13139 = vmatpush1.bf16.msra.mxu1 %v18213_v46  ;;  %13170 = vmatprep.mubr.bf16.mxu1 %v12691_v53  ;;  %v18299_v46 = vld [vmem:[#allocation30 + $0x6a4] ss:$16 sps:$4 sm:$0xff]  }
 0xd86   : > { %12514 = vmatprep.subr.bf16.mxu0 %v18218_v31  ;;  %13140 = vmatprep.subr.bf16.mxu1 %v18221_v18  ;;  %v18294_v31 = vld [vmem:[#allocation30 + $0x128] ss:$16 sps:$4 sm:$0xff]   ;;  %v18297_v18 = vld [vmem:[#allocation30 + $0x6a0] ss:$16 sps:$4 sm:$0xff]  }
 0xd88   : > { %12515 = vmatpush1.bf16.msra.mxu0 %v18216_v54  ;;  %v18302_v54 = vld [vmem:[#allocation30 + $0x10c] ss:$16 sps:$4 sm:$0xff]  }
 0xd89   : > { %13141 = vmatpush1.bf16.msra.mxu1 %v18219_v24  ;;  %12516 = vmatprep.subr.bf16.mxu0 %v18224_v55  ;;  %v18305_v24 = vld [vmem:[#allocation30 + $0x684] ss:$16 sps:$4 sm:$0xff]   ;;  %v18300_v55 = vld [vmem:[#allocation30 + $0x108] ss:$16 sps:$4 sm:$0xff]  }
 0xd8a   : > { %13142 = vmatprep.subr.bf16.mxu1 %v18227_v33  ;;  %v18303_v33 = vld [vmem:[#allocation30 + $0x680] ss:$16 sps:$4 sm:$0xff]  }
 0xd8c   : > { %12517 = vmatpush1.bf16.msra.mxu0 %v18222_v59  ;;  %v18308_v59 = vld [vmem:[#allocation30 + $0x824] ss:$16 sps:$4 sm:$0xff]  }
 0xd8d   : > { %13143 = vmatpush1.bf16.msra.mxu1 %v18225_v29  ;;  %12518 = vmatprep.subr.bf16.mxu0 %v18230_v1  ;;  %v18311_v29 = vld [vmem:[#allocation30 + $0x82c] ss:$16 sps:$4 sm:$0xff]   ;;  %v18306_v1 = vld [vmem:[#allocation30 + $0x820] ss:$16 sps:$4 sm:$0xff]  }
 0xd8e   : > { %13144 = vmatprep.subr.bf16.mxu1 %v18233_v62  ;;  %v18309_v62 = vld [vmem:[#allocation30 + $0x828] ss:$16 sps:$4 sm:$0xff]  }
 0xd90   : > { %12519 = vmatpush1.bf16.msra.mxu0 %v18228_v36  ;;  %v18314_v36 = vld [vmem:[#allocation30 + $0x804] ss:$16 sps:$4 sm:$0xff]  }
 0xd91   : > { %13145 = vmatpush1.bf16.msra.mxu1 %v18231_v40  ;;  %12520 = vmatprep.subr.bf16.mxu0 %v18236_v4  ;;  %v12690_v40 = vrot.slane %v20230_v7, 1  ;;  %v18317_v4 = vld [vmem:[#allocation30 + $0x80c] ss:$16 sps:$4 sm:$0xff]  }
 0xd92   : > { %13146 = vmatprep.subr.bf16.mxu1 %v18239_v21  ;;  %v18312_v21 = vld [vmem:[#allocation30 + $0x800] ss:$16 sps:$4 sm:$0xff]  }
 0xd94   : > { %12521 = vmatpush1.bf16.msra.mxu0 %v18234_v0  ;;  %v18315_v0 = vld [vmem:[#allocation30 + $0x808] ss:$16 sps:$4 sm:$0xff]  }
 0xd95   : > { %13147 = vmatpush1.bf16.msra.mxu1 %v18237_v58  ;;  %12522 = vmatprep.subr.bf16.mxu0 %v18242_v8  ;;  %v18320_v58 = vld [vmem:[#allocation30 + $0x7e4] ss:$16 sps:$4 sm:$0xff]   ;;  %v18323_v8 = vld [vmem:[#allocation30 + $0x7ec] ss:$16 sps:$4 sm:$0xff]  }
 0xd96   : > { %13148 = vmatprep.subr.bf16.mxu1 %v18245_v10  ;;  %v18318_v10 = vld [vmem:[#allocation30 + $0x7e0] ss:$16 sps:$4 sm:$0xff]  }
 0xd98   : > { %12523 = vmatpush1.bf16.msra.mxu0 %v18240_v5  ;;  %v18321_v5 = vld [vmem:[#allocation30 + $0x7e8] ss:$16 sps:$4 sm:$0xff]  }
 0xd99   : > { %13149 = vmatpush1.bf16.msra.mxu1 %v18243_v13  ;;  %12524 = vmatprep.subr.bf16.mxu0 %v18248_v14  ;;  %v18326_v13 = vld [vmem:[#allocation30 + $0x7c4] ss:$16 sps:$4 sm:$0xff]   ;;  %v18329_v14 = vld [vmem:[#allocation30 + $0x7cc] ss:$16 sps:$4 sm:$0xff]  }
 0xd9a   : > { %13150 = vmatprep.subr.bf16.mxu1 %v18251_v16  ;;  %v18324_v16 = vld [vmem:[#allocation30 + $0x7c0] ss:$16 sps:$4 sm:$0xff]  }
 0xd9c   : > { %12525 = vmatpush1.bf16.msra.mxu0 %v18246_v2  ;;  %v18327_v2 = vld [vmem:[#allocation30 + $0x7c8] ss:$16 sps:$4 sm:$0xff]  }
 0xd9d   : > { %13151 = vmatpush1.bf16.msra.mxu1 %v18249_v22  ;;  %12526 = vmatprep.subr.bf16.mxu0 %v18254_v25  ;;  %v18332_v22 = vld [vmem:[#allocation30 + $0x7a4] ss:$16 sps:$4 sm:$0xff]   ;;  %v18335_v25 = vld [vmem:[#allocation30 + $0x7ac] ss:$16 sps:$4 sm:$0xff]  }
 0xd9e   : > { %13152 = vmatprep.subr.bf16.mxu1 %v18257_v26  ;;  %v18330_v26 = vld [vmem:[#allocation30 + $0x7a0] ss:$16 sps:$4 sm:$0xff]  }
 0xda0   : > { %12527 = vmatpush1.bf16.msra.mxu0 %v18252_v3  ;;  %v18333_v3 = vld [vmem:[#allocation30 + $0x7a8] ss:$16 sps:$4 sm:$0xff]  }
 0xda1   : > { %13153 = vmatpush1.bf16.msra.mxu1 %v18255_v56  ;;  %12528 = vmatprep.subr.bf16.mxu0 %v18260_v50  ;;  %v18338_v56 = vld [vmem:[#allocation30 + $0x784] ss:$16 sps:$4 sm:$0xff]   ;;  %v18341_v50 = vld [vmem:[#allocation30 + $0x78c] ss:$16 sps:$4 sm:$0xff]  }
 0xda2   : > { %13154 = vmatprep.subr.bf16.mxu1 %v18263_v12  ;;  %v18336_v12 = vld [vmem:[#allocation30 + $0x780] ss:$16 sps:$4 sm:$0xff]  }
 0xda4   : > { %12529 = vmatpush2.bf16.msra.mxu0 %v18258_v28  ;;  %v18339_v28 = vld [vmem:[#allocation30 + $0x788] ss:$16 sps:$4 sm:$0xff]  }
 0xda5   : > { %13155 = vmatpush2.bf16.msra.mxu1 %v18261_v60  ;;  %12530 = vmatprep.subr.bf16.mxu0 %v18266_v61  ;;  %v18344_v60 = vld [vmem:[#allocation30 + $0x66c] ss:$16 sps:$4 sm:$0xff]   ;;  %v18342_v61 = vld [vmem:[#allocation30 + $0x668] ss:$16 sps:$4 sm:$0xff]  }
 0xda6   : > { %13156 = vmatprep.subr.bf16.mxu1 %v18269_v49  ;;  %v12692_v49 = vrot.slane %v20255_v35, 1  ;;  %v18351_v35 = vld [vmem:[#allocation30 + $0x608] ss:$16 sps:$4 sm:$0xff]  }
 0xda8   : > { %12531 = vmatpush2.bf16.msra.mxu0 %v18264_v23  ;;  %v18347_v23 = vld [vmem:[#allocation30 + $0x64c] ss:$16 sps:$4 sm:$0xff]  }
 0xda9   : > { %13157 = vmatpush2.bf16.msra.mxu1 %v18267_v30  ;;  %12532 = vmatprep.subr.bf16.mxu0 %v18272_v9  ;;  %v18345_v30 = vld [vmem:[#allocation30 + $0x648] ss:$16 sps:$4 sm:$0xff]   ;;  %v18350_v9 = vld [vmem:[#allocation30 + $0x62c] ss:$16 sps:$4 sm:$0xff]  }
 0xdaa   : > { %13158 = vmatprep.subr.bf16.mxu1 %v18275_v37  ;;  %v18348_v37 = vld [vmem:[#allocation30 + $0x628] ss:$16 sps:$4 sm:$0xff]  }
 0xdac   : > { %12533 = vmatpush2.bf16.msra.mxu0 %v18270_v52  ;;  %v18353_v52 = vld [vmem:[#allocation30 + $0x60c] ss:$16 sps:$4 sm:$0xff]  }
 0xdad   : > { %13159 = vmatpush2.bf16.msra.mxu1 %v18273_v38  ;;  %12534 = vmatprep.subr.bf16.mxu0 %v18278_v17  ;;  %v18356_v38 = vld [vmem:[#allocation30 + $0x5ec] ss:$16 sps:$4 sm:$0xff]   ;;  %v18354_v17 = vld [vmem:[#allocation30 + $0x5e8] ss:$16 sps:$4 sm:$0xff]  }
 0xdae   : > { %13160 = vmatprep.subr.bf16.mxu1 %v18281_v39  ;;  %v18359_v39 = vld [vmem:[#allocation30 + $0x5cc] ss:$16 sps:$4 sm:$0xff]  }
 0xdb0   : > { %12535 = vmatpush2.bf16.msra.mxu0 %v18276_v20  ;;  %v18357_v20 = vld [vmem:[#allocation30 + $0x5c8] ss:$16 sps:$4 sm:$0xff]  }
 0xdb1   : > { %13161 = vmatpush2.bf16.msra.mxu1 %v18279_v41  ;;  %12536 = vmatprep.subr.bf16.mxu0 %v18284_v42  ;;  %v18362_v41 = vld [vmem:[#allocation30 + $0x5ac] ss:$16 sps:$4 sm:$0xff]   ;;  %v18363_v42 = vld [vmem:[#allocation30 + $0x588] ss:$16 sps:$4 sm:$0xff]  }
 0xdb2   : > { %13162 = vmatprep.subr.bf16.mxu1 %v18287_v47  ;;  %v18368_v47 = vld [vmem:[#allocation30 + $0x76c] ss:$16 sps:$4 sm:$0xff]  }
 0xdb4   : > { %12537 = vmatpush2.bf16.msra.mxu0 %v18282_v27  ;;  %v18366_v27 = vld [vmem:[#allocation30 + $0x768] ss:$16 sps:$4 sm:$0xff]  }
 0xdb5   : > { %13163 = vmatpush2.bf16.msra.mxu1 %v18285_v44  ;;  %12538 = vmatprep.subr.bf16.mxu0 %v18290_v63  ;;  %v18371_v44 = vld [vmem:[#allocation30 + $0x74c] ss:$16 sps:$4 sm:$0xff]   ;;  %v18369_v63 = vld [vmem:[#allocation30 + $0x748] ss:$16 sps:$4 sm:$0xff]  }
 0xdb6   : > { %13164 = vmatprep.subr.bf16.mxu1 %v18293_v51  ;;  %v18374_v51 = vld [vmem:[#allocation30 + $0x72c] ss:$16 sps:$4 sm:$0xff]  }
 0xdb8   : > { %12539 = vmatpush2.bf16.msra.mxu0 %v18288_v34  ;;  %v18372_v34 = vld [vmem:[#allocation30 + $0x728] ss:$16 sps:$4 sm:$0xff]  }
 0xdb9   : > { %13165 = vmatpush2.bf16.msra.mxu1 %v18291_v48  ;;  %12540 = vmatprep.subr.bf16.mxu0 %v18296_v32  ;;  %v18377_v48 = vld [vmem:[#allocation30 + $0x70c] ss:$16 sps:$4 sm:$0xff]   ;;  %v18375_v32 = vld [vmem:[#allocation30 + $0x708] ss:$16 sps:$4 sm:$0xff]  }
 0xdba   : > { %13166 = vmatprep.subr.bf16.mxu1 %v18299_v46  ;;  %v18380_v46 = vld [vmem:[#allocation30 + $0x6ec] ss:$16 sps:$4 sm:$0xff]  }
 0xdbc   : > { %12541 = vmatpush2.bf16.msra.mxu0 %v18294_v31  ;;  %v18378_v31 = vld [vmem:[#allocation30 + $0x6e8] ss:$16 sps:$4 sm:$0xff]  }
 0xdbd   : > { %13167 = vmatpush2.bf16.msra.mxu1 %v18297_v18  ;;  %12542 = vmatprep.subr.bf16.mxu0 %v18302_v54  ;;  %v18383_v18 = vld [vmem:[#allocation30 + $0x6cc] ss:$16 sps:$4 sm:$0xff]   ;;  %v18381_v54 = vld [vmem:[#allocation30 + $0x6c8] ss:$16 sps:$4 sm:$0xff]  }
 0xdbe   : > { %13168 = vmatprep.subr.bf16.mxu1 %v18305_v24  ;;  %v18390_v24 = vld [vmem:[#allocation33 + $0x218] sm:$0xff]  }
 0xdc0   : > { %12543 = vmatpush2.bf16.msra.mxu0 %v18300_v55  ;;  %v18391_v55 = vld [vmem:[#allocation33 + $0x1d8] sm:$0xff]  }
 0xdc1   : > { %13169 = vmatpush2.bf16.msra.mxu1 %v18303_v33  ;;  %13185 = vmatprep.subr.bf16.mxu0 %v18308_v59  ;;  %v18392_v33 = vld [vmem:[#allocation33 + $0x210] sm:$0xff]   ;;  %v18386_v59 = vld [vmem:[#allocation30 + $0x6ac] ss:$16 sps:$4 sm:$0xff]  }
 0xdc2   : > { %13271 = vmatprep.subr.bf16.mxu1 %v18311_v29  ;;  %v18393_v29 = vld [vmem:[#allocation33 + $0x1d0] sm:$0xff]  }
 0xdc3   : > { %12545 = vmatmul.mubr.bf16.vlgmr.msra.gmra.mxu0 %v20230_v7 }
 0xdc4   : > { %13171 = vmatmul.mubr.bf16.vlgmr.msra.gmra.mxu1 %v12690_v40  ;;  %13186 = vmatpush1.bf16.msra.mxu0 %v18306_v1  ;;  %v18384_v1 = vld [vmem:[#allocation30 + $0x6a8] ss:$16 sps:$4 sm:$0xff]  }
 0xdc5   : > { %13272 = vmatpush1.bf16.msra.mxu1 %v18309_v62  ;;  %13187 = vmatprep.subr.bf16.mxu0 %v18314_v36  ;;  %v18389_v62 = vld [vmem:[#allocation30 + $0x68c] ss:$16 sps:$4 sm:$0xff]   ;;  %v18387_v36 = vld [vmem:[#allocation30 + $0x688] ss:$16 sps:$4 sm:$0xff]  }
 0xdc6   : > { %13273 = vmatprep.subr.bf16.mxu1 %v18317_v4  ;;  %13213 = vmatprep.mubr.bf16.mxu0 %v19133_v19 }
 0xdc7   : > { %13299 = vmatprep.mubr.bf16.mxu1 %v19133_v19 }
 0xdc8   : > { %13188 = vmatpush1.bf16.msra.mxu0 %v18312_v21  ;;  %v20286_v4 = vpop.f32.mrf.mxu1  ;;  %v18394_v21 = vld [vmem:[#allocation33 + $0x208] sm:$0xff]  }
 0xdc9   : > { %13274 = vmatpush1.bf16.msra.mxu1 %v18315_v0  ;;  %13189 = vmatprep.subr.bf16.mxu0 %v18320_v58  ;;  %v18395_v58 = vld [vmem:[#allocation33 + $0x1c8] sm:$0xff]  }
 0xdca   : > { %13275 = vmatprep.subr.bf16.mxu1 %v18323_v8  ;;  %v20289_v0 = vpop.f32.mrf.mxu1 }
 0xdcc   : > { %13190 = vmatpush1.bf16.msra.mxu0 %v18318_v10  ;;  %v18396_v10 = vld [vmem:[#allocation33 + $0x200] sm:$0xff]  }
 0xdcd   : > { %13276 = vmatpush1.bf16.msra.mxu1 %v18321_v5  ;;  %13191 = vmatprep.subr.bf16.mxu0 %v18326_v13  ;;  %v20295_v5 = vpop.f32.mrf.mxu1  ;;  %v18397_v13 = vld [vmem:[#allocation33 + $0x1c0] sm:$0xff]  }
 0xdce   : > { %13277 = vmatprep.subr.bf16.mxu1 %v18329_v14 }
 0xdd0   : > { %13192 = vmatpush1.bf16.msra.mxu0 %v18324_v16  ;;  %v18398_v16 = vld [vmem:[#allocation33 + $0x1f8] sm:$0xff]  }
 0xdd1   : > { %13278 = vmatpush1.bf16.msra.mxu1 %v18327_v2  ;;  %13193 = vmatprep.subr.bf16.mxu0 %v18332_v22  ;;  %v20299_v2 = vpop.f32.mrf.mxu1  ;;  %v18399_v22 = vld [vmem:[#allocation33 + $0x1b8] sm:$0xff]  }
 0xdd2   : > { %13279 = vmatprep.subr.bf16.mxu1 %v18335_v25  ;;  %v18400_v25 = vld [vmem:[#allocation33 + $0x1f0] sm:$0xff]  }
 0xdd4   : > { %13194 = vmatpush1.bf16.msra.mxu0 %v18330_v26  ;;  %v18401_v26 = vld [vmem:[#allocation33 + $0x1b0] sm:$0xff]  }
 0xdd5   : > { %13280 = vmatpush1.bf16.msra.mxu1 %v18333_v3  ;;  %13195 = vmatprep.subr.bf16.mxu0 %v18338_v56 }
 0xdd6   : > { %13281 = vmatprep.subr.bf16.mxu1 %v18341_v50  ;;  %v18402_v50 = vld [vmem:[#allocation33 + $0x1e8] sm:$0xff]  }
 0xdd8   : > { %13196 = vmatpush1.bf16.msra.mxu0 %v18336_v12 }
 0xdd9   : > { %13282 = vmatpush1.bf16.msra.mxu1 %v18339_v28  ;;  %13224 = vmatprep.subr.bf16.mxu0 %v18344_v60  ;;  %v18403_v28 = vld [vmem:[#allocation33 + $0x1a8] sm:$0xff]  }
 0xdda   : > { %16307 = vmatprep.subr.bf16.mxu1 %v18390_v24 }
 0xddb   : > { %15981 = vmatmul.mubr.msk.bf16.vlgmr.msra.gmra.mxu0 %vm4368_vm6, %v12692_v49 }
 0xddc   : > { %15982 = vmatmul.mubr.msk.bf16.vlgmr.msra.gmra.mxu1 %vm4368_vm6, %v12692_v49  ;;  %13225 = vmatpush1.bf16.msra.mxu0 %v18342_v61  ;;  %v18404_v61 = vld [vmem:[#allocation33 + $0x1e0] sm:$0xff]   ;;  %vm13393_vm6 = vsmask.f32 256 }
 0xddd   : > { %13256 = vmatprep.mubr.bf16.mxu0 %v12691_v53  ;;  %13226 = vmatprep.subr.bf16.mxu0 %v18347_v23  ;;  %v18365_v53 = vld [vmem:[#allocation30 + $0x58c] ss:$16 sps:$4 sm:$0xff]   ;;  %vm20344_vm7 = vmand %vm8269_vm9, %vm13393_vm6 }
 0xdde   : > { %16308 = vmatpush3.bf16.msra.mxu1 %v18391_v55 }
 0xddf   : > { %16309 = vmatprep.subr.bf16.mxu1 %v18392_v33 }
 0xde0   : > { %13227 = vmatpush1.bf16.msra.mxu0 %v18345_v30  ;;  %v18405_v30 = vld [vmem:[#allocation33 + $0x1a0] sm:$0xff]  }
 0xde1   : > { %13228 = vmatprep.subr.bf16.mxu0 %v18350_v9 }
 0xde2   : > { %16310 = vmatpush3.bf16.msra.mxu1 %v18393_v29 }
 0xde3   : > { %16311 = vmatprep.subr.bf16.mxu1 %v18394_v21 }
 0xde4   : > { %13229 = vmatpush1.bf16.msra.mxu0 %v18348_v37 }
 0xde5   : > { %13230 = vmatprep.subr.bf16.mxu0 %v18353_v52 }
 0xde6   : > { %16312 = vmatpush3.bf16.msra.mxu1 %v18395_v58 }
 0xde7   : > { %16313 = vmatprep.subr.bf16.mxu1 %v18396_v10 }
 0xde8   : > { %13231 = vmatpush1.bf16.msra.mxu0 %v18351_v35 }
 0xde9   : > { %13232 = vmatprep.subr.bf16.mxu0 %v18356_v38 }
 0xdea   : > { %16314 = vmatpush3.bf16.msra.mxu1 %v18397_v13 }
 0xdeb   : > { %v20293_v8 = vpop.f32.mrf.mxu0  ;;  %16315 = vmatprep.subr.bf16.mxu1 %v18398_v16  ;;  %v11975_v7 = vpop.f32.mrf.mxu1 }
 0xdec   : > { %13233 = vmatpush1.bf16.msra.mxu0 %v18354_v17 }
 0xded   : > { %13234 = vmatprep.subr.bf16.mxu0 %v18359_v39  ;;  %v20297_v14 = vpop.f32.mrf.mxu0  ;;  %v11977_v3 = vpop.f32.mrf.mxu1  ;;  %v18406_v39 = vld [vmem:[#allocation33 + $0x78] sm:$0xff]  }
 0xdee   : > { %16316 = vmatpush3.bf16.msra.mxu1 %v18399_v22 }
 0xdef   : > { %16317 = vmatprep.subr.bf16.mxu1 %v18400_v25  ;;  %v11979_v49 = vpop.f32.mrf.mxu1  ;;  %v11890_v25 = vadd.f32 %v20293_v8, %v20286_v4 }
 0xdf0   : > { %13235 = vmatpush1.bf16.msra.mxu0 %v18357_v20  ;;  %v18420_v20 = vld [vmem:[#allocation33 + $0x258] sm:$0xff]  }
 0xdf1   : > { %13236 = vmatprep.subr.bf16.mxu0 %v18362_v41  ;;  %v11981_v35 = vpop.f32.mrf.mxu1  ;;  %v18423_v41 = vld [vmem:[#allocation33 + $0x250] sm:$0xff]  }
 0xdf2   : > { %16318 = vmatpush3.bf16.msra.mxu1 %v18401_v26 }
 0xdf3   : > { %16319 = vmatprep.subr.bf16.mxu1 %v18402_v50 }
 0xdf4   : > { %13237 = vmatpush1.bf16.msra.mxu0 %v18360_v57  ;;  %v18426_v57 = vld [vmem:[#allocation33 + $0x248] sm:$0xff]  }
 0xdf5   : > { %13238 = vmatprep.subr.bf16.mxu0 %v18365_v53  ;;  %v18429_v53 = vld [vmem:[#allocation33 + $0x240] sm:$0xff]  }
 0xdf6   : > { %16320 = vmatpush3.bf16.msra.mxu1 %v18403_v28 }
 0xdf7   : > { %16321 = vmatprep.subr.bf16.mxu1 %v18404_v61 }
 0xdf8   : > { %13239 = vmatpush1.bf16.msra.mxu0 %v18363_v42  ;;  %v18432_v42 = vld [vmem:[#allocation33 + $0x238] sm:$0xff]  }
 0xdf9   : > { %13240 = vmatprep.subr.bf16.mxu0 %v18368_v47  ;;  %v18435_v47 = vld [vmem:[#allocation33 + $0x230] sm:$0xff]  }
 0xdfa   : > { %16322 = vmatpush3.bf16.msra.mxu1 %v18405_v30 }
 0xdfb   : > { %16329 = vmatprep.subr.bf16.mxu1 %v18406_v39 }
 0xdfc   : > { %13241 = vmatpush2.bf16.msra.mxu0 %v18366_v27  ;;  %v18438_v27 = vld [vmem:[#allocation33 + $0x228] sm:$0xff]  }
 0xdfd   : > { %13242 = vmatprep.subr.bf16.mxu0 %v18371_v44  ;;  %v18441_v44 = vld [vmem:[#allocation33 + $0x220] sm:$0xff]  }
 0xe00   : > { %13243 = vmatpush2.bf16.msra.mxu0 %v18369_v63  ;;  %v18444_v63 = vld [vmem:[#allocation33 + $0x268] sm:$0xff]  }
 0xe01   : > { %13244 = vmatprep.subr.bf16.mxu0 %v18374_v51  ;;  %v18447_v51 = vld [vmem:[#allocation33 + $0x260] sm:$0xff]  }
 0xe04   : > { %13245 = vmatpush2.bf16.msra.mxu0 %v18372_v34 }
 0xe05   : > { %13246 = vmatprep.subr.bf16.mxu0 %v18377_v48 }
 0xe08   : > { %13247 = vmatpush2.bf16.msra.mxu0 %v18375_v32 }
 0xe09   : > { %13248 = vmatprep.subr.bf16.mxu0 %v18380_v46 }
 0xe0c   : > { %13249 = vmatpush2.bf16.msra.mxu0 %v18378_v31 }
 0xe0d   : > { %13250 = vmatprep.subr.bf16.mxu0 %v18383_v18 }
 0xe10   : > { %13251 = vmatpush2.bf16.msra.mxu0 %v18381_v54 }
 0xe11   : > { %13252 = vmatprep.subr.bf16.mxu0 %v18386_v59 }
 0xe14   : > { %13253 = vmatpush2.bf16.msra.mxu0 %v18384_v1 }
 0xe15   : > { %13254 = vmatprep.subr.bf16.mxu0 %v18389_v62 }
 0xe18   : > { %13255 = vmatpush2.bf16.msra.mxu0 %v18387_v36 }
 0xe19   : > { %13715 = vmatprep.subr.bf16.mxu0 %v19133_v19 }
 0xe1b   : > { %13257 = vmatmul.mubr.bf16.vlgmr.msra.gmra.mxu0 %v12690_v40  ;;  %v20301_v40 = vpop.f32.mrf.mxu0 }
 0xe1c   : > { %13716 = vmatpush1.bf16.msra.mxu0 %v18420_v20 }
 0xe1d   : > { %v20303_v56 = vpop.f32.mrf.mxu0  ;;  %13717 = vmatprep.subr.bf16.mxu0 %v19133_v19 }
 0xe1e   : > { %v11896_v30 = vadd.f32 %v20303_v56, %v20299_v2 }
 0xe20   : > { %13718 = vmatpush1.bf16.msra.mxu0 %v18423_v41 }
 0xe21   : > { %13719 = vmatprep.subr.bf16.mxu0 %v19133_v19 }
 0xe24   : > { %13720 = vmatpush1.bf16.msra.mxu0 %v18426_v57 }
 0xe25   : > { %13721 = vmatprep.subr.bf16.mxu0 %v19133_v19 }
 0xe28   : > { %13722 = vmatpush1.bf16.msra.mxu0 %v18429_v53 }
 0xe29   : > { %13723 = vmatprep.subr.bf16.mxu0 %v19133_v19 }
 0xe2b   : > { %v11932_v12 = vpop.f32.mrf.mxu0  ;;  %v12460_v34 = vpop.f32.mrf.mxu1 }
 0xe2c   : > { %v11976_v60 = vadd.f32 %v11975_v7, %v11932_v12  ;;  %13724 = vmatpush1.bf16.msra.mxu0 %v18432_v42  ;;  %v12461_v50 = vadd.f32 %v12460_v34, %v11890_v25  ;;  %v20333_v12 = vld [vmem:[#allocation31] sm:$0xf] }
 0xe2d   : > { %v11934_v23 = vpop.f32.mrf.mxu0  ;;  %13725 = vmatprep.subr.bf16.mxu0 %v19133_v19  ;;  %v12462_v48 = vpop.f32.mrf.mxu1  ;;  %v13323_v4 = vrot.slane %v20333_v12, %v19639_v43 }
 0xe2e   : > { %v11978_v9 = vadd.f32 %v11977_v3, %v11934_v23  ;;  %v11892_v3 = vadd.f32 %v20297_v14, %v20289_v0 }
 0xe2f   : > { %v11936_v37 = vpop.f32.mrf.mxu0  ;;  %v12464_v46 = vpop.f32.mrf.mxu1 }
 0xe30   : > { %v11980_v52 = vadd.f32 %v11979_v49, %v11936_v37  ;;  %13726 = vmatpush1.bf16.msra.mxu0 %v18435_v47  ;;  %v12463_v61 = vadd.f32 %v12462_v48, %v11892_v3  ;;  %v18409_v3 = vld [vmem:[#allocation33 + $0x30] sm:$0xff]  }
 0xe31   : > { %v11938_v38 = vpop.f32.mrf.mxu0  ;;  %13727 = vmatprep.subr.bf16.mxu0 %v19133_v19  ;;  %v12466_v18 = vpop.f32.mrf.mxu1 }
 0xe32   : > { %v11982_v17 = vadd.f32 %v11981_v35, %v11938_v38  ;;  %v13327_v35 = vrot.slane %v20333_v12, %v19642_v45 }
 0xe34   : > { %13728 = vmatpush1.bf16.msra.mxu0 %v18438_v27 }
 0xe35   : > { %13729 = vmatprep.subr.bf16.mxu0 %v19133_v19 }
 0xe38   : > { %13730 = vmatpush1.bf16.msra.mxu0 %v18441_v44 }
 0xe39   : > { %13743 = vmatprep.subr.bf16.mxu0 %v19133_v19 }
 0xe3c   : > { %13744 = vmatpush2.bf16.msra.mxu0 %v18444_v63 }
 0xe3d   : > { %13745 = vmatprep.subr.bf16.mxu0 %v19133_v19 }
 0xe40   : > { %13746 = vmatpush2.bf16.msra.mxu0 %v18447_v51 }
 0xe41   : > { %13983 = vmatprep.subr.bf16.mxu0 %v19133_v19 }
 0xe43   : > { %v12503_v32 = vpop.f32.mrf.mxu0  ;;  %v20315_v24 = vpop.f32.mrf.mxu1 }
 0xe44   : > { %v12504_v49 = vadd.f32 %v12503_v32, %v12461_v50 }
 0xe45   : > { %v12505_v31 = vpop.f32.mrf.mxu0  ;;  %v20317_v33 = vpop.f32.mrf.mxu1 }
 0xe46   : > { %v12506_v0 = vadd.f32 %v12505_v31, %v12463_v61 }
 0xe47   : > { %v12507_v54 = vpop.f32.mrf.mxu0  ;;  %v20323_v36 = vpop.f32.mrf.mxu1 }
 0xe49   : > { %v12509_v55 = vpop.f32.mrf.mxu0  ;;  %v12595_v16 = vpop.f32.mrf.mxu1 }
 0xe83   : > { %v12546_v59 = vpop.f32.mrf.mxu0 }
 0xe84   : > { %v20319_v29 = vadd.f32 %v12546_v59, %v11976_v60  ;;  %v13172_v7 = vpop.f32.mrf.mxu1  ;;  %v11894_v60 = vadd.f32 %v20301_v40, %v20295_v5  ;;  %v12467_v5 = vadd.f32 %v12466_v18, %v11896_v30  ;;  %v18413_v30 = vld [vmem:[#allocation33 + $0x20] sm:$0xff]  }
 0xe85   : > { %v12548_v1 = vpop.f32.mrf.mxu0 }
 0xe86   : > { %v20321_v62 = vadd.f32 %v12548_v1, %v11978_v9  ;;  %v13174_v26 = vpop.f32.mrf.mxu1  ;;  %v12465_v37 = vadd.f32 %v12464_v46, %v11894_v60  ;;  %v12510_v2 = vadd.f32 %v12509_v55, %v12467_v5  ;;  %v18410_v60 = vld [vmem:[#allocation33 + $0x68] sm:$0xff]   ;;  %v18422_v5 = vld [vmem:[#allocation33] sm:$0xff]  }
 0xe87   : > { %v12550_v21 = vpop.f32.mrf.mxu0 }
 0xe88   : > { %v20325_v58 = vadd.f32 %v12550_v21, %v11980_v52  ;;  %v13176_v9 = vpop.f32.mrf.mxu1  ;;  %v12508_v40 = vadd.f32 %v12507_v54, %v12465_v37  ;;  %v18417_v37 = vld [vmem:[#allocation33 + $0x10] sm:$0xff]   ;;  %v18452_v21 = vld [vmem:[#allocation33 + $0x98] sm:$0xff]  }
 0xe89   : > { %v12552_v10 = vpop.f32.mrf.mxu0 }
 0xe8a   : > { %v12553_v13 = vadd.f32 %v12552_v10, %v11982_v17  ;;  %v13178_v20 = vpop.f32.mrf.mxu1  ;;  %v18407_v10 = vld [vmem:[#allocation33 + $0x38] sm:$0xff]  }
 0xe8c   : > { %v20327_v22 = vadd.f32 %v12595_v16, %v12553_v13  ;;  %v18408_v16 = vld [vmem:[#allocation33 + $0x70] sm:$0xff]  }
 0xe9b   : > { %v13215_v28 = vpop.f32.mrf.mxu0 }
 0xe9c   : > { %v13216_v23 = vadd.f32 %v13215_v28, %v13172_v7 }
 0xe9d   : > { %v13217_v8 = vpop.f32.mrf.mxu0 }
 0xe9e   : > { %v13310_v14 = vadd.f32 %v13216_v23, %v12504_v49  ;;  %v13218_v52 = vadd.f32 %v13217_v8, %v13174_v26  ;;  %v18411_v49 = vld [vmem:[#allocation33 + $0x28] sm:$0xff]   ;;  %v18412_v23 = vld [vmem:[#allocation33 + $0x60] sm:$0xff]   ;;  %v18416_v8 = vld [vmem:[#allocation33 + $0x50] sm:$0xff]  }
 0xe9f   : > { %v13219_v38 = vpop.f32.mrf.mxu0 }
 0xea0   : > { %v13311_v17 = vadd.f32 %v13218_v52, %v12506_v0  ;;  %v13220_v39 = vadd.f32 %v13219_v38, %v13176_v9  ;;  %v13340_v56 = vadd.f32 %v13323_v4, %v13310_v14  ;;  %v18414_v9 = vld [vmem:[#allocation33 + $0x58] sm:$0xff]   ;;  %v18418_v0 = vld [vmem:[#allocation33 + $0x48] sm:$0xff]   ;;  %v18421_v38 = vld [vmem:[#allocation33 + $0x40] sm:$0xff]  }
 0xea1   : > { %v13221_v41 = vpop.f32.mrf.mxu0  ;;  %v18419_v52 = vld [vmem:[#allocation33 + $0x8] sm:$0xff]  }
 0xea2   : > { %v13314_v57 = vadd.f32 %v13220_v39, %v12508_v40  ;;  %v13222_v53 = vadd.f32 %v13221_v41, %v13178_v20  ;;  %v13341_v43 = vadd.f32 %v13327_v35, %v13311_v17  ;;  %v13348_v27 = vmax.f32 %v13340_v56, 0.0  ;;  %v18424_v17 = vld [vmem:[#allocation33 + $0x148] sm:$0xff]   ;;  %v13301_v56 = vpop.f32.mrf.mxu1 }
 0xea3   : > { %v18425_v20 = vld [vmem:[#allocation33 + $0x108] sm:$0xff]  }
 0xea4   : > { %v13344_v42 = vadd.f32 %v13323_v4, %v13314_v57  ;;  %v13315_v47 = vadd.f32 %v13222_v53, %v12510_v2  ;;  %v13349_v51 = vmax.f32 %v13341_v43, 0.0  ;;  %v18415_v4 = vld [vmem:[#allocation33 + $0x18] sm:$0xff]   ;;  %v18427_v2 = vld [vmem:[#allocation33 + $0x140] sm:$0xff]   ;;  %v13303_v43 = vpop.f32.mrf.mxu1 }
 0xea5   : > { %v18428_v57 = vld [vmem:[#allocation33 + $0x100] sm:$0xff]   ;;  %v18430_v53 = vld [vmem:[#allocation33 + $0x138] sm:$0xff]  }
 0xea6   : > { %v13352_v44 = vmax.f32 %v13344_v42, 0.0  ;;  %v13345_v63 = vadd.f32 %v13327_v35, %v13315_v47  ;;  %v18431_v42 = vld [vmem:[#allocation33 + $0xf8] sm:$0xff]   ;;  %v18433_v47 = vld [vmem:[#allocation33 + $0x130] sm:$0xff]  }
 0xea8   : > { %v13356_v34 = vpack.c.bf16 %v13352_v44, %v13348_v27  ;;  %v13353_v45 = vmax.f32 %v13345_v63, 0.0  ;;  %v12590_v44 = vadd.f32 %v20315_v24, %v20319_v29  ;;  %v13335_v29 = vrot.slane %v20333_v12, %v1635_v15  ;;  %v18442_v15 = vld [vmem:[#allocation33 + $0x118] sm:$0xff]  }
 0xeaa   : > { %v13361_v48 = vshrl.u32 %v13356_v34, 16  ;;  %v13357_v32 = vpack.c.bf16 %v13353_v45, %v13349_v51  ;;  %v13364_v18 = vshll.u32 %v13356_v34, 16  ;;  %v13305_v51 = vpop.f32.mrf.mxu1  ;;  %v18434_v45 = vld [vmem:[#allocation33 + $0xf0] sm:$0xff]  }
 0xeac   : > { %v13363_v46 = vrot.slane %v13361_v48, 7  ;;  %v13368_v31 = vshrl.u32 %v13357_v32, 16  ;;  %v13371_v55 = vshll.u32 %v13357_v32, 16  ;;  %v12592_v48 = vadd.f32 %v20317_v33, %v20321_v62  ;;  %v18437_v62 = vld [vmem:[#allocation33 + $0xe8] sm:$0xff]  }
 0xeae   : > { %v13370_v54 = vrot.slane %v13368_v31, 7  ;;  %v13366_v59 = vor.u32 %v13364_v18, %v13363_v46  ;;  %v13331_v46 = vrot.slane %v20333_v12, %v19630_v11  ;;  %v18436_v18 = vld [vmem:[#allocation33 + $0x128] sm:$0xff]  }
 0xeb0   : > { %v13373_v1 = vor.u32 %v13371_v55, %v13370_v54  ;;  %v13395_v25 = vsel %vm20344_vm7, 0, %v13366_v59  ;;  %v12594_v55 = vadd.f32 %v20323_v36, %v20325_v58  ;;  %v18440_v36 = vld [vmem:[#allocation33 + $0xe0] sm:$0xff]  }
 0xeb1   : > { %v13401_v14 = vsel %vm11163_vm0, %v13395_v25, 0 }
 0xeb2   : > { %v13396_v13 = vsel %vm20344_vm7, 0, %v13373_v1  ;;  %v13758_v35 = vshll.u32 %v13401_v14, 16  ;;  %v13756_v39 = vshrl.u32 %v13401_v14, 16  ;;  %v13307_v1 = vpop.f32.mrf.mxu1 }
 0xeb3   : > { %v13404_v7 = vsel %vm11163_vm0, %v13396_v13, 0  ;;  %16009 = vmatprep.mubr.msk.bf16.mxu1 %vm11163_vm0, %v13396_v13 }
 0xeb4   : > { %v13764_v26 = vshll.u32 %v13404_v7, 16  ;;  %16010 = vmatmul.mubr.msk.bf16.vlgmr.msra.gmra.mxu1 %vm11163_vm0, %v13395_v25  ;;  %v13762_v50 = vshrl.u32 %v13404_v7, 16  ;;  %v13760_v40 = vrot.slane %v13758_v35, 1  ;;  %v18448_v35 = vld [vmem:[#allocation33 + $0xb8] sm:$0xff]  }
 0xeb5   : > { %16330 = vmatpush3.bf16.msra.mxu1 %v18407_v10 }
 0xeb6   : > { %16331 = vmatprep.subr.bf16.mxu1 %v18408_v16  ;;  %v13766_v28 = vrot.slane %v13764_v26, 1  ;;  %v20356_v41 = vor.u32 %v13760_v40, %v13756_v39  ;;  %v18439_v16 = vld [vmem:[#allocation33 + $0x120] sm:$0xff]  }
 0xeb8   : > { %v13767_v61 = vor.u32 %v13766_v28, %v13762_v50 }
 0xeb9   : > { %16332 = vmatpush3.bf16.msra.mxu1 %v18409_v3 }
 0xeba   : > { %13974 = vmatprep.mubr.bf16.mxu1 %v13767_v61  ;;  %16333 = vmatprep.subr.bf16.mxu1 %v18410_v60  ;;  %v18443_v60 = vld [vmem:[#allocation33 + $0xd8] sm:$0xff]  }
 0xebd   : > { %16334 = vmatpush3.bf16.msra.mxu1 %v18411_v49 }
 0xebe   : > { %16335 = vmatprep.subr.bf16.mxu1 %v18412_v23  ;;  %v18445_v23 = vld [vmem:[#allocation33 + $0x110] sm:$0xff]  }
 0xec1   : > { %16336 = vmatpush3.bf16.msra.mxu1 %v18413_v30 }
 0xec2   : > { %16337 = vmatprep.subr.bf16.mxu1 %v18414_v9 }
 0xec5   : > { %16338 = vmatpush3.bf16.msra.mxu1 %v18415_v4 }
 0xec6   : > { %16339 = vmatprep.subr.bf16.mxu1 %v18416_v8 }
 0xec9   : > { %16340 = vmatpush3.bf16.msra.mxu1 %v18417_v37 }
 0xeca   : > { %16341 = vmatprep.subr.bf16.mxu1 %v18418_v0 }
 0xecd   : > { %16342 = vmatpush3.bf16.msra.mxu1 %v18419_v52 }
 0xece   : > { %16343 = vmatprep.subr.bf16.mxu1 %v18421_v38 }
 0xed1   : > { %16344 = vmatpush3.bf16.msra.mxu1 %v18422_v5 }
 0xed2   : > { %16351 = vmatprep.subr.bf16.mxu1 %v18424_v17 }
 0xed4   : > { %13975 = vmatmul.mubr.bf16.vlgmr.msra.gmra.mxu1 %v20356_v41 }
 0xed5   : > { %16352 = vmatpush3.bf16.msra.mxu1 %v18425_v20  ;;  %14265 = vmatprep.mubr.bf16.mxu1 %v13767_v61  ;;  %v18449_v20 = vld [vmem:[#allocation33 + $0xb0] sm:$0xff]  }
 0xed6   : > { %16353 = vmatprep.subr.bf16.mxu1 %v18427_v2 }
 0xed9   : > { %16354 = vmatpush3.bf16.msra.mxu1 %v18428_v57  ;;  %v18453_v57 = vld [vmem:[#allocation33 + $0x90] sm:$0xff]  }
 0xeda   : > { %16355 = vmatprep.subr.bf16.mxu1 %v18430_v53  ;;  %v18454_v53 = vld [vmem:[#allocation33 + $0x88] sm:$0xff]  }
 0xedb   : > { %v13258_v27 = vpop.f32.mrf.mxu0 }
 0xedc   : > { %v13302_v63 = vadd.f32 %v13301_v56, %v13258_v27  ;;  %v18450_v56 = vld [vmem:[#allocation33 + $0xa8] sm:$0xff]  }
 0xedd   : > { %16356 = vmatpush3.bf16.msra.mxu1 %v18431_v42  ;;  %v13260_v34 = vpop.f32.mrf.mxu0 }
 0xede   : > { %v13312_v32 = vadd.f32 %v13302_v63, %v12590_v44  ;;  %v13304_v31 = vadd.f32 %v13303_v43, %v13260_v34  ;;  %16357 = vmatprep.subr.bf16.mxu1 %v18433_v47  ;;  %v18455_v43 = vld [vmem:[#allocation33 + $0x80] sm:$0xff]   ;;  %v18456_v47 = vld [vmem:[#allocation33 + $0xc8] sm:$0xff]  }
 0xedf   : > { %v13262_v54 = vpop.f32.mrf.mxu0  ;;  %v18457_v44 = vld [vmem:[#allocation33 + $0xc0] sm:$0xff]   ;;  %v18458_v34 = vld [vmem:[#allocation33 + $0x188] sm:$0xff]  }
 0xee0   : > { %v13313_v24 = vadd.f32 %v13304_v31, %v12592_v48  ;;  %v13306_v59 = vadd.f32 %v13305_v51, %v13262_v54  ;;  %v13342_v10 = vadd.f32 %v13331_v46, %v13312_v32  ;;  %v18459_v48 = vld [vmem:[#allocation33 + $0x180] sm:$0xff]   ;;  %v18460_v32 = vld [vmem:[#allocation33 + $0x178] sm:$0xff]   ;;  %v18462_v31 = vld [vmem:[#allocation33 + $0x168] sm:$0xff]  }
 0xee1   : > { %16358 = vmatpush3.bf16.msra.mxu1 %v18434_v45  ;;  %v13264_v33 = vpop.f32.mrf.mxu0  ;;  %v18464_v54 = vld [vmem:[#allocation33 + $0x158] sm:$0xff]  }
 0xee2   : > { %v13316_v13 = vadd.f32 %v13306_v59, %v12594_v55  ;;  %v13308_v11 = vadd.f32 %v13307_v1, %v13264_v33  ;;  %16359 = vmatprep.subr.bf16.mxu1 %v18436_v18  ;;  %v13343_v7 = vadd.f32 %v13335_v29, %v13313_v24  ;;  %v13350_v58 = vmax.f32 %v13342_v10, 0.0  ;;  %v18463_v18 = vld [vmem:[#allocation33 + $0x160] sm:$0xff]   ;;  %v18465_v55 = vld [vmem:[#allocation33 + $0x150] sm:$0xff]   ;;  %v18466_v24 = vld [vmem:[#allocation33 + $0x198] sm:$0xff]  }
 0xee4   : > { %v13346_v25 = vadd.f32 %v13331_v46, %v13316_v13  ;;  %v13317_v26 = vadd.f32 %v13308_v11, %v20327_v22  ;;  %v13351_v12 = vmax.f32 %v13343_v7, 0.0  ;;  %v18446_v22 = vld [vmem:[#allocation33 + $0xd0] sm:$0xff]  }
 0xee5   : > { %16360 = vmatpush3.bf16.msra.mxu1 %v18437_v62  ;;  %v18461_v46 = vld [vmem:[#allocation33 + $0x170] sm:$0xff]  }
 0xee6   : > { %v13354_v6 = vmax.f32 %v13346_v25, 0.0  ;;  %v13347_v3 = vadd.f32 %v13335_v29, %v13317_v26  ;;  %16361 = vmatprep.subr.bf16.mxu1 %v18439_v16  ;;  %v18467_v29 = vld [vmem:[#allocation33 + $0x190] sm:$0xff]  }
 0xee8   : > { %v13358_v50 = vpack.c.bf16 %v13354_v6, %v13350_v58  ;;  %v13355_v28 = vmax.f32 %v13347_v3, 0.0 }
 0xee9   : > { %16362 = vmatpush3.bf16.msra.mxu1 %v18440_v36 }
 0xeea   : > { %v13375_v61 = vshrl.u32 %v13358_v50, 16  ;;  %v13359_v49 = vpack.c.bf16 %v13355_v28, %v13351_v12  ;;  %16363 = vmatprep.subr.bf16.mxu1 %v18442_v15  ;;  %v13378_v4 = vshll.u32 %v13358_v50, 16 }
 0xeec   : > { %v13377_v30 = vrot.slane %v13375_v61, 7  ;;  %v13382_v9 = vshrl.u32 %v13359_v49, 16  ;;  %v13385_v37 = vshll.u32 %v13359_v49, 16 }
 0xeed   : > { %16364 = vmatpush3.bf16.msra.mxu1 %v18443_v60 }
 0xeee   : > { %16365 = vmatprep.subr.bf16.mxu1 %v18445_v23  ;;  %v13384_v8 = vrot.slane %v13382_v9, 7  ;;  %v13380_v14 = vor.u32 %v13378_v4, %v13377_v30 }
 0xef0   : > { %v13387_v0 = vor.u32 %v13385_v37, %v13384_v8  ;;  %v13397_v40 = vsel %vm20344_vm7, 0, %v13380_v14 }
 0xef1   : > { %16366 = vmatpush3.bf16.msra.mxu1 %v18446_v22  ;;  %v13407_v42 = vsel %vm11163_vm0, %v13397_v40, 0 }
 0xef2   : > { %v13398_v52 = vsel %vm20344_vm7, 0, %v13387_v0  ;;  %v13770_v27 = vshll.u32 %v13407_v42, 16  ;;  %v13768_v51 = vshrl.u32 %v13407_v42, 16 }
 0xef3   : > { %v13410_v38 = vsel %vm11163_vm0, %v13398_v52, 0 }
 0xef4   : > { %14266 = vmatmul.mubr.bf16.vlgmr.msra.gmra.mxu1 %v20356_v41  ;;  %16011 = vmatprep.mubr.msk.bf16.mxu0 %vm2317_vm5, %v13410_v38  ;;  %v13776_v5 = vshll.u32 %v13410_v38, 16  ;;  %v13774_v17 = vshrl.u32 %v13410_v38, 16  ;;  %v18451_v41 = vld [vmem:[#allocation33 + $0xa0] sm:$0xff]   ;;  %v13772_v63 = vrot.slane %v13770_v27, 1 }
 0xef5   : > { %16012 = vmatmul.mubr.msk.bf16.vlgmr.msra.gmra.mxu0 %vm11163_vm0, %v13397_v40 }
 0xef6   : > { %v13778_v39 = vrot.slane %v13776_v5, 1  ;;  %13984 = vmatpush1.bf16.msra.mxu0 %v18448_v35  ;;  %v13773_v45 = vor.u32 %v13772_v63, %v13768_v51 }
 0xef7   : > { %13985 = vmatprep.subr.bf16.mxu0 %v19133_v19 }
 0xef8   : > { %v13779_v2 = vor.u32 %v13778_v39, %v13774_v17  ;;  %v16067_v39 = vld [vmem:[%s20530_s0] ss:$0 sm:$0xff] }
 0xefa   : > { %13986 = vmatpush1.bf16.msra.mxu0 %v18449_v20  ;;  %16039 = vmatprep.mubr.msk.bf16.mxu0 %vm2317_vm5, %v13779_v2 }
 0xefb   : > { %13987 = vmatprep.subr.bf16.mxu0 %v19133_v19 }
 0xefe   : > { %13988 = vmatpush1.bf16.msra.mxu0 %v18450_v56 }
 0xeff   : > { %13989 = vmatprep.subr.bf16.mxu0 %v19133_v19 }
 0xf02   : > { %13990 = vmatpush1.bf16.msra.mxu0 %v18451_v41 }
 0xf03   : > { %13991 = vmatprep.subr.bf16.mxu0 %v19133_v19 }
 0xf06   : > { %13992 = vmatpush1.bf16.msra.mxu0 %v18452_v21 }
 0xf07   : > { %13993 = vmatprep.subr.bf16.mxu0 %v19133_v19 }
 0xf0a   : > { %13994 = vmatpush1.bf16.msra.mxu0 %v18453_v57 }
 0xf0b   : > { %13995 = vmatprep.subr.bf16.mxu0 %v19133_v19 }
 0xf0e   : > { %13996 = vmatpush1.bf16.msra.mxu0 %v18454_v53 }
 0xf0f   : > { %13997 = vmatprep.subr.bf16.mxu0 %v19133_v19 }
 0xf12   : > { %13998 = vmatpush1.bf16.msra.mxu0 %v18455_v43 }
 0xf13   : > { %14011 = vmatprep.subr.bf16.mxu0 %v19133_v19 }
 0xf16   : > { %14012 = vmatpush2.bf16.msra.mxu0 %v18456_v47 }
 0xf17   : > { %14013 = vmatprep.subr.bf16.mxu0 %v19133_v19 }
 0xf1a   : > { %14014 = vmatpush2.bf16.msra.mxu0 %v18457_v44 }
 0xf1b   : > { %14274 = vmatprep.subr.bf16.mxu0 %v19133_v19 }
 0xf1d   : > { %14016 = vmatmul.mubr.bf16.vlgmr.msra.gmra.mxu0 %v13773_v45 }
 0xf1e   : > { %14275 = vmatpush1.bf16.msra.mxu0 %v18458_v34  ;;  %16066 = vmatprep.mubr.msk.bf16.mxu0 %vm2317_vm5, %v13779_v2  ;;  %vm14346_vm5 = vcmask 457728  }
 0xf1f   : > { %14276 = vmatprep.subr.bf16.mxu0 %v19133_v19 }
 0xf22   : > { %14277 = vmatpush1.bf16.msra.mxu0 %v18459_v48 }
 0xf23   : > { %14278 = vmatprep.subr.bf16.mxu0 %v19133_v19 }
 0xf26   : > { %14279 = vmatpush1.bf16.msra.mxu0 %v18460_v32 }
 0xf27   : > { %14280 = vmatprep.subr.bf16.mxu0 %v19133_v19 }
 0xf2a   : > { %14281 = vmatpush1.bf16.msra.mxu0 %v18461_v46 }
 0xf2b   : > { %14282 = vmatprep.subr.bf16.mxu0 %v19133_v19 }
 0xf2e   : > { %14283 = vmatpush1.bf16.msra.mxu0 %v18462_v31 }
 0xf2f   : > { %14284 = vmatprep.subr.bf16.mxu0 %v19133_v19 }
 0xf32   : > { %14285 = vmatpush1.bf16.msra.mxu0 %v18463_v18 }
 0xf33   : > { %14286 = vmatprep.subr.bf16.mxu0 %v19133_v19 }
 0xf36   : > { %14287 = vmatpush1.bf16.msra.mxu0 %v18464_v54 }
 0xf37   : > { %14288 = vmatprep.subr.bf16.mxu0 %v19133_v19 }
 0xf3a   : > { %14289 = vmatpush1.bf16.msra.mxu0 %v18465_v55 }
 0xf3b   : > { %14302 = vmatprep.subr.bf16.mxu0 %v19133_v19 }
 0xf3e   : > { %14303 = vmatpush2.bf16.msra.mxu0 %v18466_v24 }
 0xf3f   : > { %14304 = vmatprep.subr.bf16.mxu0 %v19133_v19 }
 0xf42   : > { %14305 = vmatpush2.bf16.msra.mxu0 %v18467_v29 }
 0xf45   : > { %14307 = vmatmul.mubr.bf16.vlgmr.msra.gmra.mxu0 %v13773_v45 }
 0xf74   : > { %v16323_v59 = vpop.f32.mrf.mxu1 }
 0xf76   : > { %v16324_v1 = vpop.f32.mrf.mxu1 }
 0xf77   : > { %v16325_v33 = vadd.f32 %v16324_v1, %v16323_v59 }
 0xf78   : > { %v16326_v62 = vpop.f32.mrf.mxu1 }
 0xf7a   : > { %v16327_v10 = vpop.f32.mrf.mxu1 }
 0xf7b   : > { %v16328_v13 = vadd.f32 %v16327_v10, %v16326_v62 }
 0xf94   : > { %v16345_v11 = vpop.f32.mrf.mxu1 }
 0xf96   : > { %v16346_v16 = vpop.f32.mrf.mxu1 }
 0xf97   : > { %v16347_v7 = vadd.f32 %v16346_v16, %v16345_v11 }
 0xf98   : > { %v16348_v25 = vpop.f32.mrf.mxu1 }
 0xf9a   : > { %v16349_v26 = vpop.f32.mrf.mxu1 }
 0xf9b   : > { %v16350_v36 = vadd.f32 %v16349_v26, %v16348_v25 }
 0xfb4   : > { %v16367_v22 = vpop.f32.mrf.mxu1 }
 0xfb5   : > { %v13749_v58 = vpop.f32.mrf.mxu0 }
 0xfb6   : > { %v13750_v6 = vadd.f32 %v16325_v33, %v13749_v58  ;;  %v16368_v4 = vpop.f32.mrf.mxu1 }
 0xfb7   : > { %v13751_v3 = vpop.f32.mrf.mxu0  ;;  %v16369_v37 = vadd.f32 %v16368_v4, %v16367_v22 }
 0xfb8   : > { %v13977_v15 = vadd.f32 %v16347_v7, %v13750_v6  ;;  %v16370_v8 = vpop.f32.mrf.mxu1 }
 0xfb9   : > { %v13752_v12 = vpop.f32.mrf.mxu0 }
 0xfba   : > { %v13753_v19 = vadd.f32 %v16328_v13, %v13752_v12  ;;  %v16371_v0 = vpop.f32.mrf.mxu1 }
 0xfbb   : > { %v13754_v50 = vpop.f32.mrf.mxu0  ;;  %v16372_v38 = vadd.f32 %v16371_v0, %v16370_v8 }
 0xfbc   : > { %v13980_v28 = vadd.f32 %v16350_v36, %v13753_v19 }
 0xfdd   : > { %v14017_v60 = vpop.f32.mrf.mxu0 }
 0xfde   : > { %v14018_v61 = vadd.f32 %v14017_v60, %v13977_v15 }
 0xfdf   : > { %v14019_v49 = vpop.f32.mrf.mxu0 }
 0xfe1   : > { %v14020_v23 = vpop.f32.mrf.mxu0 }
 0xfe2   : > { %v14021_v30 = vadd.f32 %v14020_v23, %v13980_v28 }
 0xfe3   : > { %v14022_v9 = vpop.f32.mrf.mxu0 }
0x1005   : > { %v14308_v14 = vpop.f32.mrf.mxu0 }
0x1006   : > { %v14309_v52 = vadd.f32 %v16369_v37, %v14308_v14 }
0x1007   : > { %v14310_v35 = vpop.f32.mrf.mxu0 }
0x1008   : > { %14317 = vrot.lane.b32.xlu0 %v14309_v52, %s19135_s8 }
0x1009   : > { %v14311_v5 = vpop.f32.mrf.mxu0 }
0x100a   : > { %v14312_v40 = vadd.f32 %v16372_v38, %v14311_v5 }
0x100b   : > { %v14313_v17 = vpop.f32.mrf.mxu0 }
0x100c   : > { %14319 = vrot.lane.b32.xlu1 %v14312_v40, %s19135_s8 }
0x107a   : > { %v14318_v20 = vpop.permute.xlu0 %14317 }
0x107b   : > { %v14323_v2 = vsel %vm1078_vm2, %v14018_v61, %v14318_v20 }
0x107c   : > { %v14332_v56 = vadd.f32 %v16067_v39, %v14323_v2 }
0x107e   : > { %v16068_v41 = vmul.f32 -1.442695, %v14332_v56  ;;  %v14320_v21 = vpop.permute.xlu1 %14319 }
0x107f   : > { %v14324_v57 = vsel %vm1078_vm2, %v14021_v30, %v14320_v21 }
0x1080   : > { %18470 = vpow2.f32 %v16068_v41  ;;  %v14333_v53 = vadd.f32 %v16067_v39, %v14324_v57 }
0x1082   : > { %v16069_v43 = vmul.f32 -1.442695, %v14333_v53 }
0x1084   : > { %18472 = vpow2.f32 %v16069_v43 }
0x108d   : > { %v18471_v42 = vpop.eup %18470 }
0x108e   : > { %v14340_v47 = vadd.f32 1.0, %v18471_v42 }
0x1090   : > { %18474 = vrcp.f32 %v14340_v47 }
0x1091   : > { %v18473_v27 = vpop.eup %18472 }
0x1092   : > { %v14341_v44 = vadd.f32 1.0, %v18473_v27 }
0x1094   : > { %18476 = vrcp.f32 %v14341_v44 }
0x109d   : > { %v18475_v63 = vpop.eup %18474 }
0x109e   : > { %14347 = vst.msk [vmem:[%s1052_s1] sm:$0xff] %vm14346_vm5, %v18475_v63 }
0x10a1   : > { %v18477_v51 = vpop.eup %18476 }
0x10a2   : > { %14349 = vst.msk [vmem:[%s1052_s1 + $0x8] sm:$0x3f] %vm14348_vm8, %v18477_v51 }
0x10a3 PF: > { %p45_p10 = scmp.ge.s32.totalorder %s19487_s3, 4   ;;  %s20532_s5 = smov %s19092_s26 }
0x10a4   : > { %s20533_s26 = smov %s19096_s27  ;;  %s20534_s27 = smov %s19499_s6 }
0x10a5   : > { %s20535_s28 = smov %s19487_s3  ;;  %47 = sbr.rel (!%p45_p10) target bundleno = 28 (0x1c), region = 275 }
0x10aa   :  { %14383 = vsyncpa [#allocation3], 1 }
0x10ab   :  { %14385 = vsyncpa [#allocation3 + $0x1], 1 }
0x10ac   :  { %14386 = vsyncpa [#allocation5], 1 }
0x10ad   :  { %14387 = vsyncpa [#allocation8], 1 }
0x10ae   :  { %14388 = vsyncpa [#allocation11], 1 }
0x10af   :  { %14389 = vsyncpa [#allocation14], 1 }
0x10b0   :  { %14390 = vsyncpa [#allocation17], 1 }
0x10b1   :  { %14391 = vsyncpa [#allocation20], 1 }
0x10b2   :  { %14392 = vsyncpa [#allocation23], 1 }
0x10b3   :  { %14393 = vsyncpa [#allocation26], 1 }
0x10b4   :  { %14394 = vsyncpa [#allocation29], 1 }
0x10b5   :  { %14395 = vsyncpa [#allocation32], 1 }

</bundles_post_ra>
